<compile_context>
chip_gen: v7x
topology: tpu7x:2x2x1
jax: 0.10.0
libtpu: 0.0.40
codegen_flags: <defaults>
</compile_context>

<pallas_src>
import functools
import math

import jax
import jax.numpy as jnp
from jax.experimental import pallas as pl
from jax.experimental.pallas import tpu as pltpu

# ---- small shapes consistent with the module's forward ----
B_TOTAL = 64     # total batch (multiple of B_TILE)
B_TILE = 32      # rows per grid step (multiple of 8 sublanes)
NINP = 4         # self._ninp
EXTRA = 0        # self._extra_ninp
NHID = 32        # self._nhid   (MLP hidden)
NBLOCKS = 4      # nblocks of AllInOneBlock
INN_NHID = 64    # inn_nhid     (coupling subnet hidden)
S1 = NINP - NINP // 2    # first split (passive half)
S2 = NINP // 2           # second split (transformed half)
CLAMP = 2.0              # AllInOneBlock affine_clamping default


def _softplus(v):
    # PyTorch Softplus(beta=1): log(1 + exp(v)), numerically stable form.
    return jnp.maximum(v, 0.0) + jnp.log(1.0 + jnp.exp(-jnp.abs(v)))


def _softplus_and_sigmoid(v):
    # One EUP exp shared between softplus(v) and sigmoid(v).
    en = jnp.exp(-jnp.abs(v))
    sp = jnp.maximum(v, 0.0) + jnp.log(1.0 + en)
    inv = 1.0 / (1.0 + en)
    sig = jnp.where(v >= 0.0, inv, en * inv)
    return sp, sig


def _global_scale(gs):
    # FrEIA 'SOFTPLUS' global affine: 0.1 * Softplus(beta=0.5)(gs) = 0.2 * softplus(0.5*gs)
    return 0.2 * _softplus(0.5 * gs)


def _vpu_dot(x, w):
    # (B, K) @ (K, N) with tiny K, lowered as VPU broadcast-FMAs so the MXU
    # push/pop latency stays off the serial dependency chain.
    acc = x[:, 0:1] * w[0:1, :]
    for k in range(1, w.shape[0]):
        acc = acc + x[:, k:k + 1] * w[k:k + 1, :]
    return acc


def invertible_nn_reg_kernel(
    x_ref,                                   # (B_TILE, NINP)
    wtA_ref, wtB_ref,                        # columns of w.T (forward permute): (NB,N,S1),(NB,N,S2)
    wA_ref, wB_ref,                          # columns of w   (inverse permute): (NB,N,S1),(NB,N,S2)
    gs1_ref, gs2_ref,                        # raw global scale, split halves: (NB,S1),(NB,S2)
    go1_ref, go2_ref,                        # global offset, split halves
    w1_ref, b1_ref,                          # subnet layer 1: (NB,S1,IH),(NB,1,IH)
    w2s_ref, b2s_ref, w2t_ref, b2t_ref,      # subnet layer 2 split into s/t halves: (NB,IH,S2),(NB,1,S2)
    a1_ref, c1_ref, a2_ref, c2_ref,          # MLP layers 1,2
    a3s_ref, c3s_ref, a3t_ref, c3t_ref,      # MLP layer 3 split into z1/z2 halves
    out_ref,                                 # (B_TILE, NINP)
):
    dot = functools.partial(jnp.dot, preferred_element_type=jnp.float32)

    # ---- hoisted: global affine scale for all blocks (one vectorized softplus)
    #      and its exact reciprocal (replaces per-block divisions in Phase C).
    scale1_all = _global_scale(gs1_ref[...])     # (NB, S1)
    scale2_all = _global_scale(gs2_ref[...])     # (NB, S2)
    inv1_all = 1.0 / scale1_all
    inv2_all = 1.0 / scale2_all
    go1_all = go1_ref[...]
    go2_all = go2_ref[...]

    x = x_ref[...]
    y1 = x[:, :S1]
    y2 = x[:, S1:]

    # ---------------- Phase A: y = inn_net(x), caching primal intermediates ----
    cache = []
    for i in range(NBLOCKS):
        W1, b1 = w1_ref[i], b1_ref[i]
        W2s, b2s = w2s_ref[i], b2s_ref[i]
        W2t, b2t = w2t_ref[i], b2t_ref[i]

        pre = _vpu_dot(y1, W1) + b1               # K = S1 = 2 -> VPU FMAs
        h, sig = _softplus_and_sigmoid(pre)       # sigmoid(pre) cached for Phase C
        a_s = 0.1 * (dot(h, W2s) + b2s)           # K = 64 -> MXU
        a_t = 0.1 * (dot(h, W2t) + b2t)
        th = jnp.tanh(a_s)
        s = CLAMP * th
        dth = CLAMP * (1.0 - th * th)             # cached d(clamp*tanh)/da factor
        exp_s = jnp.exp(s)
        exp_neg_s = 1.0 / exp_s                   # cached for Phase C (== exp(-s))
        y2n = y2 * exp_s + a_t

        p1 = y1 * scale1_all[i:i + 1, :] + go1_all[i:i + 1, :]
        p2 = y2n * scale2_all[i:i + 1, :] + go2_all[i:i + 1, :]

        # soft permutation y_new = cat(p1, p2) @ w.T, column-split (K = 2 FMAs)
        wtA, wtB = wtA_ref[i], wtB_ref[i]
        y1_new = _vpu_dot(p1, wtA[:S1, :]) + _vpu_dot(p2, wtA[S1:, :])
        y2_new = _vpu_dot(p1, wtB[:S1, :]) + _vpu_dot(p2, wtB[S1:, :])

        cache.append((sig, dth, exp_neg_s, y2))   # y2 = this block's forward-input 2nd half
        y1, y2 = y1_new, y2_new

    # ---------------- Phase B: dx = MLP(y) ----------------
    A1 = a1_ref[...]
    h1 = _softplus(_vpu_dot(y1, A1[:S1, :]) + _vpu_dot(y2, A1[S1:, :]) + c1_ref[...])
    h2 = _softplus(dot(h1, a2_ref[...]) + c2_ref[...])
    dz1 = dot(h2, a3s_ref[...]) + c3s_ref[...]    # dx[:, :S1]
    dz2 = dot(h2, a3t_ref[...]) + c3t_ref[...]    # dx[:, S1:]

    # ---------------- Phase C: JVP of inverse INN at y along dx ----------------
    # The inverse primal evaluated at the forward output reproduces the forward
    # intermediates exactly (v1 == y1, v2 == y2n, pre/s/t identical, o2 == y2_in),
    # so only the tangent math is computed here, reusing the Phase-A cache.
    for i in reversed(range(NBLOCKS)):
        sig, dth, exp_neg_s, y2_in = cache[i]
        W1 = w1_ref[i]
        W2s, W2t = w2s_ref[i], w2t_ref[i]
        wA, wB = wA_ref[i], wB_ref[i]

        # du = dz @ w, column-split so dv1/dv2 never need a lane slice
        du1 = _vpu_dot(dz1, wA[:S1, :]) + _vpu_dot(dz2, wA[S1:, :])
        du2 = _vpu_dot(dz1, wB[:S1, :]) + _vpu_dot(dz2, wB[S1:, :])
        dv1 = du1 * inv1_all[i:i + 1, :]
        dv2 = du2 * inv2_all[i:i + 1, :]

        dh = sig * _vpu_dot(dv1, W1)              # d/dv1 softplus = sigmoid(pre)
        da_s = 0.1 * dot(dh, W2s)                 # K = 64 -> MXU
        da_t = 0.1 * dot(dh, W2t)
        ds = dth * da_s
        do2 = exp_neg_s * (dv2 - da_t) - y2_in * ds

        dz1, dz2 = dv1, do2

    # single full-width store of the result
    out_ref[...] = jnp.concatenate([dz1, dz2], axis=1)


def _prepare_kernel_params(p):
    """Pure layout plumbing: split weights so the kernel never lane-slices compute results."""
    wp, gs, go, w1, b1, w2, b2, A1, c1, A2, c2, A3, c3 = p
    wT = jnp.transpose(wp, (0, 2, 1))
    return (
        wT[:, :, :S1], wT[:, :, S1:],        # wtA, wtB  (forward permute columns)
        wp[:, :, :S1], wp[:, :, S1:],        # wA,  wB   (inverse permute columns)
        gs[:, 0, :S1], gs[:, 0, S1:],        # gs1, gs2  (NB,S1)/(NB,S2)
        go[:, 0, :S1], go[:, 0, S1:],        # go1, go2
        w1, b1,                              # subnet layer 1
        w2[:, :, :S2], b2[:, :, :S2],        # W2s, b2s
        w2[:, :, S2:], b2[:, :, S2:],        # W2t, b2t
        A1, c1, A2, c2,                      # MLP layers 1, 2
        A3[:, :S1], c3[:, :S1],              # A3s, c3s
        A3[:, S1:], c3[:, S1:],              # A3t, c3t
    )


def invertible_nn_reg_forward(x, params):
    kparams = _prepare_kernel_params(params)
    b_total = x.shape[0]
    assert b_total % B_TILE == 0
    grid = (b_total // B_TILE,)

    def full_spec(shape):
        return pl.BlockSpec(shape, lambda b, _n=len(shape): (0,) * _n)

    in_specs = [pl.BlockSpec((B_TILE, NINP), lambda b: (b, 0))]
    in_specs += [full_spec(p.shape) for p in kparams]
    out_spec = pl.BlockSpec((B_TILE, NINP), lambda b: (b, 0))

    return pl.pallas_call(
        invertible_nn_reg_kernel,
        out_shape=jax.ShapeDtypeStruct((b_total, NINP), jnp.float32),
        grid=grid,
        in_specs=in_specs,
        out_specs=out_spec,
        compiler_params=pltpu.CompilerParams(dimension_semantics=("parallel",)),
    )(x, *kparams)


# ---------------- deterministic parameter construction (synthetic init) ----------------
def _torch_linear_init(key, fan_in, fan_out):
    k = 1.0 / math.sqrt(fan_in)
    kw, kb = jax.random.split(key)
    W = jax.random.uniform(kw, (fan_in, fan_out), jnp.float32, -k, k)  # stored (in, out)
    b = jax.random.uniform(kb, (1, fan_out), jnp.float32, -k, k)
    return W, b


def init_params(key):
    keys = jax.random.split(key, NBLOCKS + 3)
    wps, w1s, b1s, w2s_, b2s_ = [], [], [], [], []
    for i in range(NBLOCKS):
        k0, k1, k2 = jax.random.split(keys[i], 3)
        m = jax.random.normal(k0, (NINP, NINP), jnp.float32)
        q, r = jnp.linalg.qr(m)
        q = q * jnp.sign(jnp.diag(r))[None, :]          # deterministic orthogonal "soft permutation"
        wps.append(q)
        W1, b1 = _torch_linear_init(k1, S1, INN_NHID)
        W2, b2 = _torch_linear_init(k2, INN_NHID, 2 * S2)
        w1s.append(W1); b1s.append(b1); w2s_.append(W2); b2s_.append(b2)

    wp = jnp.stack(wps)                                 # (NB, N, N)
    gs_init = 2.0 * math.log(math.exp(0.5 * 10.0 * 1.0) - 1.0)   # FrEIA SOFTPLUS global_affine_init=1.0
    gs = jnp.full((NBLOCKS, 1, NINP), gs_init, jnp.float32)
    go = jnp.zeros((NBLOCKS, 1, NINP), jnp.float32)
    w1 = jnp.stack(w1s); b1 = jnp.stack(b1s)
    w2 = jnp.stack(w2s_); b2 = jnp.stack(b2s_)

    # MLP (ndepth=3): Linear(NINP+EXTRA, NHID) -> Softplus -> Linear(NHID, NHID) -> Softplus -> Linear(NHID, NINP)
    A1, c1 = _torch_linear_init(keys[NBLOCKS + 0], NINP + EXTRA, NHID)
    A2, c2 = _torch_linear_init(keys[NBLOCKS + 1], NHID, NHID)
    A3, c3 = _torch_linear_init(keys[NBLOCKS + 2], NHID, NINP)
    return (wp, gs, go, w1, b1, w2, b2, A1, c1, A2, c2, A3, c3)


# ---------------- pure-JAX reference (for correctness check only) ----------------
def _inn_forward_ref(p, x):
    wp, gs, go, w1, b1, w2, b2 = p[:7]
    y = x
    for i in range(NBLOCKS):
        scale = _global_scale(gs[i])
        y1, y2 = y[:, :S1], y[:, S1:]
        h = _softplus(y1 @ w1[i] + b1[i])
        a = 0.1 * (h @ w2[i] + b2[i])
        s = CLAMP * jnp.tanh(a[:, :S2]); t = a[:, S2:]
        y2n = y2 * jnp.exp(s) + t
        y = (jnp.concatenate([y1, y2n], axis=1) * scale + go[i]) @ wp[i].T
    return y


def _inn_inverse_ref(p, z):
    wp, gs, go, w1, b1, w2, b2 = p[:7]
    for i in reversed(range(NBLOCKS)):
        scale = _global_scale(gs[i])
        v = (z @ wp[i] - go[i]) / scale
        v1, v2 = v[:, :S1], v[:, S1:]
        h = _softplus(v1 @ w1[i] + b1[i])
        a = 0.1 * (h @ w2[i] + b2[i])
        s = CLAMP * jnp.tanh(a[:, :S2]); t = a[:, S2:]
        z = jnp.concatenate([v1, (v2 - t) * jnp.exp(-s)], axis=1)
    return z


def _ref_forward(p, x):
    y = _inn_forward_ref(p, x)
    A1, c1, A2, c2, A3, c3 = p[7:]
    dx = _softplus(_softplus(y @ A1 + c1) @ A2 + c2) @ A3 + c3
    _, tangent = jax.jvp(lambda z: _inn_inverse_ref(p, z), (y,), (dx,))
    return tangent


if __name__ == "__main__":
    key = jax.random.PRNGKey(0)
    kx, kp = jax.random.split(key)
    x = jax.random.normal(kx, (B_TOTAL, NINP), jnp.float32)
    params = init_params(kp)

    out = invertible_nn_reg_forward(x, params)
    out = jax.block_until_ready(out)

    ref = _ref_forward(params, x)
    assert out.shape == (B_TOTAL, NINP)
    assert jnp.allclose(out, ref, rtol=1e-3, atol=1e-3), (out, ref)
    print("KERNEL_OK")
</pallas_src>

<mosaic_0001>
module attributes {stable_mosaic.version = 11 : i64} {
  func.func @invertible_nn_reg_kernel(%arg0: i32, %arg1: memref<32x4xf32, #tpu.memory_space<vmem>>, %arg2: memref<4x4x2xf32, #tpu.memory_space<vmem>>, %arg3: memref<4x4x2xf32, #tpu.memory_space<vmem>>, %arg4: memref<4x4x2xf32, #tpu.memory_space<vmem>>, %arg5: memref<4x4x2xf32, #tpu.memory_space<vmem>>, %arg6: memref<4x2xf32, #tpu.memory_space<vmem>>, %arg7: memref<4x2xf32, #tpu.memory_space<vmem>>, %arg8: memref<4x2xf32, #tpu.memory_space<vmem>>, %arg9: memref<4x2xf32, #tpu.memory_space<vmem>>, %arg10: memref<4x2x64xf32, #tpu.memory_space<vmem>>, %arg11: memref<4x1x64xf32, #tpu.memory_space<vmem>>, %arg12: memref<4x64x2xf32, #tpu.memory_space<vmem>>, %arg13: memref<4x1x2xf32, #tpu.memory_space<vmem>>, %arg14: memref<4x64x2xf32, #tpu.memory_space<vmem>>, %arg15: memref<4x1x2xf32, #tpu.memory_space<vmem>>, %arg16: memref<4x32xf32, #tpu.memory_space<vmem>>, %arg17: memref<1x32xf32, #tpu.memory_space<vmem>>, %arg18: memref<32x32xf32, #tpu.memory_space<vmem>>, %arg19: memref<1x32xf32, #tpu.memory_space<vmem>>, %arg20: memref<32x2xf32, #tpu.memory_space<vmem>>, %arg21: memref<1x2xf32, #tpu.memory_space<vmem>>, %arg22: memref<32x2xf32, #tpu.memory_space<vmem>>, %arg23: memref<1x2xf32, #tpu.memory_space<vmem>>, %arg24: memref<32x4xf32, #tpu.memory_space<vmem>>) attributes {dimension_semantics = [#tpu.dimension_semantics<parallel>], iteration_bounds = array<i64: 2>, scalar_prefetch = 0 : i64, scratch_operands = 0 : i64, tpu.core_type = #tpu.core_type<tc>, window_params = [{transform_indices = @transform_0, window_bounds = array<i64: 32, 4>}, {pipeline_mode = #tpu.pipeline_mode<synchronous>, transform_indices = @transform_1, window_bounds = array<i64: 4, 4, 2>}, {pipeline_mode = #tpu.pipeline_mode<synchronous>, transform_indices = @transform_2, window_bounds = array<i64: 4, 4, 2>}, {pipeline_mode = #tpu.pipeline_mode<synchronous>, transform_indices = @transform_3, window_bounds = array<i64: 4, 4, 2>}, {pipeline_mode = #tpu.pipeline_mode<synchronous>, transform_indices = @transform_4, window_bounds = array<i64: 4, 4, 2>}, {pipeline_mode = #tpu.pipeline_mode<synchronous>, transform_indices = @transform_5, window_bounds = array<i64: 4, 2>}, {pipeline_mode = #tpu.pipeline_mode<synchronous>, transform_indices = @transform_6, window_bounds = array<i64: 4, 2>}, {pipeline_mode = #tpu.pipeline_mode<synchronous>, transform_indices = @transform_7, window_bounds = array<i64: 4, 2>}, {pipeline_mode = #tpu.pipeline_mode<synchronous>, transform_indices = @transform_8, window_bounds = array<i64: 4, 2>}, {pipeline_mode = #tpu.pipeline_mode<synchronous>, transform_indices = @transform_9, window_bounds = array<i64: 4, 2, 64>}, {pipeline_mode = #tpu.pipeline_mode<synchronous>, transform_indices = @transform_10, window_bounds = array<i64: 4, 1, 64>}, {pipeline_mode = #tpu.pipeline_mode<synchronous>, transform_indices = @transform_11, window_bounds = array<i64: 4, 64, 2>}, {pipeline_mode = #tpu.pipeline_mode<synchronous>, transform_indices = @transform_12, window_bounds = array<i64: 4, 1, 2>}, {pipeline_mode = #tpu.pipeline_mode<synchronous>, transform_indices = @transform_13, window_bounds = array<i64: 4, 64, 2>}, {pipeline_mode = #tpu.pipeline_mode<synchronous>, transform_indices = @transform_14, window_bounds = array<i64: 4, 1, 2>}, {pipeline_mode = #tpu.pipeline_mode<synchronous>, transform_indices = @transform_15, window_bounds = array<i64: 4, 32>}, {pipeline_mode = #tpu.pipeline_mode<synchronous>, transform_indices = @transform_16, window_bounds = array<i64: 1, 32>}, {pipeline_mode = #tpu.pipeline_mode<synchronous>, transform_indices = @transform_17, window_bounds = array<i64: 32, 32>}, {pipeline_mode = #tpu.pipeline_mode<synchronous>, transform_indices = @transform_18, window_bounds = array<i64: 1, 32>}, {pipeline_mode = #tpu.pipeline_mode<synchronous>, transform_indices = @transform_19, window_bounds = array<i64: 32, 2>}, {pipeline_mode = #tpu.pipeline_mode<synchronous>, transform_indices = @transform_20, window_bounds = array<i64: 1, 2>}, {pipeline_mode = #tpu.pipeline_mode<synchronous>, transform_indices = @transform_21, window_bounds = array<i64: 32, 2>}, {pipeline_mode = #tpu.pipeline_mode<synchronous>, transform_indices = @transform_22, window_bounds = array<i64: 1, 2>}, {transform_indices = @transform_23, window_bounds = array<i64: 32, 4>}]} {
    %c0 = arith.constant 0 : index
    %c0_0 = arith.constant 0 : index
    %0 = vector.load %arg6[%c0, %c0_0] : memref<4x2xf32, #tpu.memory_space<vmem>>, vector<4x2xf32>
    %cst = arith.constant 5.000000e-01 : f32
    %1 = vector.broadcast %cst : f32 to vector<4x2xf32>
    %2 = arith.mulf %1, %0 : vector<4x2xf32>
    %cst_1 = arith.constant 0.000000e+00 : f32
    %3 = vector.broadcast %cst_1 : f32 to vector<4x2xf32>
    %4 = arith.maximumf %2, %3 : vector<4x2xf32>
    %5 = math.absf %2 : vector<4x2xf32>
    %cst_2 = arith.constant 0.000000e+00 : f32
    %6 = vector.broadcast %cst_2 : f32 to vector<4x2xf32>
    %7 = arith.subf %6, %5 : vector<4x2xf32>
    %8 = math.exp %7 : vector<4x2xf32>
    %cst_3 = arith.constant 1.000000e+00 : f32
    %9 = vector.broadcast %cst_3 : f32 to vector<4x2xf32>
    %10 = arith.addf %9, %8 : vector<4x2xf32>
    %11 = math.log %10 : vector<4x2xf32>
    %12 = arith.addf %4, %11 : vector<4x2xf32>
    %cst_4 = arith.constant 2.000000e-01 : f32
    %13 = vector.broadcast %cst_4 : f32 to vector<4x2xf32>
    %14 = arith.mulf %13, %12 : vector<4x2xf32>
    %c0_5 = arith.constant 0 : index
    %c0_6 = arith.constant 0 : index
    %15 = vector.load %arg7[%c0_5, %c0_6] : memref<4x2xf32, #tpu.memory_space<vmem>>, vector<4x2xf32>
    %cst_7 = arith.constant 5.000000e-01 : f32
    %16 = vector.broadcast %cst_7 : f32 to vector<4x2xf32>
    %17 = arith.mulf %16, %15 : vector<4x2xf32>
    %cst_8 = arith.constant 0.000000e+00 : f32
    %18 = vector.broadcast %cst_8 : f32 to vector<4x2xf32>
    %19 = arith.maximumf %17, %18 : vector<4x2xf32>
    %20 = math.absf %17 : vector<4x2xf32>
    %cst_9 = arith.constant 0.000000e+00 : f32
    %21 = vector.broadcast %cst_9 : f32 to vector<4x2xf32>
    %22 = arith.subf %21, %20 : vector<4x2xf32>
    %23 = math.exp %22 : vector<4x2xf32>
    %cst_10 = arith.constant 1.000000e+00 : f32
    %24 = vector.broadcast %cst_10 : f32 to vector<4x2xf32>
    %25 = arith.addf %24, %23 : vector<4x2xf32>
    %26 = math.log %25 : vector<4x2xf32>
    %27 = arith.addf %19, %26 : vector<4x2xf32>
    %cst_11 = arith.constant 2.000000e-01 : f32
    %28 = vector.broadcast %cst_11 : f32 to vector<4x2xf32>
    %29 = arith.mulf %28, %27 : vector<4x2xf32>
    %cst_12 = arith.constant 1.000000e+00 : f32
    %30 = vector.broadcast %cst_12 : f32 to vector<4x2xf32>
    %31 = arith.divf %30, %14 : vector<4x2xf32>
    %cst_13 = arith.constant 1.000000e+00 : f32
    %32 = vector.broadcast %cst_13 : f32 to vector<4x2xf32>
    %33 = arith.divf %32, %29 : vector<4x2xf32>
    %c0_14 = arith.constant 0 : index
    %c0_15 = arith.constant 0 : index
    %34 = vector.load %arg8[%c0_14, %c0_15] : memref<4x2xf32, #tpu.memory_space<vmem>>, vector<4x2xf32>
    %c0_16 = arith.constant 0 : index
    %c0_17 = arith.constant 0 : index
    %35 = vector.load %arg9[%c0_16, %c0_17] : memref<4x2xf32, #tpu.memory_space<vmem>>, vector<4x2xf32>
    %c0_18 = arith.constant 0 : index
    %c0_19 = arith.constant 0 : index
    %36 = vector.load %arg1[%c0_18, %c0_19] : memref<32x4xf32, #tpu.memory_space<vmem>>, vector<32x4xf32>
    %37 = vector.extract_strided_slice %36 {offsets = [0, 0], sizes = [32, 2], strides = [1, 1]} : vector<32x4xf32> to vector<32x2xf32>
    %38 = vector.extract_strided_slice %36 {offsets = [0, 2], sizes = [32, 2], strides = [1, 1]} : vector<32x4xf32> to vector<32x2xf32>
    %c0_20 = arith.constant 0 : index
    %c0_21 = arith.constant 0 : index
    %c0_22 = arith.constant 0 : index
    %39 = vector.load %arg10[%c0_20, %c0_21, %c0_22] : memref<4x2x64xf32, #tpu.memory_space<vmem>>, vector<1x2x64xf32>
    %40 = vector.shape_cast %39 : vector<1x2x64xf32> to vector<2x64xf32>
    %c0_23 = arith.constant 0 : index
    %c0_24 = arith.constant 0 : index
    %c0_25 = arith.constant 0 : index
    %41 = vector.load %arg11[%c0_23, %c0_24, %c0_25] : memref<4x1x64xf32, #tpu.memory_space<vmem>>, vector<1x1x64xf32>
    %42 = vector.shape_cast %41 : vector<1x1x64xf32> to vector<1x64xf32>
    %c0_26 = arith.constant 0 : index
    %c0_27 = arith.constant 0 : index
    %c0_28 = arith.constant 0 : index
    %43 = vector.load %arg12[%c0_26, %c0_27, %c0_28] : memref<4x64x2xf32, #tpu.memory_space<vmem>>, vector<1x64x2xf32>
    %44 = vector.shape_cast %43 : vector<1x64x2xf32> to vector<64x2xf32>
    %c0_29 = arith.constant 0 : index
    %c0_30 = arith.constant 0 : index
    %c0_31 = arith.constant 0 : index
    %45 = vector.load %arg13[%c0_29, %c0_30, %c0_31] : memref<4x1x2xf32, #tpu.memory_space<vmem>>, vector<1x1x2xf32>
    %46 = vector.shape_cast %45 : vector<1x1x2xf32> to vector<1x2xf32>
    %c0_32 = arith.constant 0 : index
    %c0_33 = arith.constant 0 : index
    %c0_34 = arith.constant 0 : index
    %47 = vector.load %arg14[%c0_32, %c0_33, %c0_34] : memref<4x64x2xf32, #tpu.memory_space<vmem>>, vector<1x64x2xf32>
    %48 = vector.shape_cast %47 : vector<1x64x2xf32> to vector<64x2xf32>
    %c0_35 = arith.constant 0 : index
    %c0_36 = arith.constant 0 : index
    %c0_37 = arith.constant 0 : index
    %49 = vector.load %arg15[%c0_35, %c0_36, %c0_37] : memref<4x1x2xf32, #tpu.memory_space<vmem>>, vector<1x1x2xf32>
    %50 = vector.shape_cast %49 : vector<1x1x2xf32> to vector<1x2xf32>
    %51 = vector.extract_strided_slice %37 {offsets = [0, 0], sizes = [32, 1], strides = [1, 1]} : vector<32x2xf32> to vector<32x1xf32>
    %52 = vector.extract_strided_slice %40 {offsets = [0, 0], sizes = [1, 64], strides = [1, 1]} : vector<2x64xf32> to vector<1x64xf32>
    %53 = vector.broadcast %51 : vector<32x1xf32> to vector<32x64xf32>
    %54 = vector.broadcast %52 : vector<1x64xf32> to vector<32x64xf32>
    %55 = arith.mulf %53, %54 : vector<32x64xf32>
    %56 = vector.extract_strided_slice %37 {offsets = [0, 1], sizes = [32, 1], strides = [1, 1]} : vector<32x2xf32> to vector<32x1xf32>
    %57 = vector.extract_strided_slice %40 {offsets = [1, 0], sizes = [1, 64], strides = [1, 1]} : vector<2x64xf32> to vector<1x64xf32>
    %58 = vector.broadcast %56 : vector<32x1xf32> to vector<32x64xf32>
    %59 = vector.broadcast %57 : vector<1x64xf32> to vector<32x64xf32>
    %60 = arith.mulf %58, %59 : vector<32x64xf32>
    %61 = arith.addf %55, %60 : vector<32x64xf32>
    %62 = vector.broadcast %42 : vector<1x64xf32> to vector<32x64xf32>
    %63 = arith.addf %61, %62 : vector<32x64xf32>
    %64 = math.absf %63 : vector<32x64xf32>
    %cst_38 = arith.constant 0.000000e+00 : f32
    %65 = vector.broadcast %cst_38 : f32 to vector<32x64xf32>
    %66 = arith.subf %65, %64 : vector<32x64xf32>
    %67 = math.exp %66 : vector<32x64xf32>
    %cst_39 = arith.constant 0.000000e+00 : f32
    %68 = vector.broadcast %cst_39 : f32 to vector<32x64xf32>
    %69 = arith.maximumf %63, %68 : vector<32x64xf32>
    %cst_40 = arith.constant 1.000000e+00 : f32
    %70 = vector.broadcast %cst_40 : f32 to vector<32x64xf32>
    %71 = arith.addf %70, %67 : vector<32x64xf32>
    %72 = math.log %71 : vector<32x64xf32>
    %73 = arith.addf %69, %72 : vector<32x64xf32>
    %cst_41 = arith.constant 1.000000e+00 : f32
    %74 = vector.broadcast %cst_41 : f32 to vector<32x64xf32>
    %75 = arith.addf %74, %67 : vector<32x64xf32>
    %cst_42 = arith.constant 1.000000e+00 : f32
    %76 = vector.broadcast %cst_42 : f32 to vector<32x64xf32>
    %77 = arith.divf %76, %75 : vector<32x64xf32>
    %cst_43 = arith.constant 0.000000e+00 : f32
    %78 = vector.broadcast %cst_43 : f32 to vector<32x64xf32>
    %79 = arith.cmpf oge, %63, %78 : vector<32x64xf32>
    %80 = arith.mulf %67, %77 : vector<32x64xf32>
    %81 = arith.select %79, %77, %80 : vector<32x64xi1>, vector<32x64xf32>
    %cst_44 = arith.constant dense<0.000000e+00> : vector<32x2xf32>
    %82 = tpu.matmul %73, %44, %cst_44 {dimension_numbers = #tpu.dot_dimension_numbers<[1], [0], [0], [1], [0, 0, 1, 1], [], []>} : vector<32x64xf32>, vector<64x2xf32>, vector<32x2xf32> -> vector<32x2xf32>
    %83 = vector.broadcast %46 : vector<1x2xf32> to vector<32x2xf32>
    %84 = arith.addf %82, %83 : vector<32x2xf32>
    %cst_45 = arith.constant 1.000000e-01 : f32
    %85 = vector.broadcast %cst_45 : f32 to vector<32x2xf32>
    %86 = arith.mulf %85, %84 : vector<32x2xf32>
    %cst_46 = arith.constant dense<0.000000e+00> : vector<32x2xf32>
    %87 = tpu.matmul %73, %48, %cst_46 {dimension_numbers = #tpu.dot_dimension_numbers<[1], [0], [0], [1], [0, 0, 1, 1], [], []>} : vector<32x64xf32>, vector<64x2xf32>, vector<32x2xf32> -> vector<32x2xf32>
    %88 = vector.broadcast %50 : vector<1x2xf32> to vector<32x2xf32>
    %89 = arith.addf %87, %88 : vector<32x2xf32>
    %cst_47 = arith.constant 1.000000e-01 : f32
    %90 = vector.broadcast %cst_47 : f32 to vector<32x2xf32>
    %91 = arith.mulf %90, %89 : vector<32x2xf32>
    %92 = math.tanh %86 : vector<32x2xf32>
    %cst_48 = arith.constant 2.000000e+00 : f32
    %93 = vector.broadcast %cst_48 : f32 to vector<32x2xf32>
    %94 = arith.mulf %93, %92 : vector<32x2xf32>
    %95 = arith.mulf %92, %92 : vector<32x2xf32>
    %cst_49 = arith.constant 1.000000e+00 : f32
    %96 = vector.broadcast %cst_49 : f32 to vector<32x2xf32>
    %97 = arith.subf %96, %95 : vector<32x2xf32>
    %cst_50 = arith.constant 2.000000e+00 : f32
    %98 = vector.broadcast %cst_50 : f32 to vector<32x2xf32>
    %99 = arith.mulf %98, %97 : vector<32x2xf32>
    %100 = math.exp %94 : vector<32x2xf32>
    %cst_51 = arith.constant 1.000000e+00 : f32
    %101 = vector.broadcast %cst_51 : f32 to vector<32x2xf32>
    %102 = arith.divf %101, %100 : vector<32x2xf32>
    %103 = arith.mulf %38, %100 : vector<32x2xf32>
    %104 = arith.addf %103, %91 : vector<32x2xf32>
    %105 = vector.extract_strided_slice %14 {offsets = [0, 0], sizes = [1, 2], strides = [1, 1]} : vector<4x2xf32> to vector<1x2xf32>
    %106 = vector.broadcast %105 : vector<1x2xf32> to vector<32x2xf32>
    %107 = arith.mulf %37, %106 : vector<32x2xf32>
    %108 = vector.extract_strided_slice %34 {offsets = [0, 0], sizes = [1, 2], strides = [1, 1]} : vector<4x2xf32> to vector<1x2xf32>
    %109 = vector.broadcast %108 : vector<1x2xf32> to vector<32x2xf32>
    %110 = arith.addf %107, %109 : vector<32x2xf32>
    %111 = vector.extract_strided_slice %29 {offsets = [0, 0], sizes = [1, 2], strides = [1, 1]} : vector<4x2xf32> to vector<1x2xf32>
    %112 = vector.broadcast %111 : vector<1x2xf32> to vector<32x2xf32>
    %113 = arith.mulf %104, %112 : vector<32x2xf32>
    %114 = vector.extract_strided_slice %35 {offsets = [0, 0], sizes = [1, 2], strides = [1, 1]} : vector<4x2xf32> to vector<1x2xf32>
    %115 = vector.broadcast %114 : vector<1x2xf32> to vector<32x2xf32>
    %116 = arith.addf %113, %115 : vector<32x2xf32>
    %c0_52 = arith.constant 0 : index
    %c0_53 = arith.constant 0 : index
    %c0_54 = arith.constant 0 : index
    %117 = vector.load %arg2[%c0_52, %c0_53, %c0_54] : memref<4x4x2xf32, #tpu.memory_space<vmem>>, vector<1x4x2xf32>
    %118 = vector.shape_cast %117 : vector<1x4x2xf32> to vector<4x2xf32>
    %c0_55 = arith.constant 0 : index
    %c0_56 = arith.constant 0 : index
    %c0_57 = arith.constant 0 : index
    %119 = vector.load %arg3[%c0_55, %c0_56, %c0_57] : memref<4x4x2xf32, #tpu.memory_space<vmem>>, vector<1x4x2xf32>
    %120 = vector.shape_cast %119 : vector<1x4x2xf32> to vector<4x2xf32>
    %121 = vector.extract_strided_slice %118 {offsets = [0, 0], sizes = [2, 2], strides = [1, 1]} : vector<4x2xf32> to vector<2x2xf32>
    %122 = vector.extract_strided_slice %110 {offsets = [0, 0], sizes = [32, 1], strides = [1, 1]} : vector<32x2xf32> to vector<32x1xf32>
    %123 = vector.extract_strided_slice %121 {offsets = [0, 0], sizes = [1, 2], strides = [1, 1]} : vector<2x2xf32> to vector<1x2xf32>
    %124 = vector.broadcast %122 : vector<32x1xf32> to vector<32x2xf32>
    %125 = vector.broadcast %123 : vector<1x2xf32> to vector<32x2xf32>
    %126 = arith.mulf %124, %125 : vector<32x2xf32>
    %127 = vector.extract_strided_slice %110 {offsets = [0, 1], sizes = [32, 1], strides = [1, 1]} : vector<32x2xf32> to vector<32x1xf32>
    %128 = vector.extract_strided_slice %121 {offsets = [1, 0], sizes = [1, 2], strides = [1, 1]} : vector<2x2xf32> to vector<1x2xf32>
    %129 = vector.broadcast %127 : vector<32x1xf32> to vector<32x2xf32>
    %130 = vector.broadcast %128 : vector<1x2xf32> to vector<32x2xf32>
    %131 = arith.mulf %129, %130 : vector<32x2xf32>
    %132 = arith.addf %126, %131 : vector<32x2xf32>
    %133 = vector.extract_strided_slice %118 {offsets = [2, 0], sizes = [2, 2], strides = [1, 1]} : vector<4x2xf32> to vector<2x2xf32>
    %134 = vector.extract_strided_slice %116 {offsets = [0, 0], sizes = [32, 1], strides = [1, 1]} : vector<32x2xf32> to vector<32x1xf32>
    %135 = vector.extract_strided_slice %133 {offsets = [0, 0], sizes = [1, 2], strides = [1, 1]} : vector<2x2xf32> to vector<1x2xf32>
    %136 = vector.broadcast %134 : vector<32x1xf32> to vector<32x2xf32>
    %137 = vector.broadcast %135 : vector<1x2xf32> to vector<32x2xf32>
    %138 = arith.mulf %136, %137 : vector<32x2xf32>
    %139 = vector.extract_strided_slice %116 {offsets = [0, 1], sizes = [32, 1], strides = [1, 1]} : vector<32x2xf32> to vector<32x1xf32>
    %140 = vector.extract_strided_slice %133 {offsets = [1, 0], sizes = [1, 2], strides = [1, 1]} : vector<2x2xf32> to vector<1x2xf32>
    %141 = vector.broadcast %139 : vector<32x1xf32> to vector<32x2xf32>
    %142 = vector.broadcast %140 : vector<1x2xf32> to vector<32x2xf32>
    %143 = arith.mulf %141, %142 : vector<32x2xf32>
    %144 = arith.addf %138, %143 : vector<32x2xf32>
    %145 = arith.addf %132, %144 : vector<32x2xf32>
    %146 = vector.extract_strided_slice %120 {offsets = [0, 0], sizes = [2, 2], strides = [1, 1]} : vector<4x2xf32> to vector<2x2xf32>
    %147 = vector.extract_strided_slice %110 {offsets = [0, 0], sizes = [32, 1], strides = [1, 1]} : vector<32x2xf32> to vector<32x1xf32>
    %148 = vector.extract_strided_slice %146 {offsets = [0, 0], sizes = [1, 2], strides = [1, 1]} : vector<2x2xf32> to vector<1x2xf32>
    %149 = vector.broadcast %147 : vector<32x1xf32> to vector<32x2xf32>
    %150 = vector.broadcast %148 : vector<1x2xf32> to vector<32x2xf32>
    %151 = arith.mulf %149, %150 : vector<32x2xf32>
    %152 = vector.extract_strided_slice %110 {offsets = [0, 1], sizes = [32, 1], strides = [1, 1]} : vector<32x2xf32> to vector<32x1xf32>
    %153 = vector.extract_strided_slice %146 {offsets = [1, 0], sizes = [1, 2], strides = [1, 1]} : vector<2x2xf32> to vector<1x2xf32>
    %154 = vector.broadcast %152 : vector<32x1xf32> to vector<32x2xf32>
    %155 = vector.broadcast %153 : vector<1x2xf32> to vector<32x2xf32>
    %156 = arith.mulf %154, %155 : vector<32x2xf32>
    %157 = arith.addf %151, %156 : vector<32x2xf32>
    %158 = vector.extract_strided_slice %120 {offsets = [2, 0], sizes = [2, 2], strides = [1, 1]} : vector<4x2xf32> to vector<2x2xf32>
    %159 = vector.extract_strided_slice %116 {offsets = [0, 0], sizes = [32, 1], strides = [1, 1]} : vector<32x2xf32> to vector<32x1xf32>
    %160 = vector.extract_strided_slice %158 {offsets = [0, 0], sizes = [1, 2], strides = [1, 1]} : vector<2x2xf32> to vector<1x2xf32>
    %161 = vector.broadcast %159 : vector<32x1xf32> to vector<32x2xf32>
    %162 = vector.broadcast %160 : vector<1x2xf32> to vector<32x2xf32>
    %163 = arith.mulf %161, %162 : vector<32x2xf32>
    %164 = vector.extract_strided_slice %116 {offsets = [0, 1], sizes = [32, 1], strides = [1, 1]} : vector<32x2xf32> to vector<32x1xf32>
    %165 = vector.extract_strided_slice %158 {offsets = [1, 0], sizes = [1, 2], strides = [1, 1]} : vector<2x2xf32> to vector<1x2xf32>
    %166 = vector.broadcast %164 : vector<32x1xf32> to vector<32x2xf32>
    %167 = vector.broadcast %165 : vector<1x2xf32> to vector<32x2xf32>
    %168 = arith.mulf %166, %167 : vector<32x2xf32>
    %169 = arith.addf %163, %168 : vector<32x2xf32>
    %170 = arith.addf %157, %169 : vector<32x2xf32>
    %c1 = arith.constant 1 : index
    %c0_58 = arith.constant 0 : index
    %c0_59 = arith.constant 0 : index
    %171 = vector.load %arg10[%c1, %c0_58, %c0_59] : memref<4x2x64xf32, #tpu.memory_space<vmem>>, vector<1x2x64xf32>
    %172 = vector.shape_cast %171 : vector<1x2x64xf32> to vector<2x64xf32>
    %c1_60 = arith.constant 1 : index
    %c0_61 = arith.constant 0 : index
    %c0_62 = arith.constant 0 : index
    %173 = vector.load %arg11[%c1_60, %c0_61, %c0_62] : memref<4x1x64xf32, #tpu.memory_space<vmem>>, vector<1x1x64xf32>
    %174 = vector.shape_cast %173 : vector<1x1x64xf32> to vector<1x64xf32>
    %c1_63 = arith.constant 1 : index
    %c0_64 = arith.constant 0 : index
    %c0_65 = arith.constant 0 : index
    %175 = vector.load %arg12[%c1_63, %c0_64, %c0_65] : memref<4x64x2xf32, #tpu.memory_space<vmem>>, vector<1x64x2xf32>
    %176 = vector.shape_cast %175 : vector<1x64x2xf32> to vector<64x2xf32>
    %c1_66 = arith.constant 1 : index
    %c0_67 = arith.constant 0 : index
    %c0_68 = arith.constant 0 : index
    %177 = vector.load %arg13[%c1_66, %c0_67, %c0_68] : memref<4x1x2xf32, #tpu.memory_space<vmem>>, vector<1x1x2xf32>
    %178 = vector.shape_cast %177 : vector<1x1x2xf32> to vector<1x2xf32>
    %c1_69 = arith.constant 1 : index
    %c0_70 = arith.constant 0 : index
    %c0_71 = arith.constant 0 : index
    %179 = vector.load %arg14[%c1_69, %c0_70, %c0_71] : memref<4x64x2xf32, #tpu.memory_space<vmem>>, vector<1x64x2xf32>
    %180 = vector.shape_cast %179 : vector<1x64x2xf32> to vector<64x2xf32>
    %c1_72 = arith.constant 1 : index
    %c0_73 = arith.constant 0 : index
    %c0_74 = arith.constant 0 : index
    %181 = vector.load %arg15[%c1_72, %c0_73, %c0_74] : memref<4x1x2xf32, #tpu.memory_space<vmem>>, vector<1x1x2xf32>
    %182 = vector.shape_cast %181 : vector<1x1x2xf32> to vector<1x2xf32>
    %183 = vector.extract_strided_slice %145 {offsets = [0, 0], sizes = [32, 1], strides = [1, 1]} : vector<32x2xf32> to vector<32x1xf32>
    %184 = vector.extract_strided_slice %172 {offsets = [0, 0], sizes = [1, 64], strides = [1, 1]} : vector<2x64xf32> to vector<1x64xf32>
    %185 = vector.broadcast %183 : vector<32x1xf32> to vector<32x64xf32>
    %186 = vector.broadcast %184 : vector<1x64xf32> to vector<32x64xf32>
    %187 = arith.mulf %185, %186 : vector<32x64xf32>
    %188 = vector.extract_strided_slice %145 {offsets = [0, 1], sizes = [32, 1], strides = [1, 1]} : vector<32x2xf32> to vector<32x1xf32>
    %189 = vector.extract_strided_slice %172 {offsets = [1, 0], sizes = [1, 64], strides = [1, 1]} : vector<2x64xf32> to vector<1x64xf32>
    %190 = vector.broadcast %188 : vector<32x1xf32> to vector<32x64xf32>
    %191 = vector.broadcast %189 : vector<1x64xf32> to vector<32x64xf32>
    %192 = arith.mulf %190, %191 : vector<32x64xf32>
    %193 = arith.addf %187, %192 : vector<32x64xf32>
    %194 = vector.broadcast %174 : vector<1x64xf32> to vector<32x64xf32>
    %195 = arith.addf %193, %194 : vector<32x64xf32>
    %196 = math.absf %195 : vector<32x64xf32>
    %cst_75 = arith.constant 0.000000e+00 : f32
    %197 = vector.broadcast %cst_75 : f32 to vector<32x64xf32>
    %198 = arith.subf %197, %196 : vector<32x64xf32>
    %199 = math.exp %198 : vector<32x64xf32>
    %cst_76 = arith.constant 0.000000e+00 : f32
    %200 = vector.broadcast %cst_76 : f32 to vector<32x64xf32>
    %201 = arith.maximumf %195, %200 : vector<32x64xf32>
    %cst_77 = arith.constant 1.000000e+00 : f32
    %202 = vector.broadcast %cst_77 : f32 to vector<32x64xf32>
    %203 = arith.addf %202, %199 : vector<32x64xf32>
    %204 = math.log %203 : vector<32x64xf32>
    %205 = arith.addf %201, %204 : vector<32x64xf32>
    %cst_78 = arith.constant 1.000000e+00 : f32
    %206 = vector.broadcast %cst_78 : f32 to vector<32x64xf32>
    %207 = arith.addf %206, %199 : vector<32x64xf32>
    %cst_79 = arith.constant 1.000000e+00 : f32
    %208 = vector.broadcast %cst_79 : f32 to vector<32x64xf32>
    %209 = arith.divf %208, %207 : vector<32x64xf32>
    %cst_80 = arith.constant 0.000000e+00 : f32
    %210 = vector.broadcast %cst_80 : f32 to vector<32x64xf32>
    %211 = arith.cmpf oge, %195, %210 : vector<32x64xf32>
    %212 = arith.mulf %199, %209 : vector<32x64xf32>
    %213 = arith.select %211, %209, %212 : vector<32x64xi1>, vector<32x64xf32>
    %cst_81 = arith.constant dense<0.000000e+00> : vector<32x2xf32>
    %214 = tpu.matmul %205, %176, %cst_81 {dimension_numbers = #tpu.dot_dimension_numbers<[1], [0], [0], [1], [0, 0, 1, 1], [], []>} : vector<32x64xf32>, vector<64x2xf32>, vector<32x2xf32> -> vector<32x2xf32>
    %215 = vector.broadcast %178 : vector<1x2xf32> to vector<32x2xf32>
    %216 = arith.addf %214, %215 : vector<32x2xf32>
    %cst_82 = arith.constant 1.000000e-01 : f32
    %217 = vector.broadcast %cst_82 : f32 to vector<32x2xf32>
    %218 = arith.mulf %217, %216 : vector<32x2xf32>
    %cst_83 = arith.constant dense<0.000000e+00> : vector<32x2xf32>
    %219 = tpu.matmul %205, %180, %cst_83 {dimension_numbers = #tpu.dot_dimension_numbers<[1], [0], [0], [1], [0, 0, 1, 1], [], []>} : vector<32x64xf32>, vector<64x2xf32>, vector<32x2xf32> -> vector<32x2xf32>
    %220 = vector.broadcast %182 : vector<1x2xf32> to vector<32x2xf32>
    %221 = arith.addf %219, %220 : vector<32x2xf32>
    %cst_84 = arith.constant 1.000000e-01 : f32
    %222 = vector.broadcast %cst_84 : f32 to vector<32x2xf32>
    %223 = arith.mulf %222, %221 : vector<32x2xf32>
    %224 = math.tanh %218 : vector<32x2xf32>
    %cst_85 = arith.constant 2.000000e+00 : f32
    %225 = vector.broadcast %cst_85 : f32 to vector<32x2xf32>
    %226 = arith.mulf %225, %224 : vector<32x2xf32>
    %227 = arith.mulf %224, %224 : vector<32x2xf32>
    %cst_86 = arith.constant 1.000000e+00 : f32
    %228 = vector.broadcast %cst_86 : f32 to vector<32x2xf32>
    %229 = arith.subf %228, %227 : vector<32x2xf32>
    %cst_87 = arith.constant 2.000000e+00 : f32
    %230 = vector.broadcast %cst_87 : f32 to vector<32x2xf32>
    %231 = arith.mulf %230, %229 : vector<32x2xf32>
    %232 = math.exp %226 : vector<32x2xf32>
    %cst_88 = arith.constant 1.000000e+00 : f32
    %233 = vector.broadcast %cst_88 : f32 to vector<32x2xf32>
    %234 = arith.divf %233, %232 : vector<32x2xf32>
    %235 = arith.mulf %170, %232 : vector<32x2xf32>
    %236 = arith.addf %235, %223 : vector<32x2xf32>
    %237 = vector.extract_strided_slice %14 {offsets = [1, 0], sizes = [1, 2], strides = [1, 1]} : vector<4x2xf32> to vector<1x2xf32>
    %238 = vector.broadcast %237 : vector<1x2xf32> to vector<32x2xf32>
    %239 = arith.mulf %145, %238 : vector<32x2xf32>
    %240 = vector.extract_strided_slice %34 {offsets = [1, 0], sizes = [1, 2], strides = [1, 1]} : vector<4x2xf32> to vector<1x2xf32>
    %241 = vector.broadcast %240 : vector<1x2xf32> to vector<32x2xf32>
    %242 = arith.addf %239, %241 : vector<32x2xf32>
    %243 = vector.extract_strided_slice %29 {offsets = [1, 0], sizes = [1, 2], strides = [1, 1]} : vector<4x2xf32> to vector<1x2xf32>
    %244 = vector.broadcast %243 : vector<1x2xf32> to vector<32x2xf32>
    %245 = arith.mulf %236, %244 : vector<32x2xf32>
    %246 = vector.extract_strided_slice %35 {offsets = [1, 0], sizes = [1, 2], strides = [1, 1]} : vector<4x2xf32> to vector<1x2xf32>
    %247 = vector.broadcast %246 : vector<1x2xf32> to vector<32x2xf32>
    %248 = arith.addf %245, %247 : vector<32x2xf32>
    %c1_89 = arith.constant 1 : index
    %c0_90 = arith.constant 0 : index
    %c0_91 = arith.constant 0 : index
    %249 = vector.load %arg2[%c1_89, %c0_90, %c0_91] : memref<4x4x2xf32, #tpu.memory_space<vmem>>, vector<1x4x2xf32>
    %250 = vector.shape_cast %249 : vector<1x4x2xf32> to vector<4x2xf32>
    %c1_92 = arith.constant 1 : index
    %c0_93 = arith.constant 0 : index
    %c0_94 = arith.constant 0 : index
    %251 = vector.load %arg3[%c1_92, %c0_93, %c0_94] : memref<4x4x2xf32, #tpu.memory_space<vmem>>, vector<1x4x2xf32>
    %252 = vector.shape_cast %251 : vector<1x4x2xf32> to vector<4x2xf32>
    %253 = vector.extract_strided_slice %250 {offsets = [0, 0], sizes = [2, 2], strides = [1, 1]} : vector<4x2xf32> to vector<2x2xf32>
    %254 = vector.extract_strided_slice %242 {offsets = [0, 0], sizes = [32, 1], strides = [1, 1]} : vector<32x2xf32> to vector<32x1xf32>
    %255 = vector.extract_strided_slice %253 {offsets = [0, 0], sizes = [1, 2], strides = [1, 1]} : vector<2x2xf32> to vector<1x2xf32>
    %256 = vector.broadcast %254 : vector<32x1xf32> to vector<32x2xf32>
    %257 = vector.broadcast %255 : vector<1x2xf32> to vector<32x2xf32>
    %258 = arith.mulf %256, %257 : vector<32x2xf32>
    %259 = vector.extract_strided_slice %242 {offsets = [0, 1], sizes = [32, 1], strides = [1, 1]} : vector<32x2xf32> to vector<32x1xf32>
    %260 = vector.extract_strided_slice %253 {offsets = [1, 0], sizes = [1, 2], strides = [1, 1]} : vector<2x2xf32> to vector<1x2xf32>
    %261 = vector.broadcast %259 : vector<32x1xf32> to vector<32x2xf32>
    %262 = vector.broadcast %260 : vector<1x2xf32> to vector<32x2xf32>
    %263 = arith.mulf %261, %262 : vector<32x2xf32>
    %264 = arith.addf %258, %263 : vector<32x2xf32>
    %265 = vector.extract_strided_slice %250 {offsets = [2, 0], sizes = [2, 2], strides = [1, 1]} : vector<4x2xf32> to vector<2x2xf32>
    %266 = vector.extract_strided_slice %248 {offsets = [0, 0], sizes = [32, 1], strides = [1, 1]} : vector<32x2xf32> to vector<32x1xf32>
    %267 = vector.extract_strided_slice %265 {offsets = [0, 0], sizes = [1, 2], strides = [1, 1]} : vector<2x2xf32> to vector<1x2xf32>
    %268 = vector.broadcast %266 : vector<32x1xf32> to vector<32x2xf32>
    %269 = vector.broadcast %267 : vector<1x2xf32> to vector<32x2xf32>
    %270 = arith.mulf %268, %269 : vector<32x2xf32>
    %271 = vector.extract_strided_slice %248 {offsets = [0, 1], sizes = [32, 1], strides = [1, 1]} : vector<32x2xf32> to vector<32x1xf32>
    %272 = vector.extract_strided_slice %265 {offsets = [1, 0], sizes = [1, 2], strides = [1, 1]} : vector<2x2xf32> to vector<1x2xf32>
    %273 = vector.broadcast %271 : vector<32x1xf32> to vector<32x2xf32>
    %274 = vector.broadcast %272 : vector<1x2xf32> to vector<32x2xf32>
    %275 = arith.mulf %273, %274 : vector<32x2xf32>
    %276 = arith.addf %270, %275 : vector<32x2xf32>
    %277 = arith.addf %264, %276 : vector<32x2xf32>
    %278 = vector.extract_strided_slice %252 {offsets = [0, 0], sizes = [2, 2], strides = [1, 1]} : vector<4x2xf32> to vector<2x2xf32>
    %279 = vector.extract_strided_slice %242 {offsets = [0, 0], sizes = [32, 1], strides = [1, 1]} : vector<32x2xf32> to vector<32x1xf32>
    %280 = vector.extract_strided_slice %278 {offsets = [0, 0], sizes = [1, 2], strides = [1, 1]} : vector<2x2xf32> to vector<1x2xf32>
    %281 = vector.broadcast %279 : vector<32x1xf32> to vector<32x2xf32>
    %282 = vector.broadcast %280 : vector<1x2xf32> to vector<32x2xf32>
    %283 = arith.mulf %281, %282 : vector<32x2xf32>
    %284 = vector.extract_strided_slice %242 {offsets = [0, 1], sizes = [32, 1], strides = [1, 1]} : vector<32x2xf32> to vector<32x1xf32>
    %285 = vector.extract_strided_slice %278 {offsets = [1, 0], sizes = [1, 2], strides = [1, 1]} : vector<2x2xf32> to vector<1x2xf32>
    %286 = vector.broadcast %284 : vector<32x1xf32> to vector<32x2xf32>
    %287 = vector.broadcast %285 : vector<1x2xf32> to vector<32x2xf32>
    %288 = arith.mulf %286, %287 : vector<32x2xf32>
    %289 = arith.addf %283, %288 : vector<32x2xf32>
    %290 = vector.extract_strided_slice %252 {offsets = [2, 0], sizes = [2, 2], strides = [1, 1]} : vector<4x2xf32> to vector<2x2xf32>
    %291 = vector.extract_strided_slice %248 {offsets = [0, 0], sizes = [32, 1], strides = [1, 1]} : vector<32x2xf32> to vector<32x1xf32>
    %292 = vector.extract_strided_slice %290 {offsets = [0, 0], sizes = [1, 2], strides = [1, 1]} : vector<2x2xf32> to vector<1x2xf32>
    %293 = vector.broadcast %291 : vector<32x1xf32> to vector<32x2xf32>
    %294 = vector.broadcast %292 : vector<1x2xf32> to vector<32x2xf32>
    %295 = arith.mulf %293, %294 : vector<32x2xf32>
    %296 = vector.extract_strided_slice %248 {offsets = [0, 1], sizes = [32, 1], strides = [1, 1]} : vector<32x2xf32> to vector<32x1xf32>
    %297 = vector.extract_strided_slice %290 {offsets = [1, 0], sizes = [1, 2], strides = [1, 1]} : vector<2x2xf32> to vector<1x2xf32>
    %298 = vector.broadcast %296 : vector<32x1xf32> to vector<32x2xf32>
    %299 = vector.broadcast %297 : vector<1x2xf32> to vector<32x2xf32>
    %300 = arith.mulf %298, %299 : vector<32x2xf32>
    %301 = arith.addf %295, %300 : vector<32x2xf32>
    %302 = arith.addf %289, %301 : vector<32x2xf32>
    %c2 = arith.constant 2 : index
    %c0_95 = arith.constant 0 : index
    %c0_96 = arith.constant 0 : index
    %303 = vector.load %arg10[%c2, %c0_95, %c0_96] : memref<4x2x64xf32, #tpu.memory_space<vmem>>, vector<1x2x64xf32>
    %304 = vector.shape_cast %303 : vector<1x2x64xf32> to vector<2x64xf32>
    %c2_97 = arith.constant 2 : index
    %c0_98 = arith.constant 0 : index
    %c0_99 = arith.constant 0 : index
    %305 = vector.load %arg11[%c2_97, %c0_98, %c0_99] : memref<4x1x64xf32, #tpu.memory_space<vmem>>, vector<1x1x64xf32>
    %306 = vector.shape_cast %305 : vector<1x1x64xf32> to vector<1x64xf32>
    %c2_100 = arith.constant 2 : index
    %c0_101 = arith.constant 0 : index
    %c0_102 = arith.constant 0 : index
    %307 = vector.load %arg12[%c2_100, %c0_101, %c0_102] : memref<4x64x2xf32, #tpu.memory_space<vmem>>, vector<1x64x2xf32>
    %308 = vector.shape_cast %307 : vector<1x64x2xf32> to vector<64x2xf32>
    %c2_103 = arith.constant 2 : index
    %c0_104 = arith.constant 0 : index
    %c0_105 = arith.constant 0 : index
    %309 = vector.load %arg13[%c2_103, %c0_104, %c0_105] : memref<4x1x2xf32, #tpu.memory_space<vmem>>, vector<1x1x2xf32>
    %310 = vector.shape_cast %309 : vector<1x1x2xf32> to vector<1x2xf32>
    %c2_106 = arith.constant 2 : index
    %c0_107 = arith.constant 0 : index
    %c0_108 = arith.constant 0 : index
    %311 = vector.load %arg14[%c2_106, %c0_107, %c0_108] : memref<4x64x2xf32, #tpu.memory_space<vmem>>, vector<1x64x2xf32>
    %312 = vector.shape_cast %311 : vector<1x64x2xf32> to vector<64x2xf32>
    %c2_109 = arith.constant 2 : index
    %c0_110 = arith.constant 0 : index
    %c0_111 = arith.constant 0 : index
    %313 = vector.load %arg15[%c2_109, %c0_110, %c0_111] : memref<4x1x2xf32, #tpu.memory_space<vmem>>, vector<1x1x2xf32>
    %314 = vector.shape_cast %313 : vector<1x1x2xf32> to vector<1x2xf32>
    %315 = vector.extract_strided_slice %277 {offsets = [0, 0], sizes = [32, 1], strides = [1, 1]} : vector<32x2xf32> to vector<32x1xf32>
    %316 = vector.extract_strided_slice %304 {offsets = [0, 0], sizes = [1, 64], strides = [1, 1]} : vector<2x64xf32> to vector<1x64xf32>
    %317 = vector.broadcast %315 : vector<32x1xf32> to vector<32x64xf32>
    %318 = vector.broadcast %316 : vector<1x64xf32> to vector<32x64xf32>
    %319 = arith.mulf %317, %318 : vector<32x64xf32>
    %320 = vector.extract_strided_slice %277 {offsets = [0, 1], sizes = [32, 1], strides = [1, 1]} : vector<32x2xf32> to vector<32x1xf32>
    %321 = vector.extract_strided_slice %304 {offsets = [1, 0], sizes = [1, 64], strides = [1, 1]} : vector<2x64xf32> to vector<1x64xf32>
    %322 = vector.broadcast %320 : vector<32x1xf32> to vector<32x64xf32>
    %323 = vector.broadcast %321 : vector<1x64xf32> to vector<32x64xf32>
    %324 = arith.mulf %322, %323 : vector<32x64xf32>
    %325 = arith.addf %319, %324 : vector<32x64xf32>
    %326 = vector.broadcast %306 : vector<1x64xf32> to vector<32x64xf32>
    %327 = arith.addf %325, %326 : vector<32x64xf32>
    %328 = math.absf %327 : vector<32x64xf32>
    %cst_112 = arith.constant 0.000000e+00 : f32
    %329 = vector.broadcast %cst_112 : f32 to vector<32x64xf32>
    %330 = arith.subf %329, %328 : vector<32x64xf32>
    %331 = math.exp %330 : vector<32x64xf32>
    %cst_113 = arith.constant 0.000000e+00 : f32
    %332 = vector.broadcast %cst_113 : f32 to vector<32x64xf32>
    %333 = arith.maximumf %327, %332 : vector<32x64xf32>
    %cst_114 = arith.constant 1.000000e+00 : f32
    %334 = vector.broadcast %cst_114 : f32 to vector<32x64xf32>
    %335 = arith.addf %334, %331 : vector<32x64xf32>
    %336 = math.log %335 : vector<32x64xf32>
    %337 = arith.addf %333, %336 : vector<32x64xf32>
    %cst_115 = arith.constant 1.000000e+00 : f32
    %338 = vector.broadcast %cst_115 : f32 to vector<32x64xf32>
    %339 = arith.addf %338, %331 : vector<32x64xf32>
    %cst_116 = arith.constant 1.000000e+00 : f32
    %340 = vector.broadcast %cst_116 : f32 to vector<32x64xf32>
    %341 = arith.divf %340, %339 : vector<32x64xf32>
    %cst_117 = arith.constant 0.000000e+00 : f32
    %342 = vector.broadcast %cst_117 : f32 to vector<32x64xf32>
    %343 = arith.cmpf oge, %327, %342 : vector<32x64xf32>
    %344 = arith.mulf %331, %341 : vector<32x64xf32>
    %345 = arith.select %343, %341, %344 : vector<32x64xi1>, vector<32x64xf32>
    %cst_118 = arith.constant dense<0.000000e+00> : vector<32x2xf32>
    %346 = tpu.matmul %337, %308, %cst_118 {dimension_numbers = #tpu.dot_dimension_numbers<[1], [0], [0], [1], [0, 0, 1, 1], [], []>} : vector<32x64xf32>, vector<64x2xf32>, vector<32x2xf32> -> vector<32x2xf32>
    %347 = vector.broadcast %310 : vector<1x2xf32> to vector<32x2xf32>
    %348 = arith.addf %346, %347 : vector<32x2xf32>
    %cst_119 = arith.constant 1.000000e-01 : f32
    %349 = vector.broadcast %cst_119 : f32 to vector<32x2xf32>
    %350 = arith.mulf %349, %348 : vector<32x2xf32>
    %cst_120 = arith.constant dense<0.000000e+00> : vector<32x2xf32>
    %351 = tpu.matmul %337, %312, %cst_120 {dimension_numbers = #tpu.dot_dimension_numbers<[1], [0], [0], [1], [0, 0, 1, 1], [], []>} : vector<32x64xf32>, vector<64x2xf32>, vector<32x2xf32> -> vector<32x2xf32>
    %352 = vector.broadcast %314 : vector<1x2xf32> to vector<32x2xf32>
    %353 = arith.addf %351, %352 : vector<32x2xf32>
    %cst_121 = arith.constant 1.000000e-01 : f32
    %354 = vector.broadcast %cst_121 : f32 to vector<32x2xf32>
    %355 = arith.mulf %354, %353 : vector<32x2xf32>
    %356 = math.tanh %350 : vector<32x2xf32>
    %cst_122 = arith.constant 2.000000e+00 : f32
    %357 = vector.broadcast %cst_122 : f32 to vector<32x2xf32>
    %358 = arith.mulf %357, %356 : vector<32x2xf32>
    %359 = arith.mulf %356, %356 : vector<32x2xf32>
    %cst_123 = arith.constant 1.000000e+00 : f32
    %360 = vector.broadcast %cst_123 : f32 to vector<32x2xf32>
    %361 = arith.subf %360, %359 : vector<32x2xf32>
    %cst_124 = arith.constant 2.000000e+00 : f32
    %362 = vector.broadcast %cst_124 : f32 to vector<32x2xf32>
    %363 = arith.mulf %362, %361 : vector<32x2xf32>
    %364 = math.exp %358 : vector<32x2xf32>
    %cst_125 = arith.constant 1.000000e+00 : f32
    %365 = vector.broadcast %cst_125 : f32 to vector<32x2xf32>
    %366 = arith.divf %365, %364 : vector<32x2xf32>
    %367 = arith.mulf %302, %364 : vector<32x2xf32>
    %368 = arith.addf %367, %355 : vector<32x2xf32>
    %369 = vector.extract_strided_slice %14 {offsets = [2, 0], sizes = [1, 2], strides = [1, 1]} : vector<4x2xf32> to vector<1x2xf32>
    %370 = vector.broadcast %369 : vector<1x2xf32> to vector<32x2xf32>
    %371 = arith.mulf %277, %370 : vector<32x2xf32>
    %372 = vector.extract_strided_slice %34 {offsets = [2, 0], sizes = [1, 2], strides = [1, 1]} : vector<4x2xf32> to vector<1x2xf32>
    %373 = vector.broadcast %372 : vector<1x2xf32> to vector<32x2xf32>
    %374 = arith.addf %371, %373 : vector<32x2xf32>
    %375 = vector.extract_strided_slice %29 {offsets = [2, 0], sizes = [1, 2], strides = [1, 1]} : vector<4x2xf32> to vector<1x2xf32>
    %376 = vector.broadcast %375 : vector<1x2xf32> to vector<32x2xf32>
    %377 = arith.mulf %368, %376 : vector<32x2xf32>
    %378 = vector.extract_strided_slice %35 {offsets = [2, 0], sizes = [1, 2], strides = [1, 1]} : vector<4x2xf32> to vector<1x2xf32>
    %379 = vector.broadcast %378 : vector<1x2xf32> to vector<32x2xf32>
    %380 = arith.addf %377, %379 : vector<32x2xf32>
    %c2_126 = arith.constant 2 : index
    %c0_127 = arith.constant 0 : index
    %c0_128 = arith.constant 0 : index
    %381 = vector.load %arg2[%c2_126, %c0_127, %c0_128] : memref<4x4x2xf32, #tpu.memory_space<vmem>>, vector<1x4x2xf32>
    %382 = vector.shape_cast %381 : vector<1x4x2xf32> to vector<4x2xf32>
    %c2_129 = arith.constant 2 : index
    %c0_130 = arith.constant 0 : index
    %c0_131 = arith.constant 0 : index
    %383 = vector.load %arg3[%c2_129, %c0_130, %c0_131] : memref<4x4x2xf32, #tpu.memory_space<vmem>>, vector<1x4x2xf32>
    %384 = vector.shape_cast %383 : vector<1x4x2xf32> to vector<4x2xf32>
    %385 = vector.extract_strided_slice %382 {offsets = [0, 0], sizes = [2, 2], strides = [1, 1]} : vector<4x2xf32> to vector<2x2xf32>
    %386 = vector.extract_strided_slice %374 {offsets = [0, 0], sizes = [32, 1], strides = [1, 1]} : vector<32x2xf32> to vector<32x1xf32>
    %387 = vector.extract_strided_slice %385 {offsets = [0, 0], sizes = [1, 2], strides = [1, 1]} : vector<2x2xf32> to vector<1x2xf32>
    %388 = vector.broadcast %386 : vector<32x1xf32> to vector<32x2xf32>
    %389 = vector.broadcast %387 : vector<1x2xf32> to vector<32x2xf32>
    %390 = arith.mulf %388, %389 : vector<32x2xf32>
    %391 = vector.extract_strided_slice %374 {offsets = [0, 1], sizes = [32, 1], strides = [1, 1]} : vector<32x2xf32> to vector<32x1xf32>
    %392 = vector.extract_strided_slice %385 {offsets = [1, 0], sizes = [1, 2], strides = [1, 1]} : vector<2x2xf32> to vector<1x2xf32>
    %393 = vector.broadcast %391 : vector<32x1xf32> to vector<32x2xf32>
    %394 = vector.broadcast %392 : vector<1x2xf32> to vector<32x2xf32>
    %395 = arith.mulf %393, %394 : vector<32x2xf32>
    %396 = arith.addf %390, %395 : vector<32x2xf32>
    %397 = vector.extract_strided_slice %382 {offsets = [2, 0], sizes = [2, 2], strides = [1, 1]} : vector<4x2xf32> to vector<2x2xf32>
    %398 = vector.extract_strided_slice %380 {offsets = [0, 0], sizes = [32, 1], strides = [1, 1]} : vector<32x2xf32> to vector<32x1xf32>
    %399 = vector.extract_strided_slice %397 {offsets = [0, 0], sizes = [1, 2], strides = [1, 1]} : vector<2x2xf32> to vector<1x2xf32>
    %400 = vector.broadcast %398 : vector<32x1xf32> to vector<32x2xf32>
    %401 = vector.broadcast %399 : vector<1x2xf32> to vector<32x2xf32>
    %402 = arith.mulf %400, %401 : vector<32x2xf32>
    %403 = vector.extract_strided_slice %380 {offsets = [0, 1], sizes = [32, 1], strides = [1, 1]} : vector<32x2xf32> to vector<32x1xf32>
    %404 = vector.extract_strided_slice %397 {offsets = [1, 0], sizes = [1, 2], strides = [1, 1]} : vector<2x2xf32> to vector<1x2xf32>
    %405 = vector.broadcast %403 : vector<32x1xf32> to vector<32x2xf32>
    %406 = vector.broadcast %404 : vector<1x2xf32> to vector<32x2xf32>
    %407 = arith.mulf %405, %406 : vector<32x2xf32>
    %408 = arith.addf %402, %407 : vector<32x2xf32>
    %409 = arith.addf %396, %408 : vector<32x2xf32>
    %410 = vector.extract_strided_slice %384 {offsets = [0, 0], sizes = [2, 2], strides = [1, 1]} : vector<4x2xf32> to vector<2x2xf32>
    %411 = vector.extract_strided_slice %374 {offsets = [0, 0], sizes = [32, 1], strides = [1, 1]} : vector<32x2xf32> to vector<32x1xf32>
    %412 = vector.extract_strided_slice %410 {offsets = [0, 0], sizes = [1, 2], strides = [1, 1]} : vector<2x2xf32> to vector<1x2xf32>
    %413 = vector.broadcast %411 : vector<32x1xf32> to vector<32x2xf32>
    %414 = vector.broadcast %412 : vector<1x2xf32> to vector<32x2xf32>
    %415 = arith.mulf %413, %414 : vector<32x2xf32>
    %416 = vector.extract_strided_slice %374 {offsets = [0, 1], sizes = [32, 1], strides = [1, 1]} : vector<32x2xf32> to vector<32x1xf32>
    %417 = vector.extract_strided_slice %410 {offsets = [1, 0], sizes = [1, 2], strides = [1, 1]} : vector<2x2xf32> to vector<1x2xf32>
    %418 = vector.broadcast %416 : vector<32x1xf32> to vector<32x2xf32>
    %419 = vector.broadcast %417 : vector<1x2xf32> to vector<32x2xf32>
    %420 = arith.mulf %418, %419 : vector<32x2xf32>
    %421 = arith.addf %415, %420 : vector<32x2xf32>
    %422 = vector.extract_strided_slice %384 {offsets = [2, 0], sizes = [2, 2], strides = [1, 1]} : vector<4x2xf32> to vector<2x2xf32>
    %423 = vector.extract_strided_slice %380 {offsets = [0, 0], sizes = [32, 1], strides = [1, 1]} : vector<32x2xf32> to vector<32x1xf32>
    %424 = vector.extract_strided_slice %422 {offsets = [0, 0], sizes = [1, 2], strides = [1, 1]} : vector<2x2xf32> to vector<1x2xf32>
    %425 = vector.broadcast %423 : vector<32x1xf32> to vector<32x2xf32>
    %426 = vector.broadcast %424 : vector<1x2xf32> to vector<32x2xf32>
    %427 = arith.mulf %425, %426 : vector<32x2xf32>
    %428 = vector.extract_strided_slice %380 {offsets = [0, 1], sizes = [32, 1], strides = [1, 1]} : vector<32x2xf32> to vector<32x1xf32>
    %429 = vector.extract_strided_slice %422 {offsets = [1, 0], sizes = [1, 2], strides = [1, 1]} : vector<2x2xf32> to vector<1x2xf32>
    %430 = vector.broadcast %428 : vector<32x1xf32> to vector<32x2xf32>
    %431 = vector.broadcast %429 : vector<1x2xf32> to vector<32x2xf32>
    %432 = arith.mulf %430, %431 : vector<32x2xf32>
    %433 = arith.addf %427, %432 : vector<32x2xf32>
    %434 = arith.addf %421, %433 : vector<32x2xf32>
    %c3 = arith.constant 3 : index
    %c0_132 = arith.constant 0 : index
    %c0_133 = arith.constant 0 : index
    %435 = vector.load %arg10[%c3, %c0_132, %c0_133] : memref<4x2x64xf32, #tpu.memory_space<vmem>>, vector<1x2x64xf32>
    %436 = vector.shape_cast %435 : vector<1x2x64xf32> to vector<2x64xf32>
    %c3_134 = arith.constant 3 : index
    %c0_135 = arith.constant 0 : index
    %c0_136 = arith.constant 0 : index
    %437 = vector.load %arg11[%c3_134, %c0_135, %c0_136] : memref<4x1x64xf32, #tpu.memory_space<vmem>>, vector<1x1x64xf32>
    %438 = vector.shape_cast %437 : vector<1x1x64xf32> to vector<1x64xf32>
    %c3_137 = arith.constant 3 : index
    %c0_138 = arith.constant 0 : index
    %c0_139 = arith.constant 0 : index
    %439 = vector.load %arg12[%c3_137, %c0_138, %c0_139] : memref<4x64x2xf32, #tpu.memory_space<vmem>>, vector<1x64x2xf32>
    %440 = vector.shape_cast %439 : vector<1x64x2xf32> to vector<64x2xf32>
    %c3_140 = arith.constant 3 : index
    %c0_141 = arith.constant 0 : index
    %c0_142 = arith.constant 0 : index
    %441 = vector.load %arg13[%c3_140, %c0_141, %c0_142] : memref<4x1x2xf32, #tpu.memory_space<vmem>>, vector<1x1x2xf32>
    %442 = vector.shape_cast %441 : vector<1x1x2xf32> to vector<1x2xf32>
    %c3_143 = arith.constant 3 : index
    %c0_144 = arith.constant 0 : index
    %c0_145 = arith.constant 0 : index
    %443 = vector.load %arg14[%c3_143, %c0_144, %c0_145] : memref<4x64x2xf32, #tpu.memory_space<vmem>>, vector<1x64x2xf32>
    %444 = vector.shape_cast %443 : vector<1x64x2xf32> to vector<64x2xf32>
    %c3_146 = arith.constant 3 : index
    %c0_147 = arith.constant 0 : index
    %c0_148 = arith.constant 0 : index
    %445 = vector.load %arg15[%c3_146, %c0_147, %c0_148] : memref<4x1x2xf32, #tpu.memory_space<vmem>>, vector<1x1x2xf32>
    %446 = vector.shape_cast %445 : vector<1x1x2xf32> to vector<1x2xf32>
    %447 = vector.extract_strided_slice %409 {offsets = [0, 0], sizes = [32, 1], strides = [1, 1]} : vector<32x2xf32> to vector<32x1xf32>
    %448 = vector.extract_strided_slice %436 {offsets = [0, 0], sizes = [1, 64], strides = [1, 1]} : vector<2x64xf32> to vector<1x64xf32>
    %449 = vector.broadcast %447 : vector<32x1xf32> to vector<32x64xf32>
    %450 = vector.broadcast %448 : vector<1x64xf32> to vector<32x64xf32>
    %451 = arith.mulf %449, %450 : vector<32x64xf32>
    %452 = vector.extract_strided_slice %409 {offsets = [0, 1], sizes = [32, 1], strides = [1, 1]} : vector<32x2xf32> to vector<32x1xf32>
    %453 = vector.extract_strided_slice %436 {offsets = [1, 0], sizes = [1, 64], strides = [1, 1]} : vector<2x64xf32> to vector<1x64xf32>
    %454 = vector.broadcast %452 : vector<32x1xf32> to vector<32x64xf32>
    %455 = vector.broadcast %453 : vector<1x64xf32> to vector<32x64xf32>
    %456 = arith.mulf %454, %455 : vector<32x64xf32>
    %457 = arith.addf %451, %456 : vector<32x64xf32>
    %458 = vector.broadcast %438 : vector<1x64xf32> to vector<32x64xf32>
    %459 = arith.addf %457, %458 : vector<32x64xf32>
    %460 = math.absf %459 : vector<32x64xf32>
    %cst_149 = arith.constant 0.000000e+00 : f32
    %461 = vector.broadcast %cst_149 : f32 to vector<32x64xf32>
    %462 = arith.subf %461, %460 : vector<32x64xf32>
    %463 = math.exp %462 : vector<32x64xf32>
    %cst_150 = arith.constant 0.000000e+00 : f32
    %464 = vector.broadcast %cst_150 : f32 to vector<32x64xf32>
    %465 = arith.maximumf %459, %464 : vector<32x64xf32>
    %cst_151 = arith.constant 1.000000e+00 : f32
    %466 = vector.broadcast %cst_151 : f32 to vector<32x64xf32>
    %467 = arith.addf %466, %463 : vector<32x64xf32>
    %468 = math.log %467 : vector<32x64xf32>
    %469 = arith.addf %465, %468 : vector<32x64xf32>
    %cst_152 = arith.constant 1.000000e+00 : f32
    %470 = vector.broadcast %cst_152 : f32 to vector<32x64xf32>
    %471 = arith.addf %470, %463 : vector<32x64xf32>
    %cst_153 = arith.constant 1.000000e+00 : f32
    %472 = vector.broadcast %cst_153 : f32 to vector<32x64xf32>
    %473 = arith.divf %472, %471 : vector<32x64xf32>
    %cst_154 = arith.constant 0.000000e+00 : f32
    %474 = vector.broadcast %cst_154 : f32 to vector<32x64xf32>
    %475 = arith.cmpf oge, %459, %474 : vector<32x64xf32>
    %476 = arith.mulf %463, %473 : vector<32x64xf32>
    %477 = arith.select %475, %473, %476 : vector<32x64xi1>, vector<32x64xf32>
    %cst_155 = arith.constant dense<0.000000e+00> : vector<32x2xf32>
    %478 = tpu.matmul %469, %440, %cst_155 {dimension_numbers = #tpu.dot_dimension_numbers<[1], [0], [0], [1], [0, 0, 1, 1], [], []>} : vector<32x64xf32>, vector<64x2xf32>, vector<32x2xf32> -> vector<32x2xf32>
    %479 = vector.broadcast %442 : vector<1x2xf32> to vector<32x2xf32>
    %480 = arith.addf %478, %479 : vector<32x2xf32>
    %cst_156 = arith.constant 1.000000e-01 : f32
    %481 = vector.broadcast %cst_156 : f32 to vector<32x2xf32>
    %482 = arith.mulf %481, %480 : vector<32x2xf32>
    %cst_157 = arith.constant dense<0.000000e+00> : vector<32x2xf32>
    %483 = tpu.matmul %469, %444, %cst_157 {dimension_numbers = #tpu.dot_dimension_numbers<[1], [0], [0], [1], [0, 0, 1, 1], [], []>} : vector<32x64xf32>, vector<64x2xf32>, vector<32x2xf32> -> vector<32x2xf32>
    %484 = vector.broadcast %446 : vector<1x2xf32> to vector<32x2xf32>
    %485 = arith.addf %483, %484 : vector<32x2xf32>
    %cst_158 = arith.constant 1.000000e-01 : f32
    %486 = vector.broadcast %cst_158 : f32 to vector<32x2xf32>
    %487 = arith.mulf %486, %485 : vector<32x2xf32>
    %488 = math.tanh %482 : vector<32x2xf32>
    %cst_159 = arith.constant 2.000000e+00 : f32
    %489 = vector.broadcast %cst_159 : f32 to vector<32x2xf32>
    %490 = arith.mulf %489, %488 : vector<32x2xf32>
    %491 = arith.mulf %488, %488 : vector<32x2xf32>
    %cst_160 = arith.constant 1.000000e+00 : f32
    %492 = vector.broadcast %cst_160 : f32 to vector<32x2xf32>
    %493 = arith.subf %492, %491 : vector<32x2xf32>
    %cst_161 = arith.constant 2.000000e+00 : f32
    %494 = vector.broadcast %cst_161 : f32 to vector<32x2xf32>
    %495 = arith.mulf %494, %493 : vector<32x2xf32>
    %496 = math.exp %490 : vector<32x2xf32>
    %cst_162 = arith.constant 1.000000e+00 : f32
    %497 = vector.broadcast %cst_162 : f32 to vector<32x2xf32>
    %498 = arith.divf %497, %496 : vector<32x2xf32>
    %499 = arith.mulf %434, %496 : vector<32x2xf32>
    %500 = arith.addf %499, %487 : vector<32x2xf32>
    %501 = vector.extract_strided_slice %14 {offsets = [3, 0], sizes = [1, 2], strides = [1, 1]} : vector<4x2xf32> to vector<1x2xf32>
    %502 = vector.broadcast %501 : vector<1x2xf32> to vector<32x2xf32>
    %503 = arith.mulf %409, %502 : vector<32x2xf32>
    %504 = vector.extract_strided_slice %34 {offsets = [3, 0], sizes = [1, 2], strides = [1, 1]} : vector<4x2xf32> to vector<1x2xf32>
    %505 = vector.broadcast %504 : vector<1x2xf32> to vector<32x2xf32>
    %506 = arith.addf %503, %505 : vector<32x2xf32>
    %507 = vector.extract_strided_slice %29 {offsets = [3, 0], sizes = [1, 2], strides = [1, 1]} : vector<4x2xf32> to vector<1x2xf32>
    %508 = vector.broadcast %507 : vector<1x2xf32> to vector<32x2xf32>
    %509 = arith.mulf %500, %508 : vector<32x2xf32>
    %510 = vector.extract_strided_slice %35 {offsets = [3, 0], sizes = [1, 2], strides = [1, 1]} : vector<4x2xf32> to vector<1x2xf32>
    %511 = vector.broadcast %510 : vector<1x2xf32> to vector<32x2xf32>
    %512 = arith.addf %509, %511 : vector<32x2xf32>
    %c3_163 = arith.constant 3 : index
    %c0_164 = arith.constant 0 : index
    %c0_165 = arith.constant 0 : index
    %513 = vector.load %arg2[%c3_163, %c0_164, %c0_165] : memref<4x4x2xf32, #tpu.memory_space<vmem>>, vector<1x4x2xf32>
    %514 = vector.shape_cast %513 : vector<1x4x2xf32> to vector<4x2xf32>
    %c3_166 = arith.constant 3 : index
    %c0_167 = arith.constant 0 : index
    %c0_168 = arith.constant 0 : index
    %515 = vector.load %arg3[%c3_166, %c0_167, %c0_168] : memref<4x4x2xf32, #tpu.memory_space<vmem>>, vector<1x4x2xf32>
    %516 = vector.shape_cast %515 : vector<1x4x2xf32> to vector<4x2xf32>
    %517 = vector.extract_strided_slice %514 {offsets = [0, 0], sizes = [2, 2], strides = [1, 1]} : vector<4x2xf32> to vector<2x2xf32>
    %518 = vector.extract_strided_slice %506 {offsets = [0, 0], sizes = [32, 1], strides = [1, 1]} : vector<32x2xf32> to vector<32x1xf32>
    %519 = vector.extract_strided_slice %517 {offsets = [0, 0], sizes = [1, 2], strides = [1, 1]} : vector<2x2xf32> to vector<1x2xf32>
    %520 = vector.broadcast %518 : vector<32x1xf32> to vector<32x2xf32>
    %521 = vector.broadcast %519 : vector<1x2xf32> to vector<32x2xf32>
    %522 = arith.mulf %520, %521 : vector<32x2xf32>
    %523 = vector.extract_strided_slice %506 {offsets = [0, 1], sizes = [32, 1], strides = [1, 1]} : vector<32x2xf32> to vector<32x1xf32>
    %524 = vector.extract_strided_slice %517 {offsets = [1, 0], sizes = [1, 2], strides = [1, 1]} : vector<2x2xf32> to vector<1x2xf32>
    %525 = vector.broadcast %523 : vector<32x1xf32> to vector<32x2xf32>
    %526 = vector.broadcast %524 : vector<1x2xf32> to vector<32x2xf32>
    %527 = arith.mulf %525, %526 : vector<32x2xf32>
    %528 = arith.addf %522, %527 : vector<32x2xf32>
    %529 = vector.extract_strided_slice %514 {offsets = [2, 0], sizes = [2, 2], strides = [1, 1]} : vector<4x2xf32> to vector<2x2xf32>
    %530 = vector.extract_strided_slice %512 {offsets = [0, 0], sizes = [32, 1], strides = [1, 1]} : vector<32x2xf32> to vector<32x1xf32>
    %531 = vector.extract_strided_slice %529 {offsets = [0, 0], sizes = [1, 2], strides = [1, 1]} : vector<2x2xf32> to vector<1x2xf32>
    %532 = vector.broadcast %530 : vector<32x1xf32> to vector<32x2xf32>
    %533 = vector.broadcast %531 : vector<1x2xf32> to vector<32x2xf32>
    %534 = arith.mulf %532, %533 : vector<32x2xf32>
    %535 = vector.extract_strided_slice %512 {offsets = [0, 1], sizes = [32, 1], strides = [1, 1]} : vector<32x2xf32> to vector<32x1xf32>
    %536 = vector.extract_strided_slice %529 {offsets = [1, 0], sizes = [1, 2], strides = [1, 1]} : vector<2x2xf32> to vector<1x2xf32>
    %537 = vector.broadcast %535 : vector<32x1xf32> to vector<32x2xf32>
    %538 = vector.broadcast %536 : vector<1x2xf32> to vector<32x2xf32>
    %539 = arith.mulf %537, %538 : vector<32x2xf32>
    %540 = arith.addf %534, %539 : vector<32x2xf32>
    %541 = arith.addf %528, %540 : vector<32x2xf32>
    %542 = vector.extract_strided_slice %516 {offsets = [0, 0], sizes = [2, 2], strides = [1, 1]} : vector<4x2xf32> to vector<2x2xf32>
    %543 = vector.extract_strided_slice %506 {offsets = [0, 0], sizes = [32, 1], strides = [1, 1]} : vector<32x2xf32> to vector<32x1xf32>
    %544 = vector.extract_strided_slice %542 {offsets = [0, 0], sizes = [1, 2], strides = [1, 1]} : vector<2x2xf32> to vector<1x2xf32>
    %545 = vector.broadcast %543 : vector<32x1xf32> to vector<32x2xf32>
    %546 = vector.broadcast %544 : vector<1x2xf32> to vector<32x2xf32>
    %547 = arith.mulf %545, %546 : vector<32x2xf32>
    %548 = vector.extract_strided_slice %506 {offsets = [0, 1], sizes = [32, 1], strides = [1, 1]} : vector<32x2xf32> to vector<32x1xf32>
    %549 = vector.extract_strided_slice %542 {offsets = [1, 0], sizes = [1, 2], strides = [1, 1]} : vector<2x2xf32> to vector<1x2xf32>
    %550 = vector.broadcast %548 : vector<32x1xf32> to vector<32x2xf32>
    %551 = vector.broadcast %549 : vector<1x2xf32> to vector<32x2xf32>
    %552 = arith.mulf %550, %551 : vector<32x2xf32>
    %553 = arith.addf %547, %552 : vector<32x2xf32>
    %554 = vector.extract_strided_slice %516 {offsets = [2, 0], sizes = [2, 2], strides = [1, 1]} : vector<4x2xf32> to vector<2x2xf32>
    %555 = vector.extract_strided_slice %512 {offsets = [0, 0], sizes = [32, 1], strides = [1, 1]} : vector<32x2xf32> to vector<32x1xf32>
    %556 = vector.extract_strided_slice %554 {offsets = [0, 0], sizes = [1, 2], strides = [1, 1]} : vector<2x2xf32> to vector<1x2xf32>
    %557 = vector.broadcast %555 : vector<32x1xf32> to vector<32x2xf32>
    %558 = vector.broadcast %556 : vector<1x2xf32> to vector<32x2xf32>
    %559 = arith.mulf %557, %558 : vector<32x2xf32>
    %560 = vector.extract_strided_slice %512 {offsets = [0, 1], sizes = [32, 1], strides = [1, 1]} : vector<32x2xf32> to vector<32x1xf32>
    %561 = vector.extract_strided_slice %554 {offsets = [1, 0], sizes = [1, 2], strides = [1, 1]} : vector<2x2xf32> to vector<1x2xf32>
    %562 = vector.broadcast %560 : vector<32x1xf32> to vector<32x2xf32>
    %563 = vector.broadcast %561 : vector<1x2xf32> to vector<32x2xf32>
    %564 = arith.mulf %562, %563 : vector<32x2xf32>
    %565 = arith.addf %559, %564 : vector<32x2xf32>
    %566 = arith.addf %553, %565 : vector<32x2xf32>
    %c0_169 = arith.constant 0 : index
    %c0_170 = arith.constant 0 : index
    %567 = vector.load %arg16[%c0_169, %c0_170] : memref<4x32xf32, #tpu.memory_space<vmem>>, vector<4x32xf32>
    %568 = vector.extract_strided_slice %567 {offsets = [0, 0], sizes = [2, 32], strides = [1, 1]} : vector<4x32xf32> to vector<2x32xf32>
    %569 = vector.extract_strided_slice %541 {offsets = [0, 0], sizes = [32, 1], strides = [1, 1]} : vector<32x2xf32> to vector<32x1xf32>
    %570 = vector.extract_strided_slice %568 {offsets = [0, 0], sizes = [1, 32], strides = [1, 1]} : vector<2x32xf32> to vector<1x32xf32>
    %571 = vector.broadcast %569 : vector<32x1xf32> to vector<32x32xf32>
    %572 = vector.broadcast %570 : vector<1x32xf32> to vector<32x32xf32>
    %573 = arith.mulf %571, %572 : vector<32x32xf32>
    %574 = vector.extract_strided_slice %541 {offsets = [0, 1], sizes = [32, 1], strides = [1, 1]} : vector<32x2xf32> to vector<32x1xf32>
    %575 = vector.extract_strided_slice %568 {offsets = [1, 0], sizes = [1, 32], strides = [1, 1]} : vector<2x32xf32> to vector<1x32xf32>
    %576 = vector.broadcast %574 : vector<32x1xf32> to vector<32x32xf32>
    %577 = vector.broadcast %575 : vector<1x32xf32> to vector<32x32xf32>
    %578 = arith.mulf %576, %577 : vector<32x32xf32>
    %579 = arith.addf %573, %578 : vector<32x32xf32>
    %580 = vector.extract_strided_slice %567 {offsets = [2, 0], sizes = [2, 32], strides = [1, 1]} : vector<4x32xf32> to vector<2x32xf32>
    %581 = vector.extract_strided_slice %566 {offsets = [0, 0], sizes = [32, 1], strides = [1, 1]} : vector<32x2xf32> to vector<32x1xf32>
    %582 = vector.extract_strided_slice %580 {offsets = [0, 0], sizes = [1, 32], strides = [1, 1]} : vector<2x32xf32> to vector<1x32xf32>
    %583 = vector.broadcast %581 : vector<32x1xf32> to vector<32x32xf32>
    %584 = vector.broadcast %582 : vector<1x32xf32> to vector<32x32xf32>
    %585 = arith.mulf %583, %584 : vector<32x32xf32>
    %586 = vector.extract_strided_slice %566 {offsets = [0, 1], sizes = [32, 1], strides = [1, 1]} : vector<32x2xf32> to vector<32x1xf32>
    %587 = vector.extract_strided_slice %580 {offsets = [1, 0], sizes = [1, 32], strides = [1, 1]} : vector<2x32xf32> to vector<1x32xf32>
    %588 = vector.broadcast %586 : vector<32x1xf32> to vector<32x32xf32>
    %589 = vector.broadcast %587 : vector<1x32xf32> to vector<32x32xf32>
    %590 = arith.mulf %588, %589 : vector<32x32xf32>
    %591 = arith.addf %585, %590 : vector<32x32xf32>
    %592 = arith.addf %579, %591 : vector<32x32xf32>
    %c0_171 = arith.constant 0 : index
    %c0_172 = arith.constant 0 : index
    %593 = vector.load %arg17[%c0_171, %c0_172] : memref<1x32xf32, #tpu.memory_space<vmem>>, vector<1x32xf32>
    %594 = vector.broadcast %593 : vector<1x32xf32> to vector<32x32xf32>
    %595 = arith.addf %592, %594 : vector<32x32xf32>
    %cst_173 = arith.constant 0.000000e+00 : f32
    %596 = vector.broadcast %cst_173 : f32 to vector<32x32xf32>
    %597 = arith.maximumf %595, %596 : vector<32x32xf32>
    %598 = math.absf %595 : vector<32x32xf32>
    %cst_174 = arith.constant 0.000000e+00 : f32
    %599 = vector.broadcast %cst_174 : f32 to vector<32x32xf32>
    %600 = arith.subf %599, %598 : vector<32x32xf32>
    %601 = math.exp %600 : vector<32x32xf32>
    %cst_175 = arith.constant 1.000000e+00 : f32
    %602 = vector.broadcast %cst_175 : f32 to vector<32x32xf32>
    %603 = arith.addf %602, %601 : vector<32x32xf32>
    %604 = math.log %603 : vector<32x32xf32>
    %605 = arith.addf %597, %604 : vector<32x32xf32>
    %c0_176 = arith.constant 0 : index
    %c0_177 = arith.constant 0 : index
    %606 = vector.load %arg18[%c0_176, %c0_177] : memref<32x32xf32, #tpu.memory_space<vmem>>, vector<32x32xf32>
    %cst_178 = arith.constant dense<0.000000e+00> : vector<32x32xf32>
    %607 = tpu.matmul %605, %606, %cst_178 {dimension_numbers = #tpu.dot_dimension_numbers<[1], [0], [0], [1], [0, 0, 1, 1], [], []>} : vector<32x32xf32>, vector<32x32xf32>, vector<32x32xf32> -> vector<32x32xf32>
    %c0_179 = arith.constant 0 : index
    %c0_180 = arith.constant 0 : index
    %608 = vector.load %arg19[%c0_179, %c0_180] : memref<1x32xf32, #tpu.memory_space<vmem>>, vector<1x32xf32>
    %609 = vector.broadcast %608 : vector<1x32xf32> to vector<32x32xf32>
    %610 = arith.addf %607, %609 : vector<32x32xf32>
    %cst_181 = arith.constant 0.000000e+00 : f32
    %611 = vector.broadcast %cst_181 : f32 to vector<32x32xf32>
    %612 = arith.maximumf %610, %611 : vector<32x32xf32>
    %613 = math.absf %610 : vector<32x32xf32>
    %cst_182 = arith.constant 0.000000e+00 : f32
    %614 = vector.broadcast %cst_182 : f32 to vector<32x32xf32>
    %615 = arith.subf %614, %613 : vector<32x32xf32>
    %616 = math.exp %615 : vector<32x32xf32>
    %cst_183 = arith.constant 1.000000e+00 : f32
    %617 = vector.broadcast %cst_183 : f32 to vector<32x32xf32>
    %618 = arith.addf %617, %616 : vector<32x32xf32>
    %619 = math.log %618 : vector<32x32xf32>
    %620 = arith.addf %612, %619 : vector<32x32xf32>
    %c0_184 = arith.constant 0 : index
    %c0_185 = arith.constant 0 : index
    %621 = vector.load %arg20[%c0_184, %c0_185] : memref<32x2xf32, #tpu.memory_space<vmem>>, vector<32x2xf32>
    %cst_186 = arith.constant dense<0.000000e+00> : vector<32x2xf32>
    %622 = tpu.matmul %620, %621, %cst_186 {dimension_numbers = #tpu.dot_dimension_numbers<[1], [0], [0], [1], [0, 0, 1, 1], [], []>} : vector<32x32xf32>, vector<32x2xf32>, vector<32x2xf32> -> vector<32x2xf32>
    %c0_187 = arith.constant 0 : index
    %c0_188 = arith.constant 0 : index
    %623 = vector.load %arg21[%c0_187, %c0_188] : memref<1x2xf32, #tpu.memory_space<vmem>>, vector<1x2xf32>
    %624 = vector.broadcast %623 : vector<1x2xf32> to vector<32x2xf32>
    %625 = arith.addf %622, %624 : vector<32x2xf32>
    %c0_189 = arith.constant 0 : index
    %c0_190 = arith.constant 0 : index
    %626 = vector.load %arg22[%c0_189, %c0_190] : memref<32x2xf32, #tpu.memory_space<vmem>>, vector<32x2xf32>
    %cst_191 = arith.constant dense<0.000000e+00> : vector<32x2xf32>
    %627 = tpu.matmul %620, %626, %cst_191 {dimension_numbers = #tpu.dot_dimension_numbers<[1], [0], [0], [1], [0, 0, 1, 1], [], []>} : vector<32x32xf32>, vector<32x2xf32>, vector<32x2xf32> -> vector<32x2xf32>
    %c0_192 = arith.constant 0 : index
    %c0_193 = arith.constant 0 : index
    %628 = vector.load %arg23[%c0_192, %c0_193] : memref<1x2xf32, #tpu.memory_space<vmem>>, vector<1x2xf32>
    %629 = vector.broadcast %628 : vector<1x2xf32> to vector<32x2xf32>
    %630 = arith.addf %627, %629 : vector<32x2xf32>
    %c3_194 = arith.constant 3 : index
    %c0_195 = arith.constant 0 : index
    %c0_196 = arith.constant 0 : index
    %631 = vector.load %arg10[%c3_194, %c0_195, %c0_196] : memref<4x2x64xf32, #tpu.memory_space<vmem>>, vector<1x2x64xf32>
    %632 = vector.shape_cast %631 : vector<1x2x64xf32> to vector<2x64xf32>
    %c3_197 = arith.constant 3 : index
    %c0_198 = arith.constant 0 : index
    %c0_199 = arith.constant 0 : index
    %633 = vector.load %arg12[%c3_197, %c0_198, %c0_199] : memref<4x64x2xf32, #tpu.memory_space<vmem>>, vector<1x64x2xf32>
    %634 = vector.shape_cast %633 : vector<1x64x2xf32> to vector<64x2xf32>
    %c3_200 = arith.constant 3 : index
    %c0_201 = arith.constant 0 : index
    %c0_202 = arith.constant 0 : index
    %635 = vector.load %arg14[%c3_200, %c0_201, %c0_202] : memref<4x64x2xf32, #tpu.memory_space<vmem>>, vector<1x64x2xf32>
    %636 = vector.shape_cast %635 : vector<1x64x2xf32> to vector<64x2xf32>
    %c3_203 = arith.constant 3 : index
    %c0_204 = arith.constant 0 : index
    %c0_205 = arith.constant 0 : index
    %637 = vector.load %arg4[%c3_203, %c0_204, %c0_205] : memref<4x4x2xf32, #tpu.memory_space<vmem>>, vector<1x4x2xf32>
    %638 = vector.shape_cast %637 : vector<1x4x2xf32> to vector<4x2xf32>
    %c3_206 = arith.constant 3 : index
    %c0_207 = arith.constant 0 : index
    %c0_208 = arith.constant 0 : index
    %639 = vector.load %arg5[%c3_206, %c0_207, %c0_208] : memref<4x4x2xf32, #tpu.memory_space<vmem>>, vector<1x4x2xf32>
    %640 = vector.shape_cast %639 : vector<1x4x2xf32> to vector<4x2xf32>
    %641 = vector.extract_strided_slice %638 {offsets = [0, 0], sizes = [2, 2], strides = [1, 1]} : vector<4x2xf32> to vector<2x2xf32>
    %642 = vector.extract_strided_slice %625 {offsets = [0, 0], sizes = [32, 1], strides = [1, 1]} : vector<32x2xf32> to vector<32x1xf32>
    %643 = vector.extract_strided_slice %641 {offsets = [0, 0], sizes = [1, 2], strides = [1, 1]} : vector<2x2xf32> to vector<1x2xf32>
    %644 = vector.broadcast %642 : vector<32x1xf32> to vector<32x2xf32>
    %645 = vector.broadcast %643 : vector<1x2xf32> to vector<32x2xf32>
    %646 = arith.mulf %644, %645 : vector<32x2xf32>
    %647 = vector.extract_strided_slice %625 {offsets = [0, 1], sizes = [32, 1], strides = [1, 1]} : vector<32x2xf32> to vector<32x1xf32>
    %648 = vector.extract_strided_slice %641 {offsets = [1, 0], sizes = [1, 2], strides = [1, 1]} : vector<2x2xf32> to vector<1x2xf32>
    %649 = vector.broadcast %647 : vector<32x1xf32> to vector<32x2xf32>
    %650 = vector.broadcast %648 : vector<1x2xf32> to vector<32x2xf32>
    %651 = arith.mulf %649, %650 : vector<32x2xf32>
    %652 = arith.addf %646, %651 : vector<32x2xf32>
    %653 = vector.extract_strided_slice %638 {offsets = [2, 0], sizes = [2, 2], strides = [1, 1]} : vector<4x2xf32> to vector<2x2xf32>
    %654 = vector.extract_strided_slice %630 {offsets = [0, 0], sizes = [32, 1], strides = [1, 1]} : vector<32x2xf32> to vector<32x1xf32>
    %655 = vector.extract_strided_slice %653 {offsets = [0, 0], sizes = [1, 2], strides = [1, 1]} : vector<2x2xf32> to vector<1x2xf32>
    %656 = vector.broadcast %654 : vector<32x1xf32> to vector<32x2xf32>
    %657 = vector.broadcast %655 : vector<1x2xf32> to vector<32x2xf32>
    %658 = arith.mulf %656, %657 : vector<32x2xf32>
    %659 = vector.extract_strided_slice %630 {offsets = [0, 1], sizes = [32, 1], strides = [1, 1]} : vector<32x2xf32> to vector<32x1xf32>
    %660 = vector.extract_strided_slice %653 {offsets = [1, 0], sizes = [1, 2], strides = [1, 1]} : vector<2x2xf32> to vector<1x2xf32>
    %661 = vector.broadcast %659 : vector<32x1xf32> to vector<32x2xf32>
    %662 = vector.broadcast %660 : vector<1x2xf32> to vector<32x2xf32>
    %663 = arith.mulf %661, %662 : vector<32x2xf32>
    %664 = arith.addf %658, %663 : vector<32x2xf32>
    %665 = arith.addf %652, %664 : vector<32x2xf32>
    %666 = vector.extract_strided_slice %640 {offsets = [0, 0], sizes = [2, 2], strides = [1, 1]} : vector<4x2xf32> to vector<2x2xf32>
    %667 = vector.extract_strided_slice %625 {offsets = [0, 0], sizes = [32, 1], strides = [1, 1]} : vector<32x2xf32> to vector<32x1xf32>
    %668 = vector.extract_strided_slice %666 {offsets = [0, 0], sizes = [1, 2], strides = [1, 1]} : vector<2x2xf32> to vector<1x2xf32>
    %669 = vector.broadcast %667 : vector<32x1xf32> to vector<32x2xf32>
    %670 = vector.broadcast %668 : vector<1x2xf32> to vector<32x2xf32>
    %671 = arith.mulf %669, %670 : vector<32x2xf32>
    %672 = vector.extract_strided_slice %625 {offsets = [0, 1], sizes = [32, 1], strides = [1, 1]} : vector<32x2xf32> to vector<32x1xf32>
    %673 = vector.extract_strided_slice %666 {offsets = [1, 0], sizes = [1, 2], strides = [1, 1]} : vector<2x2xf32> to vector<1x2xf32>
    %674 = vector.broadcast %672 : vector<32x1xf32> to vector<32x2xf32>
    %675 = vector.broadcast %673 : vector<1x2xf32> to vector<32x2xf32>
    %676 = arith.mulf %674, %675 : vector<32x2xf32>
    %677 = arith.addf %671, %676 : vector<32x2xf32>
    %678 = vector.extract_strided_slice %640 {offsets = [2, 0], sizes = [2, 2], strides = [1, 1]} : vector<4x2xf32> to vector<2x2xf32>
    %679 = vector.extract_strided_slice %630 {offsets = [0, 0], sizes = [32, 1], strides = [1, 1]} : vector<32x2xf32> to vector<32x1xf32>
    %680 = vector.extract_strided_slice %678 {offsets = [0, 0], sizes = [1, 2], strides = [1, 1]} : vector<2x2xf32> to vector<1x2xf32>
    %681 = vector.broadcast %679 : vector<32x1xf32> to vector<32x2xf32>
    %682 = vector.broadcast %680 : vector<1x2xf32> to vector<32x2xf32>
    %683 = arith.mulf %681, %682 : vector<32x2xf32>
    %684 = vector.extract_strided_slice %630 {offsets = [0, 1], sizes = [32, 1], strides = [1, 1]} : vector<32x2xf32> to vector<32x1xf32>
    %685 = vector.extract_strided_slice %678 {offsets = [1, 0], sizes = [1, 2], strides = [1, 1]} : vector<2x2xf32> to vector<1x2xf32>
    %686 = vector.broadcast %684 : vector<32x1xf32> to vector<32x2xf32>
    %687 = vector.broadcast %685 : vector<1x2xf32> to vector<32x2xf32>
    %688 = arith.mulf %686, %687 : vector<32x2xf32>
    %689 = arith.addf %683, %688 : vector<32x2xf32>
    %690 = arith.addf %677, %689 : vector<32x2xf32>
    %691 = vector.extract_strided_slice %31 {offsets = [3, 0], sizes = [1, 2], strides = [1, 1]} : vector<4x2xf32> to vector<1x2xf32>
    %692 = vector.broadcast %691 : vector<1x2xf32> to vector<32x2xf32>
    %693 = arith.mulf %665, %692 : vector<32x2xf32>
    %694 = vector.extract_strided_slice %33 {offsets = [3, 0], sizes = [1, 2], strides = [1, 1]} : vector<4x2xf32> to vector<1x2xf32>
    %695 = vector.broadcast %694 : vector<1x2xf32> to vector<32x2xf32>
    %696 = arith.mulf %690, %695 : vector<32x2xf32>
    %697 = vector.extract_strided_slice %693 {offsets = [0, 0], sizes = [32, 1], strides = [1, 1]} : vector<32x2xf32> to vector<32x1xf32>
    %698 = vector.extract_strided_slice %632 {offsets = [0, 0], sizes = [1, 64], strides = [1, 1]} : vector<2x64xf32> to vector<1x64xf32>
    %699 = vector.broadcast %697 : vector<32x1xf32> to vector<32x64xf32>
    %700 = vector.broadcast %698 : vector<1x64xf32> to vector<32x64xf32>
    %701 = arith.mulf %699, %700 : vector<32x64xf32>
    %702 = vector.extract_strided_slice %693 {offsets = [0, 1], sizes = [32, 1], strides = [1, 1]} : vector<32x2xf32> to vector<32x1xf32>
    %703 = vector.extract_strided_slice %632 {offsets = [1, 0], sizes = [1, 64], strides = [1, 1]} : vector<2x64xf32> to vector<1x64xf32>
    %704 = vector.broadcast %702 : vector<32x1xf32> to vector<32x64xf32>
    %705 = vector.broadcast %703 : vector<1x64xf32> to vector<32x64xf32>
    %706 = arith.mulf %704, %705 : vector<32x64xf32>
    %707 = arith.addf %701, %706 : vector<32x64xf32>
    %708 = arith.mulf %477, %707 : vector<32x64xf32>
    %cst_209 = arith.constant dense<0.000000e+00> : vector<32x2xf32>
    %709 = tpu.matmul %708, %634, %cst_209 {dimension_numbers = #tpu.dot_dimension_numbers<[1], [0], [0], [1], [0, 0, 1, 1], [], []>} : vector<32x64xf32>, vector<64x2xf32>, vector<32x2xf32> -> vector<32x2xf32>
    %cst_210 = arith.constant 1.000000e-01 : f32
    %710 = vector.broadcast %cst_210 : f32 to vector<32x2xf32>
    %711 = arith.mulf %710, %709 : vector<32x2xf32>
    %cst_211 = arith.constant dense<0.000000e+00> : vector<32x2xf32>
    %712 = tpu.matmul %708, %636, %cst_211 {dimension_numbers = #tpu.dot_dimension_numbers<[1], [0], [0], [1], [0, 0, 1, 1], [], []>} : vector<32x64xf32>, vector<64x2xf32>, vector<32x2xf32> -> vector<32x2xf32>
    %cst_212 = arith.constant 1.000000e-01 : f32
    %713 = vector.broadcast %cst_212 : f32 to vector<32x2xf32>
    %714 = arith.mulf %713, %712 : vector<32x2xf32>
    %715 = arith.mulf %495, %711 : vector<32x2xf32>
    %716 = arith.subf %696, %714 : vector<32x2xf32>
    %717 = arith.mulf %498, %716 : vector<32x2xf32>
    %718 = arith.mulf %434, %715 : vector<32x2xf32>
    %719 = arith.subf %717, %718 : vector<32x2xf32>
    %c2_213 = arith.constant 2 : index
    %c0_214 = arith.constant 0 : index
    %c0_215 = arith.constant 0 : index
    %720 = vector.load %arg10[%c2_213, %c0_214, %c0_215] : memref<4x2x64xf32, #tpu.memory_space<vmem>>, vector<1x2x64xf32>
    %721 = vector.shape_cast %720 : vector<1x2x64xf32> to vector<2x64xf32>
    %c2_216 = arith.constant 2 : index
    %c0_217 = arith.constant 0 : index
    %c0_218 = arith.constant 0 : index
    %722 = vector.load %arg12[%c2_216, %c0_217, %c0_218] : memref<4x64x2xf32, #tpu.memory_space<vmem>>, vector<1x64x2xf32>
    %723 = vector.shape_cast %722 : vector<1x64x2xf32> to vector<64x2xf32>
    %c2_219 = arith.constant 2 : index
    %c0_220 = arith.constant 0 : index
    %c0_221 = arith.constant 0 : index
    %724 = vector.load %arg14[%c2_219, %c0_220, %c0_221] : memref<4x64x2xf32, #tpu.memory_space<vmem>>, vector<1x64x2xf32>
    %725 = vector.shape_cast %724 : vector<1x64x2xf32> to vector<64x2xf32>
    %c2_222 = arith.constant 2 : index
    %c0_223 = arith.constant 0 : index
    %c0_224 = arith.constant 0 : index
    %726 = vector.load %arg4[%c2_222, %c0_223, %c0_224] : memref<4x4x2xf32, #tpu.memory_space<vmem>>, vector<1x4x2xf32>
    %727 = vector.shape_cast %726 : vector<1x4x2xf32> to vector<4x2xf32>
    %c2_225 = arith.constant 2 : index
    %c0_226 = arith.constant 0 : index
    %c0_227 = arith.constant 0 : index
    %728 = vector.load %arg5[%c2_225, %c0_226, %c0_227] : memref<4x4x2xf32, #tpu.memory_space<vmem>>, vector<1x4x2xf32>
    %729 = vector.shape_cast %728 : vector<1x4x2xf32> to vector<4x2xf32>
    %730 = vector.extract_strided_slice %727 {offsets = [0, 0], sizes = [2, 2], strides = [1, 1]} : vector<4x2xf32> to vector<2x2xf32>
    %731 = vector.extract_strided_slice %693 {offsets = [0, 0], sizes = [32, 1], strides = [1, 1]} : vector<32x2xf32> to vector<32x1xf32>
    %732 = vector.extract_strided_slice %730 {offsets = [0, 0], sizes = [1, 2], strides = [1, 1]} : vector<2x2xf32> to vector<1x2xf32>
    %733 = vector.broadcast %731 : vector<32x1xf32> to vector<32x2xf32>
    %734 = vector.broadcast %732 : vector<1x2xf32> to vector<32x2xf32>
    %735 = arith.mulf %733, %734 : vector<32x2xf32>
    %736 = vector.extract_strided_slice %693 {offsets = [0, 1], sizes = [32, 1], strides = [1, 1]} : vector<32x2xf32> to vector<32x1xf32>
    %737 = vector.extract_strided_slice %730 {offsets = [1, 0], sizes = [1, 2], strides = [1, 1]} : vector<2x2xf32> to vector<1x2xf32>
    %738 = vector.broadcast %736 : vector<32x1xf32> to vector<32x2xf32>
    %739 = vector.broadcast %737 : vector<1x2xf32> to vector<32x2xf32>
    %740 = arith.mulf %738, %739 : vector<32x2xf32>
    %741 = arith.addf %735, %740 : vector<32x2xf32>
    %742 = vector.extract_strided_slice %727 {offsets = [2, 0], sizes = [2, 2], strides = [1, 1]} : vector<4x2xf32> to vector<2x2xf32>
    %743 = vector.extract_strided_slice %719 {offsets = [0, 0], sizes = [32, 1], strides = [1, 1]} : vector<32x2xf32> to vector<32x1xf32>
    %744 = vector.extract_strided_slice %742 {offsets = [0, 0], sizes = [1, 2], strides = [1, 1]} : vector<2x2xf32> to vector<1x2xf32>
    %745 = vector.broadcast %743 : vector<32x1xf32> to vector<32x2xf32>
    %746 = vector.broadcast %744 : vector<1x2xf32> to vector<32x2xf32>
    %747 = arith.mulf %745, %746 : vector<32x2xf32>
    %748 = vector.extract_strided_slice %719 {offsets = [0, 1], sizes = [32, 1], strides = [1, 1]} : vector<32x2xf32> to vector<32x1xf32>
    %749 = vector.extract_strided_slice %742 {offsets = [1, 0], sizes = [1, 2], strides = [1, 1]} : vector<2x2xf32> to vector<1x2xf32>
    %750 = vector.broadcast %748 : vector<32x1xf32> to vector<32x2xf32>
    %751 = vector.broadcast %749 : vector<1x2xf32> to vector<32x2xf32>
    %752 = arith.mulf %750, %751 : vector<32x2xf32>
    %753 = arith.addf %747, %752 : vector<32x2xf32>
    %754 = arith.addf %741, %753 : vector<32x2xf32>
    %755 = vector.extract_strided_slice %729 {offsets = [0, 0], sizes = [2, 2], strides = [1, 1]} : vector<4x2xf32> to vector<2x2xf32>
    %756 = vector.extract_strided_slice %693 {offsets = [0, 0], sizes = [32, 1], strides = [1, 1]} : vector<32x2xf32> to vector<32x1xf32>
    %757 = vector.extract_strided_slice %755 {offsets = [0, 0], sizes = [1, 2], strides = [1, 1]} : vector<2x2xf32> to vector<1x2xf32>
    %758 = vector.broadcast %756 : vector<32x1xf32> to vector<32x2xf32>
    %759 = vector.broadcast %757 : vector<1x2xf32> to vector<32x2xf32>
    %760 = arith.mulf %758, %759 : vector<32x2xf32>
    %761 = vector.extract_strided_slice %693 {offsets = [0, 1], sizes = [32, 1], strides = [1, 1]} : vector<32x2xf32> to vector<32x1xf32>
    %762 = vector.extract_strided_slice %755 {offsets = [1, 0], sizes = [1, 2], strides = [1, 1]} : vector<2x2xf32> to vector<1x2xf32>
    %763 = vector.broadcast %761 : vector<32x1xf32> to vector<32x2xf32>
    %764 = vector.broadcast %762 : vector<1x2xf32> to vector<32x2xf32>
    %765 = arith.mulf %763, %764 : vector<32x2xf32>
    %766 = arith.addf %760, %765 : vector<32x2xf32>
    %767 = vector.extract_strided_slice %729 {offsets = [2, 0], sizes = [2, 2], strides = [1, 1]} : vector<4x2xf32> to vector<2x2xf32>
    %768 = vector.extract_strided_slice %719 {offsets = [0, 0], sizes = [32, 1], strides = [1, 1]} : vector<32x2xf32> to vector<32x1xf32>
    %769 = vector.extract_strided_slice %767 {offsets = [0, 0], sizes = [1, 2], strides = [1, 1]} : vector<2x2xf32> to vector<1x2xf32>
    %770 = vector.broadcast %768 : vector<32x1xf32> to vector<32x2xf32>
    %771 = vector.broadcast %769 : vector<1x2xf32> to vector<32x2xf32>
    %772 = arith.mulf %770, %771 : vector<32x2xf32>
    %773 = vector.extract_strided_slice %719 {offsets = [0, 1], sizes = [32, 1], strides = [1, 1]} : vector<32x2xf32> to vector<32x1xf32>
    %774 = vector.extract_strided_slice %767 {offsets = [1, 0], sizes = [1, 2], strides = [1, 1]} : vector<2x2xf32> to vector<1x2xf32>
    %775 = vector.broadcast %773 : vector<32x1xf32> to vector<32x2xf32>
    %776 = vector.broadcast %774 : vector<1x2xf32> to vector<32x2xf32>
    %777 = arith.mulf %775, %776 : vector<32x2xf32>
    %778 = arith.addf %772, %777 : vector<32x2xf32>
    %779 = arith.addf %766, %778 : vector<32x2xf32>
    %780 = vector.extract_strided_slice %31 {offsets = [2, 0], sizes = [1, 2], strides = [1, 1]} : vector<4x2xf32> to vector<1x2xf32>
    %781 = vector.broadcast %780 : vector<1x2xf32> to vector<32x2xf32>
    %782 = arith.mulf %754, %781 : vector<32x2xf32>
    %783 = vector.extract_strided_slice %33 {offsets = [2, 0], sizes = [1, 2], strides = [1, 1]} : vector<4x2xf32> to vector<1x2xf32>
    %784 = vector.broadcast %783 : vector<1x2xf32> to vector<32x2xf32>
    %785 = arith.mulf %779, %784 : vector<32x2xf32>
    %786 = vector.extract_strided_slice %782 {offsets = [0, 0], sizes = [32, 1], strides = [1, 1]} : vector<32x2xf32> to vector<32x1xf32>
    %787 = vector.extract_strided_slice %721 {offsets = [0, 0], sizes = [1, 64], strides = [1, 1]} : vector<2x64xf32> to vector<1x64xf32>
    %788 = vector.broadcast %786 : vector<32x1xf32> to vector<32x64xf32>
    %789 = vector.broadcast %787 : vector<1x64xf32> to vector<32x64xf32>
    %790 = arith.mulf %788, %789 : vector<32x64xf32>
    %791 = vector.extract_strided_slice %782 {offsets = [0, 1], sizes = [32, 1], strides = [1, 1]} : vector<32x2xf32> to vector<32x1xf32>
    %792 = vector.extract_strided_slice %721 {offsets = [1, 0], sizes = [1, 64], strides = [1, 1]} : vector<2x64xf32> to vector<1x64xf32>
    %793 = vector.broadcast %791 : vector<32x1xf32> to vector<32x64xf32>
    %794 = vector.broadcast %792 : vector<1x64xf32> to vector<32x64xf32>
    %795 = arith.mulf %793, %794 : vector<32x64xf32>
    %796 = arith.addf %790, %795 : vector<32x64xf32>
    %797 = arith.mulf %345, %796 : vector<32x64xf32>
    %cst_228 = arith.constant dense<0.000000e+00> : vector<32x2xf32>
    %798 = tpu.matmul %797, %723, %cst_228 {dimension_numbers = #tpu.dot_dimension_numbers<[1], [0], [0], [1], [0, 0, 1, 1], [], []>} : vector<32x64xf32>, vector<64x2xf32>, vector<32x2xf32> -> vector<32x2xf32>
    %cst_229 = arith.constant 1.000000e-01 : f32
    %799 = vector.broadcast %cst_229 : f32 to vector<32x2xf32>
    %800 = arith.mulf %799, %798 : vector<32x2xf32>
    %cst_230 = arith.constant dense<0.000000e+00> : vector<32x2xf32>
    %801 = tpu.matmul %797, %725, %cst_230 {dimension_numbers = #tpu.dot_dimension_numbers<[1], [0], [0], [1], [0, 0, 1, 1], [], []>} : vector<32x64xf32>, vector<64x2xf32>, vector<32x2xf32> -> vector<32x2xf32>
    %cst_231 = arith.constant 1.000000e-01 : f32
    %802 = vector.broadcast %cst_231 : f32 to vector<32x2xf32>
    %803 = arith.mulf %802, %801 : vector<32x2xf32>
    %804 = arith.mulf %363, %800 : vector<32x2xf32>
    %805 = arith.subf %785, %803 : vector<32x2xf32>
    %806 = arith.mulf %366, %805 : vector<32x2xf32>
    %807 = arith.mulf %302, %804 : vector<32x2xf32>
    %808 = arith.subf %806, %807 : vector<32x2xf32>
    %c1_232 = arith.constant 1 : index
    %c0_233 = arith.constant 0 : index
    %c0_234 = arith.constant 0 : index
    %809 = vector.load %arg10[%c1_232, %c0_233, %c0_234] : memref<4x2x64xf32, #tpu.memory_space<vmem>>, vector<1x2x64xf32>
    %810 = vector.shape_cast %809 : vector<1x2x64xf32> to vector<2x64xf32>
    %c1_235 = arith.constant 1 : index
    %c0_236 = arith.constant 0 : index
    %c0_237 = arith.constant 0 : index
    %811 = vector.load %arg12[%c1_235, %c0_236, %c0_237] : memref<4x64x2xf32, #tpu.memory_space<vmem>>, vector<1x64x2xf32>
    %812 = vector.shape_cast %811 : vector<1x64x2xf32> to vector<64x2xf32>
    %c1_238 = arith.constant 1 : index
    %c0_239 = arith.constant 0 : index
    %c0_240 = arith.constant 0 : index
    %813 = vector.load %arg14[%c1_238, %c0_239, %c0_240] : memref<4x64x2xf32, #tpu.memory_space<vmem>>, vector<1x64x2xf32>
    %814 = vector.shape_cast %813 : vector<1x64x2xf32> to vector<64x2xf32>
    %c1_241 = arith.constant 1 : index
    %c0_242 = arith.constant 0 : index
    %c0_243 = arith.constant 0 : index
    %815 = vector.load %arg4[%c1_241, %c0_242, %c0_243] : memref<4x4x2xf32, #tpu.memory_space<vmem>>, vector<1x4x2xf32>
    %816 = vector.shape_cast %815 : vector<1x4x2xf32> to vector<4x2xf32>
    %c1_244 = arith.constant 1 : index
    %c0_245 = arith.constant 0 : index
    %c0_246 = arith.constant 0 : index
    %817 = vector.load %arg5[%c1_244, %c0_245, %c0_246] : memref<4x4x2xf32, #tpu.memory_space<vmem>>, vector<1x4x2xf32>
    %818 = vector.shape_cast %817 : vector<1x4x2xf32> to vector<4x2xf32>
    %819 = vector.extract_strided_slice %816 {offsets = [0, 0], sizes = [2, 2], strides = [1, 1]} : vector<4x2xf32> to vector<2x2xf32>
    %820 = vector.extract_strided_slice %782 {offsets = [0, 0], sizes = [32, 1], strides = [1, 1]} : vector<32x2xf32> to vector<32x1xf32>
    %821 = vector.extract_strided_slice %819 {offsets = [0, 0], sizes = [1, 2], strides = [1, 1]} : vector<2x2xf32> to vector<1x2xf32>
    %822 = vector.broadcast %820 : vector<32x1xf32> to vector<32x2xf32>
    %823 = vector.broadcast %821 : vector<1x2xf32> to vector<32x2xf32>
    %824 = arith.mulf %822, %823 : vector<32x2xf32>
    %825 = vector.extract_strided_slice %782 {offsets = [0, 1], sizes = [32, 1], strides = [1, 1]} : vector<32x2xf32> to vector<32x1xf32>
    %826 = vector.extract_strided_slice %819 {offsets = [1, 0], sizes = [1, 2], strides = [1, 1]} : vector<2x2xf32> to vector<1x2xf32>
    %827 = vector.broadcast %825 : vector<32x1xf32> to vector<32x2xf32>
    %828 = vector.broadcast %826 : vector<1x2xf32> to vector<32x2xf32>
    %829 = arith.mulf %827, %828 : vector<32x2xf32>
    %830 = arith.addf %824, %829 : vector<32x2xf32>
    %831 = vector.extract_strided_slice %816 {offsets = [2, 0], sizes = [2, 2], strides = [1, 1]} : vector<4x2xf32> to vector<2x2xf32>
    %832 = vector.extract_strided_slice %808 {offsets = [0, 0], sizes = [32, 1], strides = [1, 1]} : vector<32x2xf32> to vector<32x1xf32>
    %833 = vector.extract_strided_slice %831 {offsets = [0, 0], sizes = [1, 2], strides = [1, 1]} : vector<2x2xf32> to vector<1x2xf32>
    %834 = vector.broadcast %832 : vector<32x1xf32> to vector<32x2xf32>
    %835 = vector.broadcast %833 : vector<1x2xf32> to vector<32x2xf32>
    %836 = arith.mulf %834, %835 : vector<32x2xf32>
    %837 = vector.extract_strided_slice %808 {offsets = [0, 1], sizes = [32, 1], strides = [1, 1]} : vector<32x2xf32> to vector<32x1xf32>
    %838 = vector.extract_strided_slice %831 {offsets = [1, 0], sizes = [1, 2], strides = [1, 1]} : vector<2x2xf32> to vector<1x2xf32>
    %839 = vector.broadcast %837 : vector<32x1xf32> to vector<32x2xf32>
    %840 = vector.broadcast %838 : vector<1x2xf32> to vector<32x2xf32>
    %841 = arith.mulf %839, %840 : vector<32x2xf32>
    %842 = arith.addf %836, %841 : vector<32x2xf32>
    %843 = arith.addf %830, %842 : vector<32x2xf32>
    %844 = vector.extract_strided_slice %818 {offsets = [0, 0], sizes = [2, 2], strides = [1, 1]} : vector<4x2xf32> to vector<2x2xf32>
    %845 = vector.extract_strided_slice %782 {offsets = [0, 0], sizes = [32, 1], strides = [1, 1]} : vector<32x2xf32> to vector<32x1xf32>
    %846 = vector.extract_strided_slice %844 {offsets = [0, 0], sizes = [1, 2], strides = [1, 1]} : vector<2x2xf32> to vector<1x2xf32>
    %847 = vector.broadcast %845 : vector<32x1xf32> to vector<32x2xf32>
    %848 = vector.broadcast %846 : vector<1x2xf32> to vector<32x2xf32>
    %849 = arith.mulf %847, %848 : vector<32x2xf32>
    %850 = vector.extract_strided_slice %782 {offsets = [0, 1], sizes = [32, 1], strides = [1, 1]} : vector<32x2xf32> to vector<32x1xf32>
    %851 = vector.extract_strided_slice %844 {offsets = [1, 0], sizes = [1, 2], strides = [1, 1]} : vector<2x2xf32> to vector<1x2xf32>
    %852 = vector.broadcast %850 : vector<32x1xf32> to vector<32x2xf32>
    %853 = vector.broadcast %851 : vector<1x2xf32> to vector<32x2xf32>
    %854 = arith.mulf %852, %853 : vector<32x2xf32>
    %855 = arith.addf %849, %854 : vector<32x2xf32>
    %856 = vector.extract_strided_slice %818 {offsets = [2, 0], sizes = [2, 2], strides = [1, 1]} : vector<4x2xf32> to vector<2x2xf32>
    %857 = vector.extract_strided_slice %808 {offsets = [0, 0], sizes = [32, 1], strides = [1, 1]} : vector<32x2xf32> to vector<32x1xf32>
    %858 = vector.extract_strided_slice %856 {offsets = [0, 0], sizes = [1, 2], strides = [1, 1]} : vector<2x2xf32> to vector<1x2xf32>
    %859 = vector.broadcast %857 : vector<32x1xf32> to vector<32x2xf32>
    %860 = vector.broadcast %858 : vector<1x2xf32> to vector<32x2xf32>
    %861 = arith.mulf %859, %860 : vector<32x2xf32>
    %862 = vector.extract_strided_slice %808 {offsets = [0, 1], sizes = [32, 1], strides = [1, 1]} : vector<32x2xf32> to vector<32x1xf32>
    %863 = vector.extract_strided_slice %856 {offsets = [1, 0], sizes = [1, 2], strides = [1, 1]} : vector<2x2xf32> to vector<1x2xf32>
    %864 = vector.broadcast %862 : vector<32x1xf32> to vector<32x2xf32>
    %865 = vector.broadcast %863 : vector<1x2xf32> to vector<32x2xf32>
    %866 = arith.mulf %864, %865 : vector<32x2xf32>
    %867 = arith.addf %861, %866 : vector<32x2xf32>
    %868 = arith.addf %855, %867 : vector<32x2xf32>
    %869 = vector.extract_strided_slice %31 {offsets = [1, 0], sizes = [1, 2], strides = [1, 1]} : vector<4x2xf32> to vector<1x2xf32>
    %870 = vector.broadcast %869 : vector<1x2xf32> to vector<32x2xf32>
    %871 = arith.mulf %843, %870 : vector<32x2xf32>
    %872 = vector.extract_strided_slice %33 {offsets = [1, 0], sizes = [1, 2], strides = [1, 1]} : vector<4x2xf32> to vector<1x2xf32>
    %873 = vector.broadcast %872 : vector<1x2xf32> to vector<32x2xf32>
    %874 = arith.mulf %868, %873 : vector<32x2xf32>
    %875 = vector.extract_strided_slice %871 {offsets = [0, 0], sizes = [32, 1], strides = [1, 1]} : vector<32x2xf32> to vector<32x1xf32>
    %876 = vector.extract_strided_slice %810 {offsets = [0, 0], sizes = [1, 64], strides = [1, 1]} : vector<2x64xf32> to vector<1x64xf32>
    %877 = vector.broadcast %875 : vector<32x1xf32> to vector<32x64xf32>
    %878 = vector.broadcast %876 : vector<1x64xf32> to vector<32x64xf32>
    %879 = arith.mulf %877, %878 : vector<32x64xf32>
    %880 = vector.extract_strided_slice %871 {offsets = [0, 1], sizes = [32, 1], strides = [1, 1]} : vector<32x2xf32> to vector<32x1xf32>
    %881 = vector.extract_strided_slice %810 {offsets = [1, 0], sizes = [1, 64], strides = [1, 1]} : vector<2x64xf32> to vector<1x64xf32>
    %882 = vector.broadcast %880 : vector<32x1xf32> to vector<32x64xf32>
    %883 = vector.broadcast %881 : vector<1x64xf32> to vector<32x64xf32>
    %884 = arith.mulf %882, %883 : vector<32x64xf32>
    %885 = arith.addf %879, %884 : vector<32x64xf32>
    %886 = arith.mulf %213, %885 : vector<32x64xf32>
    %cst_247 = arith.constant dense<0.000000e+00> : vector<32x2xf32>
    %887 = tpu.matmul %886, %812, %cst_247 {dimension_numbers = #tpu.dot_dimension_numbers<[1], [0], [0], [1], [0, 0, 1, 1], [], []>} : vector<32x64xf32>, vector<64x2xf32>, vector<32x2xf32> -> vector<32x2xf32>
    %cst_248 = arith.constant 1.000000e-01 : f32
    %888 = vector.broadcast %cst_248 : f32 to vector<32x2xf32>
    %889 = arith.mulf %888, %887 : vector<32x2xf32>
    %cst_249 = arith.constant dense<0.000000e+00> : vector<32x2xf32>
    %890 = tpu.matmul %886, %814, %cst_249 {dimension_numbers = #tpu.dot_dimension_numbers<[1], [0], [0], [1], [0, 0, 1, 1], [], []>} : vector<32x64xf32>, vector<64x2xf32>, vector<32x2xf32> -> vector<32x2xf32>
    %cst_250 = arith.constant 1.000000e-01 : f32
    %891 = vector.broadcast %cst_250 : f32 to vector<32x2xf32>
    %892 = arith.mulf %891, %890 : vector<32x2xf32>
    %893 = arith.mulf %231, %889 : vector<32x2xf32>
    %894 = arith.subf %874, %892 : vector<32x2xf32>
    %895 = arith.mulf %234, %894 : vector<32x2xf32>
    %896 = arith.mulf %170, %893 : vector<32x2xf32>
    %897 = arith.subf %895, %896 : vector<32x2xf32>
    %c0_251 = arith.constant 0 : index
    %c0_252 = arith.constant 0 : index
    %c0_253 = arith.constant 0 : index
    %898 = vector.load %arg10[%c0_251, %c0_252, %c0_253] : memref<4x2x64xf32, #tpu.memory_space<vmem>>, vector<1x2x64xf32>
    %899 = vector.shape_cast %898 : vector<1x2x64xf32> to vector<2x64xf32>
    %c0_254 = arith.constant 0 : index
    %c0_255 = arith.constant 0 : index
    %c0_256 = arith.constant 0 : index
    %900 = vector.load %arg12[%c0_254, %c0_255, %c0_256] : memref<4x64x2xf32, #tpu.memory_space<vmem>>, vector<1x64x2xf32>
    %901 = vector.shape_cast %900 : vector<1x64x2xf32> to vector<64x2xf32>
    %c0_257 = arith.constant 0 : index
    %c0_258 = arith.constant 0 : index
    %c0_259 = arith.constant 0 : index
    %902 = vector.load %arg14[%c0_257, %c0_258, %c0_259] : memref<4x64x2xf32, #tpu.memory_space<vmem>>, vector<1x64x2xf32>
    %903 = vector.shape_cast %902 : vector<1x64x2xf32> to vector<64x2xf32>
    %c0_260 = arith.constant 0 : index
    %c0_261 = arith.constant 0 : index
    %c0_262 = arith.constant 0 : index
    %904 = vector.load %arg4[%c0_260, %c0_261, %c0_262] : memref<4x4x2xf32, #tpu.memory_space<vmem>>, vector<1x4x2xf32>
    %905 = vector.shape_cast %904 : vector<1x4x2xf32> to vector<4x2xf32>
    %c0_263 = arith.constant 0 : index
    %c0_264 = arith.constant 0 : index
    %c0_265 = arith.constant 0 : index
    %906 = vector.load %arg5[%c0_263, %c0_264, %c0_265] : memref<4x4x2xf32, #tpu.memory_space<vmem>>, vector<1x4x2xf32>
    %907 = vector.shape_cast %906 : vector<1x4x2xf32> to vector<4x2xf32>
    %908 = vector.extract_strided_slice %905 {offsets = [0, 0], sizes = [2, 2], strides = [1, 1]} : vector<4x2xf32> to vector<2x2xf32>
    %909 = vector.extract_strided_slice %871 {offsets = [0, 0], sizes = [32, 1], strides = [1, 1]} : vector<32x2xf32> to vector<32x1xf32>
    %910 = vector.extract_strided_slice %908 {offsets = [0, 0], sizes = [1, 2], strides = [1, 1]} : vector<2x2xf32> to vector<1x2xf32>
    %911 = vector.broadcast %909 : vector<32x1xf32> to vector<32x2xf32>
    %912 = vector.broadcast %910 : vector<1x2xf32> to vector<32x2xf32>
    %913 = arith.mulf %911, %912 : vector<32x2xf32>
    %914 = vector.extract_strided_slice %871 {offsets = [0, 1], sizes = [32, 1], strides = [1, 1]} : vector<32x2xf32> to vector<32x1xf32>
    %915 = vector.extract_strided_slice %908 {offsets = [1, 0], sizes = [1, 2], strides = [1, 1]} : vector<2x2xf32> to vector<1x2xf32>
    %916 = vector.broadcast %914 : vector<32x1xf32> to vector<32x2xf32>
    %917 = vector.broadcast %915 : vector<1x2xf32> to vector<32x2xf32>
    %918 = arith.mulf %916, %917 : vector<32x2xf32>
    %919 = arith.addf %913, %918 : vector<32x2xf32>
    %920 = vector.extract_strided_slice %905 {offsets = [2, 0], sizes = [2, 2], strides = [1, 1]} : vector<4x2xf32> to vector<2x2xf32>
    %921 = vector.extract_strided_slice %897 {offsets = [0, 0], sizes = [32, 1], strides = [1, 1]} : vector<32x2xf32> to vector<32x1xf32>
    %922 = vector.extract_strided_slice %920 {offsets = [0, 0], sizes = [1, 2], strides = [1, 1]} : vector<2x2xf32> to vector<1x2xf32>
    %923 = vector.broadcast %921 : vector<32x1xf32> to vector<32x2xf32>
    %924 = vector.broadcast %922 : vector<1x2xf32> to vector<32x2xf32>
    %925 = arith.mulf %923, %924 : vector<32x2xf32>
    %926 = vector.extract_strided_slice %897 {offsets = [0, 1], sizes = [32, 1], strides = [1, 1]} : vector<32x2xf32> to vector<32x1xf32>
    %927 = vector.extract_strided_slice %920 {offsets = [1, 0], sizes = [1, 2], strides = [1, 1]} : vector<2x2xf32> to vector<1x2xf32>
    %928 = vector.broadcast %926 : vector<32x1xf32> to vector<32x2xf32>
    %929 = vector.broadcast %927 : vector<1x2xf32> to vector<32x2xf32>
    %930 = arith.mulf %928, %929 : vector<32x2xf32>
    %931 = arith.addf %925, %930 : vector<32x2xf32>
    %932 = arith.addf %919, %931 : vector<32x2xf32>
    %933 = vector.extract_strided_slice %907 {offsets = [0, 0], sizes = [2, 2], strides = [1, 1]} : vector<4x2xf32> to vector<2x2xf32>
    %934 = vector.extract_strided_slice %871 {offsets = [0, 0], sizes = [32, 1], strides = [1, 1]} : vector<32x2xf32> to vector<32x1xf32>
    %935 = vector.extract_strided_slice %933 {offsets = [0, 0], sizes = [1, 2], strides = [1, 1]} : vector<2x2xf32> to vector<1x2xf32>
    %936 = vector.broadcast %934 : vector<32x1xf32> to vector<32x2xf32>
    %937 = vector.broadcast %935 : vector<1x2xf32> to vector<32x2xf32>
    %938 = arith.mulf %936, %937 : vector<32x2xf32>
    %939 = vector.extract_strided_slice %871 {offsets = [0, 1], sizes = [32, 1], strides = [1, 1]} : vector<32x2xf32> to vector<32x1xf32>
    %940 = vector.extract_strided_slice %933 {offsets = [1, 0], sizes = [1, 2], strides = [1, 1]} : vector<2x2xf32> to vector<1x2xf32>
    %941 = vector.broadcast %939 : vector<32x1xf32> to vector<32x2xf32>
    %942 = vector.broadcast %940 : vector<1x2xf32> to vector<32x2xf32>
    %943 = arith.mulf %941, %942 : vector<32x2xf32>
    %944 = arith.addf %938, %943 : vector<32x2xf32>
    %945 = vector.extract_strided_slice %907 {offsets = [2, 0], sizes = [2, 2], strides = [1, 1]} : vector<4x2xf32> to vector<2x2xf32>
    %946 = vector.extract_strided_slice %897 {offsets = [0, 0], sizes = [32, 1], strides = [1, 1]} : vector<32x2xf32> to vector<32x1xf32>
    %947 = vector.extract_strided_slice %945 {offsets = [0, 0], sizes = [1, 2], strides = [1, 1]} : vector<2x2xf32> to vector<1x2xf32>
    %948 = vector.broadcast %946 : vector<32x1xf32> to vector<32x2xf32>
    %949 = vector.broadcast %947 : vector<1x2xf32> to vector<32x2xf32>
    %950 = arith.mulf %948, %949 : vector<32x2xf32>
    %951 = vector.extract_strided_slice %897 {offsets = [0, 1], sizes = [32, 1], strides = [1, 1]} : vector<32x2xf32> to vector<32x1xf32>
    %952 = vector.extract_strided_slice %945 {offsets = [1, 0], sizes = [1, 2], strides = [1, 1]} : vector<2x2xf32> to vector<1x2xf32>
    %953 = vector.broadcast %951 : vector<32x1xf32> to vector<32x2xf32>
    %954 = vector.broadcast %952 : vector<1x2xf32> to vector<32x2xf32>
    %955 = arith.mulf %953, %954 : vector<32x2xf32>
    %956 = arith.addf %950, %955 : vector<32x2xf32>
    %957 = arith.addf %944, %956 : vector<32x2xf32>
    %958 = vector.extract_strided_slice %31 {offsets = [0, 0], sizes = [1, 2], strides = [1, 1]} : vector<4x2xf32> to vector<1x2xf32>
    %959 = vector.broadcast %958 : vector<1x2xf32> to vector<32x2xf32>
    %960 = arith.mulf %932, %959 : vector<32x2xf32>
    %961 = vector.extract_strided_slice %33 {offsets = [0, 0], sizes = [1, 2], strides = [1, 1]} : vector<4x2xf32> to vector<1x2xf32>
    %962 = vector.broadcast %961 : vector<1x2xf32> to vector<32x2xf32>
    %963 = arith.mulf %957, %962 : vector<32x2xf32>
    %964 = vector.extract_strided_slice %960 {offsets = [0, 0], sizes = [32, 1], strides = [1, 1]} : vector<32x2xf32> to vector<32x1xf32>
    %965 = vector.extract_strided_slice %899 {offsets = [0, 0], sizes = [1, 64], strides = [1, 1]} : vector<2x64xf32> to vector<1x64xf32>
    %966 = vector.broadcast %964 : vector<32x1xf32> to vector<32x64xf32>
    %967 = vector.broadcast %965 : vector<1x64xf32> to vector<32x64xf32>
    %968 = arith.mulf %966, %967 : vector<32x64xf32>
    %969 = vector.extract_strided_slice %960 {offsets = [0, 1], sizes = [32, 1], strides = [1, 1]} : vector<32x2xf32> to vector<32x1xf32>
    %970 = vector.extract_strided_slice %899 {offsets = [1, 0], sizes = [1, 64], strides = [1, 1]} : vector<2x64xf32> to vector<1x64xf32>
    %971 = vector.broadcast %969 : vector<32x1xf32> to vector<32x64xf32>
    %972 = vector.broadcast %970 : vector<1x64xf32> to vector<32x64xf32>
    %973 = arith.mulf %971, %972 : vector<32x64xf32>
    %974 = arith.addf %968, %973 : vector<32x64xf32>
    %975 = arith.mulf %81, %974 : vector<32x64xf32>
    %cst_266 = arith.constant dense<0.000000e+00> : vector<32x2xf32>
    %976 = tpu.matmul %975, %901, %cst_266 {dimension_numbers = #tpu.dot_dimension_numbers<[1], [0], [0], [1], [0, 0, 1, 1], [], []>} : vector<32x64xf32>, vector<64x2xf32>, vector<32x2xf32> -> vector<32x2xf32>
    %cst_267 = arith.constant 1.000000e-01 : f32
    %977 = vector.broadcast %cst_267 : f32 to vector<32x2xf32>
    %978 = arith.mulf %977, %976 : vector<32x2xf32>
    %cst_268 = arith.constant dense<0.000000e+00> : vector<32x2xf32>
    %979 = tpu.matmul %975, %903, %cst_268 {dimension_numbers = #tpu.dot_dimension_numbers<[1], [0], [0], [1], [0, 0, 1, 1], [], []>} : vector<32x64xf32>, vector<64x2xf32>, vector<32x2xf32> -> vector<32x2xf32>
    %cst_269 = arith.constant 1.000000e-01 : f32
    %980 = vector.broadcast %cst_269 : f32 to vector<32x2xf32>
    %981 = arith.mulf %980, %979 : vector<32x2xf32>
    %982 = arith.mulf %99, %978 : vector<32x2xf32>
    %983 = arith.subf %963, %981 : vector<32x2xf32>
    %984 = arith.mulf %102, %983 : vector<32x2xf32>
    %985 = arith.mulf %38, %982 : vector<32x2xf32>
    %986 = arith.subf %984, %985 : vector<32x2xf32>
    %987 = tpu.concatenate %960, %986 in 1 : vector<32x2xf32>, vector<32x2xf32> -> vector<32x4xf32>
    %c0_270 = arith.constant 0 : index
    %c0_271 = arith.constant 0 : index
    %988 = vector.load %arg24[%c0_270, %c0_271] : memref<32x4xf32, #tpu.memory_space<vmem>>, vector<32x4xf32>
    tpu.vector_store %arg24[%c0_270, %c0_271], %987 {strides = array<i32>} : memref<32x4xf32, #tpu.memory_space<vmem>>, vector<32x4xf32>,
    return
  }
  func.func @transform_0(%arg0: i32) -> (i32, i32) {
    %c0_i32 = arith.constant 0 : i32
    %c0_i32_0 = arith.constant 0 : i32
    return %arg0, %c0_i32 : i32, i32
  }
  func.func @transform_1(%arg0: i32) -> (i32, i32, i32) {
    %c0_i32 = arith.constant 0 : i32
    %c0_i32_0 = arith.constant 0 : i32
    %c0_i32_1 = arith.constant 0 : i32
    %c0_i32_2 = arith.constant 0 : i32
    return %c0_i32, %c0_i32_0, %c0_i32_1 : i32, i32, i32
  }
  func.func @transform_2(%arg0: i32) -> (i32, i32, i32) {
    %c0_i32 = arith.constant 0 : i32
    %c0_i32_0 = arith.constant 0 : i32
    %c0_i32_1 = arith.constant 0 : i32
    %c0_i32_2 = arith.constant 0 : i32
    return %c0_i32, %c0_i32_0, %c0_i32_1 : i32, i32, i32
  }
  func.func @transform_3(%arg0: i32) -> (i32, i32, i32) {
    %c0_i32 = arith.constant 0 : i32
    %c0_i32_0 = arith.constant 0 : i32
    %c0_i32_1 = arith.constant 0 : i32
    %c0_i32_2 = arith.constant 0 : i32
    return %c0_i32, %c0_i32_0, %c0_i32_1 : i32, i32, i32
  }
  func.func @transform_4(%arg0: i32) -> (i32, i32, i32) {
    %c0_i32 = arith.constant 0 : i32
    %c0_i32_0 = arith.constant 0 : i32
    %c0_i32_1 = arith.constant 0 : i32
    %c0_i32_2 = arith.constant 0 : i32
    return %c0_i32, %c0_i32_0, %c0_i32_1 : i32, i32, i32
  }
  func.func @transform_5(%arg0: i32) -> (i32, i32) {
    %c0_i32 = arith.constant 0 : i32
    %c0_i32_0 = arith.constant 0 : i32
    %c0_i32_1 = arith.constant 0 : i32
    return %c0_i32, %c0_i32_0 : i32, i32
  }
  func.func @transform_6(%arg0: i32) -> (i32, i32) {
    %c0_i32 = arith.constant 0 : i32
    %c0_i32_0 = arith.constant 0 : i32
    %c0_i32_1 = arith.constant 0 : i32
    return %c0_i32, %c0_i32_0 : i32, i32
  }
  func.func @transform_7(%arg0: i32) -> (i32, i32) {
    %c0_i32 = arith.constant 0 : i32
    %c0_i32_0 = arith.constant 0 : i32
    %c0_i32_1 = arith.constant 0 : i32
    return %c0_i32, %c0_i32_0 : i32, i32
  }
  func.func @transform_8(%arg0: i32) -> (i32, i32) {
    %c0_i32 = arith.constant 0 : i32
    %c0_i32_0 = arith.constant 0 : i32
    %c0_i32_1 = arith.constant 0 : i32
    return %c0_i32, %c0_i32_0 : i32, i32
  }
  func.func @transform_9(%arg0: i32) -> (i32, i32, i32) {
    %c0_i32 = arith.constant 0 : i32
    %c0_i32_0 = arith.constant 0 : i32
    %c0_i32_1 = arith.constant 0 : i32
    %c0_i32_2 = arith.constant 0 : i32
    return %c0_i32, %c0_i32_0, %c0_i32_1 : i32, i32, i32
  }
  func.func @transform_10(%arg0: i32) -> (i32, i32, i32) {
    %c0_i32 = arith.constant 0 : i32
    %c0_i32_0 = arith.constant 0 : i32
    %c0_i32_1 = arith.constant 0 : i32
    %c0_i32_2 = arith.constant 0 : i32
    return %c0_i32, %c0_i32_0, %c0_i32_1 : i32, i32, i32
  }
  func.func @transform_11(%arg0: i32) -> (i32, i32, i32) {
    %c0_i32 = arith.constant 0 : i32
    %c0_i32_0 = arith.constant 0 : i32
    %c0_i32_1 = arith.constant 0 : i32
    %c0_i32_2 = arith.constant 0 : i32
    return %c0_i32, %c0_i32_0, %c0_i32_1 : i32, i32, i32
  }
  func.func @transform_12(%arg0: i32) -> (i32, i32, i32) {
    %c0_i32 = arith.constant 0 : i32
    %c0_i32_0 = arith.constant 0 : i32
    %c0_i32_1 = arith.constant 0 : i32
    %c0_i32_2 = arith.constant 0 : i32
    return %c0_i32, %c0_i32_0, %c0_i32_1 : i32, i32, i32
  }
  func.func @transform_13(%arg0: i32) -> (i32, i32, i32) {
    %c0_i32 = arith.constant 0 : i32
    %c0_i32_0 = arith.constant 0 : i32
    %c0_i32_1 = arith.constant 0 : i32
    %c0_i32_2 = arith.constant 0 : i32
    return %c0_i32, %c0_i32_0, %c0_i32_1 : i32, i32, i32
  }
  func.func @transform_14(%arg0: i32) -> (i32, i32, i32) {
    %c0_i32 = arith.constant 0 : i32
    %c0_i32_0 = arith.constant 0 : i32
    %c0_i32_1 = arith.constant 0 : i32
    %c0_i32_2 = arith.constant 0 : i32
    return %c0_i32, %c0_i32_0, %c0_i32_1 : i32, i32, i32
  }
  func.func @transform_15(%arg0: i32) -> (i32, i32) {
    %c0_i32 = arith.constant 0 : i32
    %c0_i32_0 = arith.constant 0 : i32
    %c0_i32_1 = arith.constant 0 : i32
    return %c0_i32, %c0_i32_0 : i32, i32
  }
  func.func @transform_16(%arg0: i32) -> (i32, i32) {
    %c0_i32 = arith.constant 0 : i32
    %c0_i32_0 = arith.constant 0 : i32
    %c0_i32_1 = arith.constant 0 : i32
    return %c0_i32, %c0_i32_0 : i32, i32
  }
  func.func @transform_17(%arg0: i32) -> (i32, i32) {
    %c0_i32 = arith.constant 0 : i32
    %c0_i32_0 = arith.constant 0 : i32
    %c0_i32_1 = arith.constant 0 : i32
    return %c0_i32, %c0_i32_0 : i32, i32
  }
  func.func @transform_18(%arg0: i32) -> (i32, i32) {
    %c0_i32 = arith.constant 0 : i32
    %c0_i32_0 = arith.constant 0 : i32
    %c0_i32_1 = arith.constant 0 : i32
    return %c0_i32, %c0_i32_0 : i32, i32
  }
  func.func @transform_19(%arg0: i32) -> (i32, i32) {
    %c0_i32 = arith.constant 0 : i32
    %c0_i32_0 = arith.constant 0 : i32
    %c0_i32_1 = arith.constant 0 : i32
    return %c0_i32, %c0_i32_0 : i32, i32
  }
  func.func @transform_20(%arg0: i32) -> (i32, i32) {
    %c0_i32 = arith.constant 0 : i32
    %c0_i32_0 = arith.constant 0 : i32
    %c0_i32_1 = arith.constant 0 : i32
    return %c0_i32, %c0_i32_0 : i32, i32
  }
  func.func @transform_21(%arg0: i32) -> (i32, i32) {
    %c0_i32 = arith.constant 0 : i32
    %c0_i32_0 = arith.constant 0 : i32
    %c0_i32_1 = arith.constant 0 : i32
    return %c0_i32, %c0_i32_0 : i32, i32
  }
  func.func @transform_22(%arg0: i32) -> (i32, i32) {
    %c0_i32 = arith.constant 0 : i32
    %c0_i32_0 = arith.constant 0 : i32
    %c0_i32_1 = arith.constant 0 : i32
    return %c0_i32, %c0_i32_0 : i32, i32
  }
  func.func @transform_23(%arg0: i32) -> (i32, i32) {
    %c0_i32 = arith.constant 0 : i32
    %c0_i32_0 = arith.constant 0 : i32
    return %arg0, %c0_i32 : i32, i32
  }
}

</mosaic_0001>

<bundles_post_ra>
// kernel: tpu_custom_call.1
= control target key start
LH: loop header
LB: loop body
LE: loop exit
PB: predicated region body
PF: predicated region fallthrough
CT: control target
= control target key end

     0   :  { %s9073_s0 = inlined_call_operand.vmem [shape: f32[64,4], index: 0, kind: input, shape index: {}]   ;;  %s9074_s1 = inlined_call_operand.vmem [shape: f32[4,4,2], index: 1, kind: input, shape index: {}]   ;;  %s9075_s2 = inlined_call_operand.vmem [shape: f32[4,4,2], index: 2, kind: input, shape index: {}]   ;;  %s9076_s3 = inlined_call_operand.vmem [shape: f32[4,4,2], index: 3, kind: input, shape index: {}]   ;;  %s9077_s4 = inlined_call_operand.vmem [shape: f32[4,4,2], index: 4, kind: input, shape index: {}]   ;;  %s9078_s5 = inlined_call_operand.vmem [shape: f32[4,2], index: 5, kind: input, shape index: {}]   ;;  %s9079_s6 = inlined_call_operand.vmem [shape: f32[4,2], index: 6, kind: input, shape index: {}]   ;;  %s9080_s7 = inlined_call_operand.vmem [shape: f32[4,2], index: 7, kind: input, shape index: {}]   ;;  %s9081_s8 = inlined_call_operand.vmem [shape: f32[4,2], index: 8, kind: input, shape index: {}]   ;;  %s9082_s9 = inlined_call_operand.vmem [shape: f32[4,2,64], index: 9, kind: input, shape index: {}]   ;;  %s9083_s10 = inlined_call_operand.vmem [shape: f32[4,1,64], index: 10, kind: input, shape index: {}]   ;;  %s9084_s11 = inlined_call_operand.vmem [shape: f32[4,64,2], index: 11, kind: input, shape index: {}]   ;;  %s9085_s12 = inlined_call_operand.vmem [shape: f32[4,1,2], index: 12, kind: input, shape index: {}]   ;;  %s9086_s13 = inlined_call_operand.vmem [shape: f32[4,64,2], index: 13, kind: input, shape index: {}]   ;;  %s9087_s14 = inlined_call_operand.vmem [shape: f32[4,1,2], index: 14, kind: input, shape index: {}]   ;;  %s9088_s15 = inlined_call_operand.vmem [shape: f32[4,32], index: 15, kind: input, shape index: {}]   ;;  %s9089_s16 = inlined_call_operand.vmem [shape: f32[1,32], index: 16, kind: input, shape index: {}]   ;;  %s9090_s17 = inlined_call_operand.vmem [shape: f32[32,32], index: 17, kind: input, shape index: {}]   ;;  %s9091_s18 = inlined_call_operand.vmem [shape: f32[1,32], index: 18, kind: input, shape index: {}]   ;;  %s9092_s19 = inlined_call_operand.vmem [shape: f32[32,2], index: 19, kind: input, shape index: {}]   ;;  %s9093_s20 = inlined_call_operand.vmem [shape: f32[1,2], index: 20, kind: input, shape index: {}]   ;;  %s9094_s21 = inlined_call_operand.vmem [shape: f32[32,2], index: 21, kind: input, shape index: {}]   ;;  %s9095_s22 = inlined_call_operand.vmem [shape: f32[1,2], index: 22, kind: input, shape index: {}]   ;;  %s9096_s23 = inlined_call_operand.vmem [shape: f32[64,4], index: 23, kind: output, shape index: {}]  }
   0x1   :  { %9201 = sst [smem:[#allocation79_spill]] %s9073_s0 }
   0x2   :  { %9202 = sst [smem:[#allocation80_spill]] %s9074_s1 }
   0x3   :  { %9203 = sst [smem:[#allocation81_spill]] %s9075_s2 }
   0x4   :  { %9204 = sst [smem:[#allocation82_spill]] %s9076_s3 }
   0x5   :  { %9205 = sst [smem:[#allocation83_spill]] %s9077_s4  ;;  %s7023_s4 = smov 0  }
   0x6   :  { %9206 = sst [smem:[#allocation84_spill]] %s9078_s5 }
   0x7   :  { %9207 = sst [smem:[#allocation85_spill]] %s9079_s6 }
   0x8   :  { %9208 = sst [smem:[#allocation86_spill]] %s9080_s7 }
   0x9 LB: > { %s5426_s30 = sadd.s32 4294967295, %s6895_s4   ;;  %p5430_p0 = scmp.ge.s32.totalorder %s6895_s4, 1  ;;  %s6895_s4 = sphi %s7023_s4, %s33_s4  }
   0xa   : > { %p638_p1 = scmp.lt.s32.totalorder %s6895_s4, 3 }
   0xc   : > { %p639_p2 = pnand %p5430_p0, %p638_p1 }
   0xe   : > { %642 = sbr.rel (%p639_p2) target bundleno = 5462 (0x1556), region = 112 }
  0x15   : > { %s5431_s24 = sshll.u32 %s5426_s30, 2  ;;  %v9106_v0 = vmov 0   ;;  %s9209_s26 = sld [smem:[#allocation79_spill]]  ;;  %v9102_v3 = vmov 1   ;;  %v750_v6 = vld [vmem:[%s9084_s11] sm:$0xff]  ;;  %v751_v7 = vld [vmem:[%s9084_s11 + $0x8] sm:$0xff]  ;;  %v788_v30 = vlaneseq }
  0x16   : > { %6507 = vset.pattern.permute.xlu1 %v9106_v0  ;;  %6505 = vset.pattern.permute.xlu0 %v9106_v0  ;;  %p703_p3 = scmp.lt.s32.totalorder %s5431_s24, 7  ;;  %v759_v8 = vld [vmem:[%s9086_s13] sm:$0xff]  ;;  %v7075_v9 = vpack.c.bf16 %v751_v7, %v750_v6  ;;  %v760_v10 = vld [vmem:[%s9086_s13 + $0x8] sm:$0xff]  ;;  %v752_v11 = vld [vmem:[%s9084_s11 + $0x10] sm:$0xff]  ;;  %vm896_vm0 = vcmask 523264   ;;  %s9224_s3 = sld [smem:[#allocation85_spill]] }
  0x17   : > { %v753_v12 = vld [vmem:[%s9084_s11 + $0x18] sm:$0xff]  ;;  %v7086_v13 = vpack.c.bf16 %v760_v10, %v759_v8  ;;  %v761_v15 = vld [vmem:[%s9086_s13 + $0x10] sm:$0xff]  ;;  %v754_v17 = vld [vmem:[%s9084_s11 + $0x20] sm:$0xff]  ;;  %v7146_v31 = vshrl.u32 %v788_v30, 7  ;;  %s9199_s0 = smov 2   ;;  %s9225_s1 = sld [smem:[#allocation84_spill]] }
  0x18   : > { %s9376_s24 = smov (!%p703_p3, %s5431_s24), 7  ;;  %9210 = vst [vmem:[#allocation2_spill] sm:$0xff] %v7075_v9  ;;  %v7088_v14 = vpack.c.bf16 %v753_v12, %v752_v11  ;;  %v762_v16 = vld [vmem:[%s9086_s13 + $0x18] sm:$0xff]  ;;  %6212 = vmatprep.subr.bf16.mxu0 %v7075_v9  ;;  %v755_v19 = vld [vmem:[%s9084_s11 + $0x28] sm:$0xff]  ;;  %v763_v20 = vld [vmem:[%s9086_s13 + $0x20] sm:$0xff]  ;;  %s9236_s6 = sld [smem:[#allocation80_spill]] }
  0x19   : > { %s9136_s25 = sshll.u32 %s9376_s24, 3  ;;  %9211 = vst [vmem:[#allocation3_spill] sm:$0xff] %v7086_v13  ;;  %v7100_v18 = vpack.c.bf16 %v762_v16, %v761_v15  ;;  %v764_v21 = vld [vmem:[%s9086_s13 + $0x28] sm:$0xff]  ;;  %6228 = vmatprep.subr.bf16.mxu1 %v7086_v13  ;;  %6214 = vmatpush3.bf16.msra.mxu0 %v7075_v9  ;;  %v7115_v22 = vpack.c.bf16 %v755_v19, %v754_v17  ;;  %v756_v24 = vld [vmem:[%s9084_s11 + $0x30] sm:$0xff]  ;;  %v757_v25 = vld [vmem:[%s9084_s11 + $0x38] sm:$0xff]  ;;  %v7149_v32 = vsub.s32 0, %v7146_v31 }
  0x1a   : > { %9212 = vst [vmem:[#allocation4_spill] sm:$0xff] %v7088_v14  ;;  %6230 = vmatpush3.bf16.msra.mxu1 %v7086_v13  ;;  %6216 = vmatprep.subr.bf16.mxu0 %v7088_v14  ;;  %v7118_v23 = vpack.c.bf16 %v764_v21, %v763_v20  ;;  %v765_v26 = vld [vmem:[%s9086_s13 + $0x30] sm:$0xff]  ;;  %v766_v27 = vld [vmem:[%s9086_s13 + $0x38] sm:$0xff]  ;;  %v7135_v28 = vpack.c.bf16 %v757_v25, %v756_v24  ;;  %v7152_v33 = vsub.s32 1, %v7146_v31  ;;  %v748_v34 = vld [vmem:[%s9082_s9] sm:$0x3] }
  0x1b   : > { %s7041_s2 = scalar_lea.vmem %s9209_s26, %s9136_s25  ;;  %9213 = vst [vmem:[#allocation5_spill] sm:$0xff] %v7100_v18  ;;  %9214 = vst [vmem:[#allocation6_spill] sm:$0xff] %v7115_v22  ;;  %6232 = vmatprep.subr.bf16.mxu1 %v7100_v18  ;;  %v7138_v29 = vpack.c.bf16 %v766_v27, %v765_v26  ;;  %v7158_v37 = vrot.slane %v748_v34, %v7149_v32  ;;  %v5435_v45 = vld [vmem:[%s9083_s10] ss:$0 sm:$0xff]  ;;  %s9254_s27 = sld [smem:[#allocation81_spill]] }
  0x1c   : > { %v7044_v1 = vld [vmem:[%s7041_s2 + $0x8] sm:$0xff]  ;;  %v7047_v2 = vld [vmem:[%s7041_s2] sm:$0xff]  ;;  %v7056_v4 = vld [vmem:[%s7041_s2 + $0x10] sm:$0xff]  ;;  %9215 = vst [vmem:[#allocation7_spill] sm:$0xff] %v7118_v23  ;;  %v7161_v38 = vrot.slane %v748_v34, %v7152_v33  ;;  %s9295_s5 = sld [smem:[#allocation82_spill]]  ;;  %s9296_s26 = sld [smem:[#allocation83_spill]] }
  0x1d   : > { %775 = vperm.xlu1 %6507, %v7044_v1   ;;  %770 = vperm.xlu0 %6505, %v7047_v2   ;;  %v7062_v5 = vld [vmem:[%s7041_s2 + $0x18] sm:$0xff]  ;;  %9216 = vst [vmem:[#allocation8_spill] sm:$0xff] %v7135_v28  ;;  %9217 = vst [vmem:[#allocation9_spill] sm:$0xff] %v7138_v29 }
  0x1e   : > { %6218 = vmatpush3.bf16.msra.mxu0 %v7088_v14  ;;  %6234 = vmatpush3.bf16.msra.mxu1 %v7100_v18  ;;  %9218 = vst [vmem:[#allocation10_spill] sm:$0xff] %v7158_v37  ;;  %9219 = vst [vmem:[#allocation11_spill] sm:$0xff] %v7161_v38 }
  0x1f   : > { %6220 = vmatprep.subr.bf16.mxu0 %v7115_v22  ;;  %6236 = vmatprep.subr.bf16.mxu1 %v7118_v23 }
  0x21   : > { %6508 = vset.pattern.permute.xlu1 %v9102_v3  ;;  %6506 = vset.pattern.permute.xlu0 %v9102_v3 }
  0x22   : > { %801 = vperm.xlu1 %6508, %v7044_v1   ;;  %797 = vperm.xlu0 %6506, %v7047_v2  }
  0x23   : > { %6222 = vmatpush3.bf16.msra.mxu0 %v7115_v22  ;;  %6238 = vmatpush3.bf16.msra.mxu1 %v7118_v23 }
  0x24   : > { %6224 = vmatprep.subr.bf16.mxu0 %v7135_v28  ;;  %6240 = vmatprep.subr.bf16.mxu1 %v7138_v29 }
  0x26   : > { %6509 = vset.pattern.permute.xlu1 %v9106_v0  ;;  %805 = vperm.xlu0 %6506, %v7056_v4  }
  0x27   : > { %780 = vperm.xlu1 %6509, %v7056_v4   ;;  %6226 = vmatpush3.bf16.msra.mxu0 %v7135_v28 }
  0x28   : > { %6242 = vmatpush3.bf16.msra.mxu1 %v7138_v29 }
  0x2a   : > { %809 = vperm.xlu0 %6506, %v7062_v5  }
  0x2b   : > { %785 = vperm.xlu1 %6509, %v7062_v5  }
  0x9c   : > { %v776_v35 = vpop.permute.xlu1 %775  ;;  %v771_v36 = vpop.permute.xlu0 %770 }
  0x9d   : > { %v793_v41 = vmul.f32 %v7158_v37, %v776_v35  ;;  %v792_v42 = vmul.f32 %v7158_v37, %v771_v36 }
  0xa1   : > { %v802_v39 = vpop.permute.xlu1 %801  ;;  %v798_v40 = vpop.permute.xlu0 %797 }
  0xa2   : > { %v817_v43 = vmul.f32 %v7161_v38, %v802_v39  ;;  %v816_v44 = vmul.f32 %v7161_v38, %v798_v40 }
  0xa4   : > { %v821_v46 = vadd.f32 %v817_v43, %v793_v41  ;;  %v820_v47 = vadd.f32 %v816_v44, %v792_v42 }
  0xa5   : > { %v806_v48 = vpop.permute.xlu0 %805 }
  0xa6   : > { %v7170_v49 = vadd.f32 %v5435_v45, %v821_v46  ;;  %v830_v50 = vadd.f32 %v5435_v45, %v820_v47  ;;  %v818_v51 = vmul.f32 %v7161_v38, %v806_v48  ;;  %v781_v52 = vpop.permute.xlu1 %780 }
  0xa7   : > { %v794_v53 = vmul.f32 %v7158_v37, %v781_v52 }
  0xa8   : > { %v835_v54 = vand.u32 2147483647, %v7170_v49  ;;  %v834_v55 = vand.u32 2147483647, %v830_v50  ;;  %v851_v39 = vmax.f32 %v7170_v49, 0.0  ;;  %v850_v42 = vmax.f32 %v830_v50, 0.0 }
  0xa9   : > { %v822_v56 = vadd.f32 %v818_v51, %v794_v53  ;;  %v810_v57 = vpop.permute.xlu0 %809  ;;  %vm878_vm1 = vcmp.ge.f32.partialorder %v830_v50, 0.0  ;;  %vm879_vm2 = vcmp.ge.f32.partialorder %v7170_v49, 0.0 }
  0xaa   : > { %v839_v58 = vsub.f32 0.0, %v835_v54  ;;  %v838_v59 = vsub.f32 0.0, %v834_v55  ;;  %v819_v60 = vmul.f32 %v7161_v38, %v810_v57  ;;  %v786_v61 = vpop.permute.xlu1 %785 }
  0xab   : > { %v7176_v62 = vadd.f32 %v5435_v45, %v822_v56  ;;  %v795_v63 = vmul.f32 %v7158_v37, %v786_v61 }
  0xac   : > { %v844_v6 = vmul.f32 1.442695, %v839_v58  ;;  %v842_v7 = vmul.f32 1.442695, %v838_v59 }
  0xad   : > { %v836_v8 = vand.u32 2147483647, %v7176_v62  ;;  %v823_v10 = vadd.f32 %v819_v60, %v795_v63  ;;  %v852_v54 = vmax.f32 %v7176_v62, 0.0  ;;  %vm880_vm3 = vcmp.ge.f32.partialorder %v7176_v62, 0.0  ;;  %v726_v62 = vld [vmem:[%s9224_s3] sm:$0xf] }
  0xae   : > { %6647 = vpow2.f32 %v844_v6  ;;  %s9233_s3 = sld [smem:[#allocation86_spill]] }
  0xaf   : > { %6649 = vpow2.f32 %v842_v7  ;;  %v840_v11 = vsub.f32 0.0, %v836_v8  ;;  %v7180_v12 = vadd.f32 %v5435_v45, %v823_v10  ;;  %v727_v8 = vmul.f32 0.5, %v726_v62 }
  0xb1   : > { %v846_v15 = vmul.f32 1.442695, %v840_v11  ;;  %v837_v16 = vand.u32 2147483647, %v7180_v12  ;;  %v853_v60 = vmax.f32 %v7180_v12, 0.0  ;;  %vm881_vm4 = vcmp.ge.f32.partialorder %v7180_v12, 0.0 }
  0xb2   : > { %v729_v10 = vand.u32 2147483647, %v727_v8  ;;  %v728_v12 = vmax.f32 %v727_v8, 0.0 }
  0xb3   : > { %6651 = vpow2.f32 %v846_v15  ;;  %v841_v17 = vsub.f32 0.0, %v837_v16 }
  0xb4   : > { %v730_v11 = vsub.f32 0.0, %v729_v10 }
  0xb5   : > { %v848_v19 = vmul.f32 1.442695, %v841_v17 }
  0xb6   : > { %v731_v15 = vmul.f32 1.442695, %v730_v11 }
  0xb7   : > { %6653 = vpow2.f32 %v848_v19 }
  0xb8   : > { %v6648_v20 = vpop.eup %6647 }
  0xb9   : > { %v6650_v21 = vpop.eup %6649  ;;  %v855_v24 = vadd.f32 1.0, %v6648_v20 }
  0xba   : > { %v854_v25 = vadd.f32 1.0, %v6650_v21 }
  0xbb   : > { %6655 = vlog2.f32 %v855_v24 }
  0xbc   : > { %6657 = vlog2.f32 %v854_v25 }
  0xbd   : > { %v6652_v26 = vpop.eup %6651  ;;  %6659 = vrcp.f32 %v854_v25 }
  0xbe   : > { %6661 = vrcp.f32 %v855_v24  ;;  %v856_v27 = vadd.f32 1.0, %v6652_v26 }
  0xc0   : > { %6663 = vlog2.f32 %v856_v27 }
  0xc1   : > { %v6654_v30 = vpop.eup %6653  ;;  %6665 = vrcp.f32 %v856_v27 }
  0xc2   : > { %v857_v34 = vadd.f32 1.0, %v6654_v30 }
  0xc4   : > { %6667 = vlog2.f32 %v857_v34 }
  0xc5   : > { %v6656_v35 = vpop.eup %6655  ;;  %6669 = vrcp.f32 %v857_v34 }
  0xc6   : > { %v6658_v36 = vpop.eup %6657  ;;  %v861_v40 = vmul.f32 0.6931472, %v6656_v35  ;;  %6671 = vpow2.f32 %v731_v15 }
  0xc7   : > { %v6660_v41 = vpop.eup %6659  ;;  %v859_v43 = vmul.f32 0.6931472, %v6658_v36 }
  0xc8   : > { %v6662_v44 = vpop.eup %6661  ;;  %v867_v45 = vadd.f32 %v861_v40, %v851_v39  ;;  %v882_v46 = vmul.f32 %v6660_v41, %v6650_v21  ;;  %v5436_v39 = vld [vmem:[%s9085_s12] ss:$0 sm:$0xff] }
  0xc9   : > { %v866_v47 = vadd.f32 %v859_v43, %v850_v42  ;;  %v883_v48 = vmul.f32 %v6662_v44, %v6648_v20  ;;  %v5441_v40 = vld [vmem:[%s9087_s14] ss:$0 sm:$0xff] }
  0xca   : > { %v6664_v51 = vpop.eup %6663  ;;  %v7184_v52 = vsel %vm878_vm1, %v6660_v41, %v882_v46 }
  0xcb   : > { %9220 = vst [vmem:[#allocation12_spill] sm:$0xff] %v7184_v52  ;;  %v6666_v53 = vpop.eup %6665  ;;  %5833 = vmatprep.mubr.msk.f32.mxu0 %vm896_vm0, %v866_v47  ;;  %5855 = vmatprep.mubr.msk.f32.mxu1 %vm896_vm0, %v866_v47  ;;  %v863_v55 = vmul.f32 0.6931472, %v6664_v51  ;;  %v7190_v56 = vsel %vm879_vm2, %v6662_v44, %v883_v48  ;;  %vm3316_vm2 = vcmask 261120  }
  0xcc   : > { %9221 = vst [vmem:[#allocation13_spill] sm:$0xff] %v7190_v56  ;;  %5834 = vmatmul.mubr.msk.f32.vlgmr.msra.gmra.mrb[0].mxu0 %vm896_vm0, %v867_v45  ;;  %5856 = vmatmul.mubr.msk.f32.vlgmr.msra.gmra.mrb[0].mxu1 %vm896_vm0, %v867_v45  ;;  %v884_v50 = vmul.f32 %v6666_v53, %v6652_v26  ;;  %v714_v26 = vld [vmem:[%s9225_s1] sm:$0xf]  ;;  %s6902_s1 = smov 126  }
  0xcd   : > { %v868_v57 = vadd.f32 %v863_v55, %v852_v54  ;;  %v715_v27 = vmul.f32 0.5, %v714_v26 }
  0xce   : > { %v6668_v58 = vpop.eup %6667  ;;  %v7195_v49 = vsel %vm880_vm3, %v6666_v53, %v884_v50  ;;  %vm5365_vm3 = vcmask 31744  }
  0xcf   : > { %9222 = vst [vmem:[#allocation14_spill] sm:$0xff] %v7195_v49  ;;  %v6670_v59 = vpop.eup %6669  ;;  %5836 = vmatprep.mubr.msk.f32.mxu0 %vm896_vm0, %v868_v57  ;;  %5858 = vmatprep.mubr.msk.f32.mxu1 %vm896_vm0, %v868_v57  ;;  %v865_v61 = vmul.f32 0.6931472, %v6668_v58 }
  0xd0   : > { %v885_v63 = vmul.f32 %v6670_v59, %v6654_v30  ;;  %v6672_v16 = vpop.eup %6671  ;;  %v717_v30 = vand.u32 2147483647, %v715_v27 }
  0xd1   : > { %v869_v6 = vadd.f32 %v865_v61, %v853_v60  ;;  %v733_v17 = vadd.f32 1.0, %v6672_v16 }
  0xd2   : > { %v7201_v7 = vsel %vm881_vm4, %v6670_v59, %v885_v63  ;;  %v718_v34 = vsub.f32 0.0, %v717_v30 }
  0xd3   : > { %9223 = vst [vmem:[#allocation15_spill] sm:$0xff] %v7201_v7  ;;  %5837 = vmatmul.mubr.msk.f32.gmra.mrb[2].mxu0 %vm896_vm0, %v869_v6  ;;  %5859 = vmatmul.mubr.msk.f32.gmra.mrb[2].mxu1 %vm896_vm0, %v869_v6  ;;  %6673 = vlog2.f32 %v733_v17 }
  0xd4   : > { %v719_v35 = vmul.f32 1.442695, %v718_v34 }
  0xd6   : > { %6675 = vpow2.f32 %v719_v35 }
  0xdd   : > { %v6674_v19 = vpop.eup %6673 }
  0xde   : > { %v735_v20 = vmul.f32 0.6931472, %v6674_v19 }
  0xe0   : > { %v736_v21 = vadd.f32 %v735_v20, %v728_v12  ;;  %v6676_v36 = vpop.eup %6675  ;;  %v716_v12 = vmax.f32 %v715_v27, 0.0 }
  0xe1   : > { %v721_v43 = vadd.f32 1.0, %v6676_v36 }
  0xe2   : > { %v7208_v24 = vmul.f32 0.2, %v736_v21 }
  0xe3   : > { %6677 = vlog2.f32 %v721_v43 }
  0xe4   : > { %v1188_v25 = vrot.slane %v7208_v24, %v7149_v32 }
  0xe6   : > { %1190 = vrot.lane.b32.xlu0 %v1188_v25, %s9199_s0 }
  0xed   : > { %v6678_v8 = vpop.eup %6677 }
  0xee   : > { %v723_v20 = vmul.f32 0.6931472, %v6678_v8 }
  0xf0   : > { %v724_v30 = vadd.f32 %v723_v20, %v716_v12 }
 0x19f   : > { %v5835_v41 = vpop.f32.mrb[0].mxu0  ;;  %v5857_v42 = vpop.f32.mrb[0].mxu1 }
 0x1a0   : > { %v981_v44 = vadd.f32 %v5835_v41, %v5436_v39  ;;  %v1076_v45 = vadd.f32 %v5857_v42, %v5441_v40  ;;  %v975_v46 = vpop.f32.mrb[1].mxu0  ;;  %v1070_v47 = vpop.f32.mrb[1].mxu1 }
 0x1a1   : > { %v976_v48 = vadd.f32 %v5436_v39, %v975_v46  ;;  %v1071_v51 = vadd.f32 %v5441_v40, %v1070_v47 }
 0x1a2   : > { %v995_v53 = vmul.f32 0.1, %v981_v44  ;;  %v1090_v54 = vmul.f32 0.1, %v1076_v45  ;;  %v7251_v44 = vld [vmem:[%s9233_s3] sm:$0xf] }
 0x1a3   : > { %v994_v55 = vmul.f32 0.1, %v976_v48  ;;  %v1089_v50 = vmul.f32 0.1, %v1071_v51  ;;  %v1180_v48 = vrot.slane %v7251_v44, %v7149_v32 }
 0x1a4   : > { %6679 = vtanh.f32 %v995_v53  ;;  %1155 = vrot.lane.b32.xlu0 %v1090_v54, %s9199_s0 }
 0x1a5   : > { %6681 = vtanh.f32 %v994_v55  ;;  %1153 = vrot.lane.b32.xlu1 %v1089_v50, %s9199_s0 }
 0x1a6   : > { %v5838_v57 = vpop.f32.mrb[2].mxu0  ;;  %v5860_v58 = vpop.f32.mrb[2].mxu1 }
 0x1a7   : > { %v991_v59 = vadd.f32 %v5838_v57, %v5436_v39  ;;  %v985_v60 = vpop.f32.mrb[3].mxu0  ;;  %v1080_v61 = vpop.f32.mrb[3].mxu1  ;;  %v1086_v45 = vadd.f32 %v5860_v58, %v5441_v40 }
 0x1a8   : > { %v986_v63 = vadd.f32 %v5436_v39, %v985_v60  ;;  %v7236_v39 = vmul.f32 0.2, %v724_v30  ;;  %v1081_v41 = vadd.f32 %v5441_v40, %v1080_v61  ;;  %v7265_v40 = vld [vmem:[%s9081_s8] sm:$0xf]  ;;  %v6900_v61 = vmov 2  }
 0x1a9   : > { %v997_v6 = vmul.f32 0.1, %v991_v59  ;;  %v1092_v53 = vmul.f32 0.1, %v1086_v45  ;;  %v1200_v57 = vrot.slane %v7265_v40, %v7149_v32 }
 0x1aa   : > { %v996_v62 = vmul.f32 0.1, %v986_v63  ;;  %9230 = vst [vmem:[#allocation20_spill] sm:$0xff] %v7236_v39  ;;  %v1172_v43 = vrot.slane %v7236_v39, %v7149_v32  ;;  %v1091_v46 = vmul.f32 0.1, %v1081_v41  ;;  %v6901_v63 = vmov 3  }
 0x1ab   : > { %6683 = vtanh.f32 %v997_v6  ;;  %v1191_v6 = vpop.permute.xlu0 %1190 }
 0x1ac   : > { %6685 = vtanh.f32 %v996_v62  ;;  %v1173_v47 = vmul.f32 %v1172_v43, %v7047_v2  ;;  %v1175_v55 = vmul.f32 %v1172_v43, %v7056_v4  ;;  %v1174_v59 = vmul.f32 %v1172_v43, %v7044_v1 }
 0x1ae   : > { %v7224_v10 = vpop.eup %6679  ;;  %v1181_v54 = vadd.f32 %v1180_v48, %v1173_v47  ;;  %v1183_v58 = vadd.f32 %v1180_v48, %v1175_v55  ;;  %v1182_v60 = vadd.f32 %v1180_v48, %v1174_v59  ;;  %v1176_v47 = vmul.f32 %v1172_v43, %v7062_v5 }
 0x1af   : > { %9226 = vst [vmem:[#allocation16_spill] sm:$0xff] %v7224_v10  ;;  %v7226_v11 = vpop.eup %6681  ;;  %v1098_v15 = vmul.f32 2.0, %v7224_v10 }
 0x1b0   : > { %9227 = vst [vmem:[#allocation17_spill] sm:$0xff] %v7226_v11  ;;  %v1097_v16 = vmul.f32 2.0, %v7226_v11  ;;  %v1184_v55 = vadd.f32 %v1180_v48, %v1176_v47 }
 0x1b1   : > { %v1115_v17 = vmul.f32 1.442695, %v1098_v15 }
 0x1b2   : > { %v1113_v19 = vmul.f32 1.442695, %v1097_v16 }
 0x1b3   : > { %6687 = vpow2.f32 %v1115_v17 }
 0x1b4   : > { %6689 = vpow2.f32 %v1113_v19 }
 0x1b5   : > { %v7230_v21 = vpop.eup %6683 }
 0x1b6   : > { %9228 = vst [vmem:[#allocation18_spill] sm:$0xff] %v7230_v21  ;;  %v7232_v25 = vpop.eup %6685  ;;  %v1100_v26 = vmul.f32 2.0, %v7230_v21 }
 0x1b7   : > { %9229 = vst [vmem:[#allocation19_spill] sm:$0xff] %v7232_v25  ;;  %v1099_v34 = vmul.f32 2.0, %v7232_v25 }
 0x1b8   : > { %v1119_v35 = vmul.f32 1.442695, %v1100_v26 }
 0x1b9   : > { %v1117_v36 = vmul.f32 1.442695, %v1099_v34 }
 0x1ba   : > { %6691 = vpow2.f32 %v1119_v35 }
 0x1bb   : > { %6693 = vpow2.f32 %v1117_v36 }
 0x1bd   : > { %v7238_v42 = vpop.eup %6687 }
 0x1be   : > { %9231 = vst [vmem:[#allocation21_spill] sm:$0xff] %v7238_v42  ;;  %v7240_v27 = vpop.eup %6689  ;;  %1135 = vrot.lane.b32.xlu0 %v7238_v42, %s9199_s0 }
 0x1bf   : > { %9232 = vst [vmem:[#allocation22_spill] sm:$0xff] %v7240_v27  ;;  %1133 = vrot.lane.b32.xlu1 %v7240_v27, %s9199_s0 }
 0x1c2   : > { %1157 = vrot.lane.b32.xlu0 %v1091_v46, %s9199_s0 }
 0x1c4   : > { %v7257_v51 = vpop.eup %6691 }
 0x1c5   : > { %9234 = vst [vmem:[#allocation23_spill] sm:$0xff] %v7257_v51  ;;  %1139 = vrot.lane.b32.xlu1 %v7257_v51, %s9199_s0  ;;  %v7268_v50 = vpop.eup %6693 }
 0x1c6   : > { %1159 = vrot.lane.b32.xlu0 %v1092_v53, %s9199_s0  ;;  %9235 = vst [vmem:[#allocation24_spill] sm:$0xff] %v7268_v50 }
 0x1c9   : > { %1137 = vrot.lane.b32.xlu1 %v7268_v50, %s9199_s0 }
 0x1ca   : > { %1240 = vperm.xlu0 %6506, %v1181_v54  }
 0x1cd   : > { %1202 = vrot.lane.b32.xlu1 %v1200_v57, %s9199_s0  ;;  %s9369_s0 = smov 2  }
 0x1ce   : > { %1248 = vperm.xlu0 %6506, %v1183_v58  }
 0x1d1   : > { %1213 = vperm.xlu1 %6509, %v1181_v54  }
 0x1d2   : > { %6512 = vset.pattern.permute.xlu0 %v6900_v61 }
 0x1d5   : > { %1218 = vperm.xlu1 %6509, %v1182_v60  }
 0x1d9   : > { %6510 = vset.pattern.permute.xlu1 %v9102_v3 }
 0x1da   : > { %1244 = vperm.xlu1 %6510, %v1182_v60  }
 0x1de   : > { %6511 = vset.pattern.permute.xlu1 %v9106_v0 }
 0x1df   : > { %1223 = vperm.xlu1 %6511, %v1183_v58  }
 0x1e3   : > { %6513 = vset.pattern.permute.xlu1 %v6901_v63 }
 0x216   : > { %v1156_v62 = vpop.permute.xlu0 %1155 }
 0x217   : > { %v1154_v8 = vpop.permute.xlu1 %1153 }
 0x230   : > { %v1136_v15 = vpop.permute.xlu0 %1135 }
 0x231   : > { %v1134_v16 = vpop.permute.xlu1 %1133  ;;  %v1146_v17 = vmul.f32 %v1136_v15, %v7044_v1 }
 0x232   : > { %v1145_v20 = vmul.f32 %v1134_v16, %v7047_v2 }
 0x233   : > { %v1166_v12 = vadd.f32 %v1156_v62, %v1146_v17  ;;  %v7296_v62 = vsub.s32 3, %v7146_v31 }
 0x234   : > { %v1165_v34 = vadd.f32 %v1154_v8, %v1145_v20  ;;  %v1158_v41 = vpop.permute.xlu0 %1157 }
 0x235   : > { %v1194_v30 = vmul.f32 %v1191_v6, %v1166_v12 }
 0x236   : > { %v1193_v45 = vmul.f32 %v1191_v6, %v1165_v34 }
 0x237   : > { %v1140_v19 = vpop.permute.xlu1 %1139 }
 0x238   : > { %v1148_v53 = vmul.f32 %v1140_v19, %v7062_v5  ;;  %v1160_v2 = vpop.permute.xlu0 %1159 }
 0x23a   : > { %v1168_v57 = vadd.f32 %v1160_v2, %v1148_v53 }
 0x23b   : > { %v1138_v26 = vpop.permute.xlu1 %1137 }
 0x23c   : > { %v1147_v46 = vmul.f32 %v1138_v26, %v7056_v4  ;;  %v1196_v4 = vmul.f32 %v1191_v6, %v1168_v57 }
 0x23e   : > { %v1167_v54 = vadd.f32 %v1158_v41, %v1147_v46 }
 0x23f   : > { %v1203_v35 = vpop.permute.xlu1 %1202 }
 0x240   : > { %v1206_v36 = vadd.f32 %v1203_v35, %v1194_v30  ;;  %v1205_v1 = vadd.f32 %v1203_v35, %v1193_v45  ;;  %v1195_v58 = vmul.f32 %v1191_v6, %v1167_v54  ;;  %v1208_v43 = vadd.f32 %v1203_v35, %v1196_v4 }
 0x242   : > { %1274 = vperm.xlu0 %6512, %v1206_v36   ;;  %1300 = vperm.xlu1 %6513, %v1206_v36   ;;  %v1207_v59 = vadd.f32 %v1203_v35, %v1195_v58 }
 0x246   : > { %6515 = vset.pattern.permute.xlu0 %v6901_v63  ;;  %6514 = vset.pattern.permute.xlu1 %v6900_v61 }
 0x247   : > { %1296 = vperm.xlu0 %6515, %v1205_v1   ;;  %1269 = vperm.xlu1 %6514, %v1205_v1  }
 0x249   : > { %v7291_v60 = vpop.permute.xlu0 %1240 }
 0x24b   : > { %6516 = vset.pattern.permute.xlu0 %v9106_v0  ;;  %6517 = vset.pattern.permute.xlu1 %v9102_v3 }
 0x24c   : > { %1228 = vperm.xlu0 %6516, %v1184_v55   ;;  %1252 = vperm.xlu1 %6517, %v1184_v55  }
 0x24d   : > { %v7304_v8 = vpop.permute.xlu0 %1248 }
 0x250   : > { %6521 = vset.pattern.permute.xlu0 %v6901_v63  ;;  %6518 = vset.pattern.permute.xlu1 %v6900_v61  ;;  %v7287_v5 = vpop.permute.xlu1 %1213 }
 0x251   : > { %1308 = vperm.xlu0 %6521, %v1208_v43   ;;  %1279 = vperm.xlu1 %6518, %v1207_v59  }
 0x254   : > { %v7289_v48 = vpop.permute.xlu1 %1218 }
 0x255   : > { %6519 = vset.pattern.permute.xlu1 %v6901_v63  ;;  %6522 = vset.pattern.permute.xlu0 %v9106_v0  ;;  %v7299_v63 = vsub.s32 2, %v7146_v31 }
 0x256   : > { %1304 = vperm.xlu1 %6519, %v1207_v59  }
 0x259   : > { %v7293_v6 = vpop.permute.xlu1 %1244 }
 0x25a   : > { %6520 = vset.pattern.permute.xlu1 %v6900_v61  ;;  %v1209_v61 = vld [vmem:[%s9236_s6] sm:$0xf] }
 0x25b   : > { %1284 = vperm.xlu1 %6520, %v1208_v43   ;;  %v1258_v16 = vrot.slane %v1209_v61, %v7152_v33  ;;  %v1290_v17 = vrot.slane %v1209_v61, %v7299_v63  ;;  %v1314_v19 = vrot.slane %v1209_v61, %v7296_v62  ;;  %v1234_v12 = vrot.slane %v1209_v61, %v7149_v32 }
 0x25d   : > { %v1260_v20 = vmul.f32 %v1258_v16, %v7293_v6  ;;  %v1236_v30 = vmul.f32 %v1234_v12, %v7289_v48  ;;  %v1235_v45 = vmul.f32 %v1234_v12, %v7287_v5  ;;  %v1259_v1 = vmul.f32 %v1258_v16, %v7291_v60 }
 0x25e   : > { %v7306_v15 = vpop.permute.xlu1 %1223 }
 0x25f   : > { %6523 = vset.pattern.permute.xlu1 %v9102_v3  ;;  %v1264_v36 = vadd.f32 %v1260_v20, %v1236_v30  ;;  %v1263_v55 = vadd.f32 %v1259_v1, %v1235_v45  ;;  %v1237_v61 = vmul.f32 %v1234_v12, %v7306_v15  ;;  %v1261_v30 = vmul.f32 %v1258_v16, %v7304_v8 }
 0x2c1   : > { %v7313_v31 = vpop.permute.xlu0 %1274  ;;  %v7315_v26 = vpop.permute.xlu1 %1300 }
 0x2c2   : > { %v1292_v34 = vmul.f32 %v1290_v17, %v7313_v31  ;;  %v1316_v35 = vmul.f32 %v1314_v19, %v7315_v26 }
 0x2c4   : > { %v1320_v41 = vadd.f32 %v1316_v35, %v1292_v34 }
 0x2c6   : > { %v7321_v46 = vpop.permute.xlu0 %1296  ;;  %v7323_v47 = vpop.permute.xlu1 %1269  ;;  %v1324_v53 = vadd.f32 %v1320_v41, %v1264_v36  ;;  %v1265_v36 = vadd.f32 %v1261_v30, %v1237_v61 }
 0x2c7   : > { %v1315_v54 = vmul.f32 %v1314_v19, %v7321_v46  ;;  %v1291_v2 = vmul.f32 %v1290_v17, %v7323_v47 }
 0x2c8   : > { %1430 = vperm.xlu1 %6523, %v1324_v53   ;;  %1404 = vperm.xlu0 %6522, %v1324_v53  }
 0x2c9   : > { %v1319_v57 = vadd.f32 %v1315_v54, %v1291_v2  ;;  %v1768_v2 = vrot.slane %v7236_v39, %v7152_v33 }
 0x2cb   : > { %v7328_v58 = vpop.permute.xlu1 %1252  ;;  %v1323_v4 = vadd.f32 %v1319_v57, %v1263_v55  ;;  %v7335_v59 = vpop.permute.xlu0 %1228 }
 0x2cc   : > { %6524 = vset.pattern.permute.xlu1 %v9106_v0  ;;  %6527 = vset.pattern.permute.xlu0 %v9102_v3  ;;  %v1238_v1 = vmul.f32 %v1234_v12, %v7335_v59  ;;  %v1262_v54 = vmul.f32 %v1258_v16, %v7328_v58  ;;  %v1776_v12 = vrot.slane %v7251_v44, %v7152_v33 }
 0x2cd   : > { %1399 = vperm.xlu1 %6524, %v1323_v4   ;;  %v1769_v51 = vmul.f32 %v1768_v2, %v1323_v4 }
 0x2ce   : > { %v1266_v61 = vadd.f32 %v1262_v54, %v1238_v1  ;;  %v5450_v54 = vld [vmem:[%s9084_s11 + $0x50] sm:$0xff] }
 0x2d0   : > { %v7332_v43 = vpop.permute.xlu1 %1279  ;;  %v7344_v41 = vpop.permute.xlu0 %1308 }
 0x2d1   : > { %6525 = vset.pattern.permute.xlu1 %v9102_v3  ;;  %v1293_v34 = vmul.f32 %v1290_v17, %v7332_v43  ;;  %v1318_v3 = vmul.f32 %v1314_v19, %v7344_v41 }
 0x2d2   : > { %1426 = vperm.xlu1 %6525, %v1323_v4  }
 0x2d5   : > { %v7338_v20 = vpop.permute.xlu1 %1304 }
 0x2d6   : > { %v1317_v35 = vmul.f32 %v1314_v19, %v7338_v20  ;;  %6526 = vset.pattern.permute.xlu1 %v9106_v0  ;;  %v9237_v19 = vmov 1  }
 0x2d8   : > { %v1321_v45 = vadd.f32 %v1317_v35, %v1293_v34  ;;  %v1777_v34 = vadd.f32 %v1776_v12, %v1769_v51  ;;  %v5449_v51 = vld [vmem:[%s9084_s11 + $0x48] sm:$0xff] }
 0x2da   : > { %v7350_v55 = vpop.permute.xlu1 %1284  ;;  %v1325_v57 = vadd.f32 %v1321_v45, %v1265_v36 }
 0x2db   : > { %v1294_v50 = vmul.f32 %v1290_v17, %v7350_v55  ;;  %v1770_v17 = vmul.f32 %v1768_v2, %v1324_v53  ;;  %v5458_v53 = vld [vmem:[%s9086_s13 + $0x48] sm:$0xff] }
 0x2dc   : > { %1434 = vperm.xlu0 %6527, %v1325_v57   ;;  %1409 = vperm.xlu1 %6526, %v1325_v57  }
 0x2dd   : > { %v1322_v30 = vadd.f32 %v1318_v3, %v1294_v50  ;;  %v1778_v4 = vadd.f32 %v1776_v12, %v1770_v17  ;;  %v5448_v3 = vld [vmem:[%s9084_s11 + $0x40] sm:$0xff] }
 0x2de   : > { %v5457_v50 = vld [vmem:[%s9086_s13 + $0x40] sm:$0xff]  ;;  %v7371_v45 = vpack.c.bf16 %v5449_v51, %v5448_v3 }
 0x2df   : > { %v1326_v16 = vadd.f32 %v1322_v30, %v1266_v61  ;;  %v7376_v1 = vpack.c.bf16 %v5458_v53, %v5457_v50  ;;  %v5451_v61 = vld [vmem:[%s9084_s11 + $0x58] sm:$0xff]  ;;  %v5459_v30 = vld [vmem:[%s9086_s13 + $0x50] sm:$0xff]  ;;  %v5452_v3 = vld [vmem:[%s9084_s11 + $0x60] sm:$0xff]  ;;  %v1771_v50 = vmul.f32 %v1768_v2, %v1325_v57 }
 0x2e0   : > { %6531 = vset.pattern.permute.xlu0 %v9106_v0  ;;  %9238 = vst [vmem:[#allocation25_spill] sm:$0xff] %v7371_v45  ;;  %6244 = vmatprep.subr.bf16.mxu0 %v7371_v45  ;;  %v5461_v51 = vld [vmem:[%s9086_s13 + $0x60] sm:$0xff]  ;;  %v5455_v57 = vld [vmem:[%s9084_s11 + $0x78] sm:$0xff] }
 0x2e1   : > { %1803 = vperm.xlu0 %6531, %v1777_v34   ;;  %1414 = vperm.xlu1 %6526, %v1326_v16   ;;  %v1772_v35 = vmul.f32 %v1768_v2, %v1326_v16  ;;  %9239 = vst [vmem:[#allocation26_spill] sm:$0xff] %v7376_v1  ;;  %v5454_v2 = vld [vmem:[%s9084_s11 + $0x70] sm:$0xff] }
 0x2e2   : > { %6260 = vmatprep.subr.bf16.mxu1 %v7376_v1  ;;  %6246 = vmatpush3.bf16.msra.mxu0 %v7371_v45 }
 0x2e3   : > { %v7357_v36 = vadd.f32 %v1776_v12, %v1772_v35  ;;  %v5460_v35 = vld [vmem:[%s9086_s13 + $0x58] sm:$0xff]  ;;  %6262 = vmatpush3.bf16.msra.mxu1 %v7376_v1 }
 0x2e4   : > { %v7397_v17 = vpack.c.bf16 %v5460_v35, %v5459_v30  ;;  %v7430_v30 = vadd.f32 %v1776_v12, %v1771_v50  ;;  %v7432_v35 = vpack.c.bf16 %v5455_v57, %v5454_v2  ;;  %v5446_v12 = vld [vmem:[%s9082_s9 + $0x2] sm:$0x3] }
 0x2e5   : > { %6528 = vset.pattern.permute.xlu1 %v9237_v19  ;;  %1818 = vperm.xlu0 %6531, %v7357_v36   ;;  %v7455_v50 = vrot.slane %v5446_v12, %v7152_v33 }
 0x2e6   : > { %1438 = vperm.xlu1 %6528, %v1326_v16   ;;  %v7391_v16 = vpack.c.bf16 %v5451_v61, %v5450_v54  ;;  %9241 = vst [vmem:[#allocation28_spill] sm:$0xff] %v7397_v17  ;;  %6264 = vmatprep.subr.bf16.mxu1 %v7397_v17  ;;  %v5462_v54 = vld [vmem:[%s9086_s13 + $0x68] sm:$0xff]  ;;  %9244 = vst [vmem:[#allocation31_spill] sm:$0xff] %v7432_v35 }
 0x2e7   : > { %v7416_v61 = vpack.c.bf16 %v5462_v54, %v5461_v51  ;;  %6266 = vmatpush3.bf16.msra.mxu1 %v7397_v17  ;;  %v7452_v51 = vrot.slane %v5446_v12, %v7149_v32  ;;  %9247 = vst [vmem:[#allocation34_spill] sm:$0xff] %v7455_v50 }
 0x2e8   : > { %9240 = vst [vmem:[#allocation27_spill] sm:$0xff] %v7391_v16  ;;  %6248 = vmatprep.subr.bf16.mxu0 %v7391_v16 }
 0x2e9   : > { %6250 = vmatpush3.bf16.msra.mxu0 %v7391_v16  ;;  %9243 = vst [vmem:[#allocation30_spill] sm:$0xff] %v7416_v61  ;;  %6268 = vmatprep.subr.bf16.mxu1 %v7416_v61  ;;  %9246 = vst [vmem:[#allocation33_spill] sm:$0xff] %v7452_v51 }
 0x2ea   : > { %6529 = vset.pattern.permute.xlu1 %v9106_v0 }
 0x2eb   : > { %1808 = vperm.xlu1 %6529, %v1778_v4   ;;  %6270 = vmatpush3.bf16.msra.mxu1 %v7416_v61 }
 0x2ef   : > { %6530 = vset.pattern.permute.xlu1 %v9237_v19 }
 0x2f0   : > { %1834 = vperm.xlu1 %6530, %v1778_v4   ;;  %v5453_v4 = vld [vmem:[%s9084_s11 + $0x68] sm:$0xff] }
 0x2f1   : > { %v7410_v53 = vpack.c.bf16 %v5453_v4, %v5452_v3  ;;  %v5464_v3 = vld [vmem:[%s9086_s13 + $0x78] sm:$0xff] }
 0x2f3   : > { %9242 = vst [vmem:[#allocation29_spill] sm:$0xff] %v7410_v53  ;;  %6252 = vmatprep.subr.bf16.mxu0 %v7410_v53 }
 0x2f4   : > { %1830 = vperm.xlu1 %6530, %v1777_v34   ;;  %v5463_v34 = vld [vmem:[%s9086_s13 + $0x70] sm:$0xff]  ;;  %6254 = vmatpush3.bf16.msra.mxu0 %v7410_v53 }
 0x2f5   : > { %v7439_v4 = vpack.c.bf16 %v5464_v3, %v5463_v34  ;;  %6256 = vmatprep.subr.bf16.mxu0 %v7432_v35  ;;  %v5466_v3 = vld [vmem:[%s9083_s10 + $0x1] ss:$0 sm:$0xff] }
 0x2f7   : > { %9245 = vst [vmem:[#allocation32_spill] sm:$0xff] %v7439_v4  ;;  %6272 = vmatprep.subr.bf16.mxu1 %v7439_v4 }
 0x2f8   : > { %6532 = vset.pattern.permute.xlu1 %v9106_v0  ;;  %6258 = vmatpush3.bf16.msra.mxu0 %v7432_v35 }
 0x2f9   : > { %1813 = vperm.xlu1 %6532, %v7430_v30   ;;  %6274 = vmatpush3.bf16.msra.mxu1 %v7439_v4 }
 0x2fd   : > { %6533 = vset.pattern.permute.xlu1 %v9237_v19 }
 0x347   : > { %v1405_v54 = vpop.permute.xlu0 %1404  ;;  %v1431_v2 = vpop.permute.xlu1 %1430 }
 0x348   : > { %v1422_v57 = vmul.f32 %v7452_v51, %v1405_v54  ;;  %v1446_v34 = vmul.f32 %v7455_v50, %v1431_v2 }
 0x34a   : > { %v1450_v0 = vadd.f32 %v1446_v34, %v1422_v57 }
 0x34c   : > { %v1460_v25 = vadd.f32 %v5466_v3, %v1450_v0  ;;  %v1400_v21 = vpop.permute.xlu1 %1399 }
 0x34d   : > { %v1421_v12 = vmul.f32 %v7452_v51, %v1400_v21 }
 0x34e   : > { %v1464_v27 = vand.u32 2147483647, %v1460_v25  ;;  %vm1508_vm5 = vcmp.ge.f32.partialorder %v1460_v25, 0.0 }
 0x350   : > { %v1468_v42 = vsub.f32 0.0, %v1464_v27 }
 0x351   : > { %v1427_v11 = vpop.permute.xlu1 %1426 }
 0x352   : > { %v1473_v10 = vmul.f32 1.442695, %v1468_v42  ;;  %v1445_v7 = vmul.f32 %v7455_v50, %v1427_v11 }
 0x354   : > { %6695 = vpow2.f32 %v1473_v10  ;;  %v1449_v49 = vadd.f32 %v1445_v7, %v1421_v12 }
 0x356   : > { %v1459_v54 = vadd.f32 %v5466_v3, %v1449_v49 }
 0x358   : > { %v1463_v56 = vand.u32 2147483647, %v1459_v54  ;;  %vm1507_vm6 = vcmp.ge.f32.partialorder %v1459_v54, 0.0 }
 0x35a   : > { %v1467_v2 = vsub.f32 0.0, %v1463_v56 }
 0x35b   : > { %v1435_v52 = vpop.permute.xlu0 %1434  ;;  %v1410_v38 = vpop.permute.xlu1 %1409 }
 0x35c   : > { %v1471_v37 = vmul.f32 1.442695, %v1467_v2  ;;  %v1447_v57 = vmul.f32 %v7455_v50, %v1435_v52  ;;  %v1423_v0 = vmul.f32 %v7452_v51, %v1410_v38 }
 0x35e   : > { %v6696_v34 = vpop.eup %6695  ;;  %6697 = vpow2.f32 %v1471_v37  ;;  %v1451_v27 = vadd.f32 %v1447_v57, %v1423_v0 }
 0x35f   : > { %v1484_v42 = vadd.f32 1.0, %v6696_v34 }
 0x360   : > { %v1461_v29 = vadd.f32 %v5466_v3, %v1451_v27  ;;  %v1415_v21 = vpop.permute.xlu1 %1414 }
 0x361   : > { %6699 = vrcp.f32 %v1484_v42  ;;  %v1424_v56 = vmul.f32 %v7452_v51, %v1415_v21 }
 0x362   : > { %v1465_v11 = vand.u32 2147483647, %v1461_v29  ;;  %6701 = vlog2.f32 %v1484_v42  ;;  %vm1509_vm7 = vcmp.ge.f32.partialorder %v1461_v29, 0.0 }
 0x364   : > { %v1469_v10 = vsub.f32 0.0, %v1465_v11 }
 0x365   : > { %v1439_v7 = vpop.permute.xlu1 %1438 }
 0x366   : > { %v1475_v49 = vmul.f32 1.442695, %v1469_v10  ;;  %v1448_v12 = vmul.f32 %v7455_v50, %v1439_v7 }
 0x368   : > { %v6698_v2 = vpop.eup %6697  ;;  %6703 = vpow2.f32 %v1475_v49  ;;  %v1452_v52 = vadd.f32 %v1448_v12, %v1424_v56  ;;  %v1479_v56 = vmax.f32 %v1459_v54, 0.0  ;;  %v1480_v12 = vmax.f32 %v1460_v25, 0.0 }
 0x369   : > { %v1483_v38 = vadd.f32 1.0, %v6698_v2  ;;  %v1481_v25 = vmax.f32 %v1461_v29, 0.0  ;;  %v5467_v29 = vld [vmem:[%s9085_s12 + $0x1] ss:$0 sm:$0xff] }
 0x36a   : > { %v1462_v28 = vadd.f32 %v5466_v3, %v1452_v52 }
 0x36b   : > { %6705 = vlog2.f32 %v1483_v38  ;;  %v6700_v37 = vpop.eup %6699 }
 0x36c   : > { %v1466_v57 = vand.u32 2147483647, %v1462_v28  ;;  %6707 = vrcp.f32 %v1483_v38  ;;  %v1512_v0 = vmul.f32 %v6700_v37, %v6696_v34  ;;  %v6702_v23 = vpop.eup %6701  ;;  %vm1510_vm8 = vcmp.ge.f32.partialorder %v1462_v28, 0.0 }
 0x36d   : > { %v1490_v22 = vmul.f32 0.6931472, %v6702_v23 }
 0x36e   : > { %v1470_v27 = vsub.f32 0.0, %v1466_v57  ;;  %v7468_v11 = vsel %vm1508_vm5, %v6700_v37, %v1512_v0 }
 0x36f   : > { %9248 = vst [vmem:[#allocation35_spill] sm:$0xff] %v7468_v11  ;;  %v1496_v38 = vadd.f32 %v1490_v22, %v1480_v12 }
 0x370   : > { %v1477_v10 = vmul.f32 1.442695, %v1470_v27 }
 0x372   : > { %v6704_v21 = vpop.eup %6703  ;;  %6709 = vpow2.f32 %v1477_v10 }
 0x373   : > { %v1485_v7 = vadd.f32 1.0, %v6704_v21 }
 0x375   : > { %v6706_v42 = vpop.eup %6705  ;;  %6711 = vlog2.f32 %v1485_v7 }
 0x376   : > { %v6708_v49 = vpop.eup %6707  ;;  %v1488_v3 = vmul.f32 0.6931472, %v6706_v42  ;;  %6713 = vrcp.f32 %v1485_v7 }
 0x377   : > { %v1511_v52 = vmul.f32 %v6708_v49, %v6698_v2 }
 0x378   : > { %v1495_v34 = vadd.f32 %v1488_v3, %v1479_v56 }
 0x379   : > { %v7470_v57 = vsel %vm1507_vm6, %v6708_v49, %v1511_v52  ;;  %v1482_v49 = vmax.f32 %v1462_v28, 0.0 }
 0x37a   : > { %9249 = vst [vmem:[#allocation36_spill] sm:$0xff] %v7470_v57  ;;  %5877 = vmatprep.mubr.msk.f32.mxu0 %vm896_vm0, %v1495_v34  ;;  %5899 = vmatprep.mubr.msk.f32.mxu1 %vm896_vm0, %v1495_v34 }
 0x37b   : > { %5878 = vmatmul.mubr.msk.f32.vlgmr.msra.gmra.mrb[4].mxu0 %vm896_vm0, %v1496_v38  ;;  %5900 = vmatmul.mubr.msk.f32.vlgmr.msra.gmra.mrb[4].mxu1 %vm896_vm0, %v1496_v38 }
 0x37c   : > { %v6710_v23 = vpop.eup %6709 }
 0x37d   : > { %v1486_v37 = vadd.f32 1.0, %v6710_v23 }
 0x37f   : > { %v6712_v0 = vpop.eup %6711  ;;  %6715 = vlog2.f32 %v1486_v37 }
 0x380   : > { %v6714_v27 = vpop.eup %6713  ;;  %v1492_v2 = vmul.f32 0.6931472, %v6712_v0  ;;  %6717 = vrcp.f32 %v1486_v37 }
 0x381   : > { %v1513_v54 = vmul.f32 %v6714_v27, %v6704_v21 }
 0x382   : > { %v1497_v22 = vadd.f32 %v1492_v2, %v1481_v25 }
 0x383   : > { %v7476_v10 = vsel %vm1509_vm7, %v6714_v27, %v1513_v54  ;;  %v1210_v54 = vld [vmem:[%s9254_s27] sm:$0xf] }
 0x384   : > { %9250 = vst [vmem:[#allocation37_spill] sm:$0xff] %v7476_v10  ;;  %5880 = vmatprep.mubr.msk.f32.mxu0 %vm896_vm0, %v1497_v22  ;;  %5902 = vmatprep.mubr.msk.f32.mxu1 %vm896_vm0, %v1497_v22 }
 0x389   : > { %v6716_v7 = vpop.eup %6715 }
 0x38a   : > { %v6718_v42 = vpop.eup %6717  ;;  %v1494_v56 = vmul.f32 0.6931472, %v6716_v7  ;;  %v7496_v7 = vrot.slane %v1210_v54, %v7299_v63 }
 0x38b   : > { %v1514_v3 = vmul.f32 %v6718_v42, %v6710_v23 }
 0x38c   : > { %v1498_v12 = vadd.f32 %v1494_v56, %v1482_v49 }
 0x38d   : > { %v7480_v52 = vsel %vm1510_vm8, %v6718_v42, %v1514_v3  ;;  %v1358_v42 = vrot.slane %v1210_v54, %v7296_v62 }
 0x38e   : > { %9251 = vst [vmem:[#allocation38_spill] sm:$0xff] %v7480_v52  ;;  %5881 = vmatmul.mubr.msk.f32.gmra.mrb[6].mxu0 %vm896_vm0, %v1498_v12  ;;  %5903 = vmatmul.mubr.msk.f32.gmra.mrb[6].mxu1 %vm896_vm0, %v1498_v12  ;;  %v1351_v52 = vmul.f32 %v7496_v7, %v7323_v47 }
 0x44e   : > { %v5879_v21 = vpop.f32.mrb[4].mxu0  ;;  %v5901_v34 = vpop.f32.mrb[4].mxu1 }
 0x44f   : > { %v1609_v38 = vadd.f32 %v5879_v21, %v5467_v29  ;;  %v1603_v37 = vpop.f32.mrb[5].mxu0  ;;  %v1698_v0 = vpop.f32.mrb[5].mxu1 }
 0x450   : > { %v1604_v27 = vadd.f32 %v5467_v29, %v1603_v37  ;;  %v1330_v37 = vrot.slane %v1210_v54, %v7149_v32 }
 0x451   : > { %v1623_v25 = vmul.f32 0.1, %v1609_v38  ;;  %v7503_v38 = vrot.slane %v1210_v54, %v7152_v33 }
 0x452   : > { %v1622_v23 = vmul.f32 0.1, %v1604_v27 }
 0x453   : > { %6719 = vtanh.f32 %v1623_v25  ;;  %v1340_v54 = vmul.f32 %v7503_v38, %v7293_v6 }
 0x454   : > { %6721 = vtanh.f32 %v1622_v23 }
 0x45d   : > { %v7487_v28 = vpop.eup %6719 }
 0x45e   : > { %9252 = vst [vmem:[#allocation39_spill] sm:$0xff] %v7487_v28  ;;  %v7489_v2 = vpop.eup %6721  ;;  %v1726_v22 = vmul.f32 2.0, %v7487_v28  ;;  %v1352_v28 = vmul.f32 %v7496_v7, %v7313_v31  ;;  %v5472_v31 = vld [vmem:[%s9087_s14 + $0x1] ss:$0 sm:$0xff] }
 0x45f   : > { %9253 = vst [vmem:[#allocation40_spill] sm:$0xff] %v7489_v2  ;;  %v1725_v49 = vmul.f32 2.0, %v7489_v2  ;;  %v1360_v2 = vmul.f32 %v1358_v42, %v7315_v26  ;;  %v1332_v26 = vmul.f32 %v1330_v37, %v7289_v48  ;;  %v1699_v6 = vadd.f32 %v5472_v31, %v1698_v0 }
 0x460   : > { %v1743_v56 = vmul.f32 1.442695, %v1726_v22 }
 0x461   : > { %v1741_v3 = vmul.f32 1.442695, %v1725_v49  ;;  %v5882_v12 = vpop.f32.mrb[6].mxu0  ;;  %v7500_v21 = vpop.f32.mrb[6].mxu1  ;;  %v1359_v49 = vmul.f32 %v1358_v42, %v7321_v46  ;;  %v1339_v46 = vmul.f32 %v7503_v38, %v7291_v60  ;;  %v1784_v60 = vrot.slane %v7208_v24, %v7152_v33 }
 0x462   : > { %6723 = vpow2.f32 %v1743_v56  ;;  %v1619_v27 = vadd.f32 %v5882_v12, %v5467_v29  ;;  %v1613_v25 = vpop.f32.mrb[7].mxu0  ;;  %v7506_v23 = vpop.f32.mrb[7].mxu1  ;;  %v1331_v12 = vmul.f32 %v1330_v37, %v7287_v5 }
 0x463   : > { %6725 = vpow2.f32 %v1741_v3  ;;  %v1614_v22 = vadd.f32 %v5467_v29, %v1613_v25  ;;  %v1364_v29 = vadd.f32 %v1360_v2, %v1352_v28  ;;  %v1363_v47 = vadd.f32 %v1359_v49, %v1351_v52 }
 0x464   : > { %v1625_v10 = vmul.f32 0.1, %v1619_v27  ;;  %v1344_v3 = vadd.f32 %v1340_v54, %v1332_v26  ;;  %v1704_v27 = vadd.f32 %v5901_v34, %v5472_v31  ;;  %v1343_v25 = vadd.f32 %v1339_v46, %v1331_v12 }
 0x465   : > { %v1624_v56 = vmul.f32 0.1, %v1614_v22  ;;  %v1717_v52 = vmul.f32 0.1, %v1699_v6  ;;  %v1792_v28 = vrot.slane %v7265_v40, %v7152_v33  ;;  %v1354_v40 = vmul.f32 %v7496_v7, %v7350_v55 }
 0x466   : > { %6727 = vtanh.f32 %v1625_v10  ;;  %v7523_v22 = vadd.f32 %v1364_v29, %v1344_v3  ;;  %v7527_v18 = vadd.f32 %v1363_v47, %v1343_v25  ;;  %v1718_v10 = vmul.f32 0.1, %v1704_v27 }
 0x467   : > { %6729 = vtanh.f32 %v1624_v56  ;;  %v1361_v27 = vmul.f32 %v1358_v42, %v7338_v20  ;;  %v1334_v25 = vmul.f32 %v1330_v37, %v7335_v59  ;;  %v1342_v6 = vmul.f32 %v7503_v38, %v7328_v58 }
 0x468   : > { %9255 = vst [vmem:[#allocation41_spill] sm:$0xff] %v7523_v22  ;;  %9257 = vst [vmem:[#allocation43_spill] sm:$0xff] %v7527_v18  ;;  %v1341_v59 = vmul.f32 %v7503_v38, %v7304_v8 }
 0x469   : > { %v1346_v58 = vadd.f32 %v1342_v6, %v1334_v25 }
 0x46c   : > { %v7525_v5 = vpop.eup %6723 }
 0x46d   : > { %9256 = vst [vmem:[#allocation42_spill] sm:$0xff] %v7525_v5  ;;  %v7529_v14 = vpop.eup %6725  ;;  %v1758_v48 = vmul.f32 %v7525_v5, %v7523_v22 }
 0x46e   : > { %9258 = vst [vmem:[#allocation44_spill] sm:$0xff] %v7529_v14  ;;  %v1757_v34 = vmul.f32 %v7529_v14, %v7527_v18 }
 0x46f   : > { %v1762_v0 = vadd.f32 %v1758_v48, %v1718_v10  ;;  %v1362_v10 = vmul.f32 %v1358_v42, %v7344_v41  ;;  %v1714_v41 = vadd.f32 %v7500_v21, %v5472_v31 }
 0x470   : > { %v7539_v2 = vpop.eup %6727  ;;  %v1761_v49 = vadd.f32 %v1757_v34, %v1717_v52  ;;  %v1333_v52 = vmul.f32 %v1330_v37, %v7306_v15  ;;  %v1353_v34 = vmul.f32 %v7496_v7, %v7332_v43  ;;  %v1709_v15 = vadd.f32 %v5472_v31, %v7506_v23 }
 0x471   : > { %9259 = vst [vmem:[#allocation45_spill] sm:$0xff] %v7539_v2  ;;  %v7541_v54 = vpop.eup %6729  ;;  %v1786_v56 = vmul.f32 %v1784_v60, %v1762_v0  ;;  %v1728_v12 = vmul.f32 2.0, %v7539_v2  ;;  %v9261_v0 = vmov 0   ;;  %v1366_v55 = vadd.f32 %v1362_v10, %v1354_v40 }
 0x472   : > { %9260 = vst [vmem:[#allocation46_spill] sm:$0xff] %v7541_v54  ;;  %v1727_v26 = vmul.f32 2.0, %v7541_v54  ;;  %v1785_v47 = vmul.f32 %v1784_v60, %v1761_v49  ;;  %v1365_v20 = vadd.f32 %v1361_v27, %v1353_v34  ;;  %v1345_v42 = vadd.f32 %v1341_v59, %v1333_v52 }
 0x473   : > { %v1747_v29 = vmul.f32 1.442695, %v1728_v12  ;;  %v1794_v46 = vadd.f32 %v1792_v28, %v1786_v56  ;;  %v7561_v37 = vadd.f32 %v1366_v55, %v1346_v58  ;;  %v1720_v38 = vmul.f32 0.1, %v1714_v41 }
 0x474   : > { %v1745_v3 = vmul.f32 1.442695, %v1727_v26  ;;  %v1793_v48 = vadd.f32 %v1792_v28, %v1785_v47  ;;  %v7567_v7 = vadd.f32 %v1365_v20, %v1345_v42  ;;  %v1719_v49 = vmul.f32 0.1, %v1709_v15  ;;  %v7585_v47 = vpop.permute.xlu0 %1803 }
 0x475   : > { %6731 = vpow2.f32 %v1747_v29  ;;  %1890 = vperm.xlu1 %6533, %v1794_v46   ;;  %1864 = vperm.xlu0 %6531, %v1794_v46   ;;  %9262 = vst [vmem:[#allocation47_spill] sm:$0xff] %v7561_v37 }
 0x476   : > { %6733 = vpow2.f32 %v1745_v3  ;;  %9264 = vst [vmem:[#allocation49_spill] sm:$0xff] %v7567_v7 }
 0x478   : > { %v7593_v40 = vpop.permute.xlu0 %1818 }
 0x479   : > { %6534 = vset.pattern.permute.xlu1 %v9261_v0  ;;  %6535 = vset.pattern.permute.xlu0 %v9237_v19 }
 0x47a   : > { %1886 = vperm.xlu0 %6535, %v1793_v48   ;;  %1859 = vperm.xlu1 %6534, %v1793_v48  }
 0x47e   : > { %1838 = vperm.xlu0 %6535, %v7430_v30   ;;  %6536 = vset.pattern.permute.xlu1 %v9237_v19 }
 0x47f   : > { %v7565_v43 = vpop.eup %6731  ;;  %1842 = vperm.xlu1 %6536, %v7357_v36   ;;  %v7581_v36 = vpop.permute.xlu1 %1808 }
 0x480   : > { %9263 = vst [vmem:[#allocation48_spill] sm:$0xff] %v7565_v43  ;;  %v7570_v8 = vpop.eup %6733  ;;  %v1760_v21 = vmul.f32 %v7565_v43, %v7561_v37 }
 0x481   : > { %9265 = vst [vmem:[#allocation50_spill] sm:$0xff] %v7570_v8  ;;  %v1759_v23 = vmul.f32 %v7570_v8, %v7567_v7 }
 0x482   : > { %v1764_v31 = vadd.f32 %v1760_v21, %v1720_v38 }
 0x483   : > { %v1763_v30 = vadd.f32 %v1759_v23, %v1719_v49  ;;  %6537 = vset.pattern.permute.xlu1 %v9261_v0  ;;  %v7583_v46 = vpop.permute.xlu1 %1834 }
 0x484   : > { %v1788_v56 = vmul.f32 %v1784_v60, %v1764_v31 }
 0x485   : > { %v1787_v12 = vmul.f32 %v1784_v60, %v1763_v30 }
 0x486   : > { %v1796_v26 = vadd.f32 %v1792_v28, %v1788_v56 }
 0x487   : > { %v1795_v29 = vadd.f32 %v1792_v28, %v1787_v12  ;;  %v7587_v60 = vpop.permute.xlu1 %1830  ;;  %v5477_v28 = vld [vmem:[%s9236_s6 + $0x4] sm:$0xf] }
 0x488   : > { %1898 = vperm.xlu0 %6535, %v1796_v26   ;;  %v1848_v3 = vrot.slane %v5477_v28, %v7152_v33  ;;  %v1880_v25 = vrot.slane %v5477_v28, %v7299_v63  ;;  %v1904_v6 = vrot.slane %v5477_v28, %v7296_v62  ;;  %v1824_v10 = vrot.slane %v5477_v28, %v7149_v32 }
 0x489   : > { %1869 = vperm.xlu1 %6537, %v1795_v29  }
 0x48a   : > { %v1850_v48 = vmul.f32 %v1848_v3, %v7583_v46  ;;  %v1826_v55 = vmul.f32 %v1824_v10, %v7581_v36  ;;  %v1849_v42 = vmul.f32 %v1848_v3, %v7587_v60  ;;  %v1825_v49 = vmul.f32 %v1824_v10, %v7585_v47 }
 0x48b   : > { %v7595_v27 = vpop.permute.xlu1 %1813  ;;  %v1828_v7 = vmul.f32 %v1824_v10, %v7593_v40 }
 0x48c   : > { %6540 = vset.pattern.permute.xlu0 %v9261_v0  ;;  %v1854_v58 = vadd.f32 %v1850_v48, %v1826_v55  ;;  %v1853_v30 = vadd.f32 %v1849_v42, %v1825_v49 }
 0x48d   : > { %6538 = vset.pattern.permute.xlu1 %v9237_v19 }
 0x48e   : > { %1894 = vperm.xlu1 %6538, %v1795_v29  }
 0x492   : > { %6539 = vset.pattern.permute.xlu1 %v9261_v0 }
 0x493   : > { %1874 = vperm.xlu1 %6539, %v1796_v26  }
 0x497   : > { %6541 = vset.pattern.permute.xlu1 %v9237_v19 }
 0x4f4   : > { %v7601_v52 = vpop.permute.xlu0 %1864  ;;  %v7603_v34 = vpop.permute.xlu1 %1890 }
 0x4f5   : > { %v1882_v59 = vmul.f32 %v1880_v25, %v7601_v52  ;;  %v1906_v20 = vmul.f32 %v1904_v6, %v7603_v34 }
 0x4f7   : > { %v1910_v41 = vadd.f32 %v1906_v20, %v1882_v59  ;;  %v1827_v59 = vmul.f32 %v1824_v10, %v7595_v27 }
 0x4f9   : > { %v7609_v15 = vpop.permute.xlu0 %1886  ;;  %v7611_v38 = vpop.permute.xlu1 %1859  ;;  %v1914_v21 = vadd.f32 %v1910_v41, %v1854_v58 }
 0x4fa   : > { %v1905_v23 = vmul.f32 %v1904_v6, %v7609_v15  ;;  %v1881_v31 = vmul.f32 %v1880_v25, %v7611_v38 }
 0x4fb   : > { %2020 = vperm.xlu1 %6541, %v1914_v21   ;;  %1994 = vperm.xlu0 %6540, %v1914_v21  }
 0x4fc   : > { %v1909_v56 = vadd.f32 %v1905_v23, %v1881_v31  ;;  %v2358_v31 = vrot.slane %v7236_v39, %v7299_v63 }
 0x4fd   : > { %v7623_v28 = vpop.permute.xlu0 %1838 }
 0x4fe   : > { %v1913_v12 = vadd.f32 %v1909_v56, %v1853_v30  ;;  %v7618_v26 = vpop.permute.xlu1 %1842  ;;  %v1851_v48 = vmul.f32 %v1848_v3, %v7623_v28 }
 0x4ff   : > { %6542 = vset.pattern.permute.xlu1 %v9261_v0  ;;  %6545 = vset.pattern.permute.xlu0 %v9237_v19  ;;  %v1852_v23 = vmul.f32 %v1848_v3, %v7618_v26  ;;  %v2366_v3 = vrot.slane %v7251_v44, %v7299_v63  ;;  %v5482_v44 = vld [vmem:[%s9084_s11 + $0x88] sm:$0xff] }
 0x500   : > { %1989 = vperm.xlu1 %6542, %v1913_v12   ;;  %v1855_v41 = vadd.f32 %v1851_v48, %v1827_v59  ;;  %v2359_v54 = vmul.f32 %v2358_v31, %v1913_v12 }
 0x501   : > { %v1856_v48 = vadd.f32 %v1852_v23, %v1828_v7  ;;  %v5492_v23 = vld [vmem:[%s9086_s13 + $0x90] sm:$0xff] }
 0x504   : > { %6543 = vset.pattern.permute.xlu1 %v9237_v19 }
 0x505   : > { %2016 = vperm.xlu1 %6543, %v1913_v12   ;;  %v5483_v12 = vld [vmem:[%s9084_s11 + $0x90] sm:$0xff] }
 0x507   : > { %v7632_v42 = vpop.permute.xlu0 %1898 }
 0x508   : > { %v7621_v29 = vpop.permute.xlu1 %1869  ;;  %v1908_v37 = vmul.f32 %v1904_v6, %v7632_v42 }
 0x509   : > { %6544 = vset.pattern.permute.xlu1 %v9261_v0  ;;  %v1883_v20 = vmul.f32 %v1880_v25, %v7621_v29 }
 0x50d   : > { %v7627_v55 = vpop.permute.xlu1 %1894 }
 0x50e   : > { %v1907_v58 = vmul.f32 %v1904_v6, %v7627_v55 }
 0x510   : > { %v1911_v49 = vadd.f32 %v1907_v58, %v1883_v20  ;;  %v2367_v20 = vadd.f32 %v2366_v3, %v2359_v54  ;;  %v5490_v54 = vld [vmem:[%s9086_s13 + $0x80] sm:$0xff] }
 0x512   : > { %v7637_v30 = vpop.permute.xlu1 %1874  ;;  %v1915_v56 = vadd.f32 %v1911_v49, %v1855_v41  ;;  %v5484_v49 = vld [vmem:[%s9084_s11 + $0x98] sm:$0xff] }
 0x513   : > { %v1884_v8 = vmul.f32 %v1880_v25, %v7637_v30  ;;  %v2360_v25 = vmul.f32 %v2358_v31, %v1914_v21 }
 0x514   : > { %2024 = vperm.xlu0 %6545, %v1915_v56   ;;  %1999 = vperm.xlu1 %6544, %v1915_v56  }
 0x515   : > { %v1912_v59 = vadd.f32 %v1908_v37, %v1884_v8  ;;  %v5481_v37 = vld [vmem:[%s9084_s11 + $0x80] sm:$0xff]  ;;  %v5491_v8 = vld [vmem:[%s9086_s13 + $0x88] sm:$0xff]  ;;  %v2368_v21 = vadd.f32 %v2366_v3, %v2360_v25 }
 0x516   : > { %v7658_v7 = vpack.c.bf16 %v5482_v44, %v5481_v37  ;;  %v7663_v6 = vpack.c.bf16 %v5491_v8, %v5490_v54  ;;  %v5486_v25 = vld [vmem:[%s9084_s11 + $0xa8] sm:$0xff]  ;;  %v5494_v37 = vld [vmem:[%s9086_s13 + $0xa0] sm:$0xff] }
 0x517   : > { %v1916_v58 = vadd.f32 %v1912_v59, %v1856_v48  ;;  %v7678_v48 = vpack.c.bf16 %v5484_v49, %v5483_v12  ;;  %v5493_v59 = vld [vmem:[%s9086_s13 + $0x98] sm:$0xff]  ;;  %v5495_v54 = vld [vmem:[%s9086_s13 + $0xa8] sm:$0xff]  ;;  %v5487_v12 = vld [vmem:[%s9084_s11 + $0xb0] sm:$0xff] }
 0x518   : > { %6549 = vset.pattern.permute.xlu0 %v9261_v0  ;;  %6276 = vmatprep.subr.bf16.mxu0 %v7658_v7  ;;  %v7705_v8 = vpack.c.bf16 %v5495_v54, %v5494_v37  ;;  %v5488_v49 = vld [vmem:[%s9084_s11 + $0xb8] sm:$0xff] }
 0x519   : > { %2393 = vperm.xlu0 %6549, %v2367_v20   ;;  %2004 = vperm.xlu1 %6544, %v1916_v58   ;;  %v2362_v41 = vmul.f32 %v2358_v31, %v1916_v58  ;;  %9266 = vst [vmem:[#allocation51_spill] sm:$0xff] %v7678_v48 }
 0x51a   : > { %6292 = vmatprep.subr.bf16.mxu1 %v7663_v6  ;;  %6278 = vmatpush3.bf16.msra.mxu0 %v7658_v7  ;;  %9269 = vst [vmem:[#allocation54_spill] sm:$0xff] %v7705_v8 }
 0x51b   : > { %v7645_v10 = vadd.f32 %v2366_v3, %v2362_v41  ;;  %6294 = vmatpush3.bf16.msra.mxu1 %v7663_v6  ;;  %6280 = vmatprep.subr.bf16.mxu0 %v7678_v48  ;;  %v5485_v41 = vld [vmem:[%s9084_s11 + $0xa0] sm:$0xff] }
 0x51c   : > { %v7699_v44 = vpack.c.bf16 %v5486_v25, %v5485_v41  ;;  %v5497_v41 = vld [vmem:[%s9086_s13 + $0xb8] sm:$0xff] }
 0x51d   : > { %6546 = vset.pattern.permute.xlu1 %v9237_v19  ;;  %2408 = vperm.xlu0 %6549, %v7645_v10  }
 0x51e   : > { %2028 = vperm.xlu1 %6546, %v1916_v58   ;;  %v7684_v58 = vpack.c.bf16 %v5493_v59, %v5492_v23  ;;  %6282 = vmatpush3.bf16.msra.mxu0 %v7678_v48  ;;  %9268 = vst [vmem:[#allocation53_spill] sm:$0xff] %v7699_v44  ;;  %v2361_v23 = vmul.f32 %v2358_v31, %v1915_v56  ;;  %v5479_v31 = vld [vmem:[%s9082_s9 + $0x4] sm:$0x3] }
 0x51f   : > { %6284 = vmatprep.subr.bf16.mxu0 %v7699_v44  ;;  %v7719_v59 = vpack.c.bf16 %v5488_v49, %v5487_v12  ;;  %v7740_v56 = vrot.slane %v5479_v31, %v7149_v32 }
 0x520   : > { %9267 = vst [vmem:[#allocation52_spill] sm:$0xff] %v7684_v58  ;;  %6296 = vmatprep.subr.bf16.mxu1 %v7684_v58  ;;  %v7729_v37 = vadd.f32 %v2366_v3, %v2361_v23  ;;  %v7743_v3 = vrot.slane %v5479_v31, %v7152_v33 }
 0x521   : > { %6298 = vmatpush3.bf16.msra.mxu1 %v7684_v58  ;;  %9270 = vst [vmem:[#allocation55_spill] sm:$0xff] %v7719_v59  ;;  %9272 = vst [vmem:[#allocation57_spill] sm:$0xff] %v7740_v56 }
 0x522   : > { %6547 = vset.pattern.permute.xlu1 %v9261_v0  ;;  %6300 = vmatprep.subr.bf16.mxu1 %v7705_v8  ;;  %9273 = vst [vmem:[#allocation58_spill] sm:$0xff] %v7743_v3 }
 0x523   : > { %2398 = vperm.xlu1 %6547, %v2368_v21   ;;  %6286 = vmatpush3.bf16.msra.mxu0 %v7699_v44 }
 0x524   : > { %6288 = vmatprep.subr.bf16.mxu0 %v7719_v59 }
 0x525   : > { %6302 = vmatpush3.bf16.msra.mxu1 %v7705_v8 }
 0x527   : > { %6548 = vset.pattern.permute.xlu1 %v9237_v19  ;;  %6290 = vmatpush3.bf16.msra.mxu0 %v7719_v59 }
 0x528   : > { %2424 = vperm.xlu1 %6548, %v2368_v21   ;;  %v5496_v21 = vld [vmem:[%s9086_s13 + $0xb0] sm:$0xff] }
 0x529   : > { %v7725_v25 = vpack.c.bf16 %v5497_v41, %v5496_v21  ;;  %v5499_v21 = vld [vmem:[%s9083_s10 + $0x2] ss:$0 sm:$0xff] }
 0x52b   : > { %9271 = vst [vmem:[#allocation56_spill] sm:$0xff] %v7725_v25  ;;  %6304 = vmatprep.subr.bf16.mxu1 %v7725_v25 }
 0x52c   : > { %2420 = vperm.xlu1 %6548, %v2367_v20   ;;  %6306 = vmatpush3.bf16.msra.mxu1 %v7725_v25 }
 0x530   : > { %6550 = vset.pattern.permute.xlu1 %v9261_v0 }
 0x531   : > { %2403 = vperm.xlu1 %6550, %v7729_v37  }
 0x535   : > { %6551 = vset.pattern.permute.xlu1 %v9237_v19 }
 0x57a   : > { %v1995_v20 = vpop.permute.xlu0 %1994  ;;  %v2021_v54 = vpop.permute.xlu1 %2020 }
 0x57b   : > { %v2012_v12 = vmul.f32 %v7740_v56, %v1995_v20  ;;  %v2036_v49 = vmul.f32 %v7743_v3, %v2021_v54 }
 0x57d   : > { %v2040_v23 = vadd.f32 %v2036_v49, %v2012_v12 }
 0x57f   : > { %v2050_v41 = vadd.f32 %v5499_v21, %v2040_v23  ;;  %v1990_v43 = vpop.permute.xlu1 %1989 }
 0x580   : > { %v2011_v31 = vmul.f32 %v7740_v56, %v1990_v43 }
 0x581   : > { %v2054_v2 = vand.u32 2147483647, %v2050_v41  ;;  %vm2098_vm9 = vcmp.ge.f32.partialorder %v2050_v41, 0.0  ;;  %v2070_v16 = vmax.f32 %v2050_v41, 0.0 }
 0x583   : > { %v2058_v18 = vsub.f32 0.0, %v2054_v2 }
 0x584   : > { %v2017_v22 = vpop.permute.xlu1 %2016 }
 0x585   : > { %v2063_v14 = vmul.f32 1.442695, %v2058_v18  ;;  %v2035_v5 = vmul.f32 %v7743_v3, %v2017_v22 }
 0x587   : > { %6735 = vpow2.f32 %v2063_v14  ;;  %v2039_v11 = vadd.f32 %v2035_v5, %v2011_v31 }
 0x589   : > { %v2049_v20 = vadd.f32 %v5499_v21, %v2039_v11 }
 0x58b   : > { %v2053_v57 = vand.u32 2147483647, %v2049_v20  ;;  %vm2097_vm10 = vcmp.ge.f32.partialorder %v2049_v20, 0.0 }
 0x58d   : > { %v2057_v54 = vsub.f32 0.0, %v2053_v57 }
 0x58f   : > { %v2061_v51 = vmul.f32 1.442695, %v2057_v54 }
 0x591   : > { %v6736_v50 = vpop.eup %6735  ;;  %6737 = vpow2.f32 %v2061_v51 }
 0x592   : > { %v2074_v13 = vadd.f32 1.0, %v6736_v50 }
 0x593   : > { %v2025_v12 = vpop.permute.xlu0 %2024  ;;  %v2000_v49 = vpop.permute.xlu1 %1999 }
 0x594   : > { %v2037_v23 = vmul.f32 %v7743_v3, %v2025_v12  ;;  %v2013_v2 = vmul.f32 %v7740_v56, %v2000_v49  ;;  %6739 = vrcp.f32 %v2074_v13 }
 0x595   : > { %6741 = vlog2.f32 %v2074_v13 }
 0x596   : > { %v2041_v18 = vadd.f32 %v2037_v23, %v2013_v2 }
 0x598   : > { %v2051_v43 = vadd.f32 %v5499_v21, %v2041_v18  ;;  %v2005_v9 = vpop.permute.xlu1 %2004 }
 0x599   : > { %v2014_v51 = vmul.f32 %v7740_v56, %v2005_v9  ;;  %v2069_v9 = vmax.f32 %v2049_v20, 0.0 }
 0x59a   : > { %v2055_v22 = vand.u32 2147483647, %v2051_v43  ;;  %vm2099_vm11 = vcmp.ge.f32.partialorder %v2051_v43, 0.0 }
 0x59b   : > { %v6738_v14 = vpop.eup %6737 }
 0x59c   : > { %v2059_v11 = vsub.f32 0.0, %v2055_v22  ;;  %v2073_v5 = vadd.f32 1.0, %v6738_v14 }
 0x59d   : > { %v2029_v57 = vpop.permute.xlu1 %2028 }
 0x59e   : > { %v2065_v31 = vmul.f32 1.442695, %v2059_v11  ;;  %v2038_v54 = vmul.f32 %v7743_v3, %v2029_v57  ;;  %6743 = vlog2.f32 %v2073_v5  ;;  %v6740_v4 = vpop.eup %6739 }
 0x59f   : > { %6745 = vrcp.f32 %v2073_v5  ;;  %v2102_v49 = vmul.f32 %v6740_v4, %v6736_v50  ;;  %v6742_v13 = vpop.eup %6741 }
 0x5a0   : > { %6747 = vpow2.f32 %v2065_v31  ;;  %v2042_v12 = vadd.f32 %v2038_v54, %v2014_v51  ;;  %v2080_v61 = vmul.f32 0.6931472, %v6742_v13 }
 0x5a1   : > { %v7756_v2 = vsel %vm2098_vm9, %v6740_v4, %v2102_v49 }
 0x5a2   : > { %v2052_v23 = vadd.f32 %v5499_v21, %v2042_v12  ;;  %9274 = vst [vmem:[#allocation59_spill] sm:$0xff] %v7756_v2  ;;  %v2086_v51 = vadd.f32 %v2080_v61, %v2070_v16 }
 0x5a4   : > { %v2056_v18 = vand.u32 2147483647, %v2052_v23  ;;  %v2072_v49 = vmax.f32 %v2052_v23, 0.0  ;;  %vm2100_vm12 = vcmp.ge.f32.partialorder %v2052_v23, 0.0 }
 0x5a6   : > { %v2060_v22 = vsub.f32 0.0, %v2056_v18 }
 0x5a8   : > { %v6744_v35 = vpop.eup %6743  ;;  %v2067_v11 = vmul.f32 1.442695, %v2060_v22 }
 0x5a9   : > { %v6746_v53 = vpop.eup %6745  ;;  %v2078_v17 = vmul.f32 0.6931472, %v6744_v35 }
 0x5aa   : > { %v6748_v57 = vpop.eup %6747  ;;  %6749 = vpow2.f32 %v2067_v11  ;;  %v2101_v5 = vmul.f32 %v6746_v53, %v6738_v14 }
 0x5ab   : > { %v2085_v31 = vadd.f32 %v2078_v17, %v2069_v9  ;;  %v2075_v50 = vadd.f32 1.0, %v6748_v57  ;;  %v2071_v17 = vmax.f32 %v2051_v43, 0.0  ;;  %v5500_v43 = vld [vmem:[%s9085_s12 + $0x2] ss:$0 sm:$0xff] }
 0x5ac   : > { %v7758_v21 = vsel %vm2097_vm10, %v6746_v53, %v2101_v5 }
 0x5ad   : > { %9275 = vst [vmem:[#allocation60_spill] sm:$0xff] %v7758_v21  ;;  %5921 = vmatprep.mubr.msk.f32.mxu0 %vm896_vm0, %v2085_v31  ;;  %5943 = vmatprep.mubr.msk.f32.mxu1 %vm896_vm0, %v2085_v31  ;;  %6751 = vlog2.f32 %v2075_v50 }
 0x5ae   : > { %5922 = vmatmul.mubr.msk.f32.vlgmr.msra.gmra.mrb[8].mxu0 %vm896_vm0, %v2086_v51  ;;  %5944 = vmatmul.mubr.msk.f32.vlgmr.msra.gmra.mrb[8].mxu1 %vm896_vm0, %v2086_v51  ;;  %6753 = vrcp.f32 %v2075_v50 }
 0x5b4   : > { %v6750_v35 = vpop.eup %6749 }
 0x5b5   : > { %v2076_v4 = vadd.f32 1.0, %v6750_v35 }
 0x5b7   : > { %v6752_v41 = vpop.eup %6751  ;;  %6755 = vlog2.f32 %v2076_v4 }
 0x5b8   : > { %v6754_v20 = vpop.eup %6753  ;;  %v2082_v14 = vmul.f32 0.6931472, %v6752_v41  ;;  %6757 = vrcp.f32 %v2076_v4 }
 0x5b9   : > { %v2103_v16 = vmul.f32 %v6754_v20, %v6748_v57 }
 0x5ba   : > { %v2087_v53 = vadd.f32 %v2082_v14, %v2071_v17 }
 0x5bb   : > { %v7764_v61 = vsel %vm2099_vm11, %v6754_v20, %v2103_v16  ;;  %v5478_v20 = vld [vmem:[%s9254_s27 + $0x4] sm:$0xf] }
 0x5bc   : > { %9276 = vst [vmem:[#allocation61_spill] sm:$0xff] %v7764_v61  ;;  %5924 = vmatprep.mubr.msk.f32.mxu0 %vm896_vm0, %v2087_v53  ;;  %5946 = vmatprep.mubr.msk.f32.mxu1 %vm896_vm0, %v2087_v53  ;;  %v7784_v14 = vrot.slane %v5478_v20, %v7299_v63  ;;  %v7787_v16 = vrot.slane %v5478_v20, %v7296_v62 }
 0x5c1   : > { %v6756_v54 = vpop.eup %6755 }
 0x5c2   : > { %v6758_v12 = vpop.eup %6757  ;;  %v2084_v18 = vmul.f32 0.6931472, %v6756_v54 }
 0x5c3   : > { %v2104_v13 = vmul.f32 %v6758_v12, %v6750_v35 }
 0x5c4   : > { %v2088_v22 = vadd.f32 %v2084_v18, %v2072_v49  ;;  %v1942_v18 = vmul.f32 %v7784_v14, %v7601_v52  ;;  %v7811_v52 = vld [vmem:[%s9087_s14 + $0x2] ss:$0 sm:$0xff] }
 0x5c5   : > { %v7768_v11 = vsel %vm2100_vm12, %v6758_v12, %v2104_v13  ;;  %v7791_v12 = vrot.slane %v5478_v20, %v7152_v33  ;;  %v1950_v13 = vmul.f32 %v7787_v16, %v7603_v34 }
 0x5c6   : > { %9277 = vst [vmem:[#allocation62_spill] sm:$0xff] %v7768_v11  ;;  %5925 = vmatmul.mubr.msk.f32.gmra.mrb[10].mxu0 %vm896_vm0, %v2088_v22  ;;  %5947 = vmatmul.mubr.msk.f32.gmra.mrb[10].mxu1 %vm896_vm0, %v2088_v22  ;;  %v7798_v22 = vrot.slane %v5478_v20, %v7149_v32 }
 0x681   : > { %v5923_v9 = vpop.f32.mrb[8].mxu0  ;;  %v5945_v57 = vpop.f32.mrb[8].mxu1 }
 0x682   : > { %v2199_v5 = vadd.f32 %v5923_v9, %v5500_v43  ;;  %v2193_v31 = vpop.f32.mrb[9].mxu0  ;;  %v2288_v50 = vpop.f32.mrb[9].mxu1  ;;  %v1949_v9 = vmul.f32 %v7787_v16, %v7609_v15  ;;  %v1954_v15 = vadd.f32 %v1950_v13, %v1942_v18 }
 0x683   : > { %v2194_v51 = vadd.f32 %v5500_v43, %v2193_v31  ;;  %v1930_v31 = vmul.f32 %v7791_v12, %v7583_v46  ;;  %v1921_v46 = vmul.f32 %v7798_v22, %v7585_v47  ;;  %v2289_v11 = vadd.f32 %v7811_v52, %v2288_v50 }
 0x684   : > { %v2213_v4 = vmul.f32 0.1, %v2199_v5  ;;  %v1941_v5 = vmul.f32 %v7784_v14, %v7611_v38 }
 0x685   : > { %v2212_v35 = vmul.f32 0.1, %v2194_v51  ;;  %v1929_v51 = vmul.f32 %v7791_v12, %v7587_v60 }
 0x686   : > { %6759 = vtanh.f32 %v2213_v4 }
 0x687   : > { %6761 = vtanh.f32 %v2212_v35  ;;  %v1922_v35 = vmul.f32 %v7798_v22, %v7581_v36 }
 0x689   : > { %v1934_v60 = vadd.f32 %v1930_v31, %v1922_v35 }
 0x68b   : > { %v7819_v2 = vadd.f32 %v1954_v15, %v1934_v60  ;;  %v1951_v60 = vmul.f32 %v7787_v16, %v7627_v55 }
 0x68d   : > { %9280 = vst [vmem:[#allocation65_spill] sm:$0xff] %v7819_v2 }
 0x690   : > { %v7775_v23 = vpop.eup %6759 }
 0x691   : > { %9278 = vst [vmem:[#allocation63_spill] sm:$0xff] %v7775_v23  ;;  %v7777_v41 = vpop.eup %6761  ;;  %v2316_v17 = vmul.f32 2.0, %v7775_v23  ;;  %v1933_v23 = vadd.f32 %v1929_v51, %v1921_v46 }
 0x692   : > { %9279 = vst [vmem:[#allocation64_spill] sm:$0xff] %v7777_v41  ;;  %v2315_v53 = vmul.f32 2.0, %v7777_v41 }
 0x693   : > { %v2333_v54 = vmul.f32 1.442695, %v2316_v17 }
 0x694   : > { %v2331_v49 = vmul.f32 1.442695, %v2315_v53  ;;  %v1953_v53 = vadd.f32 %v1949_v9, %v1941_v5  ;;  %v2307_v9 = vmul.f32 0.1, %v2289_v11 }
 0x695   : > { %6763 = vpow2.f32 %v2333_v54 }
 0x696   : > { %6765 = vpow2.f32 %v2331_v49  ;;  %v2294_v49 = vadd.f32 %v5945_v57, %v7811_v52  ;;  %v7823_v18 = vadd.f32 %v1953_v53, %v1933_v23  ;;  %v2374_v57 = vrot.slane %v7208_v24, %v7299_v63  ;;  %v7836_v23 = vld [vmem:[%s9081_s8] sm:$0xf] }
 0x698   : > { %9282 = vst [vmem:[#allocation67_spill] sm:$0xff] %v7823_v18  ;;  %v2308_v47 = vmul.f32 0.1, %v2294_v49  ;;  %v1932_v49 = vmul.f32 %v7791_v12, %v7618_v26  ;;  %v1923_v26 = vmul.f32 %v7798_v22, %v7595_v27 }
 0x699   : > { %v5926_v34 = vpop.f32.mrb[10].mxu0  ;;  %v5948_v4 = vpop.f32.mrb[10].mxu1 }
 0x69a   : > { %v2209_v20 = vadd.f32 %v5926_v34, %v5500_v43  ;;  %v2203_v17 = vpop.f32.mrb[11].mxu0  ;;  %v2298_v38 = vpop.f32.mrb[11].mxu1 }
 0x69b   : > { %v2204_v54 = vadd.f32 %v5500_v43, %v2203_v17 }
 0x69c   : > { %v2215_v41 = vmul.f32 0.1, %v2209_v20 }
 0x69d   : > { %v2214_v61 = vmul.f32 0.1, %v2204_v54  ;;  %v1944_v54 = vmul.f32 %v7784_v14, %v7637_v30  ;;  %v1924_v30 = vmul.f32 %v7798_v22, %v7593_v40 }
 0x69e   : > { %6767 = vtanh.f32 %v2215_v41 }
 0x69f   : > { %v7821_v36 = vpop.eup %6763  ;;  %6769 = vtanh.f32 %v2214_v61  ;;  %v2382_v61 = vrot.slane %v7836_v23, %v7299_v63 }
 0x6a0   : > { %9281 = vst [vmem:[#allocation66_spill] sm:$0xff] %v7821_v36  ;;  %v7825_v13 = vpop.eup %6765  ;;  %v2348_v43 = vmul.f32 %v7821_v36, %v7819_v2 }
 0x6a1   : > { %9283 = vst [vmem:[#allocation68_spill] sm:$0xff] %v7825_v13  ;;  %v2347_v50 = vmul.f32 %v7825_v13, %v7823_v18 }
 0x6a2   : > { %v2352_v5 = vadd.f32 %v2348_v43, %v2308_v47  ;;  %v1952_v47 = vmul.f32 %v7787_v16, %v7632_v42  ;;  %v1931_v43 = vmul.f32 %v7791_v12, %v7623_v28  ;;  %v1936_v16 = vadd.f32 %v1932_v49, %v1924_v30  ;;  %v5511_v49 = vld [vmem:[%s9254_s27 + $0x8] sm:$0xf] }
 0x6a3   : > { %v2351_v41 = vadd.f32 %v2347_v50, %v2307_v9  ;;  %v1943_v9 = vmul.f32 %v7784_v14, %v7621_v29  ;;  %v2304_v28 = vadd.f32 %v5948_v4, %v7811_v52  ;;  %v2299_v29 = vadd.f32 %v7811_v52, %v2298_v38 }
 0x6a4   : > { %v2376_v31 = vmul.f32 %v2374_v57, %v2352_v5  ;;  %v1956_v55 = vadd.f32 %v1952_v47, %v1944_v54  ;;  %v1935_v12 = vadd.f32 %v1931_v43, %v1923_v26 }
 0x6a5   : > { %v2375_v34 = vmul.f32 %v2374_v57, %v2351_v41  ;;  %v1955_v42 = vadd.f32 %v1951_v60, %v1943_v9  ;;  %v2309_v22 = vmul.f32 0.1, %v2299_v29 }
 0x6a6   : > { %v2384_v51 = vadd.f32 %v2382_v61, %v2376_v31  ;;  %v7869_v14 = vadd.f32 %v1956_v55, %v1936_v16  ;;  %v7910_v55 = vrot.slane %v5511_v49, %v7149_v32 }
 0x6a7   : > { %v2383_v46 = vadd.f32 %v2382_v61, %v2375_v34  ;;  %v7874_v40 = vadd.f32 %v1955_v42, %v1935_v12  ;;  %v7886_v34 = vpop.permute.xlu1 %2398 }
 0x6a8   : > { %v7840_v35 = vpop.eup %6767  ;;  %2480 = vperm.xlu1 %6551, %v2384_v51   ;;  %2454 = vperm.xlu0 %6549, %v2384_v51   ;;  %9286 = vst [vmem:[#allocation71_spill] sm:$0xff] %v7869_v14 }
 0x6a9   : > { %9284 = vst [vmem:[#allocation69_spill] sm:$0xff] %v7840_v35  ;;  %v7842_v11 = vpop.eup %6769  ;;  %v2318_v15 = vmul.f32 2.0, %v7840_v35  ;;  %9288 = vst [vmem:[#allocation73_spill] sm:$0xff] %v7874_v40 }
 0x6aa   : > { %9285 = vst [vmem:[#allocation70_spill] sm:$0xff] %v7842_v11  ;;  %v2317_v20 = vmul.f32 2.0, %v7842_v11 }
 0x6ab   : > { %v2337_v17 = vmul.f32 1.442695, %v2318_v15  ;;  %v7888_v15 = vpop.permute.xlu1 %2424 }
 0x6ac   : > { %v2335_v53 = vmul.f32 1.442695, %v2317_v20  ;;  %6552 = vset.pattern.permute.xlu1 %v9261_v0  ;;  %6553 = vset.pattern.permute.xlu0 %v9237_v19  ;;  %v2394_v20 = vpop.permute.xlu0 %2393 }
 0x6ad   : > { %6771 = vpow2.f32 %v2337_v17  ;;  %2476 = vperm.xlu0 %6553, %v2383_v46   ;;  %2449 = vperm.xlu1 %6552, %v2383_v46  }
 0x6ae   : > { %6773 = vpow2.f32 %v2335_v53 }
 0x6b0   : > { %v7894_v46 = vpop.permute.xlu0 %2408 }
 0x6b1   : > { %2428 = vperm.xlu0 %6553, %v7729_v37   ;;  %6554 = vset.pattern.permute.xlu1 %v9237_v19 }
 0x6b2   : > { %2432 = vperm.xlu1 %6554, %v7645_v10   ;;  %v2310_v10 = vmul.f32 0.1, %v2304_v28  ;;  %v7916_v28 = vrot.slane %v5511_v49, %v7152_v33 }
 0x6b6   : > { %6555 = vset.pattern.permute.xlu1 %v9261_v0 }
 0x6b7   : > { %v7872_v37 = vpop.eup %6771 }
 0x6b8   : > { %9287 = vst [vmem:[#allocation72_spill] sm:$0xff] %v7872_v37  ;;  %v7876_v50 = vpop.eup %6773  ;;  %v2350_v27 = vmul.f32 %v7872_v37, %v7869_v14 }
 0x6b9   : > { %9289 = vst [vmem:[#allocation74_spill] sm:$0xff] %v7876_v50  ;;  %v2349_v4 = vmul.f32 %v7876_v50, %v7874_v40 }
 0x6ba   : > { %v2354_v5 = vadd.f32 %v2350_v27, %v2310_v10 }
 0x6bb   : > { %v2353_v52 = vadd.f32 %v2349_v4, %v2309_v22  ;;  %v7920_v22 = vrot.slane %v5511_v49, %v7299_v63  ;;  %v7923_v4 = vrot.slane %v5511_v49, %v7296_v62 }
 0x6bc   : > { %v2378_v38 = vmul.f32 %v2374_v57, %v2354_v5 }
 0x6bd   : > { %v2377_v41 = vmul.f32 %v2374_v57, %v2353_v52  ;;  %v2421_v57 = vpop.permute.xlu1 %2420  ;;  %v2511_v52 = vmul.f32 %v7910_v55, %v2394_v20 }
 0x6be   : > { %v2386_v31 = vadd.f32 %v2382_v61, %v2378_v38  ;;  %v2519_v27 = vmul.f32 %v7916_v28, %v2421_v57 }
 0x6bf   : > { %v2385_v51 = vadd.f32 %v2382_v61, %v2377_v41  ;;  %v5510_v61 = vld [vmem:[%s9236_s6 + $0x8] sm:$0xf] }
 0x6c0   : > { %2488 = vperm.xlu0 %6553, %v2386_v31   ;;  %v2438_v17 = vrot.slane %v5510_v61, %v7152_v33  ;;  %v2470_v54 = vrot.slane %v5510_v61, %v7299_v63  ;;  %v2494_v60 = vrot.slane %v5510_v61, %v7296_v62  ;;  %v2414_v47 = vrot.slane %v5510_v61, %v7149_v32 }
 0x6c1   : > { %2459 = vperm.xlu1 %6555, %v2385_v51   ;;  %v7896_v53 = vpop.permute.xlu1 %2403 }
 0x6c2   : > { %v2440_v43 = vmul.f32 %v2438_v17, %v7888_v15  ;;  %v2416_v26 = vmul.f32 %v2414_v47, %v7886_v34  ;;  %v2439_v10 = vmul.f32 %v2438_v17, %v2421_v57  ;;  %v2415_v5 = vmul.f32 %v2414_v47, %v2394_v20 }
 0x6c4   : > { %6558 = vset.pattern.permute.xlu0 %v9261_v0  ;;  %v2444_v12 = vadd.f32 %v2440_v43, %v2416_v26  ;;  %v2443_v57 = vadd.f32 %v2439_v10, %v2415_v5 }
 0x6c5   : > { %6556 = vset.pattern.permute.xlu1 %v9237_v19 }
 0x6c6   : > { %2484 = vperm.xlu1 %6556, %v2385_v51  }
 0x6ca   : > { %6557 = vset.pattern.permute.xlu1 %v9261_v0 }
 0x6cb   : > { %2464 = vperm.xlu1 %6557, %v2386_v31  }
 0x6cf   : > { %6559 = vset.pattern.permute.xlu1 %v9237_v19 }
 0x727   : > { %v7905_v9 = vpop.permute.xlu0 %2454  ;;  %v7907_v30 = vpop.permute.xlu1 %2480 }
 0x728   : > { %v2472_v42 = vmul.f32 %v2470_v54, %v7905_v9  ;;  %v2496_v16 = vmul.f32 %v2494_v60, %v7907_v30 }
 0x72a   : > { %v2500_v29 = vadd.f32 %v2496_v16, %v2472_v42  ;;  %v2523_v42 = vadd.f32 %v2519_v27, %v2511_v52  ;;  %v2417_v27 = vmul.f32 %v2414_v47, %v7896_v53 }
 0x72c   : > { %v2477_v38 = vpop.permute.xlu0 %2476  ;;  %v2450_v41 = vpop.permute.xlu1 %2449  ;;  %v2504_v31 = vadd.f32 %v2500_v29, %v2444_v12 }
 0x72d   : > { %v2495_v51 = vmul.f32 %v2494_v60, %v2477_v38  ;;  %v2539_v61 = vmul.f32 %v7923_v4, %v2477_v38  ;;  %v2471_v43 = vmul.f32 %v2470_v54, %v2450_v41  ;;  %v2531_v26 = vmul.f32 %v7920_v22, %v2450_v41 }
 0x72e   : > { %2610 = vperm.xlu1 %6559, %v2504_v31   ;;  %2584 = vperm.xlu0 %6558, %v2504_v31  }
 0x72f   : > { %v2499_v16 = vadd.f32 %v2495_v51, %v2471_v43  ;;  %v2543_v40 = vadd.f32 %v2539_v61, %v2531_v26  ;;  %v7951_v43 = vrot.slane %v7236_v39, %v7296_v62 }
 0x730   : > { %v7938_v29 = vpop.permute.xlu0 %2428 }
 0x731   : > { %v2503_v49 = vadd.f32 %v2499_v16, %v2443_v57  ;;  %v7928_v14 = vadd.f32 %v2543_v40, %v2523_v42  ;;  %v7933_v20 = vpop.permute.xlu1 %2432  ;;  %v2441_v10 = vmul.f32 %v2438_v17, %v7938_v29  ;;  %v2418_v42 = vmul.f32 %v2414_v47, %v7894_v46 }
 0x732   : > { %6560 = vset.pattern.permute.xlu1 %v9261_v0  ;;  %6563 = vset.pattern.permute.xlu0 %v9237_v19  ;;  %v2442_v61 = vmul.f32 %v2438_v17, %v7933_v20 }
 0x733   : > { %2579 = vperm.xlu1 %6560, %v2503_v49   ;;  %v2445_v38 = vadd.f32 %v2441_v10, %v2417_v27  ;;  %v2949_v10 = vmul.f32 %v7951_v43, %v2503_v49 }
 0x734   : > { %v2446_v17 = vadd.f32 %v2442_v61, %v2418_v42 }
 0x737   : > { %6561 = vset.pattern.permute.xlu1 %v9237_v19 }
 0x738   : > { %2606 = vperm.xlu1 %6561, %v2503_v49   ;;  %v5523_v49 = vld [vmem:[%s9086_s13 + $0xc0] sm:$0xff] }
 0x73c   : > { %6562 = vset.pattern.permute.xlu1 %v9261_v0 }
 0x73f   : > { %v7946_v41 = vpop.permute.xlu0 %2488 }
 0x740   : > { %v7936_v12 = vpop.permute.xlu1 %2459  ;;  %v2498_v16 = vmul.f32 %v2494_v60, %v7946_v41 }
 0x741   : > { %v2473_v5 = vmul.f32 %v2470_v54, %v7936_v12 }
 0x745   : > { %v7941_v40 = vpop.permute.xlu1 %2484 }
 0x746   : > { %v2497_v52 = vmul.f32 %v2494_v60, %v7941_v40  ;;  %v5514_v60 = vld [vmem:[%s9084_s11 + $0xc0] sm:$0xff] }
 0x748   : > { %v2501_v51 = vadd.f32 %v2497_v52, %v2473_v5  ;;  %v6884_v5 = vld [vmem:[%s9233_s3] sm:$0xf] }
 0x749   : > { %v2956_v52 = vrot.slane %v6884_v5, %v7296_v62  ;;  %v5525_v5 = vld [vmem:[%s9086_s13 + $0xd0] sm:$0xff] }
 0x74a   : > { %v7953_v26 = vpop.permute.xlu1 %2464  ;;  %v7955_v57 = vadd.f32 %v2501_v51, %v2445_v38  ;;  %v5524_v51 = vld [vmem:[%s9086_s13 + $0xc8] sm:$0xff] }
 0x74b   : > { %v2474_v50 = vmul.f32 %v2470_v54, %v7953_v26  ;;  %v2957_v38 = vadd.f32 %v2956_v52, %v2949_v10  ;;  %v2950_v10 = vmul.f32 %v7951_v43, %v2504_v31  ;;  %v5526_v31 = vld [vmem:[%s9086_s13 + $0xd8] sm:$0xff] }
 0x74c   : > { %2614 = vperm.xlu0 %6563, %v7955_v57   ;;  %2589 = vperm.xlu1 %6562, %v7955_v57  }
 0x74d   : > { %v2502_v27 = vadd.f32 %v2498_v16, %v2474_v50  ;;  %v5515_v50 = vld [vmem:[%s9084_s11 + $0xc8] sm:$0xff]  ;;  %v7985_v16 = vpack.c.bf16 %v5524_v51, %v5523_v49  ;;  %v5527_v51 = vld [vmem:[%s9086_s13 + $0xe0] sm:$0xff] }
 0x74e   : > { %v7983_v42 = vpack.c.bf16 %v5515_v50, %v5514_v60  ;;  %v8007_v60 = vpack.c.bf16 %v5526_v31, %v5525_v5  ;;  %v2958_v50 = vadd.f32 %v2956_v52, %v2950_v10  ;;  %v5519_v49 = vld [vmem:[%s9084_s11 + $0xe8] sm:$0xff]  ;;  %v5520_v5 = vld [vmem:[%s9084_s11 + $0xf0] sm:$0xff]  ;;  %v5521_v31 = vld [vmem:[%s9084_s11 + $0xf8] sm:$0xff] }
 0x74f   : > { %v2506_v47 = vadd.f32 %v2502_v27, %v2446_v17  ;;  %v5516_v17 = vld [vmem:[%s9084_s11 + $0xd0] sm:$0xff]  ;;  %v5517_v27 = vld [vmem:[%s9084_s11 + $0xd8] sm:$0xff]  ;;  %6324 = vmatprep.subr.bf16.mxu1 %v7985_v16  ;;  %v5528_v10 = vld [vmem:[%s9086_s13 + $0xe8] sm:$0xff] }
 0x750   : > { %6567 = vset.pattern.permute.xlu0 %v9261_v0  ;;  %6308 = vmatprep.subr.bf16.mxu0 %v7983_v42 }
 0x751   : > { %2983 = vperm.xlu0 %6567, %v2957_v38   ;;  %2594 = vperm.xlu1 %6562, %v2506_v47   ;;  %v2952_v54 = vmul.f32 %v7951_v43, %v2506_v47 }
 0x752   : > { %6310 = vmatpush3.bf16.msra.mxu0 %v7983_v42  ;;  %6326 = vmatpush3.bf16.msra.mxu1 %v7985_v16 }
 0x753   : > { %v7981_v61 = vadd.f32 %v2956_v52, %v2952_v54  ;;  %v8000_v54 = vpack.c.bf16 %v5517_v27, %v5516_v17  ;;  %6328 = vmatprep.subr.bf16.mxu1 %v8007_v60  ;;  %v8028_v27 = vpack.c.bf16 %v5528_v10, %v5527_v51  ;;  %v5530_v51 = vld [vmem:[%s9086_s13 + $0xf8] sm:$0xff] }
 0x755   : > { %6564 = vset.pattern.permute.xlu1 %v9237_v19  ;;  %2998 = vperm.xlu0 %6567, %v7981_v61  }
 0x756   : > { %2618 = vperm.xlu1 %6564, %v2506_v47   ;;  %6312 = vmatprep.subr.bf16.mxu0 %v8000_v54  ;;  %v5518_v47 = vld [vmem:[%s9084_s11 + $0xe0] sm:$0xff] }
 0x757   : > { %v8022_v17 = vpack.c.bf16 %v5519_v49, %v5518_v47  ;;  %6314 = vmatpush3.bf16.msra.mxu0 %v8000_v54  ;;  %6330 = vmatpush3.bf16.msra.mxu1 %v8007_v60  ;;  %v5529_v47 = vld [vmem:[%s9086_s13 + $0xf0] sm:$0xff]  ;;  %v8042_v49 = vpack.c.bf16 %v5521_v31, %v5520_v5  ;;  %v2951_v5 = vmul.f32 %v7951_v43, %v7955_v57 }
 0x758   : > { %6332 = vmatprep.subr.bf16.mxu1 %v8028_v27  ;;  %v8049_v10 = vpack.c.bf16 %v5530_v51, %v5529_v47 }
 0x759   : > { %6316 = vmatprep.subr.bf16.mxu0 %v8022_v17  ;;  %v8058_v31 = vadd.f32 %v2956_v52, %v2951_v5  ;;  %v5532_v5 = vld [vmem:[%s9083_s10 + $0x3] ss:$0 sm:$0xff] }
 0x75a   : > { %6565 = vset.pattern.permute.xlu1 %v9261_v0 }
 0x75b   : > { %2988 = vperm.xlu1 %6565, %v2958_v50   ;;  %6318 = vmatpush3.bf16.msra.mxu0 %v8022_v17 }
 0x75c   : > { %6334 = vmatpush3.bf16.msra.mxu1 %v8028_v27  ;;  %6320 = vmatprep.subr.bf16.mxu0 %v8042_v49 }
 0x75d   : > { %6336 = vmatprep.subr.bf16.mxu1 %v8049_v10 }
 0x75f   : > { %6566 = vset.pattern.permute.xlu1 %v9237_v19  ;;  %6322 = vmatpush3.bf16.msra.mxu0 %v8042_v49 }
 0x760   : > { %3014 = vperm.xlu1 %6566, %v2958_v50   ;;  %6338 = vmatpush3.bf16.msra.mxu1 %v8049_v10  ;;  %v5512_v50 = vld [vmem:[%s9082_s9 + $0x6] sm:$0x3] }
 0x761   : > { %v8067_v47 = vrot.slane %v5512_v50, %v7149_v32  ;;  %v8070_v43 = vrot.slane %v5512_v50, %v7152_v33 }
 0x764   : > { %3010 = vperm.xlu1 %6566, %v2957_v38  }
 0x768   : > { %6568 = vset.pattern.permute.xlu1 %v9261_v0 }
 0x769   : > { %2993 = vperm.xlu1 %6568, %v8058_v31  }
 0x76d   : > { %6569 = vset.pattern.permute.xlu1 %v9237_v19 }
 0x7ad   : > { %v2585_v57 = vpop.permute.xlu0 %2584  ;;  %v2611_v38 = vpop.permute.xlu1 %2610 }
 0x7ae   : > { %v2602_v52 = vmul.f32 %v8067_v47, %v2585_v57  ;;  %v2626_v51 = vmul.f32 %v8070_v43, %v2611_v38 }
 0x7b0   : > { %v2630_v11 = vadd.f32 %v2626_v51, %v2602_v52 }
 0x7b2   : > { %v2640_v37 = vadd.f32 %v5532_v5, %v2630_v11  ;;  %v2580_v35 = vpop.permute.xlu1 %2579 }
 0x7b3   : > { %v2601_v50 = vmul.f32 %v8067_v47, %v2580_v35 }
 0x7b4   : > { %v2644_v18 = vand.u32 2147483647, %v2640_v37  ;;  %vm2688_vm13 = vcmp.ge.f32.partialorder %v2640_v37, 0.0  ;;  %v2660_v39 = vmax.f32 %v2640_v37, 0.0 }
 0x7b6   : > { %v2648_v2 = vsub.f32 0.0, %v2644_v18 }
 0x7b7   : > { %v2607_v13 = vpop.permute.xlu1 %2606 }
 0x7b8   : > { %v2653_v36 = vmul.f32 1.442695, %v2648_v2  ;;  %v2625_v21 = vmul.f32 %v8070_v43, %v2607_v13 }
 0x7ba   : > { %6775 = vpow2.f32 %v2653_v36  ;;  %v2629_v3 = vadd.f32 %v2625_v21, %v2601_v50 }
 0x7bc   : > { %v2639_v57 = vadd.f32 %v5532_v5, %v2629_v3 }
 0x7be   : > { %v2643_v56 = vand.u32 2147483647, %v2639_v57  ;;  %vm2687_vm14 = vcmp.ge.f32.partialorder %v2639_v57, 0.0 }
 0x7c0   : > { %v2647_v38 = vsub.f32 0.0, %v2643_v56 }
 0x7c2   : > { %v2651_v1 = vmul.f32 1.442695, %v2647_v38 }
 0x7c4   : > { %v6776_v45 = vpop.eup %6775  ;;  %6777 = vpow2.f32 %v2651_v1 }
 0x7c5   : > { %v2664_v25 = vadd.f32 1.0, %v6776_v45 }
 0x7c7   : > { %6779 = vrcp.f32 %v2664_v25 }
 0x7c8   : > { %6781 = vlog2.f32 %v2664_v25 }
 0x7cb   : > { %v2615_v11 = vpop.permute.xlu0 %2614  ;;  %v2590_v52 = vpop.permute.xlu1 %2589 }
 0x7cc   : > { %v2627_v18 = vmul.f32 %v8070_v43, %v2615_v11  ;;  %v2603_v2 = vmul.f32 %v8067_v47, %v2590_v52 }
 0x7ce   : > { %v6778_v51 = vpop.eup %6777  ;;  %v2631_v35 = vadd.f32 %v2627_v18, %v2603_v2 }
 0x7cf   : > { %v2663_v13 = vadd.f32 1.0, %v6778_v51 }
 0x7d0   : > { %v2641_v36 = vadd.f32 %v5532_v5, %v2631_v35  ;;  %v2595_v21 = vpop.permute.xlu1 %2594 }
 0x7d1   : > { %6783 = vlog2.f32 %v2663_v13  ;;  %v6780_v3 = vpop.eup %6779  ;;  %v2604_v11 = vmul.f32 %v8067_v47, %v2595_v21 }
 0x7d2   : > { %v2645_v56 = vand.u32 2147483647, %v2641_v36  ;;  %6785 = vrcp.f32 %v2663_v13  ;;  %v2692_v50 = vmul.f32 %v6780_v3, %v6776_v45  ;;  %v6782_v25 = vpop.eup %6781  ;;  %v2659_v13 = vmax.f32 %v2639_v57, 0.0 }
 0x7d3   : > { %v2670_v44 = vmul.f32 0.6931472, %v6782_v25  ;;  %vm2689_vm15 = vcmp.ge.f32.partialorder %v2641_v36, 0.0 }
 0x7d4   : > { %v2649_v1 = vsub.f32 0.0, %v2645_v56  ;;  %v8081_v59 = vsel %vm2688_vm13, %v6780_v3, %v2692_v50 }
 0x7d5   : > { %v2619_v38 = vpop.permute.xlu1 %2618  ;;  %9290 = vst [vmem:[#allocation75_spill] sm:$0xff] %v8081_v59 }
 0x7d6   : > { %v2655_v8 = vmul.f32 1.442695, %v2649_v1  ;;  %v2628_v52 = vmul.f32 %v8070_v43, %v2619_v38  ;;  %v2676_v1 = vadd.f32 %v2670_v44, %v2660_v39 }
 0x7d8   : > { %6787 = vpow2.f32 %v2655_v8  ;;  %v2632_v18 = vadd.f32 %v2628_v52, %v2604_v11 }
 0x7da   : > { %v2642_v2 = vadd.f32 %v5532_v5, %v2632_v18 }
 0x7db   : > { %v6784_v35 = vpop.eup %6783 }
 0x7dc   : > { %v6786_v58 = vpop.eup %6785  ;;  %v2646_v48 = vand.u32 2147483647, %v2642_v2  ;;  %v2668_v45 = vmul.f32 0.6931472, %v6784_v35  ;;  %v2662_v18 = vmax.f32 %v2642_v2, 0.0  ;;  %vm2690_vm1 = vcmp.ge.f32.partialorder %v2642_v2, 0.0 }
 0x7dd   : > { %v2691_v56 = vmul.f32 %v6786_v58, %v6778_v51 }
 0x7de   : > { %v2650_v3 = vsub.f32 0.0, %v2646_v48  ;;  %v2675_v50 = vadd.f32 %v2668_v45, %v2659_v13 }
 0x7df   : > { %v8085_v59 = vsel %vm2687_vm14, %v6786_v58, %v2691_v56  ;;  %v2661_v58 = vmax.f32 %v2641_v36, 0.0  ;;  %v5533_v36 = vld [vmem:[%s9085_s12 + $0x3] ss:$0 sm:$0xff] }
 0x7e0   : > { %v2657_v21 = vmul.f32 1.442695, %v2650_v3  ;;  %5965 = vmatprep.mubr.msk.f32.mxu0 %vm896_vm0, %v2675_v50  ;;  %5987 = vmatprep.mubr.msk.f32.mxu1 %vm896_vm0, %v2675_v50 }
 0x7e1   : > { %5966 = vmatmul.mubr.msk.f32.vlgmr.msra.gmra.mrb[12].mxu0 %vm896_vm0, %v2676_v1  ;;  %5988 = vmatmul.mubr.msk.f32.vlgmr.msra.gmra.mrb[12].mxu1 %vm896_vm0, %v2676_v1 }
 0x7e2   : > { %v6788_v8 = vpop.eup %6787  ;;  %6789 = vpow2.f32 %v2657_v21 }
 0x7e3   : > { %v2665_v5 = vadd.f32 1.0, %v6788_v8 }
 0x7e5   : > { %6791 = vlog2.f32 %v2665_v5 }
 0x7e6   : > { %6793 = vrcp.f32 %v2665_v5 }
 0x7ec   : > { %v6790_v37 = vpop.eup %6789 }
 0x7ed   : > { %v2666_v48 = vadd.f32 1.0, %v6790_v37 }
 0x7ef   : > { %v6792_v57 = vpop.eup %6791  ;;  %6795 = vlog2.f32 %v2666_v48 }
 0x7f0   : > { %v6794_v39 = vpop.eup %6793  ;;  %v2672_v44 = vmul.f32 0.6931472, %v6792_v57  ;;  %6797 = vrcp.f32 %v2666_v48 }
 0x7f1   : > { %v2693_v51 = vmul.f32 %v6794_v39, %v6788_v8 }
 0x7f2   : > { %v2677_v38 = vadd.f32 %v2672_v44, %v2661_v58 }
 0x7f3   : > { %v8091_v11 = vsel %vm2689_vm15, %v6794_v39, %v2693_v51 }
 0x7f4   : > { %5968 = vmatprep.mubr.msk.f32.mxu0 %vm896_vm0, %v2677_v38  ;;  %5990 = vmatprep.mubr.msk.f32.mxu1 %vm896_vm0, %v2677_v38  ;;  %v2532_v38 = vmul.f32 %v7920_v22, %v7905_v9 }
 0x7f9   : > { %v6796_v52 = vpop.eup %6795 }
 0x7fa   : > { %v6798_v25 = vpop.eup %6797  ;;  %v2674_v35 = vmul.f32 0.6931472, %v6796_v52  ;;  %v2540_v52 = vmul.f32 %v7923_v4, %v7907_v30 }
 0x7fb   : > { %v2694_v13 = vmul.f32 %v6798_v25, %v6790_v37 }
 0x7fc   : > { %v2678_v45 = vadd.f32 %v2674_v35, %v2662_v18  ;;  %v5538_v18 = vld [vmem:[%s9087_s14 + $0x3] ss:$0 sm:$0xff]  ;;  %v2512_v35 = vmul.f32 %v7910_v55, %v7886_v34  ;;  %v2964_v34 = vrot.slane %v7208_v24, %v7296_v62 }
 0x7fd   : > { %v8095_v56 = vsel %vm2690_vm1, %v6798_v25, %v2694_v13  ;;  %v2520_v25 = vmul.f32 %v7916_v28, %v7888_v15  ;;  %v2544_v13 = vadd.f32 %v2540_v52, %v2532_v38  ;;  %v2972_v52 = vrot.slane %v7836_v23, %v7296_v62 }
 0x7fe   : > { %5969 = vmatmul.mubr.msk.f32.gmra.mrb[14].mxu0 %vm896_vm0, %v2678_v45  ;;  %5991 = vmatmul.mubr.msk.f32.gmra.mrb[14].mxu1 %vm896_vm0, %v2678_v45 }
 0x7ff   : > { %v2524_v45 = vadd.f32 %v2520_v25, %v2512_v35 }
 0x8b4   : > { %v5967_v3 = vpop.f32.mrb[12].mxu0  ;;  %v5989_v50 = vpop.f32.mrb[12].mxu1 }
 0x8b5   : > { %v2789_v1 = vadd.f32 %v5967_v3, %v5533_v36  ;;  %v2783_v21 = vpop.f32.mrb[13].mxu0  ;;  %v2878_v8 = vpop.f32.mrb[13].mxu1  ;;  %v2884_v3 = vadd.f32 %v5989_v50, %v5538_v18 }
 0x8b6   : > { %v2784_v5 = vadd.f32 %v5533_v36, %v2783_v21  ;;  %v8119_v21 = vadd.f32 %v2544_v13, %v2524_v45 }
 0x8b7   : > { %v2803_v48 = vmul.f32 0.1, %v2789_v1  ;;  %v2879_v1 = vadd.f32 %v5538_v18, %v2878_v8 }
 0x8b8   : > { %v2802_v37 = vmul.f32 0.1, %v2784_v5  ;;  %9291 = vst [vmem:[#allocation76_spill] sm:$0xff] %v8119_v21 }
 0x8b9   : > { %6799 = vtanh.f32 %v2803_v48  ;;  %v2897_v8 = vmul.f32 0.1, %v2879_v1 }
 0x8ba   : > { %6801 = vtanh.f32 %v2802_v37 }
 0x8c3   : > { %v8102_v2 = vpop.eup %6799 }
 0x8c4   : > { %v8104_v57 = vpop.eup %6801  ;;  %v2906_v39 = vmul.f32 2.0, %v8102_v2 }
 0x8c5   : > { %v2905_v58 = vmul.f32 2.0, %v8104_v57 }
 0x8c6   : > { %v2923_v44 = vmul.f32 1.442695, %v2906_v39 }
 0x8c7   : > { %v2921_v51 = vmul.f32 1.442695, %v2905_v58  ;;  %v2898_v58 = vmul.f32 0.1, %v2884_v3 }
 0x8c8   : > { %6803 = vpow2.f32 %v2923_v44 }
 0x8c9   : > { %6805 = vpow2.f32 %v2921_v51 }
 0x8d1   : > { %v5970_v9 = vpop.f32.mrb[14].mxu0  ;;  %v5992_v5 = vpop.f32.mrb[14].mxu1 }
 0x8d2   : > { %v8121_v30 = vpop.eup %6803  ;;  %v2799_v48 = vadd.f32 %v5970_v9, %v5533_v36  ;;  %v2793_v37 = vpop.f32.mrb[15].mxu0 }
 0x8d3   : > { %v2888_v15 = vpop.f32.mrb[15].mxu1  ;;  %v8123_v39 = vpop.eup %6805  ;;  %v2938_v44 = vmul.f32 %v8121_v30, %v8119_v21  ;;  %v2794_v50 = vadd.f32 %v5533_v36, %v2793_v37 }
 0x8d4   : > { %v2937_v51 = vmul.f32 %v8123_v39, %v7928_v14  ;;  %v2805_v38 = vmul.f32 0.1, %v2799_v48 }
 0x8d5   : > { %v2942_v25 = vadd.f32 %v2938_v44, %v2898_v58  ;;  %v2804_v35 = vmul.f32 0.1, %v2794_v50  ;;  %v2534_v44 = vmul.f32 %v7920_v22, %v7953_v26  ;;  %v2522_v50 = vmul.f32 %v7916_v28, %v7933_v20 }
 0x8d6   : > { %v2941_v13 = vadd.f32 %v2937_v51, %v2897_v8  ;;  %6807 = vtanh.f32 %v2805_v38  ;;  %v2542_v8 = vmul.f32 %v7923_v4, %v7946_v41  ;;  %v2533_v51 = vmul.f32 %v7920_v22, %v7936_v12 }
 0x8d7   : > { %v2966_v45 = vmul.f32 %v2964_v34, %v2942_v25  ;;  %6809 = vtanh.f32 %v2804_v35  ;;  %v2514_v26 = vmul.f32 %v7910_v55, %v7894_v46  ;;  %v2894_v25 = vadd.f32 %v5992_v5, %v5538_v18 }
 0x8d8   : > { %v2965_v9 = vmul.f32 %v2964_v34, %v2941_v13 }
 0x8d9   : > { %v2974_v3 = vadd.f32 %v2972_v52, %v2966_v45  ;;  %v2526_v20 = vadd.f32 %v2522_v50, %v2514_v26  ;;  %v2900_v12 = vmul.f32 0.1, %v2894_v25 }
 0x8da   : > { %v2973_v21 = vadd.f32 %v2972_v52, %v2965_v9  ;;  %v2989_v9 = vpop.permute.xlu1 %2988 }
 0x8db   : > { %3070 = vperm.xlu1 %6569, %v2974_v3   ;;  %3044 = vperm.xlu0 %6567, %v2974_v3  }
 0x8df   : > { %6570 = vset.pattern.permute.xlu1 %v9261_v0  ;;  %6571 = vset.pattern.permute.xlu0 %v9237_v19 }
 0x8e0   : > { %v8135_v36 = vpop.eup %6807  ;;  %3066 = vperm.xlu0 %6571, %v2973_v21   ;;  %3039 = vperm.xlu1 %6570, %v2973_v21   ;;  %v2541_v21 = vmul.f32 %v7923_v4, %v7941_v40  ;;  %v2513_v40 = vmul.f32 %v7910_v55, %v7896_v53  ;;  %v2889_v4 = vadd.f32 %v5538_v18, %v2888_v15 }
 0x8e1   : > { %v8137_v23 = vpop.eup %6809  ;;  %v2908_v1 = vmul.f32 2.0, %v8135_v36 }
 0x8e2   : > { %v2907_v48 = vmul.f32 2.0, %v8137_v23  ;;  %v2545_v38 = vadd.f32 %v2541_v21, %v2533_v51  ;;  %v2899_v13 = vmul.f32 0.1, %v2889_v4 }
 0x8e3   : > { %v2927_v37 = vmul.f32 1.442695, %v2908_v1  ;;  %v3015_v1 = vpop.permute.xlu1 %3014 }
 0x8e4   : > { %v2925_v58 = vmul.f32 1.442695, %v2907_v48  ;;  %3018 = vperm.xlu0 %6571, %v8058_v31   ;;  %6572 = vset.pattern.permute.xlu1 %v9237_v19  ;;  %v2521_v31 = vmul.f32 %v7916_v28, %v7938_v29  ;;  %v2984_v48 = vpop.permute.xlu0 %2983 }
 0x8e5   : > { %6811 = vpow2.f32 %v2927_v37  ;;  %3022 = vperm.xlu1 %6572, %v7981_v61   ;;  %v2546_v61 = vadd.f32 %v2542_v8, %v2534_v44 }
 0x8e6   : > { %6813 = vpow2.f32 %v2925_v58  ;;  %v2525_v35 = vadd.f32 %v2521_v31, %v2513_v40  ;;  %v5543_v58 = vld [vmem:[%s9236_s6 + $0xc] sm:$0xf] }
 0x8e7   : > { %v8161_v41 = vadd.f32 %v2546_v61, %v2526_v20  ;;  %v3011_v37 = vpop.permute.xlu1 %3010  ;;  %v8189_v50 = vrot.slane %v5543_v58, %v7299_v63  ;;  %v8195_v31 = vrot.slane %v5543_v58, %v7296_v62  ;;  %v8201_v26 = vrot.slane %v5543_v58, %v7149_v32 }
 0x8e8   : > { %v8165_v29 = vadd.f32 %v2545_v38, %v2525_v35  ;;  %v8184_v44 = vpop.permute.xlu0 %2998 }
 0x8e9   : > { %6573 = vset.pattern.permute.xlu1 %v9261_v0  ;;  %9292 = vst [vmem:[#allocation77_spill] sm:$0xff] %v8161_v41  ;;  %v3006_v38 = vmul.f32 %v8201_v26, %v2989_v9 }
 0x8ea   : > { %9293 = vst [vmem:[#allocation78_spill] sm:$0xff] %v8165_v29 }
 0x8eb   : > { %v8186_v21 = vpop.permute.xlu1 %2993 }
 0x8ef   : > { %v8163_v28 = vpop.eup %6811 }
 0x8f0   : > { %v8167_v22 = vpop.eup %6813  ;;  %v2940_v46 = vmul.f32 %v8163_v28, %v8161_v41 }
 0x8f1   : > { %v2939_v53 = vmul.f32 %v8167_v22, %v8165_v29 }
 0x8f2   : > { %v2944_v55 = vadd.f32 %v2940_v46, %v2900_v12 }
 0x8f3   : > { %v2943_v5 = vadd.f32 %v2939_v53, %v2899_v13 }
 0x8f4   : > { %v2968_v45 = vmul.f32 %v2964_v34, %v2944_v55 }
 0x8f5   : > { %v2967_v18 = vmul.f32 %v2964_v34, %v2943_v5  ;;  %v8179_v34 = vrot.slane %v5543_v58, %v7152_v33 }
 0x8f6   : > { %v2976_v15 = vadd.f32 %v2972_v52, %v2968_v45 }
 0x8f7   : > { %v2975_v3 = vadd.f32 %v2972_v52, %v2967_v18  ;;  %v5544_v52 = vld [vmem:[%s9254_s27 + $0xc] sm:$0xf]  ;;  %v3030_v40 = vmul.f32 %v8179_v34, %v3015_v1 }
 0x8f8   : > { %3078 = vperm.xlu0 %6571, %v2976_v15   ;;  %v8192_v8 = vrot.slane %v5544_v52, %v7299_v63  ;;  %v8198_v51 = vrot.slane %v5544_v52, %v7296_v62  ;;  %v8204_v61 = vrot.slane %v5544_v52, %v7152_v33  ;;  %v8213_v13 = vrot.slane %v5544_v52, %v7149_v32 }
 0x8f9   : > { %3049 = vperm.xlu1 %6573, %v2975_v3   ;;  %v3034_v53 = vadd.f32 %v3030_v40, %v3006_v38 }
 0x8fa   : > { %v3110_v55 = vmul.f32 %v8204_v61, %v3015_v1  ;;  %v3109_v45 = vmul.f32 %v8204_v61, %v3011_v37  ;;  %v3102_v18 = vmul.f32 %v8213_v13, %v2989_v9 }
 0x8fc   : > { %v3114_v52 = vadd.f32 %v3110_v55, %v3102_v18  ;;  %v3007_v18 = vmul.f32 %v8201_v26, %v8186_v21 }
 0x8fd   : > { %6574 = vset.pattern.permute.xlu1 %v9237_v19 }
 0x8fe   : > { %3074 = vperm.xlu1 %6574, %v2975_v3  }
 0x902   : > { %6575 = vset.pattern.permute.xlu1 %v9261_v0 }
 0x903   : > { %3054 = vperm.xlu1 %6575, %v2976_v15  }
 0x95a   : > { %v3045_v20 = vpop.permute.xlu0 %3044  ;;  %v3071_v25 = vpop.permute.xlu1 %3070 }
 0x95b   : > { %v3062_v35 = vmul.f32 %v8189_v50, %v3045_v20  ;;  %v3122_v4 = vmul.f32 %v8192_v8, %v3045_v20  ;;  %v3086_v12 = vmul.f32 %v8195_v31, %v3071_v25  ;;  %v3130_v46 = vmul.f32 %v8198_v51, %v3071_v25 }
 0x95c   : > { %v3101_v20 = vmul.f32 %v8213_v13, %v2984_v48 }
 0x95d   : > { %v3090_v5 = vadd.f32 %v3086_v12, %v3062_v35  ;;  %v3134_v15 = vadd.f32 %v3130_v46, %v3122_v4  ;;  %v3029_v4 = vmul.f32 %v8179_v34, %v3011_v37  ;;  %v3005_v46 = vmul.f32 %v8201_v26, %v2984_v48 }
 0x95e   : > { %v3113_v40 = vadd.f32 %v3109_v45, %v3101_v20 }
 0x95f   : > { %v3067_v3 = vpop.permute.xlu0 %3066  ;;  %v3040_v58 = vpop.permute.xlu1 %3039  ;;  %v3094_v29 = vadd.f32 %v3090_v5, %v3034_v53  ;;  %v3138_v38 = vadd.f32 %v3134_v15, %v3114_v52 }
 0x960   : > { %v3129_v41 = vmul.f32 %v8198_v51, %v3067_v3  ;;  %v3121_v25 = vmul.f32 %v8192_v8, %v3040_v58  ;;  %v3085_v12 = vmul.f32 %v8195_v31, %v3067_v3  ;;  %v3061_v9 = vmul.f32 %v8189_v50, %v3040_v58 }
 0x961   : > { %3175 = vperm.xlu0 %6571, %v3094_v29   ;;  %3149 = vperm.xlu1 %6575, %v3094_v29   ;;  %v3033_v29 = vadd.f32 %v3029_v4, %v3005_v46  ;;  %v3103_v4 = vmul.f32 %v8213_v13, %v8186_v21  ;;  %v3104_v21 = vmul.f32 %v8213_v13, %v8184_v44  ;;  %v3308_v13 = vld [vmem:[%s9090_s17 + $0x18] sm:$0xff] }
 0x962   : > { %v3133_v1 = vadd.f32 %v3129_v41, %v3121_v25  ;;  %v3089_v53 = vadd.f32 %v3085_v12, %v3061_v9 }
 0x963   : > { %v3019_v45 = vpop.permute.xlu0 %3018 }
 0x964   : > { %v3137_v35 = vadd.f32 %v3133_v1, %v3113_v40  ;;  %v3093_v41 = vadd.f32 %v3089_v53, %v3033_v29  ;;  %v3023_v55 = vpop.permute.xlu1 %3022  ;;  %v3031_v37 = vmul.f32 %v8179_v34, %v3019_v45  ;;  %v3111_v40 = vmul.f32 %v8204_v61, %v3019_v45 }
 0x965   : > { %6579 = vset.pattern.permute.xlu0 %v9261_v0  ;;  %3205 = vperm.xlu1 %6575, %v3138_v38   ;;  %v3032_v1 = vmul.f32 %v8179_v34, %v3023_v55 }
 0x966   : > { %3200 = vperm.xlu0 %6579, %v3137_v35   ;;  %v3035_v20 = vadd.f32 %v3031_v37, %v3007_v18  ;;  %v3115_v45 = vadd.f32 %v3111_v40, %v3103_v4 }
 0x969   : > { %6576 = vset.pattern.permute.xlu1 %v9237_v19 }
 0x96a   : > { %3231 = vperm.xlu1 %6576, %v3138_v38  }
 0x96e   : > { %6577 = vset.pattern.permute.xlu1 %v9261_v0 }
 0x96f   : > { %3144 = vperm.xlu1 %6577, %v3093_v41  }
 0x973   : > { %6578 = vset.pattern.permute.xlu1 %v9237_v19 }
 0x974   : > { %3171 = vperm.xlu1 %6578, %v3093_v41  }
 0x977   : > { %v3079_v25 = vpop.permute.xlu0 %3078 }
 0x978   : > { %3227 = vperm.xlu1 %6578, %v3137_v35   ;;  %v3050_v5 = vpop.permute.xlu1 %3049  ;;  %v3008_v35 = vmul.f32 %v8201_v26, %v8184_v44  ;;  %v3088_v46 = vmul.f32 %v8195_v31, %v3079_v25  ;;  %v3132_v26 = vmul.f32 %v8198_v51, %v3079_v25  ;;  %v3305_v44 = vld [vmem:[%s9090_s17] sm:$0xff] }
 0x979   : > { %v3063_v15 = vmul.f32 %v8189_v50, %v3050_v5  ;;  %v3123_v38 = vmul.f32 %v8192_v8, %v3050_v5  ;;  %v3112_v5 = vmul.f32 %v8204_v61, %v3023_v55  ;;  %v3307_v61 = vld [vmem:[%s9090_s17 + $0x10] sm:$0xff] }
 0x97a   : > { %v3036_v34 = vadd.f32 %v3032_v1, %v3008_v35  ;;  %v6343_v55 = vpack.c.bf16 %v3308_v13, %v3307_v61 }
 0x97c   : > { %6580 = vset.pattern.permute.xlu1 %v9261_v0 }
 0x97d   : > { %v3075_v48 = vpop.permute.xlu1 %3074 }
 0x97e   : > { %v3087_v3 = vmul.f32 %v8195_v31, %v3075_v48  ;;  %v3131_v58 = vmul.f32 %v8198_v51, %v3075_v48  ;;  %v3306_v31 = vld [vmem:[%s9090_s17 + $0x8] sm:$0xff] }
 0x97f   : > { %v6339_v51 = vpack.c.bf16 %v3306_v31, %v3305_v44 }
 0x980   : > { %v3091_v52 = vadd.f32 %v3087_v3, %v3063_v15  ;;  %v3135_v53 = vadd.f32 %v3131_v58, %v3123_v38  ;;  %v3141_v58 = vld [vmem:[%s9088_s15] sm:$0xf] }
 0x981   : > { %6340 = vmatprep.subr.bf16.mxu0 %v6339_v51  ;;  %v3165_v25 = vrot.slane %v3141_v58, %v7149_v32  ;;  %v3221_v1 = vrot.slane %v3141_v58, %v7299_v63  ;;  %v3245_v38 = vrot.slane %v3141_v58, %v7296_v62 }
 0x982   : > { %v3055_v12 = vpop.permute.xlu1 %3054  ;;  %v3095_v9 = vadd.f32 %v3091_v52, %v3035_v20  ;;  %v3139_v48 = vadd.f32 %v3135_v53, %v3115_v45  ;;  %6342 = vmatpush3.bf16.msra.mxu0 %v6339_v51  ;;  %v3189_v20 = vrot.slane %v3141_v58, %v7152_v33 }
 0x983   : > { %v3064_v29 = vmul.f32 %v8189_v50, %v3055_v12  ;;  %v3124_v41 = vmul.f32 %v8192_v8, %v3055_v12  ;;  %v3116_v50 = vadd.f32 %v3112_v5, %v3104_v21  ;;  %6344 = vmatprep.subr.bf16.mxu0 %v6343_v55 }
 0x984   : > { %3154 = vperm.xlu0 %6579, %v3095_v9  }
 0x985   : > { %v3092_v37 = vadd.f32 %v3088_v46, %v3064_v29  ;;  %v3136_v15 = vadd.f32 %v3132_v26, %v3124_v41  ;;  %v8277_v41 = vld [vmem:[%s9089_s16] ss:$0 sm:$0xff] }
 0x986   : > { %6346 = vmatpush3.bf16.msra.mxu0 %v6343_v55 }
 0x987   : > { %v3096_v18 = vadd.f32 %v3092_v37, %v3036_v34  ;;  %v3140_v8 = vadd.f32 %v3136_v15, %v3116_v50 }
 0x988   : > { %6583 = vset.pattern.permute.xlu0 %v9237_v19 }
 0x989   : > { %3235 = vperm.xlu0 %6583, %v3139_v48   ;;  %3159 = vperm.xlu1 %6580, %v3096_v18  }
 0x98d   : > { %6584 = vset.pattern.permute.xlu0 %v9261_v0  ;;  %6581 = vset.pattern.permute.xlu1 %v9237_v19 }
 0x98e   : > { %3215 = vperm.xlu0 %6584, %v3140_v8   ;;  %3183 = vperm.xlu1 %6581, %v3096_v18  }
 0x992   : > { %3179 = vperm.xlu1 %6581, %v3095_v9  }
 0x996   : > { %6582 = vset.pattern.permute.xlu1 %v9261_v0 }
 0x997   : > { %3210 = vperm.xlu1 %6582, %v3139_v48  }
 0x99b   : > { %6585 = vset.pattern.permute.xlu1 %v9237_v19 }
 0x99c   : > { %3239 = vperm.xlu1 %6585, %v3140_v8  }
 0x9e0   : > { %v3150_v3 = vpop.permute.xlu1 %3149  ;;  %v3176_v40 = vpop.permute.xlu0 %3175 }
 0x9e1   : > { %v3191_v35 = vmul.f32 %v3189_v20, %v3176_v40  ;;  %v3167_v12 = vmul.f32 %v3165_v25, %v3150_v3 }
 0x9e3   : > { %v3195_v53 = vadd.f32 %v3191_v35, %v3167_v12 }
 0x9e4   : > { %v3206_v52 = vpop.permute.xlu1 %3205 }
 0x9e5   : > { %v3223_v4 = vmul.f32 %v3221_v1, %v3206_v52  ;;  %v3201_v48 = vpop.permute.xlu0 %3200 }
 0x9e6   : > { %v3222_v50 = vmul.f32 %v3221_v1, %v3201_v48 }
 0x9e9   : > { %v3232_v9 = vpop.permute.xlu1 %3231 }
 0x9ea   : > { %v3247_v46 = vmul.f32 %v3245_v38, %v3232_v9 }
 0x9ec   : > { %v3251_v29 = vadd.f32 %v3247_v46, %v3223_v4 }
 0x9ee   : > { %v3255_v45 = vadd.f32 %v3251_v29, %v3195_v53  ;;  %v3145_v34 = vpop.permute.xlu1 %3144 }
 0x9ef   : > { %v3166_v8 = vmul.f32 %v3165_v25, %v3145_v34 }
 0x9f0   : > { %v3266_v37 = vadd.f32 %v8277_v41, %v3255_v45 }
 0x9f2   : > { %v3274_v5 = vand.u32 2147483647, %v3266_v37 }
 0x9f3   : > { %v3172_v26 = vpop.permute.xlu1 %3171 }
 0x9f4   : > { %v3190_v18 = vmul.f32 %v3189_v20, %v3172_v26  ;;  %v3278_v21 = vsub.f32 0.0, %v3274_v5 }
 0x9f6   : > { %v3194_v31 = vadd.f32 %v3190_v18, %v3166_v8  ;;  %v3283_v61 = vmul.f32 1.442695, %v3278_v21 }
 0x9f7   : > { %v3228_v15 = vpop.permute.xlu1 %3227 }
 0x9f8   : > { %v3246_v44 = vmul.f32 %v3245_v38, %v3228_v15  ;;  %6815 = vpow2.f32 %v3283_v61 }
 0x9fa   : > { %v3250_v51 = vadd.f32 %v3246_v44, %v3222_v50 }
 0x9fc   : > { %v3254_v13 = vadd.f32 %v3250_v51, %v3194_v31 }
 0x9fe   : > { %v3265_v55 = vadd.f32 %v8277_v41, %v3254_v13 }
 0xa00   : > { %v3273_v3 = vand.u32 2147483647, %v3265_v55 }
 0xa02   : > { %v3277_v58 = vsub.f32 0.0, %v3273_v3  ;;  %v6816_v35 = vpop.eup %6815 }
 0xa03   : > { %v3290_v12 = vadd.f32 1.0, %v6816_v35  ;;  %v3155_v9 = vpop.permute.xlu0 %3154 }
 0xa04   : > { %v3281_v52 = vmul.f32 1.442695, %v3277_v58  ;;  %v3168_v26 = vmul.f32 %v3165_v25, %v3155_v9 }
 0xa06   : > { %6817 = vpow2.f32 %v3281_v52 }
 0xa07   : > { %6819 = vlog2.f32 %v3290_v12 }
 0xa08   : > { %v3160_v40 = vpop.permute.xlu1 %3159  ;;  %v3236_v45 = vpop.permute.xlu0 %3235 }
 0xa09   : > { %v3248_v48 = vmul.f32 %v3245_v38, %v3236_v45  ;;  %v3169_v61 = vmul.f32 %v3165_v25, %v3160_v40 }
 0xa0d   : > { %v3184_v4 = vpop.permute.xlu1 %3183  ;;  %v3216_v21 = vpop.permute.xlu0 %3215 }
 0xa0e   : > { %v3193_v44 = vmul.f32 %v3189_v20, %v3184_v4  ;;  %v3225_v13 = vmul.f32 %v3221_v1, %v3216_v21 }
 0xa10   : > { %v6818_v46 = vpop.eup %6817  ;;  %v3197_v12 = vadd.f32 %v3193_v44, %v3169_v61  ;;  %v3450_v61 = vld [vmem:[%s9092_s19] sm:$0xff] }
 0xa11   : > { %v3180_v53 = vpop.permute.xlu1 %3179  ;;  %v3289_v29 = vadd.f32 1.0, %v6818_v46  ;;  %v6820_v8 = vpop.eup %6819 }
 0xa12   : > { %v3192_v34 = vmul.f32 %v3189_v20, %v3180_v53  ;;  %v3296_v52 = vmul.f32 0.6931472, %v6820_v8  ;;  %v3269_v53 = vmax.f32 %v3265_v55, 0.0 }
 0xa13   : > { %6821 = vlog2.f32 %v3289_v29  ;;  %v3270_v29 = vmax.f32 %v3266_v37, 0.0 }
 0xa14   : > { %v3196_v15 = vadd.f32 %v3192_v34, %v3168_v26 }
 0xa15   : > { %v3302_v26 = vadd.f32 %v3296_v52, %v3270_v29  ;;  %v3559_v52 = vld [vmem:[%s9094_s21 + $0x8] sm:$0xff]  ;;  %v3561_v29 = vld [vmem:[%s9094_s21 + $0x18] sm:$0xff] }
 0xa16   : > { %v3211_v5 = vpop.permute.xlu1 %3210 }
 0xa17   : > { %v3224_v18 = vmul.f32 %v3221_v1, %v3211_v5 }
 0xa19   : > { %v3252_v50 = vadd.f32 %v3248_v48, %v3224_v18 }
 0xa1b   : > { %v3256_v31 = vadd.f32 %v3252_v50, %v3196_v15  ;;  %v3240_v51 = vpop.permute.xlu1 %3239 }
 0xa1c   : > { %v3249_v3 = vmul.f32 %v3245_v38, %v3240_v51 }
 0xa1d   : > { %v6822_v58 = vpop.eup %6821  ;;  %v3267_v35 = vadd.f32 %v8277_v41, %v3256_v31 }
 0xa1e   : > { %v3253_v46 = vadd.f32 %v3249_v3, %v3225_v13  ;;  %v3294_v9 = vmul.f32 0.6931472, %v6822_v58  ;;  %v3451_v13 = vld [vmem:[%s9092_s19 + $0x8] sm:$0xff]  ;;  %v3558_v3 = vld [vmem:[%s9094_s21] sm:$0xff] }
 0xa1f   : > { %v3275_v45 = vand.u32 2147483647, %v3267_v35  ;;  %v3271_v15 = vmax.f32 %v3267_v35, 0.0  ;;  %v6347_v58 = vpack.c.bf16 %v3451_v13, %v3450_v61  ;;  %v6355_v35 = vpack.c.bf16 %v3559_v52, %v3558_v3 }
 0xa20   : > { %v3257_v34 = vadd.f32 %v3253_v46, %v3197_v12  ;;  %v3301_v5 = vadd.f32 %v3294_v9, %v3269_v53  ;;  %v3452_v12 = vld [vmem:[%s9092_s19 + $0x10] sm:$0xff]  ;;  %v3453_v46 = vld [vmem:[%s9092_s19 + $0x18] sm:$0xff] }
 0xa21   : > { %v3279_v20 = vsub.f32 0.0, %v3275_v45  ;;  %6348 = vmatprep.subr.bf16.mxu1 %v6347_v58  ;;  %6356 = vmatprep.subr.bf16.mxu0 %v6355_v35  ;;  %v3560_v53 = vld [vmem:[%s9094_s21 + $0x10] sm:$0xff]  ;;  %v6351_v9 = vpack.c.bf16 %v3453_v46, %v3452_v12 }
 0xa22   : > { %v3268_v4 = vadd.f32 %v8277_v41, %v3257_v34  ;;  %6001 = vmatprep.mubr.msk.f32.mxu0 %vm3316_vm2, %v3301_v5  ;;  %6350 = vmatpush3.bf16.msra.mxu1 %v6347_v58  ;;  %v6359_v45 = vpack.c.bf16 %v3561_v29, %v3560_v53  ;;  %v5546_v34 = vld [vmem:[%s9091_s18] ss:$0 sm:$0xff] }
 0xa23   : > { %v3285_v25 = vmul.f32 1.442695, %v3279_v20  ;;  %6002 = vmatmul.mubr.msk.f32.vlgmr.msra.gmra.mrb[16].mxu0 %vm3316_vm2, %v3302_v26  ;;  %6352 = vmatprep.subr.bf16.mxu1 %v6351_v9 }
 0xa24   : > { %v3276_v1 = vand.u32 2147483647, %v3268_v4  ;;  %v3272_v44 = vmax.f32 %v3268_v4, 0.0  ;;  %6358 = vmatpush3.bf16.msra.mxu0 %v6355_v35 }
 0xa25   : > { %6823 = vpow2.f32 %v3285_v25  ;;  %6360 = vmatprep.subr.bf16.mxu0 %v6359_v45 }
 0xa26   : > { %v3280_v38 = vsub.f32 0.0, %v3276_v1  ;;  %6354 = vmatpush3.bf16.msra.mxu1 %v6351_v9 }
 0xa27   : > { %6364 = vmatprep.subr.bf16.mxu1 %v7983_v42 }
 0xa28   : > { %v3287_v40 = vmul.f32 1.442695, %v3280_v38  ;;  %6362 = vmatpush3.bf16.msra.mxu0 %v6359_v45 }
 0xa29   : > { %6380 = vmatprep.subr.bf16.mxu0 %v7985_v16 }
 0xa2a   : > { %6825 = vpow2.f32 %v3287_v40 }
 0xa2f   : > { %v6824_v55 = vpop.eup %6823 }
 0xa30   : > { %v3291_v37 = vadd.f32 1.0, %v6824_v55 }
 0xa32   : > { %6827 = vlog2.f32 %v3291_v37 }
 0xa34   : > { %v6826_v48 = vpop.eup %6825 }
 0xa35   : > { %v3292_v18 = vadd.f32 1.0, %v6826_v48 }
 0xa37   : > { %6829 = vlog2.f32 %v3292_v18 }
 0xa3c   : > { %v6828_v21 = vpop.eup %6827 }
 0xa3d   : > { %v3298_v50 = vmul.f32 0.6931472, %v6828_v21 }
 0xa3f   : > { %v3303_v41 = vadd.f32 %v3298_v50, %v3271_v15 }
 0xa41   : > { %v6830_v8 = vpop.eup %6829  ;;  %6004 = vmatprep.mubr.msk.f32.mxu0 %vm3316_vm2, %v3303_v41 }
 0xa42   : > { %v3300_v31 = vmul.f32 0.6931472, %v6830_v8 }
 0xa44   : > { %v3304_v51 = vadd.f32 %v3300_v31, %v3272_v44 }
 0xa46   : > { %6005 = vmatmul.mubr.msk.f32.gmra.mrb[18].mxu0 %vm3316_vm2, %v3304_v51 }
 0xaf6   : > { %v6003_v5 = vpop.f32.mrb[16].mxu0 }
 0xaf7   : > { %v3401_v26 = vadd.f32 %v6003_v5, %v5546_v34  ;;  %v3395_v20 = vpop.f32.mrb[17].mxu0 }
 0xaf8   : > { %v3396_v4 = vadd.f32 %v5546_v34, %v3395_v20 }
 0xaf9   : > { %v3419_v25 = vand.u32 2147483647, %v3401_v26  ;;  %v3415_v51 = vmax.f32 %v3401_v26, 0.0 }
 0xafa   : > { %v3418_v1 = vand.u32 2147483647, %v3396_v4  ;;  %v3414_v44 = vmax.f32 %v3396_v4, 0.0 }
 0xafb   : > { %v3423_v38 = vsub.f32 0.0, %v3419_v25 }
 0xafc   : > { %v3422_v40 = vsub.f32 0.0, %v3418_v1 }
 0xafd   : > { %v3428_v55 = vmul.f32 1.442695, %v3423_v38 }
 0xafe   : > { %v3426_v37 = vmul.f32 1.442695, %v3422_v40 }
 0xaff   : > { %6831 = vpow2.f32 %v3428_v55 }
 0xb00   : > { %6833 = vpow2.f32 %v3426_v37  ;;  %v5556_v37 = vld [vmem:[%s9095_s22] ss:$0 sm:$0xff] }
 0xb09   : > { %v6832_v48 = vpop.eup %6831 }
 0xb0a   : > { %v6834_v18 = vpop.eup %6833  ;;  %v3435_v21 = vadd.f32 1.0, %v6832_v48 }
 0xb0b   : > { %v3434_v15 = vadd.f32 1.0, %v6834_v18 }
 0xb0c   : > { %6835 = vlog2.f32 %v3435_v21 }
 0xb0d   : > { %6837 = vlog2.f32 %v3434_v15 }
 0xb16   : > { %v6836_v50 = vpop.eup %6835 }
 0xb17   : > { %v6838_v41 = vpop.eup %6837  ;;  %v3441_v8 = vmul.f32 0.6931472, %v6836_v50 }
 0xb18   : > { %v3439_v31 = vmul.f32 0.6931472, %v6838_v41 }
 0xb19   : > { %v6006_v61 = vpop.f32.mrb[18].mxu0  ;;  %v3447_v52 = vadd.f32 %v3441_v8, %v3415_v51 }
 0xb1a   : > { %v3446_v13 = vadd.f32 %v3439_v31, %v3414_v44  ;;  %v3411_v3 = vadd.f32 %v6006_v61, %v5546_v34  ;;  %v3405_v58 = vpop.f32.mrb[19].mxu0 }
 0xb1b   : > { %v3406_v35 = vadd.f32 %v5546_v34, %v3405_v58  ;;  %v5562_v58 = vld [vmem:[%s9296_s26 + $0xc] sm:$0xf] }
 0xb1c   : > { %v3421_v12 = vand.u32 2147483647, %v3411_v3  ;;  %6015 = vmatprep.mubr.msk.f32.mxu1 %vm3316_vm2, %v3446_v13  ;;  %6029 = vmatprep.mubr.msk.f32.mxu0 %vm3316_vm2, %v3446_v13  ;;  %v3417_v20 = vmax.f32 %v3411_v3, 0.0  ;;  %v9294_v13 = vld [vmem:[#allocation20_spill] sm:$0xff]  ;;  %v5561_v3 = vld [vmem:[%s9295_s5 + $0xc] sm:$0xf] }
 0xb1d   : > { %v3420_v46 = vand.u32 2147483647, %v3406_v35  ;;  %6016 = vmatmul.mubr.msk.f32.vlgmr.msra.gmra.mrb[16].mxu1 %vm3316_vm2, %v3447_v52  ;;  %6030 = vmatmul.mubr.msk.f32.vlgmr.msra.gmra.mrb[20].mxu0 %vm3316_vm2, %v3447_v52  ;;  %v3416_v5 = vmax.f32 %v3406_v35, 0.0  ;;  %v8365_v52 = vrot.slane %v5561_v3, %v7149_v32 }
 0xb1e   : > { %v3425_v53 = vsub.f32 0.0, %v3421_v12  ;;  %6366 = vmatpush3.bf16.msra.mxu1 %v7983_v42  ;;  %6382 = vmatpush3.bf16.msra.mxu0 %v7985_v16  ;;  %v8368_v12 = vrot.slane %v5561_v3, %v7152_v33 }
 0xb1f   : > { %v3424_v9 = vsub.f32 0.0, %v3420_v46  ;;  %6368 = vmatprep.subr.bf16.mxu1 %v8000_v54  ;;  %6384 = vmatprep.subr.bf16.mxu0 %v8007_v60 }
 0xb20   : > { %v3432_v29 = vmul.f32 1.442695, %v3425_v53  ;;  %v8371_v53 = vrot.slane %v5562_v58, %v7149_v32 }
 0xb21   : > { %v3430_v45 = vmul.f32 1.442695, %v3424_v9  ;;  %v8374_v9 = vrot.slane %v5562_v58, %v7152_v33 }
 0xb22   : > { %6839 = vpow2.f32 %v3432_v29  ;;  %6370 = vmatpush3.bf16.msra.mxu1 %v8000_v54  ;;  %6386 = vmatpush3.bf16.msra.mxu0 %v8007_v60  ;;  %v8377_v29 = vrot.slane %v5561_v3, %v7296_v62 }
 0xb23   : > { %6841 = vpow2.f32 %v3430_v45  ;;  %6372 = vmatprep.subr.bf16.mxu1 %v8022_v17  ;;  %6388 = vmatprep.subr.bf16.mxu0 %v8028_v27  ;;  %v8380_v45 = vrot.slane %v5562_v58, %v7296_v62 }
 0xb26   : > { %6374 = vmatpush3.bf16.msra.mxu1 %v8022_v17  ;;  %6390 = vmatpush3.bf16.msra.mxu0 %v8028_v27 }
 0xb27   : > { %6376 = vmatprep.subr.bf16.mxu1 %v8042_v49  ;;  %6392 = vmatprep.subr.bf16.mxu0 %v8049_v10 }
 0xb2a   : > { %6378 = vmatpush3.bf16.msra.mxu1 %v8042_v49  ;;  %6394 = vmatpush3.bf16.msra.mxu0 %v8049_v10  ;;  %v5551_v10 = vld [vmem:[%s9093_s20] ss:$0 sm:$0xff] }
 0xb2b   : > { %6396 = vmatprep.subr.bf16.mxu1 %v7658_v7  ;;  %6412 = vmatprep.subr.bf16.mxu0 %v7663_v6 }
 0xb2c   : > { %v6840_v42 = vpop.eup %6839 }
 0xb2d   : > { %v6842_v16 = vpop.eup %6841  ;;  %v3437_v54 = vadd.f32 1.0, %v6840_v42  ;;  %v8383_v42 = vrot.slane %v5561_v3, %v7299_v63 }
 0xb2e   : > { %v3436_v60 = vadd.f32 1.0, %v6842_v16  ;;  %v8386_v16 = vrot.slane %v5562_v58, %v7299_v63 }
 0xb2f   : > { %6843 = vlog2.f32 %v3437_v54 }
 0xb30   : > { %6845 = vlog2.f32 %v3436_v60 }
 0xb31   : > { %6847 = vrcp.f32 %v9294_v13 }
 0xb32   : > { %6849 = vrcp.f32 %v7208_v24  ;;  %v2909_v24 = vmul.f32 %v8104_v57, %v8104_v57 }
 0xb33   : > { %6851 = vrcp.f32 %v8121_v30 }
 0xb34   : > { %6853 = vrcp.f32 %v8123_v39 }
 0xb35   : > { %6855 = vrcp.f32 %v8163_v28 }
 0xb36   : > { %6857 = vrcp.f32 %v8167_v22 }
 0xb39   : > { %v6844_v17 = vpop.eup %6843 }
 0xb3a   : > { %v6846_v27 = vpop.eup %6845  ;;  %v3445_v34 = vmul.f32 0.6931472, %v6844_v17 }
 0xb3b   : > { %v3443_v26 = vmul.f32 0.6931472, %v6846_v27  ;;  %v8390_v17 = vpop.eup %6847 }
 0xb3c   : > { %v3449_v49 = vadd.f32 %v3445_v34, %v3417_v20 }
 0xb3d   : > { %v3448_v4 = vadd.f32 %v3443_v26, %v3416_v5 }
 0xb3f   : > { %6018 = vmatprep.mubr.msk.f32.mxu1 %vm3316_vm2, %v3448_v4  ;;  %6032 = vmatprep.mubr.msk.f32.mxu0 %vm3316_vm2, %v3448_v4 }
 0xb40   : > { %6019 = vmatmul.mubr.msk.f32.gmra.mrb[18].mxu1 %vm3316_vm2, %v3449_v49  ;;  %6033 = vmatmul.mubr.msk.f32.gmra.mrb[22].mxu0 %vm3316_vm2, %v3449_v49 }
 0xbf0   : > { %v6017_v25 = vpop.f32.mrb[16].mxu1  ;;  %v6031_v1 = vpop.f32.mrb[20].mxu0 }
 0xbf1   : > { %v3545_v38 = vadd.f32 %v6017_v25, %v5551_v10  ;;  %v3539_v40 = vpop.f32.mrb[17].mxu1  ;;  %v3635_v55 = vpop.f32.mrb[21].mxu0  ;;  %v3641_v48 = vadd.f32 %v6031_v1, %v5556_v37 }
 0xbf2   : > { %v3540_v18 = vadd.f32 %v5551_v10, %v3539_v40  ;;  %v3636_v21 = vadd.f32 %v5556_v37, %v3635_v55  ;;  %v8400_v40 = vrot.slane %v8390_v17, %v7296_v62 }
 0xbf3   : > { %3691 = vperm.xlu1 %6585, %v3545_v38   ;;  %3665 = vperm.xlu0 %6584, %v3545_v38  }
 0xbf7   : > { %6586 = vset.pattern.permute.xlu1 %v9261_v0  ;;  %6587 = vset.pattern.permute.xlu0 %v9237_v19 }
 0xbf8   : > { %3747 = vperm.xlu0 %6587, %v3641_v48   ;;  %3721 = vperm.xlu1 %6586, %v3641_v48  }
 0xbfc   : > { %3687 = vperm.xlu0 %6587, %v3540_v18   ;;  %3660 = vperm.xlu1 %6586, %v3540_v18  }
 0xc00   : > { %3716 = vperm.xlu1 %6586, %v3636_v21   ;;  %6591 = vset.pattern.permute.xlu0 %v9261_v0 }
 0xc04   : > { %6588 = vset.pattern.permute.xlu1 %v9237_v19 }
 0xc05   : > { %3743 = vperm.xlu1 %6588, %v3636_v21  }
 0xc09   : > { %6589 = vset.pattern.permute.xlu1 %v9261_v0 }
 0xc13   : > { %v6020_v15 = vpop.f32.mrb[18].mxu1  ;;  %v6034_v50 = vpop.f32.mrb[22].mxu0 }
 0xc14   : > { %v3555_v41 = vadd.f32 %v6020_v15, %v5551_v10  ;;  %v3549_v8 = vpop.f32.mrb[19].mxu1  ;;  %v3645_v44 = vpop.f32.mrb[23].mxu0  ;;  %v3651_v61 = vadd.f32 %v6034_v50, %v5556_v37 }
 0xc15   : > { %v3646_v31 = vadd.f32 %v5556_v37, %v3645_v44  ;;  %v3550_v51 = vadd.f32 %v5551_v10, %v3549_v8 }
 0xc16   : > { %3675 = vperm.xlu1 %6589, %v3555_v41  }
 0xc17   : > { %3726 = vperm.xlu0 %6591, %v3646_v31  }
 0xc1a   : > { %3670 = vperm.xlu1 %6589, %v3550_v51  }
 0xc1b   : > { %6592 = vset.pattern.permute.xlu0 %v9237_v19 }
 0xc1c   : > { %3699 = vperm.xlu0 %6592, %v3555_v41  }
 0xc1e   : > { %6590 = vset.pattern.permute.xlu1 %v9237_v19 }
 0xc1f   : > { %3695 = vperm.xlu1 %6590, %v3550_v51  }
 0xc20   : > { %6596 = vset.pattern.permute.xlu0 %v9261_v0 }
 0xc23   : > { %6593 = vset.pattern.permute.xlu1 %v9261_v0 }
 0xc24   : > { %3731 = vperm.xlu1 %6593, %v3651_v61  }
 0xc28   : > { %6594 = vset.pattern.permute.xlu1 %v9237_v19 }
 0xc29   : > { %3751 = vperm.xlu1 %6594, %v3646_v31  }
 0xc2d   : > { %3755 = vperm.xlu1 %6594, %v3651_v61  }
 0xc31   : > { %6595 = vset.pattern.permute.xlu1 %v9261_v0 }
 0xc72   : > { %v3666_v35 = vpop.permute.xlu0 %3665  ;;  %v3692_v46 = vpop.permute.xlu1 %3691 }
 0xc73   : > { %v3683_v54 = vmul.f32 %v8365_v52, %v3666_v35  ;;  %v3707_v60 = vmul.f32 %v8368_v12, %v3692_v46  ;;  %v3779_v27 = vmul.f32 %v8371_v53, %v3666_v35  ;;  %v3787_v34 = vmul.f32 %v8374_v9, %v3692_v46 }
 0xc75   : > { %v3711_v25 = vadd.f32 %v3707_v60, %v3683_v54  ;;  %v3791_v55 = vadd.f32 %v3787_v34, %v3779_v27 }
 0xc77   : > { %v3748_v5 = vpop.permute.xlu0 %3747  ;;  %v3722_v26 = vpop.permute.xlu1 %3721 }
 0xc78   : > { %v3763_v20 = vmul.f32 %v8377_v29, %v3748_v5  ;;  %v3807_v4 = vmul.f32 %v8380_v45, %v3748_v5  ;;  %v3739_v49 = vmul.f32 %v8383_v42, %v3722_v26  ;;  %v3799_v10 = vmul.f32 %v8386_v16, %v3722_v26 }
 0xc7a   : > { %v3767_v1 = vadd.f32 %v3763_v20, %v3739_v49  ;;  %v3811_v38 = vadd.f32 %v3807_v4, %v3799_v10 }
 0xc7b   : > { %v8402_v37 = vpop.permute.xlu1 %3660  ;;  %v8409_v50 = vpop.permute.xlu0 %3687 }
 0xc7c   : > { %v3771_v48 = vadd.f32 %v3767_v1, %v3711_v25  ;;  %v8404_v18 = vadd.f32 %v3811_v38, %v3791_v55  ;;  %v3706_v41 = vmul.f32 %v8368_v12, %v8409_v50  ;;  %v3682_v8 = vmul.f32 %v8365_v52, %v8402_v37 }
 0xc7e   : > { %v3823_v21 = vmul.f32 %v8400_v40, %v3771_v48  ;;  %v3710_v61 = vadd.f32 %v3706_v41, %v3682_v8 }
 0xc7f   : > { %v8407_v15 = vpop.permute.xlu1 %3716 }
 0xc80   : > { %3841 = vperm.xlu1 %6595, %v3823_v21   ;;  %v3738_v31 = vmul.f32 %v8383_v42, %v8407_v15 }
 0xc84   : > { %v8415_v44 = vpop.permute.xlu1 %3743  ;;  %6598 = vset.pattern.permute.xlu1 %v9237_v19 }
 0xc85   : > { %v3762_v51 = vmul.f32 %v8377_v29, %v8415_v44 }
 0xc87   : > { %v3766_v13 = vadd.f32 %v3762_v51, %v3738_v31 }
 0xc89   : > { %v3770_v3 = vadd.f32 %v3766_v13, %v3710_v61 }
 0xc8b   : > { %v3822_v58 = vmul.f32 %v8400_v40, %v3770_v3 }
 0xc8d   : > { %3859 = vperm.xlu1 %6598, %v3822_v58   ;;  %3836 = vperm.xlu0 %6596, %v3822_v58  }
 0xc91   : > { %6597 = vset.pattern.permute.xlu0 %v9237_v19  ;;  %6600 = vset.pattern.permute.xlu1 %v9261_v0 }
 0xc92   : > { %3863 = vperm.xlu0 %6597, %v3823_v21  }
 0xc95   : > { %v3676_v35 = vpop.permute.xlu1 %3675 }
 0xc96   : > { %6599 = vset.pattern.permute.xlu0 %v9261_v0  ;;  %v3727_v34 = vpop.permute.xlu0 %3726  ;;  %v3685_v51 = vmul.f32 %v8365_v52, %v3676_v35  ;;  %v3781_v61 = vmul.f32 %v8371_v53, %v3676_v35 }
 0xc97   : > { %v3740_v49 = vmul.f32 %v8383_v42, %v3727_v34  ;;  %v3800_v25 = vmul.f32 %v8386_v16, %v3727_v34 }
 0xc99   : > { %v3671_v46 = vpop.permute.xlu1 %3670 }
 0xc9a   : > { %v3780_v60 = vmul.f32 %v8371_v53, %v3671_v46  ;;  %v3684_v1 = vmul.f32 %v8365_v52, %v3671_v46 }
 0xc9b   : > { %v3700_v20 = vpop.permute.xlu0 %3699 }
 0xc9c   : > { %v3709_v48 = vmul.f32 %v8368_v12, %v3700_v20  ;;  %v3789_v21 = vmul.f32 %v8374_v9, %v3700_v20 }
 0xc9e   : > { %v3696_v54 = vpop.permute.xlu1 %3695  ;;  %v3793_v34 = vadd.f32 %v3789_v21, %v3781_v61 }
 0xc9f   : > { %v3788_v27 = vmul.f32 %v8374_v9, %v3696_v54  ;;  %v3708_v4 = vmul.f32 %v8368_v12, %v3696_v54 }
 0xca1   : > { %v3792_v5 = vadd.f32 %v3788_v27, %v3780_v60  ;;  %v3712_v41 = vadd.f32 %v3708_v4, %v3684_v1  ;;  %v3713_v27 = vadd.f32 %v3709_v48, %v3685_v51 }
 0xca3   : > { %v3732_v26 = vpop.permute.xlu1 %3731 }
 0xca4   : > { %v3741_v13 = vmul.f32 %v8383_v42, %v3732_v26  ;;  %v3801_v3 = vmul.f32 %v8386_v16, %v3732_v26 }
 0xca8   : > { %v3752_v10 = vpop.permute.xlu1 %3751 }
 0xca9   : > { %v3764_v38 = vmul.f32 %v8377_v29, %v3752_v10  ;;  %v3808_v55 = vmul.f32 %v8380_v45, %v3752_v10 }
 0xcab   : > { %v3768_v8 = vadd.f32 %v3764_v38, %v3740_v49  ;;  %v3812_v31 = vadd.f32 %v3808_v55, %v3800_v25 }
 0xcac   : > { %v3756_v58 = vpop.permute.xlu1 %3755 }
 0xcad   : > { %v3772_v46 = vadd.f32 %v3768_v8, %v3712_v41  ;;  %v8440_v54 = vadd.f32 %v3812_v31, %v3792_v5  ;;  %v3765_v60 = vmul.f32 %v8377_v29, %v3756_v58  ;;  %v3809_v12 = vmul.f32 %v8380_v45, %v3756_v58  ;;  %v8454_v29 = vld [vmem:[%s9295_s5 + $0x8] sm:$0xf] }
 0xcae   : > { %v8459_v5 = vld [vmem:[%s9296_s26 + $0x8] sm:$0xf]  ;;  %v8463_v26 = vrot.slane %v8454_v29, %v7152_v33  ;;  %v8471_v25 = vrot.slane %v8454_v29, %v7149_v32 }
 0xcaf   : > { %v3769_v20 = vadd.f32 %v3765_v60, %v3741_v13  ;;  %v3813_v4 = vadd.f32 %v3809_v12, %v3801_v3  ;;  %v3824_v52 = vmul.f32 %v8400_v40, %v3772_v46  ;;  %v8467_v10 = vrot.slane %v8459_v5, %v7152_v33 }
 0xcb0   : > { %v8475_v1 = vrot.slane %v8459_v5, %v7149_v32 }
 0xcb1   : > { %v3773_v49 = vadd.f32 %v3769_v20, %v3713_v27  ;;  %v8445_v35 = vadd.f32 %v3813_v4, %v3793_v34  ;;  %3846 = vperm.xlu1 %6600, %v3824_v52  }
 0xcb3   : > { %v3825_v42 = vmul.f32 %v8400_v40, %v3773_v49 }
 0xcb5   : > { %6601 = vset.pattern.permute.xlu1 %v9237_v19  ;;  %3851 = vperm.xlu0 %6599, %v3825_v42  }
 0xcb6   : > { %3867 = vperm.xlu1 %6601, %v3824_v52  }
 0xcb9   : > { %6605 = vset.pattern.permute.xlu0 %v9237_v19 }
 0xcba   : > { %3871 = vperm.xlu1 %6601, %v3825_v42  }
 0xcbe   : > { %6602 = vset.pattern.permute.xlu1 %v9261_v0 }
 0xcff   : > { %v3842_v40 = vpop.permute.xlu1 %3841 }
 0xd00   : > { %v3855_v58 = vmul.f32 %v3842_v40, %v8067_v47  ;;  %v4105_v46 = vmul.f32 %v8471_v25, %v3842_v40  ;;  %v4185_v27 = vmul.f32 %v8475_v1, %v3842_v40  ;;  %v9299_v40 = vld [vmem:[#allocation52_spill] sm:$0xff] }
 0xd0c   : > { %v3837_v38 = vpop.permute.xlu0 %3836  ;;  %v3860_v55 = vpop.permute.xlu1 %3859 }
 0xd0d   : > { %v3854_v48 = vmul.f32 %v3837_v38, %v8067_v47  ;;  %v4104_v21 = vmul.f32 %v8471_v25, %v3837_v38  ;;  %v4184_v41 = vmul.f32 %v8475_v1, %v3837_v38  ;;  %v3874_v8 = vmul.f32 %v3860_v55, %v8070_v43  ;;  %v9297_v38 = vld [vmem:[#allocation75_spill] sm:$0xff] }
 0xd0e   : > { %v4112_v31 = vmul.f32 %v8463_v26, %v3860_v55  ;;  %v4192_v51 = vmul.f32 %v8467_v10, %v3860_v55 }
 0xd0f   : > { %v3878_v61 = vadd.f32 %v3874_v8, %v3854_v48  ;;  %v9300_v48 = vld [vmem:[#allocation53_spill] sm:$0xff]  ;;  %v9305_v8 = vld [vmem:[#allocation26_spill] sm:$0xff] }
 0xd10   : > { %v8483_v13 = vadd.f32 %v4112_v31, %v4104_v21  ;;  %v8485_v3 = vadd.f32 %v4192_v51, %v4184_v41  ;;  %v9301_v21 = vld [vmem:[#allocation54_spill] sm:$0xff]  ;;  %v9302_v41 = vld [vmem:[#allocation55_spill] sm:$0xff] }
 0xd11   : > { %v3864_v60 = vpop.permute.xlu0 %3863  ;;  %v3882_v12 = vmul.f32 %v3878_v61, %v8085_v59  ;;  %v9298_v59 = vld [vmem:[#allocation51_spill] sm:$0xff] }
 0xd12   : > { %v3875_v34 = vmul.f32 %v3864_v60, %v8070_v43  ;;  %v4113_v20 = vmul.f32 %v8463_v26, %v3864_v60  ;;  %v4193_v4 = vmul.f32 %v8467_v10, %v3864_v60 }
 0xd13   : > { %6051 = vmatprep.mubr.msk.f32.mxu1 %vm896_vm0, %v3882_v12  ;;  %6073 = vmatprep.mubr.msk.f32.mxu0 %vm896_vm0, %v3882_v12 }
 0xd14   : > { %v3879_v52 = vadd.f32 %v3875_v34, %v3855_v58  ;;  %v8496_v49 = vadd.f32 %v4113_v20, %v4105_v46  ;;  %v8498_v42 = vadd.f32 %v4193_v4, %v4185_v27 }
 0xd16   : > { %v3883_v55 = vmul.f32 %v3879_v52, %v9297_v38 }
 0xd18   : > { %6052 = vmatmul.mubr.msk.f32.vlgmr.msra.gmra.mrb[20].mxu1 %vm896_vm0, %v3883_v55  ;;  %6074 = vmatmul.mubr.msk.f32.vlgmr.msra.gmra.mrb[24].mxu0 %vm896_vm0, %v3883_v55 }
 0xd19   : > { %6398 = vmatpush3.bf16.msra.mxu1 %v7658_v7  ;;  %6414 = vmatpush3.bf16.msra.mxu0 %v7663_v6  ;;  %v9303_v7 = vld [vmem:[#allocation56_spill] sm:$0xff]  ;;  %v9304_v6 = vld [vmem:[#allocation25_spill] sm:$0xff] }
 0xd1a   : > { %6400 = vmatprep.subr.bf16.mxu1 %v9298_v59  ;;  %6416 = vmatprep.subr.bf16.mxu0 %v9299_v40 }
 0xd1d   : > { %6402 = vmatpush3.bf16.msra.mxu1 %v9298_v59  ;;  %6418 = vmatpush3.bf16.msra.mxu0 %v9299_v40 }
 0xd1e   : > { %6404 = vmatprep.subr.bf16.mxu1 %v9300_v48  ;;  %6420 = vmatprep.subr.bf16.mxu0 %v9301_v21 }
 0xd21   : > { %6406 = vmatpush3.bf16.msra.mxu1 %v9300_v48  ;;  %6422 = vmatpush3.bf16.msra.mxu0 %v9301_v21 }
 0xd22   : > { %6408 = vmatprep.subr.bf16.mxu1 %v9302_v41  ;;  %6424 = vmatprep.subr.bf16.mxu0 %v9303_v7 }
 0xd25   : > { %6410 = vmatpush3.bf16.msra.mxu1 %v9302_v41  ;;  %6426 = vmatpush3.bf16.msra.mxu0 %v9303_v7  ;;  %v3798_v41 = vmul.f32 %v8386_v16, %v8407_v15  ;;  %v8554_v7 = vpop.eup %6849 }
 0xd26   : > { %6428 = vmatprep.subr.bf16.mxu1 %v9304_v6  ;;  %6444 = vmatprep.subr.bf16.mxu0 %v9305_v8 }
 0xd30   : > { %v3847_v31 = vpop.permute.xlu1 %3846 }
 0xd31   : > { %v3856_v51 = vmul.f32 %v3847_v31, %v8067_v47  ;;  %v4106_v61 = vmul.f32 %v8471_v25, %v3847_v31  ;;  %v4186_v46 = vmul.f32 %v8475_v1, %v3847_v31 }
 0xd34   : > { %v8525_v34 = vpop.permute.xlu0 %3851 }
 0xd35   : > { %v3868_v58 = vpop.permute.xlu1 %3867  ;;  %v3857_v55 = vmul.f32 %v8525_v34, %v8067_v47  ;;  %v3806_v47 = vmul.f32 %v8380_v45, %v8415_v44 }
 0xd36   : > { %v3876_v60 = vmul.f32 %v3868_v58, %v8070_v43  ;;  %v4114_v12 = vmul.f32 %v8463_v26, %v3868_v58  ;;  %v4194_v27 = vmul.f32 %v8467_v10, %v3868_v58 }
 0xd37   : > { %v3810_v31 = vadd.f32 %v3806_v47, %v3798_v41 }
 0xd38   : > { %v3880_v20 = vadd.f32 %v3876_v60, %v3856_v51  ;;  %v8527_v4 = vadd.f32 %v4114_v12, %v4106_v61  ;;  %v8529_v52 = vadd.f32 %v4194_v27, %v4186_v46 }
 0xd39   : > { %v8531_v38 = vpop.permute.xlu1 %3871 }
 0xd3a   : > { %v3877_v59 = vmul.f32 %v8531_v38, %v8070_v43  ;;  %v3884_v40 = vmul.f32 %v3880_v20, %v8091_v11  ;;  %v3786_v43 = vmul.f32 %v8374_v9, %v8409_v50  ;;  %v3778_v11 = vmul.f32 %v8371_v53, %v8402_v37  ;;  %v6852_v20 = vpop.eup %6851 }
 0xd3b   : > { %v3829_v53 = vrot.slane %v8554_v7, %v7296_v62  ;;  %v2913_v37 = vsub.f32 1.0, %v2909_v24 }
 0xd3c   : > { %v3881_v48 = vadd.f32 %v3877_v59, %v3857_v55  ;;  %6054 = vmatprep.mubr.msk.f32.mxu1 %vm896_vm0, %v3884_v40  ;;  %6076 = vmatprep.mubr.msk.f32.mxu0 %vm896_vm0, %v3884_v40  ;;  %v3790_v9 = vadd.f32 %v3786_v43, %v3778_v11  ;;  %v6854_v40 = vpop.eup %6853 }
 0xd3d   : > { %v3831_v51 = vmul.f32 %v3829_v53, %v8404_v18  ;;  %v2917_v46 = vmul.f32 2.0, %v2913_v37  ;;  %v3832_v28 = vmul.f32 %v3829_v53, %v8440_v54 }
 0xd3e   : > { %v3885_v21 = vmul.f32 %v3881_v48, %v8095_v56  ;;  %v2910_v56 = vmul.f32 %v8102_v2, %v8102_v2  ;;  %v3814_v16 = vadd.f32 %v3810_v31, %v3790_v9  ;;  %v9306_v48 = vld [vmem:[#allocation76_spill] sm:$0xff] }
 0xd40   : > { %6055 = vmatmul.mubr.msk.f32.gmra.mrb[22].mxu1 %vm896_vm0, %v3885_v21  ;;  %6077 = vmatmul.mubr.msk.f32.gmra.mrb[26].mxu0 %vm896_vm0, %v3885_v21  ;;  %v2914_v45 = vsub.f32 1.0, %v2910_v56  ;;  %v3830_v60 = vmul.f32 %v3829_v53, %v3814_v16  ;;  %v2912_v56 = vmul.f32 %v8135_v36, %v8135_v36 }
 0xd42   : > { %v2918_v15 = vmul.f32 2.0, %v2914_v45  ;;  %v2916_v31 = vsub.f32 1.0, %v2912_v56 }
 0xd44   : > { %v2920_v9 = vmul.f32 2.0, %v2916_v31 }
 0xdeb   : > { %v6053_v50 = vpop.f32.mrb[20].mxu1  ;;  %v6075_v2 = vpop.f32.mrb[24].mxu0 }
 0xdec   : > { %v3984_v44 = vmul.f32 0.1, %v6053_v50  ;;  %v4073_v61 = vmul.f32 0.1, %v6075_v2  ;;  %v3964_v30 = vpop.f32.mrb[21].mxu1  ;;  %v4053_v58 = vpop.f32.mrb[25].mxu0 }
 0xded   : > { %v3983_v57 = vmul.f32 0.1, %v3964_v30  ;;  %v4072_v39 = vmul.f32 0.1, %v4053_v58  ;;  %v6856_v58 = vpop.eup %6855 }
 0xdee   : > { %v4077_v12 = vmul.f32 %v3984_v44, %v2918_v15  ;;  %v4081_v27 = vsub.f32 %v3831_v51, %v4073_v61  ;;  %v3833_v15 = vmul.f32 %v3829_v53, %v8445_v35  ;;  %v4143_v53 = vrot.slane %v8454_v29, %v7299_v63 }
 0xdef   : > { %v4076_v55 = vmul.f32 %v3983_v57, %v2917_v46  ;;  %v4080_v59 = vsub.f32 %v3830_v60, %v4072_v39  ;;  %v6858_v57 = vpop.eup %6857  ;;  %v9307_v60 = vld [vmem:[#allocation77_spill] sm:$0xff] }
 0xdf0   : > { %v4089_v21 = vmul.f32 %v4077_v12, %v9306_v48  ;;  %v4085_v47 = vmul.f32 %v6852_v20, %v4081_v27  ;;  %v9308_v27 = vld [vmem:[#allocation78_spill] sm:$0xff]  ;;  %v4167_v48 = vrot.slane %v8454_v29, %v7296_v62 }
 0xdf1   : > { %v4088_v43 = vmul.f32 %v4076_v55, %v7928_v14  ;;  %v4084_v11 = vmul.f32 %v6854_v40, %v4080_v59  ;;  %v2911_v14 = vmul.f32 %v8137_v23, %v8137_v23  ;;  %v8587_v40 = vrot.slane %v8459_v5, %v7299_v63 }
 0xdf2   : > { %v4093_v18 = vsub.f32 %v4085_v47, %v4089_v21  ;;  %v8593_v21 = vrot.slane %v8459_v5, %v7296_v62 }
 0xdf3   : > { %v4092_v41 = vsub.f32 %v4084_v11, %v4088_v43  ;;  %v2915_v24 = vsub.f32 1.0, %v2911_v14 }
 0xdf4   : > { %4127 = vperm.xlu1 %6602, %v4093_v18  }
 0xdf5   : > { %4149 = vperm.xlu0 %6605, %v4092_v41   ;;  %v2919_v51 = vmul.f32 2.0, %v2915_v24  ;;  %v4227_v24 = vrot.slane %v8390_v17, %v7299_v63 }
 0xdf8   : > { %6603 = vset.pattern.permute.xlu1 %v9237_v19 }
 0xdf9   : > { %4153 = vperm.xlu1 %6603, %v4093_v18   ;;  %6606 = vset.pattern.permute.xlu0 %v9261_v0 }
 0xdfd   : > { %6604 = vset.pattern.permute.xlu1 %v9261_v0 }
 0xdfe   : > { %4122 = vperm.xlu1 %6604, %v4092_v41  }
 0xe02   : > { %6607 = vset.pattern.permute.xlu1 %v9237_v19 }
 0xe13   : > { %v6056_v45 = vpop.f32.mrb[22].mxu1  ;;  %v6078_v37 = vpop.f32.mrb[26].mxu0 }
 0xe14   : > { %v3986_v16 = vmul.f32 0.1, %v6056_v45  ;;  %v4075_v50 = vmul.f32 0.1, %v6078_v37  ;;  %v3974_v2 = vpop.f32.mrb[23].mxu1  ;;  %v4063_v44 = vpop.f32.mrb[27].mxu0 }
 0xe15   : > { %v3985_v36 = vmul.f32 0.1, %v3974_v2  ;;  %v4074_v61 = vmul.f32 0.1, %v4063_v44 }
 0xe16   : > { %v4079_v30 = vmul.f32 %v3986_v16, %v2920_v9  ;;  %v4083_v23 = vsub.f32 %v3833_v15, %v4075_v50 }
 0xe17   : > { %v4078_v22 = vmul.f32 %v3985_v36, %v2919_v51  ;;  %v4082_v46 = vsub.f32 %v3832_v28, %v4074_v61 }
 0xe18   : > { %v4091_v39 = vmul.f32 %v4079_v30, %v9307_v60  ;;  %v4087_v12 = vmul.f32 %v6856_v58, %v4083_v23 }
 0xe19   : > { %v4090_v20 = vmul.f32 %v4078_v22, %v9308_v27  ;;  %v4086_v35 = vmul.f32 %v6858_v57, %v4082_v46  ;;  %v4115_v22 = vmul.f32 %v8463_v26, %v8531_v38 }
 0xe1a   : > { %v4095_v55 = vsub.f32 %v4087_v12, %v4091_v39  ;;  %v4107_v12 = vmul.f32 %v8471_v25, %v8525_v34  ;;  %v8635_v25 = vld [vmem:[%s9295_s5 + $0x4] sm:$0xf] }
 0xe1b   : > { %v4094_v59 = vsub.f32 %v4086_v35, %v4090_v20 }
 0xe1d   : > { %4157 = vperm.xlu1 %6607, %v4094_v59   ;;  %4132 = vperm.xlu0 %6606, %v4094_v59  }
 0xe21   : > { %6608 = vset.pattern.permute.xlu1 %v9261_v0  ;;  %6609 = vset.pattern.permute.xlu0 %v9237_v19 }
 0xe22   : > { %4137 = vperm.xlu1 %6608, %v4095_v55   ;;  %4161 = vperm.xlu0 %6609, %v4095_v55   ;;  %v4119_v55 = vadd.f32 %v4115_v22, %v4107_v12  ;;  %v9314_v12 = vld [vmem:[#allocation28_spill] sm:$0xff] }
 0xe26   : > { %6611 = vset.pattern.permute.xlu1 %v9237_v19  ;;  %6610 = vset.pattern.permute.xlu0 %v9261_v0 }
 0xe73   : > { %v4128_v54 = vpop.permute.xlu1 %4127 }
 0xe74   : > { %v4145_v43 = vmul.f32 %v4143_v53, %v4128_v54  ;;  %v4205_v11 = vmul.f32 %v8587_v40, %v4128_v54  ;;  %v4150_v56 = vpop.permute.xlu0 %4149  ;;  %v8644_v54 = vrot.slane %v8635_v25, %v7149_v32 }
 0xe75   : > { %v4168_v45 = vmul.f32 %v4167_v48, %v4150_v56  ;;  %v4212_v37 = vmul.f32 %v8593_v21, %v4150_v56 }
 0xe78   : > { %v4154_v47 = vpop.permute.xlu1 %4153 }
 0xe79   : > { %v4169_v18 = vmul.f32 %v4167_v48, %v4154_v47  ;;  %v4213_v41 = vmul.f32 %v8593_v21, %v4154_v47 }
 0xe7b   : > { %v4173_v14 = vadd.f32 %v4169_v18, %v4145_v43  ;;  %v4217_v31 = vadd.f32 %v4213_v41, %v4205_v11 }
 0xe7d   : > { %v4177_v9 = vadd.f32 %v4173_v14, %v8496_v49  ;;  %v8601_v29 = vadd.f32 %v4217_v31, %v8498_v42  ;;  %v4123_v5 = vpop.permute.xlu1 %4122 }
 0xe7e   : > { %v4144_v16 = vmul.f32 %v4143_v53, %v4123_v5  ;;  %v4204_v15 = vmul.f32 %v8587_v40, %v4123_v5  ;;  %v9309_v5 = vld [vmem:[#allocation57_spill] sm:$0xff] }
 0xe7f   : > { %v4229_v50 = vmul.f32 %v4227_v24, %v4177_v9 }
 0xe80   : > { %v4172_v2 = vadd.f32 %v4168_v45, %v4144_v16  ;;  %v4216_v44 = vadd.f32 %v4212_v37, %v4204_v15  ;;  %v9310_v37 = vld [vmem:[#allocation58_spill] sm:$0xff] }
 0xe81   : > { %4269 = vperm.xlu1 %6611, %v4229_v50   ;;  %4247 = vperm.xlu0 %6610, %v4229_v50  }
 0xe82   : > { %v4176_v51 = vadd.f32 %v4172_v2, %v8483_v13  ;;  %v8607_v36 = vadd.f32 %v4216_v44, %v8485_v3 }
 0xe84   : > { %v4228_v49 = vmul.f32 %v4227_v24, %v4176_v51 }
 0xe85   : > { %6612 = vset.pattern.permute.xlu1 %v9261_v0  ;;  %6615 = vset.pattern.permute.xlu0 %v9237_v19 }
 0xe86   : > { %4242 = vperm.xlu1 %6612, %v4228_v49  }
 0xe8a   : > { %6613 = vset.pattern.permute.xlu1 %v9237_v19 }
 0xe8b   : > { %4265 = vperm.xlu1 %6613, %v4228_v49  }
 0xe8f   : > { %6614 = vset.pattern.permute.xlu1 %v9261_v0 }
 0xe9c   : > { %v4133_v42 = vpop.permute.xlu0 %4132  ;;  %v4158_v28 = vpop.permute.xlu1 %4157 }
 0xe9d   : > { %v4146_v61 = vmul.f32 %v4143_v53, %v4133_v42  ;;  %v4206_v30 = vmul.f32 %v8587_v40, %v4133_v42  ;;  %v4170_v13 = vmul.f32 %v4167_v48, %v4158_v28  ;;  %v4214_v3 = vmul.f32 %v8593_v21, %v4158_v28 }
 0xe9f   : > { %v4174_v23 = vadd.f32 %v4170_v13, %v4146_v61  ;;  %v4218_v58 = vadd.f32 %v4214_v3, %v4206_v30  ;;  %v9311_v3 = vld [vmem:[#allocation60_spill] sm:$0xff] }
 0xea1   : > { %v4178_v46 = vadd.f32 %v4174_v23, %v8527_v4  ;;  %v8619_v57 = vadd.f32 %v4218_v58, %v8529_v52  ;;  %v8621_v60 = vpop.permute.xlu0 %4161  ;;  %v8623_v39 = vpop.permute.xlu1 %4137  ;;  %v8640_v52 = vld [vmem:[%s9296_s26 + $0x4] sm:$0xf]  ;;  %v9312_v58 = vld [vmem:[#allocation59_spill] sm:$0xff] }
 0xea2   : > { %v4171_v27 = vmul.f32 %v4167_v48, %v8621_v60  ;;  %v4147_v20 = vmul.f32 %v4143_v53, %v8623_v39  ;;  %v8648_v53 = vrot.slane %v8640_v52, %v7149_v32  ;;  %v8652_v48 = vrot.slane %v8635_v25, %v7152_v33 }
 0xea3   : > { %v4230_v35 = vmul.f32 %v4227_v24, %v4178_v46  ;;  %v8656_v47 = vrot.slane %v8640_v52, %v7152_v33  ;;  %v9313_v46 = vld [vmem:[#allocation27_spill] sm:$0xff] }
 0xea4   : > { %v4175_v59 = vadd.f32 %v4171_v27, %v4147_v20  ;;  %v9315_v27 = vld [vmem:[#allocation29_spill] sm:$0xff]  ;;  %v9316_v20 = vld [vmem:[#allocation30_spill] sm:$0xff] }
 0xea5   : > { %4273 = vperm.xlu0 %6615, %v4230_v35   ;;  %4252 = vperm.xlu1 %6614, %v4230_v35   ;;  %v9317_v35 = vld [vmem:[#allocation31_spill] sm:$0xff] }
 0xea6   : > { %v4179_v26 = vadd.f32 %v4175_v59, %v4119_v55  ;;  %v9320_v55 = vld [vmem:[#allocation3_spill] sm:$0xff] }
 0xea8   : > { %v4231_v4 = vmul.f32 %v4227_v24, %v4179_v26 }
 0xea9   : > { %6618 = vset.pattern.permute.xlu0 %v9261_v0 }
 0xeaa   : > { %4257 = vperm.xlu1 %6614, %v4231_v4  }
 0xeae   : > { %6616 = vset.pattern.permute.xlu1 %v9237_v19 }
 0xeaf   : > { %4277 = vperm.xlu1 %6616, %v4231_v4  }
 0xeb3   : > { %6617 = vset.pattern.permute.xlu1 %v9261_v0 }
 0xf00   : > { %v4248_v43 = vpop.permute.xlu0 %4247  ;;  %v4270_v11 = vpop.permute.xlu1 %4269 }
 0xf01   : > { %v4511_v18 = vmul.f32 %v8644_v54, %v4248_v43  ;;  %v4591_v41 = vmul.f32 %v8648_v53, %v4248_v43  ;;  %v4519_v56 = vmul.f32 %v8652_v48, %v4270_v11  ;;  %v4599_v14 = vmul.f32 %v8656_v47, %v4270_v11 }
 0xf02   : > { %v4261_v45 = vmul.f32 %v4248_v43, %v9309_v5  ;;  %v4281_v16 = vmul.f32 %v4270_v11, %v9310_v37 }
 0xf03   : > { %v8662_v31 = vadd.f32 %v4519_v56, %v4511_v18  ;;  %v8664_v24 = vadd.f32 %v4599_v14, %v4591_v41  ;;  %v9321_v41 = vld [vmem:[#allocation61_spill] sm:$0xff] }
 0xf04   : > { %v4285_v28 = vadd.f32 %v4281_v16, %v4261_v45 }
 0xf05   : > { %v4243_v9 = vpop.permute.xlu1 %4242 }
 0xf06   : > { %v4260_v15 = vmul.f32 %v4243_v9, %v9309_v5  ;;  %v4510_v50 = vmul.f32 %v8644_v54, %v4243_v9  ;;  %v4590_v44 = vmul.f32 %v8648_v53, %v4243_v9  ;;  %v4289_v22 = vmul.f32 %v4285_v28, %v9312_v58  ;;  %v9326_v28 = vld [vmem:[#allocation68_spill] sm:$0xff] }
 0xf0a   : > { %v4266_v2 = vpop.permute.xlu1 %4265 }
 0xf0b   : > { %v4280_v51 = vmul.f32 %v4266_v2, %v9310_v37  ;;  %v4518_v49 = vmul.f32 %v8652_v48, %v4266_v2  ;;  %v4598_v42 = vmul.f32 %v8656_v47, %v4266_v2  ;;  %v9323_v2 = vld [vmem:[#allocation63_spill] sm:$0xff] }
 0xf0d   : > { %v4284_v61 = vadd.f32 %v4280_v51, %v4260_v15  ;;  %v8674_v30 = vadd.f32 %v4518_v49, %v4510_v50  ;;  %v8676_v13 = vadd.f32 %v4598_v42, %v4590_v44  ;;  %v9322_v15 = vld [vmem:[#allocation62_spill] sm:$0xff]  ;;  %v2320_v44 = vmul.f32 %v9323_v2, %v9323_v2  ;;  %v9325_v49 = vld [vmem:[#allocation64_spill] sm:$0xff] }
 0xf0e   : > { %v9324_v51 = vld [vmem:[#allocation66_spill] sm:$0xff]  ;;  %v2319_v42 = vmul.f32 %v9325_v49, %v9325_v49 }
 0xf0f   : > { %v4288_v23 = vmul.f32 %v4284_v61, %v9311_v3  ;;  %6859 = vrcp.f32 %v9324_v51 }
 0xf10   : > { %6861 = vrcp.f32 %v9326_v28  ;;  %v2323_v61 = vsub.f32 1.0, %v2319_v42  ;;  %v4207_v28 = vmul.f32 %v8587_v40, %v8623_v39 }
 0xf11   : > { %6095 = vmatprep.mubr.msk.f32.mxu1 %vm896_vm0, %v4288_v23  ;;  %6117 = vmatprep.mubr.msk.f32.mxu0 %vm896_vm0, %v4288_v23 }
 0xf12   : > { %6096 = vmatmul.mubr.msk.f32.vlgmr.msra.gmra.mrb[24].mxu1 %vm896_vm0, %v4289_v22  ;;  %6118 = vmatmul.mubr.msk.f32.vlgmr.msra.gmra.mrb[28].mxu0 %vm896_vm0, %v4289_v22 }
 0xf13   : > { %6430 = vmatpush3.bf16.msra.mxu1 %v9304_v6  ;;  %6446 = vmatpush3.bf16.msra.mxu0 %v9305_v8  ;;  %v9318_v6 = vld [vmem:[#allocation32_spill] sm:$0xff]  ;;  %v9319_v8 = vld [vmem:[#allocation2_spill] sm:$0xff] }
 0xf14   : > { %6432 = vmatprep.subr.bf16.mxu1 %v9313_v46  ;;  %6448 = vmatprep.subr.bf16.mxu0 %v9314_v12 }
 0xf17   : > { %6434 = vmatpush3.bf16.msra.mxu1 %v9313_v46  ;;  %6450 = vmatpush3.bf16.msra.mxu0 %v9314_v12 }
 0xf18   : > { %6436 = vmatprep.subr.bf16.mxu1 %v9315_v27  ;;  %6452 = vmatprep.subr.bf16.mxu0 %v9316_v20 }
 0xf1b   : > { %6438 = vmatpush3.bf16.msra.mxu1 %v9315_v27  ;;  %6454 = vmatpush3.bf16.msra.mxu0 %v9316_v20 }
 0xf1c   : > { %6440 = vmatprep.subr.bf16.mxu1 %v9317_v35  ;;  %6456 = vmatprep.subr.bf16.mxu0 %v9318_v6 }
 0xf1f   : > { %6442 = vmatpush3.bf16.msra.mxu1 %v9317_v35  ;;  %6458 = vmatpush3.bf16.msra.mxu0 %v9318_v6  ;;  %v2327_v35 = vmul.f32 2.0, %v2323_v61  ;;  %v9329_v61 = vld [vmem:[#allocation69_spill] sm:$0xff] }
 0xf20   : > { %6460 = vmatprep.subr.bf16.mxu1 %v9319_v8  ;;  %6476 = vmatprep.subr.bf16.mxu0 %v9320_v55 }
 0xf24   : > { %v8700_v59 = vpop.permute.xlu0 %4273  ;;  %v8702_v26 = vpop.permute.xlu1 %4252 }
 0xf25   : > { %v4282_v4 = vmul.f32 %v8700_v59, %v9310_v37  ;;  %v4262_v43 = vmul.f32 %v8702_v26, %v9309_v5 }
 0xf27   : > { %v4286_v11 = vadd.f32 %v4282_v4, %v4262_v43 }
 0xf29   : > { %v8708_v18 = vpop.permute.xlu1 %4257  ;;  %v4290_v56 = vmul.f32 %v4286_v11, %v9321_v41 }
 0xf2a   : > { %v4263_v9 = vmul.f32 %v8708_v18, %v9309_v5  ;;  %v2324_v5 = vsub.f32 1.0, %v2320_v44  ;;  %v9328_v44 = vld [vmem:[#allocation67_spill] sm:$0xff] }
 0xf2b   : > { %6098 = vmatprep.mubr.msk.f32.mxu1 %vm896_vm0, %v4290_v56  ;;  %6120 = vmatprep.mubr.msk.f32.mxu0 %vm896_vm0, %v4290_v56  ;;  %v6860_v56 = vpop.eup %6859 }
 0xf2c   : > { %v2328_v3 = vmul.f32 2.0, %v2324_v5  ;;  %v4195_v5 = vmul.f32 %v8467_v10, %v8531_v38 }
 0xf2e   : > { %v8713_v14 = vpop.permute.xlu1 %4277 }
 0xf2f   : > { %v4283_v45 = vmul.f32 %v8713_v14, %v9310_v37  ;;  %v4235_v37 = vrot.slane %v8554_v7, %v7299_v63 }
 0xf31   : > { %v4287_v16 = vadd.f32 %v4283_v45, %v4263_v9  ;;  %v4237_v46 = vmul.f32 %v4235_v37, %v8601_v29  ;;  %v4236_v4 = vmul.f32 %v4235_v37, %v8607_v36  ;;  %v4215_v36 = vmul.f32 %v8593_v21, %v8621_v60  ;;  %v9332_v21 = vld [vmem:[#allocation74_spill] sm:$0xff] }
 0xf33   : > { %v4291_v50 = vmul.f32 %v4287_v16, %v9322_v15  ;;  %v6862_v16 = vpop.eup %6861  ;;  %v9327_v15 = vld [vmem:[#allocation65_spill] sm:$0xff] }
 0xf35   : > { %6099 = vmatmul.mubr.msk.f32.gmra.mrb[26].mxu1 %vm896_vm0, %v4291_v50  ;;  %6121 = vmatmul.mubr.msk.f32.gmra.mrb[30].mxu0 %vm896_vm0, %v4291_v50 }
 0xfe5   : > { %v6097_v23 = vpop.f32.mrb[24].mxu1  ;;  %v6119_v58 = vpop.f32.mrb[28].mxu0 }
 0xfe6   : > { %v4390_v22 = vmul.f32 0.1, %v6097_v23  ;;  %v4479_v12 = vmul.f32 0.1, %v6119_v58  ;;  %v4370_v27 = vpop.f32.mrb[25].mxu1  ;;  %v4459_v20 = vpop.f32.mrb[29].mxu0  ;;  %v4187_v23 = vmul.f32 %v8475_v1, %v8525_v34  ;;  %v4219_v58 = vadd.f32 %v4215_v36, %v4207_v28 }
 0xfe7   : > { %v4389_v6 = vmul.f32 0.1, %v4370_v27  ;;  %v4478_v43 = vmul.f32 0.1, %v4459_v20 }
 0xfe8   : > { %v4483_v11 = vmul.f32 %v4390_v22, %v2328_v3  ;;  %v4487_v41 = vsub.f32 %v4237_v46, %v4479_v12  ;;  %v2322_v3 = vmul.f32 %v9329_v61, %v9329_v61  ;;  %v9330_v22 = vld [vmem:[#allocation72_spill] sm:$0xff]  ;;  %v9331_v46 = vld [vmem:[#allocation70_spill] sm:$0xff]  ;;  %v4199_v27 = vadd.f32 %v4195_v5, %v4187_v23 }
 0xfe9   : > { %v4482_v9 = vmul.f32 %v4389_v6, %v2327_v35  ;;  %v4486_v45 = vsub.f32 %v4236_v4, %v4478_v43  ;;  %6863 = vrcp.f32 %v9330_v22  ;;  %v2321_v12 = vmul.f32 %v9331_v46, %v9331_v46 }
 0xfea   : > { %v4495_v50 = vmul.f32 %v4483_v11, %v9327_v15  ;;  %v4491_v2 = vmul.f32 %v6860_v56, %v4487_v41  ;;  %6865 = vrcp.f32 %v9332_v21  ;;  %v2326_v60 = vsub.f32 1.0, %v2322_v3 }
 0xfeb   : > { %v4494_v51 = vmul.f32 %v4482_v9, %v9328_v44  ;;  %v4490_v29 = vmul.f32 %v6862_v16, %v4486_v45  ;;  %v4223_v40 = vadd.f32 %v4219_v58, %v4199_v27  ;;  %v2325_v39 = vsub.f32 1.0, %v2321_v12  ;;  %v9333_v44 = vld [vmem:[#allocation71_spill] sm:$0xff] }
 0xfec   : > { %v4499_v49 = vsub.f32 %v4491_v2, %v4495_v50  ;;  %v2330_v20 = vmul.f32 2.0, %v2326_v60  ;;  %v4238_v41 = vmul.f32 %v4235_v37, %v8619_v57  ;;  %v4549_v61 = vrot.slane %v8635_v25, %v7299_v63 }
 0xfed   : > { %v4498_v42 = vsub.f32 %v4490_v29, %v4494_v51  ;;  %v4239_v6 = vmul.f32 %v4235_v37, %v4223_v40  ;;  %v2329_v34 = vmul.f32 2.0, %v2325_v39  ;;  %v8762_v3 = vrot.slane %v8640_v52, %v7299_v63 }
 0xfee   : > { %4533 = vperm.xlu1 %6617, %v4499_v49   ;;  %v4573_v23 = vrot.slane %v8635_v25, %v7296_v62  ;;  %v8768_v58 = vrot.slane %v8640_v52, %v7296_v62  ;;  %v4633_v52 = vrot.slane %v8390_v17, %v7152_v33 }
 0xfef   : > { %4528 = vperm.xlu0 %6618, %v4498_v42  }
 0xff2   : > { %6620 = vset.pattern.permute.xlu1 %v9237_v19 }
 0xff3   : > { %4555 = vperm.xlu1 %6620, %v4498_v42   ;;  %6619 = vset.pattern.permute.xlu0 %v9237_v19  ;;  %v6864_v16 = vpop.eup %6863 }
 0xff4   : > { %4559 = vperm.xlu0 %6619, %v4499_v49   ;;  %v6866_v2 = vpop.eup %6865  ;;  %v9334_v49 = vld [vmem:[#allocation73_spill] sm:$0xff] }
 0xff7   : > { %6622 = vset.pattern.permute.xlu1 %v9261_v0 }
 0xff8   : > { %6621 = vset.pattern.permute.xlu0 %v9261_v0 }
0x1008   : > { %v6100_v10 = vpop.f32.mrb[26].mxu1  ;;  %v6122_v38 = vpop.f32.mrb[30].mxu0 }
0x1009   : > { %v4392_v35 = vmul.f32 0.1, %v6100_v10  ;;  %v4481_v4 = vmul.f32 0.1, %v6122_v38  ;;  %v4380_v43 = vpop.f32.mrb[27].mxu1  ;;  %v4469_v1 = vpop.f32.mrb[31].mxu0 }
0x100a   : > { %v4391_v11 = vmul.f32 0.1, %v4380_v43  ;;  %v4480_v56 = vmul.f32 0.1, %v4469_v1 }
0x100b   : > { %v4485_v9 = vmul.f32 %v4392_v35, %v2330_v20  ;;  %v4489_v45 = vsub.f32 %v4239_v6, %v4481_v4 }
0x100c   : > { %v4484_v15 = vmul.f32 %v4391_v11, %v2329_v34  ;;  %v4488_v50 = vsub.f32 %v4238_v41, %v4480_v56  ;;  %v4592_v56 = vmul.f32 %v8648_v53, %v8702_v26 }
0x100d   : > { %v4497_v51 = vmul.f32 %v4485_v9, %v9333_v44  ;;  %v4493_v29 = vmul.f32 %v6864_v16, %v4489_v45 }
0x100e   : > { %v4496_v42 = vmul.f32 %v4484_v15, %v9334_v49  ;;  %v4492_v36 = vmul.f32 %v6866_v2, %v4488_v50 }
0x100f   : > { %v4501_v28 = vsub.f32 %v4493_v29, %v4497_v51  ;;  %v4521_v29 = vmul.f32 %v8652_v48, %v8713_v14 }
0x1010   : > { %v4500_v5 = vsub.f32 %v4492_v36, %v4496_v42 }
0x1011   : > { %4543 = vperm.xlu0 %6621, %v4501_v28  }
0x1012   : > { %4538 = vperm.xlu1 %6622, %v4500_v5  }
0x1015   : > { %6627 = vset.pattern.permute.xlu0 %v9237_v19 }
0x1016   : > { %6623 = vset.pattern.permute.xlu1 %v9237_v19 }
0x1017   : > { %4563 = vperm.xlu1 %6623, %v4500_v5  }
0x101b   : > { %4567 = vperm.xlu1 %6623, %v4501_v28  }
0x101f   : > { %6624 = vset.pattern.permute.xlu1 %v9261_v0 }
0x106d   : > { %v4534_v57 = vpop.permute.xlu1 %4533 }
0x106e   : > { %v4529_v37 = vpop.permute.xlu0 %4528  ;;  %v4551_v40 = vmul.f32 %v4549_v61, %v4534_v57  ;;  %v4611_v39 = vmul.f32 %v8762_v3, %v4534_v57 }
0x106f   : > { %v4550_v46 = vmul.f32 %v4549_v61, %v4529_v37  ;;  %v4610_v12 = vmul.f32 %v8762_v3, %v4529_v37 }
0x1072   : > { %v4556_v22 = vpop.permute.xlu1 %4555 }
0x1073   : > { %v4574_v27 = vmul.f32 %v4573_v23, %v4556_v22  ;;  %v4618_v21 = vmul.f32 %v8768_v58, %v4556_v22  ;;  %v4560_v60 = vpop.permute.xlu0 %4559 }
0x1074   : > { %v4575_v20 = vmul.f32 %v4573_v23, %v4560_v60  ;;  %v4619_v10 = vmul.f32 %v8768_v58, %v4560_v60 }
0x1075   : > { %v4578_v38 = vadd.f32 %v4574_v27, %v4550_v46  ;;  %v4622_v25 = vadd.f32 %v4618_v21, %v4610_v12 }
0x1076   : > { %v4579_v35 = vadd.f32 %v4575_v20, %v4551_v40  ;;  %v4623_v6 = vadd.f32 %v4619_v10, %v4611_v39 }
0x1077   : > { %v4582_v4 = vadd.f32 %v4578_v38, %v8674_v30  ;;  %v8778_v43 = vadd.f32 %v4622_v25, %v8676_v13  ;;  %v4600_v13 = vmul.f32 %v8656_v47, %v8700_v59 }
0x1078   : > { %v4583_v1 = vadd.f32 %v4579_v35, %v8662_v31  ;;  %v8782_v34 = vadd.f32 %v4623_v6, %v8664_v24  ;;  %v4520_v31 = vmul.f32 %v8652_v48, %v8700_v59  ;;  %v4512_v24 = vmul.f32 %v8644_v54, %v8702_v26  ;;  %v9335_v35 = vld [vmem:[#allocation34_spill] sm:$0xff] }
0x1079   : > { %v4634_v11 = vmul.f32 %v4633_v52, %v4582_v4  ;;  %v4604_v51 = vadd.f32 %v4600_v13, %v4592_v56  ;;  %v4513_v59 = vmul.f32 %v8644_v54, %v8708_v18  ;;  %v8817_v54 = vld [vmem:[%s9295_s5] sm:$0xf] }
0x107a   : > { %v4635_v41 = vmul.f32 %v4633_v52, %v4583_v1  ;;  %v4524_v2 = vadd.f32 %v4520_v31, %v4512_v24  ;;  %v8826_v27 = vrot.slane %v8817_v54, %v7149_v32  ;;  %v8834_v60 = vrot.slane %v8817_v54, %v7152_v33 }
0x107b   : > { %4671 = vperm.xlu0 %6627, %v4634_v11   ;;  %v4525_v37 = vadd.f32 %v4521_v29, %v4513_v59  ;;  %v9339_v59 = vld [vmem:[#allocation4_spill] sm:$0xff] }
0x107c   : > { %4653 = vperm.xlu1 %6624, %v4635_v41  }
0x107f   : > { %6628 = vset.pattern.permute.xlu0 %v9261_v0 }
0x1080   : > { %6625 = vset.pattern.permute.xlu1 %v9237_v19 }
0x1081   : > { %4675 = vperm.xlu1 %6625, %v4635_v41  }
0x1085   : > { %6626 = vset.pattern.permute.xlu1 %v9261_v0 }
0x1086   : > { %4648 = vperm.xlu1 %6626, %v4634_v11  }
0x108a   : > { %6629 = vset.pattern.permute.xlu1 %v9237_v19 }
0x1090   : > { %v8798_v44 = vpop.permute.xlu0 %4543 }
0x1091   : > { %v4539_v30 = vpop.permute.xlu1 %4538  ;;  %v4553_v36 = vmul.f32 %v4549_v61, %v8798_v44 }
0x1092   : > { %v4552_v45 = vmul.f32 %v4549_v61, %v4539_v30  ;;  %v4612_v16 = vmul.f32 %v8762_v3, %v4539_v30  ;;  %v8822_v61 = vld [vmem:[%s9296_s26] sm:$0xf]  ;;  %v9336_v30 = vld [vmem:[#allocation33_spill] sm:$0xff] }
0x1093   : > { %v8830_v21 = vrot.slane %v8822_v61, %v7149_v32  ;;  %v8838_v40 = vrot.slane %v8822_v61, %v7152_v33 }
0x1096   : > { %v4564_v9 = vpop.permute.xlu1 %4563 }
0x1097   : > { %v4576_v15 = vmul.f32 %v4573_v23, %v4564_v9  ;;  %v4620_v50 = vmul.f32 %v8768_v58, %v4564_v9 }
0x1099   : > { %v4580_v49 = vadd.f32 %v4576_v15, %v4552_v45  ;;  %v4624_v42 = vadd.f32 %v4620_v50, %v4612_v16 }
0x109a   : > { %v8804_v26 = vpop.permute.xlu1 %4567 }
0x109b   : > { %v4584_v28 = vadd.f32 %v4580_v49, %v4524_v2  ;;  %v8807_v5 = vadd.f32 %v4624_v42, %v4604_v51  ;;  %v4577_v57 = vmul.f32 %v4573_v23, %v8804_v26  ;;  %v9337_v51 = vld [vmem:[#allocation36_spill] sm:$0xff]  ;;  %v9338_v49 = vld [vmem:[#allocation35_spill] sm:$0xff] }
0x109d   : > { %v4581_v22 = vadd.f32 %v4577_v57, %v4553_v36  ;;  %v4636_v46 = vmul.f32 %v4633_v52, %v4584_v28  ;;  %v9340_v36 = vld [vmem:[#allocation5_spill] sm:$0xff]  ;;  %v9341_v28 = vld [vmem:[#allocation6_spill] sm:$0xff]  ;;  %v9342_v57 = vld [vmem:[#allocation7_spill] sm:$0xff] }
0x109f   : > { %v4585_v12 = vadd.f32 %v4581_v22, %v4525_v37  ;;  %4679 = vperm.xlu1 %6629, %v4636_v46   ;;  %4658 = vperm.xlu0 %6628, %v4636_v46   ;;  %v9343_v37 = vld [vmem:[#allocation8_spill] sm:$0xff] }
0x10a1   : > { %v4637_v48 = vmul.f32 %v4633_v52, %v4585_v12 }
0x10a3   : > { %6630 = vset.pattern.permute.xlu1 %v9261_v0  ;;  %6631 = vset.pattern.permute.xlu0 %v9237_v19 }
0x10a4   : > { %4683 = vperm.xlu0 %6631, %v4637_v48   ;;  %4663 = vperm.xlu1 %6630, %v4637_v48  }
0x10a8   : > { %6632 = vset.pattern.permute.xlu0 %v9261_v0  ;;  %6633 = vset.pattern.permute.xlu1 %v9237_v19 }
0x10fa   : > { %v4672_v52 = vpop.permute.xlu0 %4671 }
0x10fb   : > { %v4654_v23 = vpop.permute.xlu1 %4653  ;;  %v4686_v11 = vmul.f32 %v4672_v52, %v9335_v35  ;;  %v4922_v41 = vmul.f32 %v8834_v60, %v4672_v52  ;;  %v5002_v13 = vmul.f32 %v8838_v40, %v4672_v52 }
0x10fc   : > { %v4915_v20 = vmul.f32 %v8826_v27, %v4654_v23  ;;  %v4995_v10 = vmul.f32 %v8830_v21, %v4654_v23  ;;  %v4667_v31 = vmul.f32 %v4654_v23, %v9336_v30 }
0x1100   : > { %v4676_v39 = vpop.permute.xlu1 %4675 }
0x1101   : > { %v4923_v38 = vmul.f32 %v8834_v60, %v4676_v39  ;;  %v5003_v25 = vmul.f32 %v8838_v40, %v4676_v39  ;;  %v4687_v6 = vmul.f32 %v4676_v39, %v9335_v35 }
0x1103   : > { %v8845_v4 = vadd.f32 %v4923_v38, %v4915_v20  ;;  %v8847_v1 = vadd.f32 %v5003_v25, %v4995_v10  ;;  %v4691_v16 = vadd.f32 %v4687_v6, %v4667_v31 }
0x1105   : > { %v4649_v24 = vpop.permute.xlu1 %4648  ;;  %v4695_v42 = vmul.f32 %v4691_v16, %v9338_v49  ;;  %v4641_v49 = vrot.slane %v8554_v7, %v7152_v33 }
0x1106   : > { %v4666_v56 = vmul.f32 %v4649_v24, %v9336_v30  ;;  %v4914_v9 = vmul.f32 %v8826_v27, %v4649_v24  ;;  %v4994_v45 = vmul.f32 %v8830_v21, %v4649_v24 }
0x1108   : > { %v4690_v15 = vadd.f32 %v4686_v11, %v4666_v56  ;;  %v8856_v50 = vadd.f32 %v4922_v41, %v4914_v9  ;;  %v8858_v2 = vadd.f32 %v5002_v13, %v4994_v45  ;;  %v9345_v11 = vld [vmem:[#allocation37_spill] sm:$0xff]  ;;  %v9346_v56 = vld [vmem:[#allocation38_spill] sm:$0xff]  ;;  %v9347_v45 = vld [vmem:[#allocation39_spill] sm:$0xff] }
0x1109   : > { %v1730_v16 = vmul.f32 %v9347_v45, %v9347_v45 }
0x110a   : > { %v4694_v29 = vmul.f32 %v4690_v15, %v9337_v51  ;;  %v9348_v15 = vld [vmem:[#allocation42_spill] sm:$0xff] }
0x110b   : > { %6867 = vrcp.f32 %v9348_v15  ;;  %v4601_v15 = vmul.f32 %v8656_v47, %v8713_v14 }
0x110c   : > { %6139 = vmatprep.mubr.msk.f32.mxu1 %vm896_vm0, %v4694_v29  ;;  %6161 = vmatprep.mubr.msk.f32.mxu0 %vm896_vm0, %v4694_v29  ;;  %v1734_v29 = vsub.f32 1.0, %v1730_v16 }
0x110d   : > { %6140 = vmatmul.mubr.msk.f32.vlgmr.msra.gmra.mrb[28].mxu1 %vm896_vm0, %v4695_v42  ;;  %6162 = vmatmul.mubr.msk.f32.vlgmr.msra.gmra.mrb[32].mxu0 %vm896_vm0, %v4695_v42 }
0x110e   : > { %6462 = vmatpush3.bf16.msra.mxu1 %v9319_v8  ;;  %6478 = vmatpush3.bf16.msra.mxu0 %v9320_v55  ;;  %v9344_v8 = vld [vmem:[#allocation9_spill] sm:$0xff] }
0x110f   : > { %6464 = vmatprep.subr.bf16.mxu1 %v9339_v59  ;;  %6480 = vmatprep.subr.bf16.mxu0 %v9340_v36 }
0x1112   : > { %6466 = vmatpush3.bf16.msra.mxu1 %v9339_v59  ;;  %6482 = vmatpush3.bf16.msra.mxu0 %v9340_v36  ;;  %v1738_v59 = vmul.f32 2.0, %v1734_v29  ;;  %v4593_v29 = vmul.f32 %v8648_v53, %v8708_v18 }
0x1113   : > { %6468 = vmatprep.subr.bf16.mxu1 %v9341_v28  ;;  %6484 = vmatprep.subr.bf16.mxu0 %v9342_v57 }
0x1116   : > { %6470 = vmatpush3.bf16.msra.mxu1 %v9341_v28  ;;  %6486 = vmatpush3.bf16.msra.mxu0 %v9342_v57 }
0x1117   : > { %6472 = vmatprep.subr.bf16.mxu1 %v9343_v37  ;;  %6488 = vmatprep.subr.bf16.mxu0 %v9344_v8 }
0x111a   : > { %6474 = vmatpush3.bf16.msra.mxu1 %v9343_v37  ;;  %6490 = vmatpush3.bf16.msra.mxu0 %v9344_v8  ;;  %v4643_v37 = vmul.f32 %v4641_v49, %v8782_v34 }
0x111e   : > { %v4659_v55 = vpop.permute.xlu0 %4658  ;;  %v4680_v22 = vpop.permute.xlu1 %4679 }
0x111f   : > { %v4668_v46 = vmul.f32 %v4659_v55, %v9336_v30  ;;  %v4916_v12 = vmul.f32 %v8826_v27, %v4659_v55  ;;  %v4996_v48 = vmul.f32 %v8830_v21, %v4659_v55  ;;  %v4688_v23 = vmul.f32 %v4680_v22, %v9335_v35 }
0x1120   : > { %v4924_v39 = vmul.f32 %v8834_v60, %v4680_v22  ;;  %v5004_v20 = vmul.f32 %v8838_v40, %v4680_v22 }
0x1121   : > { %v4692_v10 = vadd.f32 %v4688_v23, %v4668_v46 }
0x1122   : > { %v8886_v38 = vadd.f32 %v4924_v39, %v4916_v12  ;;  %v8888_v25 = vadd.f32 %v5004_v20, %v4996_v48  ;;  %v4642_v48 = vmul.f32 %v4641_v49, %v8778_v43  ;;  %v4621_v43 = vmul.f32 %v8768_v58, %v8804_v26 }
0x1123   : > { %v8890_v52 = vpop.permute.xlu0 %4683  ;;  %v8892_v6 = vpop.permute.xlu1 %4663  ;;  %v4696_v41 = vmul.f32 %v4692_v10, %v9345_v11  ;;  %v4605_v26 = vadd.f32 %v4601_v15, %v4593_v29  ;;  %v8950_v15 = vrot.slane %v8822_v61, %v7296_v62 }
0x1124   : > { %v4689_v31 = vmul.f32 %v8890_v52, %v9335_v35  ;;  %v4669_v24 = vmul.f32 %v8892_v6, %v9336_v30  ;;  %v9349_v35 = vld [vmem:[#allocation40_spill] sm:$0xff]  ;;  %v6868_v10 = vpop.eup %6867 }
0x1125   : > { %6142 = vmatprep.mubr.msk.f32.mxu1 %vm896_vm0, %v4696_v41  ;;  %6164 = vmatprep.mubr.msk.f32.mxu0 %vm896_vm0, %v4696_v41  ;;  %v1729_v51 = vmul.f32 %v9349_v35, %v9349_v35  ;;  %v9350_v30 = vld [vmem:[#allocation44_spill] sm:$0xff]  ;;  %v4613_v35 = vmul.f32 %v8762_v3, %v8798_v44 }
0x1126   : > { %v4693_v13 = vadd.f32 %v4689_v31, %v4669_v24  ;;  %6869 = vrcp.f32 %v9350_v30  ;;  %v9351_v31 = vld [vmem:[#allocation41_spill] sm:$0xff] }
0x1127   : > { %v1733_v42 = vsub.f32 1.0, %v1729_v51  ;;  %v9353_v51 = vld [vmem:[#allocation45_spill] sm:$0xff] }
0x1128   : > { %v4697_v9 = vmul.f32 %v4693_v13, %v9346_v56  ;;  %v9352_v56 = vld [vmem:[#allocation43_spill] sm:$0xff]  ;;  %v1732_v30 = vmul.f32 %v9353_v51, %v9353_v51 }
0x1129   : > { %v1737_v46 = vmul.f32 2.0, %v1733_v42  ;;  %v4625_v42 = vadd.f32 %v4621_v43, %v4613_v35  ;;  %v4977_v43 = vrot.slane %v8817_v54, %v7296_v62 }
0x112a   : > { %6143 = vmatmul.mubr.msk.f32.gmra.mrb[30].mxu1 %vm896_vm0, %v4697_v9  ;;  %6165 = vmatmul.mubr.msk.f32.gmra.mrb[34].mxu0 %vm896_vm0, %v4697_v9  ;;  %v1736_v47 = vsub.f32 1.0, %v1732_v30 }
0x112b   : > { %v4629_v14 = vadd.f32 %v4625_v42, %v4605_v26 }
0x112c   : > { %v1740_v44 = vmul.f32 2.0, %v1736_v47 }
0x1130   : > { %v6870_v41 = vpop.eup %6869 }
0x11e0   : > { %v6141_v36 = vpop.f32.mrb[28].mxu1  ;;  %v6163_v28 = vpop.f32.mrb[32].mxu0 }
0x11e1   : > { %v4796_v57 = vmul.f32 0.1, %v6141_v36  ;;  %v4885_v8 = vmul.f32 0.1, %v6163_v28  ;;  %v4776_v55 = vpop.f32.mrb[29].mxu1  ;;  %v4865_v22 = vpop.f32.mrb[33].mxu0 }
0x11e2   : > { %v4795_v12 = vmul.f32 0.1, %v4776_v55  ;;  %v4884_v23 = vmul.f32 0.1, %v4865_v22  ;;  %v9355_v36 = vld [vmem:[#allocation46_spill] sm:$0xff]  ;;  %v4645_v55 = vmul.f32 %v4641_v49, %v4629_v14 }
0x11e3   : > { %v4889_v39 = vmul.f32 %v4796_v57, %v1738_v59  ;;  %v4893_v20 = vsub.f32 %v4643_v37, %v4885_v8  ;;  %v9354_v59 = vld [vmem:[#allocation48_spill] sm:$0xff]  ;;  %v1731_v58 = vmul.f32 %v9355_v36, %v9355_v36  ;;  %v9356_v28 = vld [vmem:[#allocation50_spill] sm:$0xff] }
0x11e4   : > { %v4888_v11 = vmul.f32 %v4795_v12, %v1737_v46  ;;  %v4892_v33 = vsub.f32 %v4642_v48, %v4884_v23  ;;  %6871 = vrcp.f32 %v9354_v59  ;;  %v4644_v48 = vmul.f32 %v4641_v49, %v8807_v5 }
0x11e5   : > { %v4901_v24 = vmul.f32 %v4889_v39, %v9351_v31  ;;  %v4897_v13 = vmul.f32 %v6868_v10, %v4893_v20  ;;  %6873 = vrcp.f32 %v9356_v28  ;;  %v1735_v3 = vsub.f32 1.0, %v1731_v58  ;;  %v9357_v31 = vld [vmem:[#allocation47_spill] sm:$0xff] }
0x11e6   : > { %v4900_v9 = vmul.f32 %v4888_v11, %v9352_v56  ;;  %v4896_v34 = vmul.f32 %v6870_v41, %v4892_v33  ;;  %v9358_v56 = vld [vmem:[#allocation49_spill] sm:$0xff]  ;;  %v4953_v5 = vrot.slane %v8817_v54, %v7299_v63  ;;  %v8944_v49 = vrot.slane %v8822_v61, %v7299_v63 }
0x11e7   : > { %v4905_v45 = vsub.f32 %v4897_v13, %v4901_v24  ;;  %v1739_v46 = vmul.f32 2.0, %v1735_v3  ;;  %v5037_v63 = vrot.slane %v8390_v17, %v7149_v32 }
0x11e8   : > { %v4904_v16 = vsub.f32 %v4896_v34, %v4900_v9 }
0x11e9   : > { %4963 = vperm.xlu1 %6633, %v4905_v45   ;;  %4937 = vperm.xlu0 %6632, %v4905_v45  }
0x11ed   : > { %6634 = vset.pattern.permute.xlu1 %v9261_v0  ;;  %6637 = vset.pattern.permute.xlu0 %v9237_v19 }
0x11ee   : > { %4932 = vperm.xlu1 %6634, %v4904_v16   ;;  %v6872_v10 = vpop.eup %6871 }
0x11ef   : > { %v6874_v41 = vpop.eup %6873 }
0x11f2   : > { %6635 = vset.pattern.permute.xlu1 %v9237_v19 }
0x11f3   : > { %4959 = vperm.xlu1 %6635, %v4904_v16  }
0x11f7   : > { %6636 = vset.pattern.permute.xlu1 %v9261_v0 }
0x11fd   : > { %v6144_v57 = vpop.f32.mrb[30].mxu1  ;;  %v6166_v37 = vpop.f32.mrb[34].mxu0 }
0x11fe   : > { %v4798_v8 = vmul.f32 0.1, %v6144_v57  ;;  %v4887_v53 = vmul.f32 0.1, %v6166_v37  ;;  %v4786_v18 = vpop.f32.mrb[31].mxu1  ;;  %v4875_v22 = vpop.f32.mrb[35].mxu0 }
0x11ff   : > { %v4797_v12 = vmul.f32 0.1, %v4786_v18  ;;  %v4886_v23 = vmul.f32 0.1, %v4875_v22 }
0x1200   : > { %v4891_v39 = vmul.f32 %v4798_v8, %v1740_v44  ;;  %v4895_v20 = vsub.f32 %v4645_v55, %v4887_v53 }
0x1201   : > { %v4890_v11 = vmul.f32 %v4797_v12, %v1739_v46  ;;  %v4894_v33 = vsub.f32 %v4644_v48, %v4886_v23 }
0x1202   : > { %v4903_v24 = vmul.f32 %v4891_v39, %v9357_v31  ;;  %v4899_v13 = vmul.f32 %v6872_v10, %v4895_v20  ;;  %v4917_v20 = vmul.f32 %v8826_v27, %v8892_v6 }
0x1203   : > { %v4902_v9 = vmul.f32 %v4890_v11, %v9358_v56  ;;  %v4898_v34 = vmul.f32 %v6874_v41, %v4894_v33 }
0x1204   : > { %v4907_v45 = vsub.f32 %v4899_v13, %v4903_v24  ;;  %v9359_v13 = vld [vmem:[#allocation10_spill] sm:$0xff] }
0x1205   : > { %v4906_v16 = vsub.f32 %v4898_v34, %v4902_v9  ;;  %v9360_v9 = vld [vmem:[#allocation11_spill] sm:$0xff] }
0x1207   : > { %4967 = vperm.xlu0 %6637, %v4906_v16   ;;  %4942 = vperm.xlu1 %6636, %v4906_v16   ;;  %v9361_v16 = vld [vmem:[#allocation12_spill] sm:$0xff] }
0x120b   : > { %4947 = vperm.xlu1 %6636, %v4907_v45   ;;  %6640 = vset.pattern.permute.xlu0 %v9261_v0 }
0x120f   : > { %6638 = vset.pattern.permute.xlu1 %v9237_v19 }
0x1210   : > { %4971 = vperm.xlu1 %6638, %v4907_v45  }
0x1214   : > { %6639 = vset.pattern.permute.xlu1 %v9261_v0 }
0x1268   : > { %v4938_v35 = vpop.permute.xlu0 %4937  ;;  %v4964_v51 = vpop.permute.xlu1 %4963 }
0x1269   : > { %v4955_v30 = vmul.f32 %v4953_v5, %v4938_v35  ;;  %v5015_v29 = vmul.f32 %v8944_v49, %v4938_v35  ;;  %v4979_v42 = vmul.f32 %v4977_v43, %v4964_v51  ;;  %v5023_v59 = vmul.f32 %v8950_v15, %v4964_v51 }
0x126b   : > { %v4983_v36 = vadd.f32 %v4979_v42, %v4955_v30  ;;  %v5027_v58 = vadd.f32 %v5023_v59, %v5015_v29  ;;  %v9362_v30 = vld [vmem:[#allocation13_spill] sm:$0xff] }
0x126d   : > { %v4987_v26 = vadd.f32 %v4983_v36, %v8845_v4  ;;  %v8958_v54 = vadd.f32 %v5027_v58, %v8847_v1  ;;  %v4933_v62 = vpop.permute.xlu1 %4932 }
0x126e   : > { %v4954_v47 = vmul.f32 %v4953_v5, %v4933_v62  ;;  %v5014_v14 = vmul.f32 %v8944_v49, %v4933_v62 }
0x126f   : > { %v8960_v61 = vmul.f32 %v5037_v63, %v4987_v26 }
0x1271   : > { %5057 = vperm.xlu1 %6639, %v8960_v61  }
0x1272   : > { %v4960_v28 = vpop.permute.xlu1 %4959 }
0x1273   : > { %v4978_v3 = vmul.f32 %v4977_v43, %v4960_v28  ;;  %v5022_v44 = vmul.f32 %v8950_v15, %v4960_v28  ;;  %v9363_v28 = vld [vmem:[#allocation14_spill] sm:$0xff] }
0x1275   : > { %v4982_v57 = vadd.f32 %v4978_v3, %v4954_v47  ;;  %v5026_v37 = vadd.f32 %v5022_v44, %v5014_v14  ;;  %6642 = vset.pattern.permute.xlu1 %v9237_v19 }
0x1277   : > { %v4986_v17 = vadd.f32 %v4982_v57, %v8856_v50  ;;  %v8968_v4 = vadd.f32 %v5026_v37, %v8858_v2  ;;  %v9364_v57 = vld [vmem:[#allocation15_spill] sm:$0xff] }
0x1279   : > { %v8970_v1 = vmul.f32 %v5037_v63, %v4986_v17  ;;  %v9365_v17 = vld [vmem:[#allocation16_spill] sm:$0xff] }
0x127b   : > { %5075 = vperm.xlu1 %6642, %v8970_v1   ;;  %5052 = vperm.xlu0 %6640, %v8970_v1  }
0x127f   : > { %6641 = vset.pattern.permute.xlu0 %v9237_v19  ;;  %6644 = vset.pattern.permute.xlu1 %v9261_v0 }
0x1280   : > { %5079 = vperm.xlu0 %6641, %v8960_v61  }
0x1284   : > { %6643 = vset.pattern.permute.xlu0 %v9261_v0  ;;  %v4925_v0 = vmul.f32 %v8834_v60, %v8890_v52 }
0x1286   : > { %v4968_v8 = vpop.permute.xlu0 %4967  ;;  %v4943_v55 = vpop.permute.xlu1 %4942 }
0x1287   : > { %v4980_v50 = vmul.f32 %v4977_v43, %v4968_v8  ;;  %v5024_v2 = vmul.f32 %v8950_v15, %v4968_v8  ;;  %v4956_v53 = vmul.f32 %v4953_v5, %v4943_v55  ;;  %v5016_v18 = vmul.f32 %v8944_v49, %v4943_v55  ;;  %v9366_v55 = vld [vmem:[#allocation17_spill] sm:$0xff] }
0x1288   : > { %v1102_v8 = vmul.f32 %v9365_v17, %v9365_v17 }
0x1289   : > { %v4984_v22 = vadd.f32 %v4980_v50, %v4956_v53  ;;  %v5028_v46 = vadd.f32 %v5024_v2, %v5016_v18  ;;  %v1101_v50 = vmul.f32 %v9366_v55, %v9366_v55  ;;  %v9367_v2 = vld [vmem:[#allocation21_spill] sm:$0xff]  ;;  %v9368_v53 = vld [vmem:[#allocation22_spill] sm:$0xff] }
0x128a   : > { %v8980_v12 = vpop.permute.xlu1 %4947  ;;  %6875 = vrcp.f32 %v9367_v2  ;;  %v1106_v18 = vsub.f32 1.0, %v1102_v8 }
0x128b   : > { %v4988_v48 = vadd.f32 %v4984_v22, %v8886_v38  ;;  %v8984_v23 = vadd.f32 %v5028_v46, %v8888_v25  ;;  %v4957_v11 = vmul.f32 %v4953_v5, %v8980_v12  ;;  %v4929_v38 = vadd.f32 %v4925_v0, %v4917_v20 }
0x128c   : > { %6877 = vrcp.f32 %v9368_v53  ;;  %v5045_v22 = vrot.slane %v8554_v7, %v7149_v32  ;;  %v1105_v46 = vsub.f32 1.0, %v1101_v50 }
0x128d   : > { %v8986_v39 = vmul.f32 %v5037_v63, %v4988_v48  ;;  %v1110_v48 = vmul.f32 2.0, %v1106_v18  ;;  %v6885_v18 = vld [vmem:[%s7041_s2 + $0x8] sm:$0xff] }
0x128f   : > { %5062 = vperm.xlu1 %6644, %v8986_v39   ;;  %v8993_v10 = vpop.permute.xlu1 %4971 }
0x1290   : > { %v4981_v33 = vmul.f32 %v4977_v43, %v8993_v10 }
0x1292   : > { %v4985_v41 = vadd.f32 %v4981_v33, %v4957_v11  ;;  %v5047_v33 = vmul.f32 %v5045_v22, %v8958_v54 }
0x1293   : > { %6645 = vset.pattern.permute.xlu1 %v9237_v19 }
0x1294   : > { %v4989_v25 = vadd.f32 %v4985_v41, %v4929_v38  ;;  %5083 = vperm.xlu1 %6645, %v8986_v39  }
0x1296   : > { %v8999_v31 = vmul.f32 %v5037_v63, %v4989_v25 }
0x1298   : > { %5087 = vperm.xlu1 %6645, %v8999_v31   ;;  %5067 = vperm.xlu0 %6643, %v8999_v31  }
0x129c   : > { %6646 = vset.pattern.permute.xlu0 %v9237_v19 }
0x12f0   : > { %v5058_v27 = vpop.permute.xlu1 %5057 }
0x12f1   : > { %v5071_v35 = vmul.f32 %v5058_v27, %v9359_v13  ;;  %v1109_v27 = vmul.f32 2.0, %v1105_v46 }
0x12fa   : > { %v5053_v60 = vpop.permute.xlu0 %5052  ;;  %v5076_v24 = vpop.permute.xlu1 %5075 }
0x12fb   : > { %v5070_v56 = vmul.f32 %v5053_v60, %v9359_v13  ;;  %v5090_v34 = vmul.f32 %v5076_v24, %v9360_v9  ;;  %v5046_v24 = vmul.f32 %v5045_v22, %v8968_v4  ;;  %v4997_v4 = vmul.f32 %v8830_v21, %v8892_v6 }
0x12fd   : > { %v5094_v45 = vadd.f32 %v5090_v34, %v5070_v56  ;;  %v6876_v34 = vpop.eup %6875 }
0x12fe   : > { %v6878_v7 = vpop.eup %6877 }
0x12ff   : > { %v5098_v5 = vmul.f32 %v5094_v45, %v9361_v16  ;;  %v5080_v43 = vpop.permute.xlu0 %5079 }
0x1300   : > { %v5091_v51 = vmul.f32 %v5080_v43, %v9360_v9  ;;  %v5005_v43 = vmul.f32 %v8838_v40, %v8890_v52 }
0x1301   : > { %6183 = vmatprep.mubr.msk.f32.mxu1 %vm896_vm0, %v5098_v5  ;;  %6205 = vmatprep.mubr.msk.f32.mxu0 %vm896_vm0, %v5098_v5  ;;  %v5025_v5 = vmul.f32 %v8950_v15, %v8993_v10  ;;  %v9373_v15 = vld [vmem:[#allocation24_spill] sm:$0xff] }
0x1302   : > { %v5095_v19 = vadd.f32 %v5091_v51, %v5071_v35  ;;  %v5017_v35 = vmul.f32 %v8944_v49, %v8980_v12  ;;  %v9370_v51 = vld [vmem:[#allocation18_spill] sm:$0xff] }
0x1304   : > { %v5099_v29 = vmul.f32 %v5095_v19, %v9362_v30  ;;  %v1104_v19 = vmul.f32 %v9370_v51, %v9370_v51  ;;  %v5029_v30 = vadd.f32 %v5025_v5, %v5017_v35 }
0x1306   : > { %6184 = vmatmul.mubr.msk.f32.vlgmr.msra.gmra.mrb[32].mxu1 %vm896_vm0, %v5099_v29  ;;  %6206 = vmatmul.mubr.msk.f32.vlgmr.msra.gmra.mrb[36].mxu0 %vm896_vm0, %v5099_v29  ;;  %v9371_v29 = vld [vmem:[#allocation19_spill] sm:$0xff]  ;;  %v1108_v10 = vsub.f32 1.0, %v1104_v19 }
0x130e   : > { %v5063_v42 = vpop.permute.xlu1 %5062 }
0x130f   : > { %v5072_v36 = vmul.f32 %v5063_v42, %v9359_v13  ;;  %v1103_v42 = vmul.f32 %v9371_v29, %v9371_v29 }
0x1311   : > { %v1107_v52 = vsub.f32 1.0, %v1103_v42 }
0x1313   : > { %v5084_v59 = vpop.permute.xlu1 %5083 }
0x1314   : > { %v5092_v58 = vmul.f32 %v5084_v59, %v9360_v9  ;;  %v9372_v59 = vld [vmem:[#allocation23_spill] sm:$0xff] }
0x1315   : > { %6879 = vrcp.f32 %v9372_v59 }
0x1316   : > { %v5096_v63 = vadd.f32 %v5092_v58, %v5072_v36  ;;  %v5009_v36 = vadd.f32 %v5005_v43, %v4997_v4  ;;  %6881 = vrcp.f32 %v9373_v15  ;;  %v1112_v58 = vmul.f32 2.0, %v1108_v10 }
0x1317   : > { %v5068_v26 = vpop.permute.xlu0 %5067  ;;  %v5088_v62 = vpop.permute.xlu1 %5087 }
0x1318   : > { %v5100_v47 = vmul.f32 %v5096_v63, %v9363_v28  ;;  %v5073_v14 = vmul.f32 %v5068_v26, %v9359_v13  ;;  %v5093_v3 = vmul.f32 %v5088_v62, %v9360_v9  ;;  %v5033_v40 = vadd.f32 %v5029_v30, %v5009_v36 }
0x1319   : > { %v1111_v28 = vmul.f32 2.0, %v1107_v52 }
0x131a   : > { %v5097_v44 = vadd.f32 %v5093_v3, %v5073_v14  ;;  %6186 = vmatprep.mubr.msk.f32.mxu1 %vm896_vm0, %v5100_v47  ;;  %6208 = vmatprep.mubr.msk.f32.mxu0 %vm896_vm0, %v5100_v47  ;;  %v5049_v49 = vmul.f32 %v5045_v22, %v5033_v40  ;;  %v5048_v14 = vmul.f32 %v5045_v22, %v8984_v23  ;;  %v6886_v22 = vld [vmem:[%s7041_s2] sm:$0xff] }
0x131c   : > { %v5101_v37 = vmul.f32 %v5097_v44, %v9364_v57 }
0x131e   : > { %6187 = vmatmul.mubr.msk.f32.gmra.mrb[34].mxu1 %vm896_vm0, %v5101_v37  ;;  %6209 = vmatmul.mubr.msk.f32.gmra.mrb[38].mxu0 %vm896_vm0, %v5101_v37  ;;  %vm5360_vm0 = vcmask 15360  }
0x131f   : > { %v6880_v37 = vpop.eup %6879 }
0x1320   : > { %v6882_v55 = vpop.eup %6881 }
0x13d9   : > { %v6185_v0 = vpop.f32.mrb[32].mxu1  ;;  %v6207_v20 = vpop.f32.mrb[36].mxu0 }
0x13da   : > { %v5200_v11 = vmul.f32 0.1, %v6185_v0  ;;  %v5289_v38 = vmul.f32 0.1, %v6207_v20  ;;  %v5180_v41 = vpop.f32.mrb[33].mxu1  ;;  %v5269_v25 = vpop.f32.mrb[37].mxu0 }
0x13db   : > { %v5199_v60 = vmul.f32 0.1, %v5180_v41  ;;  %v5288_v13 = vmul.f32 0.1, %v5269_v25  ;;  %v6887_v20 = vld [vmem:[%s7041_s2 + $0x18] sm:$0xff] }
0x13dc   : > { %v5293_v56 = vmul.f32 %v5200_v11, %v1110_v48  ;;  %v5297_v9 = vsub.f32 %v5047_v33, %v5289_v38  ;;  %v6888_v38 = vld [vmem:[%s7041_s2 + $0x10] sm:$0xff]  ;;  %s9374_s2 = sshll.u32 %s9376_s24, 3 }
0x13dd   : > { %v5292_v45 = vmul.f32 %v5199_v60, %v1109_v27  ;;  %v5296_v32 = vsub.f32 %v5046_v24, %v5288_v13  ;;  %s712_s25 = scalar_lea.vmem %s9096_s23, %s9374_s2 }
0x13de   : > { %5310 = vrot.lane.b32.xlu0 %v5293_v56, %s9369_s0  ;;  %v5301_v16 = vmul.f32 %v6876_v34, %v5297_v9 }
0x13df   : > { %5308 = vrot.lane.b32.xlu1 %v5292_v45, %s9369_s0  ;;  %v5300_v54 = vmul.f32 %v6878_v7, %v5296_v32 }
0x13f1   : > { %v6188_v21 = vpop.f32.mrb[34].mxu1  ;;  %v6210_v6 = vpop.f32.mrb[38].mxu0 }
0x13f2   : > { %v5202_v63 = vmul.f32 0.1, %v6188_v21  ;;  %v5291_v12 = vmul.f32 0.1, %v6210_v6  ;;  %v5190_v26 = vpop.f32.mrb[35].mxu1  ;;  %v5279_v62 = vpop.f32.mrb[39].mxu0 }
0x13f3   : > { %v5201_v47 = vmul.f32 0.1, %v5190_v26  ;;  %v5290_v3 = vmul.f32 0.1, %v5279_v62 }
0x13f4   : > { %v5295_v44 = vmul.f32 %v5202_v63, %v1112_v58  ;;  %v5299_v57 = vsub.f32 %v5049_v49, %v5291_v12 }
0x13f5   : > { %v5294_v17 = vmul.f32 %v5201_v47, %v1111_v28  ;;  %v5298_v8 = vsub.f32 %v5048_v14, %v5290_v3 }
0x13f6   : > { %5314 = vrot.lane.b32.xlu0 %v5295_v44, %s9369_s0  ;;  %v5303_v50 = vmul.f32 %v6880_v37, %v5299_v57 }
0x13f7   : > { %5312 = vrot.lane.b32.xlu1 %v5294_v17, %s9369_s0  ;;  %v5302_v2 = vmul.f32 %v6882_v55, %v5298_v8 }
0x1450   : > { %v5311_v53 = vpop.permute.xlu0 %5310 }
0x1451   : > { %v5321_v46 = vmul.f32 %v6885_v18, %v5311_v53  ;;  %v5309_v23 = vpop.permute.xlu1 %5308 }
0x1452   : > { %v5320_v48 = vmul.f32 %v6886_v22, %v5309_v23 }
0x1453   : > { %5330 = vrot.lane.b32.xlu0 %v5321_v46, %s6902_s1 }
0x1454   : > { %5328 = vrot.lane.b32.xlu1 %v5320_v48, %s6902_s1 }
0x1468   : > { %v5315_v0 = vpop.permute.xlu0 %5314 }
0x1469   : > { %v5323_v11 = vmul.f32 %v6887_v20, %v5315_v0  ;;  %v5313_v33 = vpop.permute.xlu1 %5312 }
0x146a   : > { %v5322_v41 = vmul.f32 %v6888_v38, %v5313_v33 }
0x146b   : > { %5334 = vrot.lane.b32.xlu0 %v5323_v11, %s6902_s1 }
0x146c   : > { %5332 = vrot.lane.b32.xlu1 %v5322_v41, %s6902_s1 }
0x14c5   : > { %v5331_v25 = vpop.permute.xlu0 %5330 }
0x14c6   : > { %v5341_v27 = vsub.f32 %v5301_v16, %v5331_v25  ;;  %v5329_v60 = vpop.permute.xlu1 %5328 }
0x14c7   : > { %v5340_v24 = vsub.f32 %v5300_v54, %v5329_v60 }
0x14c8   : > { %5350 = vrot.lane.b32.xlu0 %v5341_v27, %s9369_s0 }
0x14c9   : > { %5348 = vrot.lane.b32.xlu1 %v5340_v24, %s9369_s0 }
0x14dd   : > { %v5335_v13 = vpop.permute.xlu0 %5334 }
0x14de   : > { %v5343_v56 = vsub.f32 %v5303_v50, %v5335_v13  ;;  %v5333_v9 = vpop.permute.xlu1 %5332 }
0x14df   : > { %v5342_v34 = vsub.f32 %v5302_v2, %v5333_v9 }
0x14e0   : > { %5354 = vrot.lane.b32.xlu0 %v5343_v56, %s9369_s0 }
0x14e1   : > { %5352 = vrot.lane.b32.xlu1 %v5342_v34, %s9369_s0 }
0x153a   : > { %v5351_v45 = vpop.permute.xlu0 %5350 }
0x153b   : > { %v5349_v32 = vpop.permute.xlu1 %5348  ;;  %v5362_v16 = vsel %vm5360_vm0, %v8960_v61, %v5351_v45 }
0x153c   : > { %v5361_v7 = vsel %vm5360_vm0, %v8970_v1, %v5349_v32  ;;  %5367 = vst.msk [vmem:[%s712_s25 + $0x8] sm:$0xff] %vm5365_vm3, %v5362_v16 }
0x153d   : > { %5366 = vst.msk [vmem:[%s712_s25] sm:$0xff] %vm5365_vm3, %v5361_v7 }
0x1552   : > { %v5355_v54 = vpop.permute.xlu0 %5354 }
0x1553   : > { %v5353_v5 = vpop.permute.xlu1 %5352  ;;  %v5364_v4 = vsel %vm5360_vm0, %v8999_v31, %v5355_v54 }
0x1554   : > { %v5363_v43 = vsel %vm5360_vm0, %v8986_v39, %v5353_v5  ;;  %5369 = vst.msk [vmem:[%s712_s25 + $0x18] sm:$0xff] %vm5365_vm3, %v5364_v4 }
0x1555   : > { %5368 = vst.msk [vmem:[%s712_s25 + $0x10] sm:$0xff] %vm5365_vm3, %v5363_v43 }
0x1556 PF: > { %s33_s4 = sadd.s32 1, %s6895_s4  }
0x1557   : > { %p30_p4 = scmp.ge.s32.totalorder %s33_s4, 4  }
0x1559   :  { %32 = sbr.rel (!%p30_p4) target bundleno = 9 (0x9), region = 172 }

</bundles_post_ra>
